<compile_context>
chip_gen: v5e
topology: v5e:2x2
jax: 0.10.0
libtpu: 0.0.40
codegen_flags: <defaults>
</compile_context>

<pallas_src>
import functools

import jax
import jax.numpy as jnp
from jax.experimental import pallas as pl
from jax.experimental.pallas import tpu as pltpu

_LANES = 128


def _start_tile_gathers(pos_u_idx, v_idx, u_hbm, v_hbm,
                        u_buf, v_buf, u_sem, v_sem,
                        tile, slot, *, b_tile, kp1):
    """Issue the row-gather DMAs for one batch tile into buffer `slot`."""
    base = tile * b_tile
    for b in range(b_tile):
        pltpu.make_async_copy(
            u_hbm.at[pos_u_idx[base + b]],
            u_buf.at[slot, b],
            u_sem.at[slot, b]).start()
        for k in range(kp1):
            pltpu.make_async_copy(
                v_hbm.at[v_idx[(base + b) * kp1 + k]],
                v_buf.at[slot, b, k],
                v_sem.at[slot, b, k]).start()


def _wait_tile_gathers(u_hbm, v_hbm, u_buf, v_buf, u_sem, v_sem,
                       slot, *, b_tile, kp1):
    """Wait for every row-gather DMA of buffer `slot`."""
    for b in range(b_tile):
        pltpu.make_async_copy(
            u_hbm.at[0], u_buf.at[slot, b], u_sem.at[slot, b]).wait()
        for k in range(kp1):
            pltpu.make_async_copy(
                v_hbm.at[0], v_buf.at[slot, b, k], v_sem.at[slot, b, k]).wait()


def _skipgram_tile_kernel(pos_u_idx, v_idx, u_hbm, v_hbm, out_ref,
                          u_buf, v_buf, u_sem, v_sem,
                          *, batch, kp1, b_tile):
    """One batch tile: double-buffered HBM row gather + fused pos/neg loss."""
    tile = pl.program_id(0)
    n_tiles = pl.num_programs(0)
    slot = tile % 2

    # ---- prime the pipeline: tile 0 gathers into slot 0 ------------------
    @pl.when(tile == 0)
    def _():
        _start_tile_gathers(pos_u_idx, v_idx, u_hbm, v_hbm,
                            u_buf, v_buf, u_sem, v_sem,
                            tile=0, slot=0, b_tile=b_tile, kp1=kp1)

    # ---- prefetch the NEXT tile into the other slot (before any .wait()
    #      so the SMEM index reads are not stalled behind the DMA waits) ----
    @pl.when(tile + 1 < n_tiles)
    def _():
        _start_tile_gathers(pos_u_idx, v_idx, u_hbm, v_hbm,
                            u_buf, v_buf, u_sem, v_sem,
                            tile=tile + 1, slot=1 - slot,
                            b_tile=b_tile, kp1=kp1)

    # ---- wait for the current tile's gathered rows ------------------------
    _wait_tile_gathers(u_hbm, v_hbm, u_buf, v_buf, u_sem, v_sem,
                       slot, b_tile=b_tile, kp1=kp1)

    # ---- fused positive/negative log-sigmoid loss -------------------------
    u = u_buf[slot]                                 # (b_tile, D_pad) f32
    v = v_buf[slot]                                 # (b_tile, kp1, D_pad) f32
    scores = jnp.sum(v * u[:, None, :], axis=-1)    # (b_tile, kp1)

    col = jax.lax.broadcasted_iota(jnp.int32, scores.shape, 1)
    signed = jnp.where(col == 0, scores, -scores)   # +pos score, -neg score
    # numerically stable log(sigmoid(x)) = min(x, 0) - log1p(exp(-|x|))
    ls = jnp.minimum(signed, 0.0) - jnp.log1p(jnp.exp(-jnp.abs(signed)))

    # mask padded batch rows (they used dummy index 0; force contribution 0)
    rows = tile * b_tile + jax.lax.broadcasted_iota(jnp.int32, scores.shape, 0)
    ls = jnp.where(rows < batch, ls, 0.0)

    row_loss = -jnp.sum(ls, axis=1, keepdims=True)  # (b_tile, 1)
    lane = jax.lax.broadcasted_iota(jnp.int32, (b_tile, _LANES), 1)
    out_ref[...] = jnp.where(lane == 0, row_loss, 0.0)


def skipgram_forward(u_weight, v_weight, pos_u, pos_v, neg_v, *, b_tile=8):
    """Replicates SkipGramModel.forward; returns the scalar float32 loss."""
    V, D = u_weight.shape
    (B,) = pos_u.shape
    K = neg_v.shape[1]
    KP1 = K + 1

    b_tile = max(8, (b_tile // 8) * 8)              # keep sublane-aligned
    D_pad = ((D + _LANES - 1) // _LANES) * _LANES

    # Lane-dense padding of the tables (zero pad is exact for these dots).
    if D_pad != D:
        u_w = jnp.pad(u_weight.astype(jnp.float32), ((0, 0), (0, D_pad - D)))
        v_w = jnp.pad(v_weight.astype(jnp.float32), ((0, 0), (0, D_pad - D)))
    else:
        u_w = u_weight.astype(jnp.float32)
        v_w = v_weight.astype(jnp.float32)

    num_tiles = pl.cdiv(B, b_tile)
    B_padded = num_tiles * b_tile

    # SMEM-prefetched gather indices (pad with valid row 0; masked in-kernel).
    pos_u_p = jnp.pad(pos_u.astype(jnp.int32), (0, B_padded - B))
    idx_v = jnp.concatenate(
        [pos_v.astype(jnp.int32)[:, None], neg_v.astype(jnp.int32)], axis=1)
    idx_v_p = jnp.pad(idx_v, ((0, B_padded - B), (0, 0))).reshape(-1)

    kernel = functools.partial(
        _skipgram_tile_kernel, batch=B, kp1=KP1, b_tile=b_tile)

    cost = pl.CostEstimate(
        flops=2 * B * KP1 * D_pad + 6 * B * KP1,
        transcendentals=2 * B * KP1,
        bytes_accessed=(B * (KP1 + 1) * D_pad * 4          # gathered rows
                        + B_padded * _LANES * 4             # partial outputs
                        + B_padded * (KP1 + 1) * 4),        # indices
    )

    partials = pl.pallas_call(
        kernel,
        out_shape=jax.ShapeDtypeStruct((B_padded, _LANES), jnp.float32),
        grid_spec=pltpu.PrefetchScalarGridSpec(
            num_scalar_prefetch=2,
            grid=(num_tiles,),
            in_specs=[
                pl.BlockSpec(memory_space=pl.ANY),   # u_embeddings table (HBM)
                pl.BlockSpec(memory_space=pl.ANY),   # v_embeddings table (HBM)
            ],
            out_specs=pl.BlockSpec((b_tile, _LANES), lambda i, *_: (i, 0)),
            scratch_shapes=[
                pltpu.VMEM((2, b_tile, D_pad), jnp.float32),        # u slots
                pltpu.VMEM((2, b_tile, KP1, D_pad), jnp.float32),   # v slots
                pltpu.SemaphoreType.DMA((2, b_tile)),
                pltpu.SemaphoreType.DMA((2, b_tile, KP1)),
            ],
        ),
        compiler_params=pltpu.CompilerParams(
            # sequential grid required by the cross-step DMA prefetch chain
            dimension_semantics=("arbitrary",),
        ),
        cost_estimate=cost,
    )(pos_u_p, idx_v_p, u_w, v_w)

    # Only column 0 of each row is non-zero; sum reduces the per-row partials.
    return jnp.sum(partials)


def init_skipgram_params(emb_size, emb_dimension, key):
    """Deterministic init mirroring SkipGramModel.init_emb()."""
    initrange = 0.5 / emb_dimension
    u_weight = jax.random.uniform(
        key, (emb_size, emb_dimension), dtype=jnp.float32,
        minval=-initrange, maxval=initrange)
    v_weight = jnp.zeros((emb_size, emb_dimension), dtype=jnp.float32)
    return u_weight, v_weight


def _reference_loss(u_weight, v_weight, pos_u, pos_v, neg_v):
    """Pure-JAX reference (same math as the PyTorch forward)."""
    emb_u = u_weight[pos_u]
    emb_v = v_weight[pos_v]
    pos_ls = jax.nn.log_sigmoid(jnp.sum(emb_u * emb_v, axis=1))
    neg_ls = jax.nn.log_sigmoid(-jnp.einsum("bkd,bd->bk", v_weight[neg_v], emb_u))
    return -(jnp.sum(pos_ls) + jnp.sum(neg_ls))


if __name__ == "__main__":
    emb_size = 64        # vocabulary size
    emb_dimension = 32   # embedding dim

    key = jax.random.PRNGKey(0)
    k_params, k_vw, k_pu, k_pv, k_nv, k2_pu, k2_pv, k2_nv = jax.random.split(key, 8)

    u_weight, _ = init_skipgram_params(emb_size, emb_dimension, k_params)
    # The module inits v_embeddings to zero; use random v weights here so the
    # gathered-v path is actually exercised by the numeric check.
    v_weight = jax.random.uniform(
        k_vw, (emb_size, emb_dimension), dtype=jnp.float32,
        minval=-0.5, maxval=0.5)

    # ---- test 1: single tile (B = b_tile) --------------------------------
    B, K = 8, 5
    pos_u = jax.random.randint(k_pu, (B,), 0, emb_size, dtype=jnp.int32)
    pos_v = jax.random.randint(k_pv, (B,), 0, emb_size, dtype=jnp.int32)
    neg_v = jax.random.randint(k_nv, (B, K), 0, emb_size, dtype=jnp.int32)

    loss = jax.block_until_ready(
        skipgram_forward(u_weight, v_weight, pos_u, pos_v, neg_v))
    ref = _reference_loss(u_weight, v_weight, pos_u, pos_v, neg_v)
    assert jnp.allclose(loss, ref, rtol=1e-5, atol=1e-5), (loss, ref)

    # ---- test 2: multiple tiles + ragged batch (exercises the prefetch
    #      pipeline and the padded-row masking) -----------------------------
    B2, K2 = 20, 5
    pos_u2 = jax.random.randint(k2_pu, (B2,), 0, emb_size, dtype=jnp.int32)
    pos_v2 = jax.random.randint(k2_pv, (B2,), 0, emb_size, dtype=jnp.int32)
    neg_v2 = jax.random.randint(k2_nv, (B2, K2), 0, emb_size, dtype=jnp.int32)

    loss2 = jax.block_until_ready(
        skipgram_forward(u_weight, v_weight, pos_u2, pos_v2, neg_v2))
    ref2 = _reference_loss(u_weight, v_weight, pos_u2, pos_v2, neg_v2)
    assert jnp.allclose(loss2, ref2, rtol=1e-5, atol=1e-5), (loss2, ref2)

    print("KERNEL_OK")
</pallas_src>

<mosaic_0001>
module attributes {stable_mosaic.version = 11 : i64} {
  func.func @_skipgram_tile_kernel(%arg0: i32, %arg1: memref<8xi32, #tpu.memory_space<smem>>, %arg2: memref<48xi32, #tpu.memory_space<smem>>, %arg3: memref<64x128xf32, #tpu.memory_space<any>>, %arg4: memref<64x128xf32, #tpu.memory_space<any>>, %arg5: memref<8x128xf32, #tpu.memory_space<vmem>>, %arg6: memref<2x8x128xf32, #tpu.memory_space<vmem>>, %arg7: memref<2x8x6x128xf32, #tpu.memory_space<vmem>>, %arg8: memref<2x8x!tpu.dma_semaphore, #tpu.memory_space<semaphore_mem>>, %arg9: memref<2x8x6x!tpu.dma_semaphore, #tpu.memory_space<semaphore_mem>>) attributes {dimension_semantics = [#tpu.dimension_semantics<arbitrary>], iteration_bounds = array<i64: 1>, scalar_prefetch = 2 : i64, scratch_operands = 4 : i64, tpu.core_type = #tpu.core_type<tc>, window_params = [{}, {}, {transform_indices = @transform_2, window_bounds = array<i64: 8, 128>}]} {
    %c2_i32 = arith.constant 2 : i32
    %c0_i32 = arith.constant 0 : i32
    %0 = arith.cmpi eq, %c2_i32, %c0_i32 : i32
    %c1_i32 = arith.constant 1 : i32
    %1 = arith.select %0, %c1_i32, %c2_i32 : i32
    %2 = arith.remsi %arg0, %1 : i32
    %c0_i32_0 = arith.constant 0 : i32
    %3 = arith.cmpi ne, %2, %c0_i32_0 : i32
    %c0_i32_1 = arith.constant 0 : i32
    %4 = arith.cmpi slt, %2, %c0_i32_1 : i32
    %c0_i32_2 = arith.constant 0 : i32
    %5 = arith.cmpi slt, %1, %c0_i32_2 : i32
    %6 = arith.xori %4, %5 : i1
    %7 = arith.andi %6, %3 : i1
    %8 = arith.addi %2, %1 : i32
    %9 = arith.select %7, %8, %2 : i32
    %c0_i32_3 = arith.constant 0 : i32
    %10 = arith.cmpi eq, %arg0, %c0_i32_3 : i32
    %11 = arith.extui %10 : i1 to i32
    %c0_i32_4 = arith.constant 0 : i32
    %12 = arith.cmpi ne, %11, %c0_i32_4 : i32
    scf.if %12 {
      %c0_395 = arith.constant 0 : index
      %397 = memref.load %arg1[%c0_395] : memref<8xi32, #tpu.memory_space<smem>>
      %c0_i32_396 = arith.constant 0 : i32
      %c0_i32_397 = arith.constant 0 : i32
      %c0_i32_398 = arith.constant 0 : i32
      %c0_i32_399 = arith.constant 0 : i32
      %c0_i32_400 = arith.constant 0 : i32
      %398 = tpu.memref_slice %arg3[%397, %c0_i32_400] : memref<64x128xf32, #tpu.memory_space<any>> -> memref<1x128xf32, #tpu.memory_space<any>>
      %399 = tpu.memref_squeeze %398 : memref<1x128xf32, #tpu.memory_space<any>> -> memref<128xf32, #tpu.memory_space<any>>
      %c0_i32_401 = arith.constant 0 : i32
      %400 = tpu.memref_slice %arg6[%c0_i32_396, %c0_i32_397, %c0_i32_401] : memref<2x8x128xf32, #tpu.memory_space<vmem>> -> memref<1x1x128xf32, #tpu.memory_space<vmem>>
      %401 = tpu.memref_squeeze %400 : memref<1x1x128xf32, #tpu.memory_space<vmem>> -> memref<128xf32, #tpu.memory_space<vmem>>
      %402 = tpu.memref_slice %arg8[%c0_i32_398, %c0_i32_399] : memref<2x8x!tpu.dma_semaphore, #tpu.memory_space<semaphore_mem>> -> memref<1x1x!tpu.dma_semaphore, #tpu.memory_space<semaphore_mem>>
      %403 = tpu.memref_squeeze %402 : memref<1x1x!tpu.dma_semaphore, #tpu.memory_space<semaphore_mem>> -> memref<!tpu.dma_semaphore, #tpu.memory_space<semaphore_mem>>
      tpu.enqueue_dma source(%399 : memref<128xf32, #tpu.memory_space<any>>) target(%401 : memref<128xf32, #tpu.memory_space<vmem>>) target_semaphore(%403 : memref<!tpu.dma_semaphore, #tpu.memory_space<semaphore_mem>>)
      %c0_402 = arith.constant 0 : index
      %404 = memref.load %arg2[%c0_402] : memref<48xi32, #tpu.memory_space<smem>>
      %c0_i32_403 = arith.constant 0 : i32
      %c0_i32_404 = arith.constant 0 : i32
      %c0_i32_405 = arith.constant 0 : i32
      %c0_i32_406 = arith.constant 0 : i32
      %c0_i32_407 = arith.constant 0 : i32
      %c0_i32_408 = arith.constant 0 : i32
      %c0_i32_409 = arith.constant 0 : i32
      %405 = tpu.memref_slice %arg4[%404, %c0_i32_409] : memref<64x128xf32, #tpu.memory_space<any>> -> memref<1x128xf32, #tpu.memory_space<any>>
      %406 = tpu.memref_squeeze %405 : memref<1x128xf32, #tpu.memory_space<any>> -> memref<128xf32, #tpu.memory_space<any>>
      %c0_i32_410 = arith.constant 0 : i32
      %407 = tpu.memref_slice %arg7[%c0_i32_403, %c0_i32_404, %c0_i32_405, %c0_i32_410] : memref<2x8x6x128xf32, #tpu.memory_space<vmem>> -> memref<1x1x1x128xf32, #tpu.memory_space<vmem>>
      %408 = tpu.memref_squeeze %407 : memref<1x1x1x128xf32, #tpu.memory_space<vmem>> -> memref<128xf32, #tpu.memory_space<vmem>>
      %409 = tpu.memref_slice %arg9[%c0_i32_406, %c0_i32_407, %c0_i32_408] : memref<2x8x6x!tpu.dma_semaphore, #tpu.memory_space<semaphore_mem>> -> memref<1x1x1x!tpu.dma_semaphore, #tpu.memory_space<semaphore_mem>>
      %410 = tpu.memref_squeeze %409 : memref<1x1x1x!tpu.dma_semaphore, #tpu.memory_space<semaphore_mem>> -> memref<!tpu.dma_semaphore, #tpu.memory_space<semaphore_mem>>
      tpu.enqueue_dma source(%406 : memref<128xf32, #tpu.memory_space<any>>) target(%408 : memref<128xf32, #tpu.memory_space<vmem>>) target_semaphore(%410 : memref<!tpu.dma_semaphore, #tpu.memory_space<semaphore_mem>>)
      %c1 = arith.constant 1 : index
      %411 = memref.load %arg2[%c1] : memref<48xi32, #tpu.memory_space<smem>>
      %c0_i32_411 = arith.constant 0 : i32
      %c0_i32_412 = arith.constant 0 : i32
      %c1_i32_413 = arith.constant 1 : i32
      %c0_i32_414 = arith.constant 0 : i32
      %c0_i32_415 = arith.constant 0 : i32
      %c1_i32_416 = arith.constant 1 : i32
      %c0_i32_417 = arith.constant 0 : i32
      %412 = tpu.memref_slice %arg4[%411, %c0_i32_417] : memref<64x128xf32, #tpu.memory_space<any>> -> memref<1x128xf32, #tpu.memory_space<any>>
      %413 = tpu.memref_squeeze %412 : memref<1x128xf32, #tpu.memory_space<any>> -> memref<128xf32, #tpu.memory_space<any>>
      %c0_i32_418 = arith.constant 0 : i32
      %414 = tpu.memref_slice %arg7[%c0_i32_411, %c0_i32_412, %c1_i32_413, %c0_i32_418] : memref<2x8x6x128xf32, #tpu.memory_space<vmem>> -> memref<1x1x1x128xf32, #tpu.memory_space<vmem>>
      %415 = tpu.memref_squeeze %414 : memref<1x1x1x128xf32, #tpu.memory_space<vmem>> -> memref<128xf32, #tpu.memory_space<vmem>>
      %416 = tpu.memref_slice %arg9[%c0_i32_414, %c0_i32_415, %c1_i32_416] : memref<2x8x6x!tpu.dma_semaphore, #tpu.memory_space<semaphore_mem>> -> memref<1x1x1x!tpu.dma_semaphore, #tpu.memory_space<semaphore_mem>>
      %417 = tpu.memref_squeeze %416 : memref<1x1x1x!tpu.dma_semaphore, #tpu.memory_space<semaphore_mem>> -> memref<!tpu.dma_semaphore, #tpu.memory_space<semaphore_mem>>
      tpu.enqueue_dma source(%413 : memref<128xf32, #tpu.memory_space<any>>) target(%415 : memref<128xf32, #tpu.memory_space<vmem>>) target_semaphore(%417 : memref<!tpu.dma_semaphore, #tpu.memory_space<semaphore_mem>>)
      %c2 = arith.constant 2 : index
      %418 = memref.load %arg2[%c2] : memref<48xi32, #tpu.memory_space<smem>>
      %c0_i32_419 = arith.constant 0 : i32
      %c0_i32_420 = arith.constant 0 : i32
      %c2_i32_421 = arith.constant 2 : i32
      %c0_i32_422 = arith.constant 0 : i32
      %c0_i32_423 = arith.constant 0 : i32
      %c2_i32_424 = arith.constant 2 : i32
      %c0_i32_425 = arith.constant 0 : i32
      %419 = tpu.memref_slice %arg4[%418, %c0_i32_425] : memref<64x128xf32, #tpu.memory_space<any>> -> memref<1x128xf32, #tpu.memory_space<any>>
      %420 = tpu.memref_squeeze %419 : memref<1x128xf32, #tpu.memory_space<any>> -> memref<128xf32, #tpu.memory_space<any>>
      %c0_i32_426 = arith.constant 0 : i32
      %421 = tpu.memref_slice %arg7[%c0_i32_419, %c0_i32_420, %c2_i32_421, %c0_i32_426] : memref<2x8x6x128xf32, #tpu.memory_space<vmem>> -> memref<1x1x1x128xf32, #tpu.memory_space<vmem>>
      %422 = tpu.memref_squeeze %421 : memref<1x1x1x128xf32, #tpu.memory_space<vmem>> -> memref<128xf32, #tpu.memory_space<vmem>>
      %423 = tpu.memref_slice %arg9[%c0_i32_422, %c0_i32_423, %c2_i32_424] : memref<2x8x6x!tpu.dma_semaphore, #tpu.memory_space<semaphore_mem>> -> memref<1x1x1x!tpu.dma_semaphore, #tpu.memory_space<semaphore_mem>>
      %424 = tpu.memref_squeeze %423 : memref<1x1x1x!tpu.dma_semaphore, #tpu.memory_space<semaphore_mem>> -> memref<!tpu.dma_semaphore, #tpu.memory_space<semaphore_mem>>
      tpu.enqueue_dma source(%420 : memref<128xf32, #tpu.memory_space<any>>) target(%422 : memref<128xf32, #tpu.memory_space<vmem>>) target_semaphore(%424 : memref<!tpu.dma_semaphore, #tpu.memory_space<semaphore_mem>>)
      %c3 = arith.constant 3 : index
      %425 = memref.load %arg2[%c3] : memref<48xi32, #tpu.memory_space<smem>>
      %c0_i32_427 = arith.constant 0 : i32
      %c0_i32_428 = arith.constant 0 : i32
      %c3_i32_429 = arith.constant 3 : i32
      %c0_i32_430 = arith.constant 0 : i32
      %c0_i32_431 = arith.constant 0 : i32
      %c3_i32_432 = arith.constant 3 : i32
      %c0_i32_433 = arith.constant 0 : i32
      %426 = tpu.memref_slice %arg4[%425, %c0_i32_433] : memref<64x128xf32, #tpu.memory_space<any>> -> memref<1x128xf32, #tpu.memory_space<any>>
      %427 = tpu.memref_squeeze %426 : memref<1x128xf32, #tpu.memory_space<any>> -> memref<128xf32, #tpu.memory_space<any>>
      %c0_i32_434 = arith.constant 0 : i32
      %428 = tpu.memref_slice %arg7[%c0_i32_427, %c0_i32_428, %c3_i32_429, %c0_i32_434] : memref<2x8x6x128xf32, #tpu.memory_space<vmem>> -> memref<1x1x1x128xf32, #tpu.memory_space<vmem>>
      %429 = tpu.memref_squeeze %428 : memref<1x1x1x128xf32, #tpu.memory_space<vmem>> -> memref<128xf32, #tpu.memory_space<vmem>>
      %430 = tpu.memref_slice %arg9[%c0_i32_430, %c0_i32_431, %c3_i32_432] : memref<2x8x6x!tpu.dma_semaphore, #tpu.memory_space<semaphore_mem>> -> memref<1x1x1x!tpu.dma_semaphore, #tpu.memory_space<semaphore_mem>>
      %431 = tpu.memref_squeeze %430 : memref<1x1x1x!tpu.dma_semaphore, #tpu.memory_space<semaphore_mem>> -> memref<!tpu.dma_semaphore, #tpu.memory_space<semaphore_mem>>
      tpu.enqueue_dma source(%427 : memref<128xf32, #tpu.memory_space<any>>) target(%429 : memref<128xf32, #tpu.memory_space<vmem>>) target_semaphore(%431 : memref<!tpu.dma_semaphore, #tpu.memory_space<semaphore_mem>>)
      %c4 = arith.constant 4 : index
      %432 = memref.load %arg2[%c4] : memref<48xi32, #tpu.memory_space<smem>>
      %c0_i32_435 = arith.constant 0 : i32
      %c0_i32_436 = arith.constant 0 : i32
      %c4_i32_437 = arith.constant 4 : i32
      %c0_i32_438 = arith.constant 0 : i32
      %c0_i32_439 = arith.constant 0 : i32
      %c4_i32_440 = arith.constant 4 : i32
      %c0_i32_441 = arith.constant 0 : i32
      %433 = tpu.memref_slice %arg4[%432, %c0_i32_441] : memref<64x128xf32, #tpu.memory_space<any>> -> memref<1x128xf32, #tpu.memory_space<any>>
      %434 = tpu.memref_squeeze %433 : memref<1x128xf32, #tpu.memory_space<any>> -> memref<128xf32, #tpu.memory_space<any>>
      %c0_i32_442 = arith.constant 0 : i32
      %435 = tpu.memref_slice %arg7[%c0_i32_435, %c0_i32_436, %c4_i32_437, %c0_i32_442] : memref<2x8x6x128xf32, #tpu.memory_space<vmem>> -> memref<1x1x1x128xf32, #tpu.memory_space<vmem>>
      %436 = tpu.memref_squeeze %435 : memref<1x1x1x128xf32, #tpu.memory_space<vmem>> -> memref<128xf32, #tpu.memory_space<vmem>>
      %437 = tpu.memref_slice %arg9[%c0_i32_438, %c0_i32_439, %c4_i32_440] : memref<2x8x6x!tpu.dma_semaphore, #tpu.memory_space<semaphore_mem>> -> memref<1x1x1x!tpu.dma_semaphore, #tpu.memory_space<semaphore_mem>>
      %438 = tpu.memref_squeeze %437 : memref<1x1x1x!tpu.dma_semaphore, #tpu.memory_space<semaphore_mem>> -> memref<!tpu.dma_semaphore, #tpu.memory_space<semaphore_mem>>
      tpu.enqueue_dma source(%434 : memref<128xf32, #tpu.memory_space<any>>) target(%436 : memref<128xf32, #tpu.memory_space<vmem>>) target_semaphore(%438 : memref<!tpu.dma_semaphore, #tpu.memory_space<semaphore_mem>>)
      %c5 = arith.constant 5 : index
      %439 = memref.load %arg2[%c5] : memref<48xi32, #tpu.memory_space<smem>>
      %c0_i32_443 = arith.constant 0 : i32
      %c0_i32_444 = arith.constant 0 : i32
      %c5_i32_445 = arith.constant 5 : i32
      %c0_i32_446 = arith.constant 0 : i32
      %c0_i32_447 = arith.constant 0 : i32
      %c5_i32_448 = arith.constant 5 : i32
      %c0_i32_449 = arith.constant 0 : i32
      %440 = tpu.memref_slice %arg4[%439, %c0_i32_449] : memref<64x128xf32, #tpu.memory_space<any>> -> memref<1x128xf32, #tpu.memory_space<any>>
      %441 = tpu.memref_squeeze %440 : memref<1x128xf32, #tpu.memory_space<any>> -> memref<128xf32, #tpu.memory_space<any>>
      %c0_i32_450 = arith.constant 0 : i32
      %442 = tpu.memref_slice %arg7[%c0_i32_443, %c0_i32_444, %c5_i32_445, %c0_i32_450] : memref<2x8x6x128xf32, #tpu.memory_space<vmem>> -> memref<1x1x1x128xf32, #tpu.memory_space<vmem>>
      %443 = tpu.memref_squeeze %442 : memref<1x1x1x128xf32, #tpu.memory_space<vmem>> -> memref<128xf32, #tpu.memory_space<vmem>>
      %444 = tpu.memref_slice %arg9[%c0_i32_446, %c0_i32_447, %c5_i32_448] : memref<2x8x6x!tpu.dma_semaphore, #tpu.memory_space<semaphore_mem>> -> memref<1x1x1x!tpu.dma_semaphore, #tpu.memory_space<semaphore_mem>>
      %445 = tpu.memref_squeeze %444 : memref<1x1x1x!tpu.dma_semaphore, #tpu.memory_space<semaphore_mem>> -> memref<!tpu.dma_semaphore, #tpu.memory_space<semaphore_mem>>
      tpu.enqueue_dma source(%441 : memref<128xf32, #tpu.memory_space<any>>) target(%443 : memref<128xf32, #tpu.memory_space<vmem>>) target_semaphore(%445 : memref<!tpu.dma_semaphore, #tpu.memory_space<semaphore_mem>>)
      %c1_451 = arith.constant 1 : index
      %446 = memref.load %arg1[%c1_451] : memref<8xi32, #tpu.memory_space<smem>>
      %c0_i32_452 = arith.constant 0 : i32
      %c1_i32_453 = arith.constant 1 : i32
      %c0_i32_454 = arith.constant 0 : i32
      %c1_i32_455 = arith.constant 1 : i32
      %c0_i32_456 = arith.constant 0 : i32
      %447 = tpu.memref_slice %arg3[%446, %c0_i32_456] : memref<64x128xf32, #tpu.memory_space<any>> -> memref<1x128xf32, #tpu.memory_space<any>>
      %448 = tpu.memref_squeeze %447 : memref<1x128xf32, #tpu.memory_space<any>> -> memref<128xf32, #tpu.memory_space<any>>
      %c0_i32_457 = arith.constant 0 : i32
      %449 = tpu.memref_slice %arg6[%c0_i32_452, %c1_i32_453, %c0_i32_457] : memref<2x8x128xf32, #tpu.memory_space<vmem>> -> memref<1x1x128xf32, #tpu.memory_space<vmem>>
      %450 = tpu.memref_squeeze %449 : memref<1x1x128xf32, #tpu.memory_space<vmem>> -> memref<128xf32, #tpu.memory_space<vmem>>
      %451 = tpu.memref_slice %arg8[%c0_i32_454, %c1_i32_455] : memref<2x8x!tpu.dma_semaphore, #tpu.memory_space<semaphore_mem>> -> memref<1x1x!tpu.dma_semaphore, #tpu.memory_space<semaphore_mem>>
      %452 = tpu.memref_squeeze %451 : memref<1x1x!tpu.dma_semaphore, #tpu.memory_space<semaphore_mem>> -> memref<!tpu.dma_semaphore, #tpu.memory_space<semaphore_mem>>
      tpu.enqueue_dma source(%448 : memref<128xf32, #tpu.memory_space<any>>) target(%450 : memref<128xf32, #tpu.memory_space<vmem>>) target_semaphore(%452 : memref<!tpu.dma_semaphore, #tpu.memory_space<semaphore_mem>>)
      %c6 = arith.constant 6 : index
      %453 = memref.load %arg2[%c6] : memref<48xi32, #tpu.memory_space<smem>>
      %c0_i32_458 = arith.constant 0 : i32
      %c1_i32_459 = arith.constant 1 : i32
      %c0_i32_460 = arith.constant 0 : i32
      %c0_i32_461 = arith.constant 0 : i32
      %c1_i32_462 = arith.constant 1 : i32
      %c0_i32_463 = arith.constant 0 : i32
      %c0_i32_464 = arith.constant 0 : i32
      %454 = tpu.memref_slice %arg4[%453, %c0_i32_464] : memref<64x128xf32, #tpu.memory_space<any>> -> memref<1x128xf32, #tpu.memory_space<any>>
      %455 = tpu.memref_squeeze %454 : memref<1x128xf32, #tpu.memory_space<any>> -> memref<128xf32, #tpu.memory_space<any>>
      %c0_i32_465 = arith.constant 0 : i32
      %456 = tpu.memref_slice %arg7[%c0_i32_458, %c1_i32_459, %c0_i32_460, %c0_i32_465] : memref<2x8x6x128xf32, #tpu.memory_space<vmem>> -> memref<1x1x1x128xf32, #tpu.memory_space<vmem>>
      %457 = tpu.memref_squeeze %456 : memref<1x1x1x128xf32, #tpu.memory_space<vmem>> -> memref<128xf32, #tpu.memory_space<vmem>>
      %458 = tpu.memref_slice %arg9[%c0_i32_461, %c1_i32_462, %c0_i32_463] : memref<2x8x6x!tpu.dma_semaphore, #tpu.memory_space<semaphore_mem>> -> memref<1x1x1x!tpu.dma_semaphore, #tpu.memory_space<semaphore_mem>>
      %459 = tpu.memref_squeeze %458 : memref<1x1x1x!tpu.dma_semaphore, #tpu.memory_space<semaphore_mem>> -> memref<!tpu.dma_semaphore, #tpu.memory_space<semaphore_mem>>
      tpu.enqueue_dma source(%455 : memref<128xf32, #tpu.memory_space<any>>) target(%457 : memref<128xf32, #tpu.memory_space<vmem>>) target_semaphore(%459 : memref<!tpu.dma_semaphore, #tpu.memory_space<semaphore_mem>>)
      %c7 = arith.constant 7 : index
      %460 = memref.load %arg2[%c7] : memref<48xi32, #tpu.memory_space<smem>>
      %c0_i32_466 = arith.constant 0 : i32
      %c1_i32_467 = arith.constant 1 : i32
      %c1_i32_468 = arith.constant 1 : i32
      %c0_i32_469 = arith.constant 0 : i32
      %c1_i32_470 = arith.constant 1 : i32
      %c1_i32_471 = arith.constant 1 : i32
      %c0_i32_472 = arith.constant 0 : i32
      %461 = tpu.memref_slice %arg4[%460, %c0_i32_472] : memref<64x128xf32, #tpu.memory_space<any>> -> memref<1x128xf32, #tpu.memory_space<any>>
      %462 = tpu.memref_squeeze %461 : memref<1x128xf32, #tpu.memory_space<any>> -> memref<128xf32, #tpu.memory_space<any>>
      %c0_i32_473 = arith.constant 0 : i32
      %463 = tpu.memref_slice %arg7[%c0_i32_466, %c1_i32_467, %c1_i32_468, %c0_i32_473] : memref<2x8x6x128xf32, #tpu.memory_space<vmem>> -> memref<1x1x1x128xf32, #tpu.memory_space<vmem>>
      %464 = tpu.memref_squeeze %463 : memref<1x1x1x128xf32, #tpu.memory_space<vmem>> -> memref<128xf32, #tpu.memory_space<vmem>>
      %465 = tpu.memref_slice %arg9[%c0_i32_469, %c1_i32_470, %c1_i32_471] : memref<2x8x6x!tpu.dma_semaphore, #tpu.memory_space<semaphore_mem>> -> memref<1x1x1x!tpu.dma_semaphore, #tpu.memory_space<semaphore_mem>>
      %466 = tpu.memref_squeeze %465 : memref<1x1x1x!tpu.dma_semaphore, #tpu.memory_space<semaphore_mem>> -> memref<!tpu.dma_semaphore, #tpu.memory_space<semaphore_mem>>
      tpu.enqueue_dma source(%462 : memref<128xf32, #tpu.memory_space<any>>) target(%464 : memref<128xf32, #tpu.memory_space<vmem>>) target_semaphore(%466 : memref<!tpu.dma_semaphore, #tpu.memory_space<semaphore_mem>>)
      %c8 = arith.constant 8 : index
      %467 = memref.load %arg2[%c8] : memref<48xi32, #tpu.memory_space<smem>>
      %c0_i32_474 = arith.constant 0 : i32
      %c1_i32_475 = arith.constant 1 : i32
      %c2_i32_476 = arith.constant 2 : i32
      %c0_i32_477 = arith.constant 0 : i32
      %c1_i32_478 = arith.constant 1 : i32
      %c2_i32_479 = arith.constant 2 : i32
      %c0_i32_480 = arith.constant 0 : i32
      %468 = tpu.memref_slice %arg4[%467, %c0_i32_480] : memref<64x128xf32, #tpu.memory_space<any>> -> memref<1x128xf32, #tpu.memory_space<any>>
      %469 = tpu.memref_squeeze %468 : memref<1x128xf32, #tpu.memory_space<any>> -> memref<128xf32, #tpu.memory_space<any>>
      %c0_i32_481 = arith.constant 0 : i32
      %470 = tpu.memref_slice %arg7[%c0_i32_474, %c1_i32_475, %c2_i32_476, %c0_i32_481] : memref<2x8x6x128xf32, #tpu.memory_space<vmem>> -> memref<1x1x1x128xf32, #tpu.memory_space<vmem>>
      %471 = tpu.memref_squeeze %470 : memref<1x1x1x128xf32, #tpu.memory_space<vmem>> -> memref<128xf32, #tpu.memory_space<vmem>>
      %472 = tpu.memref_slice %arg9[%c0_i32_477, %c1_i32_478, %c2_i32_479] : memref<2x8x6x!tpu.dma_semaphore, #tpu.memory_space<semaphore_mem>> -> memref<1x1x1x!tpu.dma_semaphore, #tpu.memory_space<semaphore_mem>>
      %473 = tpu.memref_squeeze %472 : memref<1x1x1x!tpu.dma_semaphore, #tpu.memory_space<semaphore_mem>> -> memref<!tpu.dma_semaphore, #tpu.memory_space<semaphore_mem>>
      tpu.enqueue_dma source(%469 : memref<128xf32, #tpu.memory_space<any>>) target(%471 : memref<128xf32, #tpu.memory_space<vmem>>) target_semaphore(%473 : memref<!tpu.dma_semaphore, #tpu.memory_space<semaphore_mem>>)
      %c9 = arith.constant 9 : index
      %474 = memref.load %arg2[%c9] : memref<48xi32, #tpu.memory_space<smem>>
      %c0_i32_482 = arith.constant 0 : i32
      %c1_i32_483 = arith.constant 1 : i32
      %c3_i32_484 = arith.constant 3 : i32
      %c0_i32_485 = arith.constant 0 : i32
      %c1_i32_486 = arith.constant 1 : i32
      %c3_i32_487 = arith.constant 3 : i32
      %c0_i32_488 = arith.constant 0 : i32
      %475 = tpu.memref_slice %arg4[%474, %c0_i32_488] : memref<64x128xf32, #tpu.memory_space<any>> -> memref<1x128xf32, #tpu.memory_space<any>>
      %476 = tpu.memref_squeeze %475 : memref<1x128xf32, #tpu.memory_space<any>> -> memref<128xf32, #tpu.memory_space<any>>
      %c0_i32_489 = arith.constant 0 : i32
      %477 = tpu.memref_slice %arg7[%c0_i32_482, %c1_i32_483, %c3_i32_484, %c0_i32_489] : memref<2x8x6x128xf32, #tpu.memory_space<vmem>> -> memref<1x1x1x128xf32, #tpu.memory_space<vmem>>
      %478 = tpu.memref_squeeze %477 : memref<1x1x1x128xf32, #tpu.memory_space<vmem>> -> memref<128xf32, #tpu.memory_space<vmem>>
      %479 = tpu.memref_slice %arg9[%c0_i32_485, %c1_i32_486, %c3_i32_487] : memref<2x8x6x!tpu.dma_semaphore, #tpu.memory_space<semaphore_mem>> -> memref<1x1x1x!tpu.dma_semaphore, #tpu.memory_space<semaphore_mem>>
      %480 = tpu.memref_squeeze %479 : memref<1x1x1x!tpu.dma_semaphore, #tpu.memory_space<semaphore_mem>> -> memref<!tpu.dma_semaphore, #tpu.memory_space<semaphore_mem>>
      tpu.enqueue_dma source(%476 : memref<128xf32, #tpu.memory_space<any>>) target(%478 : memref<128xf32, #tpu.memory_space<vmem>>) target_semaphore(%480 : memref<!tpu.dma_semaphore, #tpu.memory_space<semaphore_mem>>)
      %c10 = arith.constant 10 : index
      %481 = memref.load %arg2[%c10] : memref<48xi32, #tpu.memory_space<smem>>
      %c0_i32_490 = arith.constant 0 : i32
      %c1_i32_491 = arith.constant 1 : i32
      %c4_i32_492 = arith.constant 4 : i32
      %c0_i32_493 = arith.constant 0 : i32
      %c1_i32_494 = arith.constant 1 : i32
      %c4_i32_495 = arith.constant 4 : i32
      %c0_i32_496 = arith.constant 0 : i32
      %482 = tpu.memref_slice %arg4[%481, %c0_i32_496] : memref<64x128xf32, #tpu.memory_space<any>> -> memref<1x128xf32, #tpu.memory_space<any>>
      %483 = tpu.memref_squeeze %482 : memref<1x128xf32, #tpu.memory_space<any>> -> memref<128xf32, #tpu.memory_space<any>>
      %c0_i32_497 = arith.constant 0 : i32
      %484 = tpu.memref_slice %arg7[%c0_i32_490, %c1_i32_491, %c4_i32_492, %c0_i32_497] : memref<2x8x6x128xf32, #tpu.memory_space<vmem>> -> memref<1x1x1x128xf32, #tpu.memory_space<vmem>>
      %485 = tpu.memref_squeeze %484 : memref<1x1x1x128xf32, #tpu.memory_space<vmem>> -> memref<128xf32, #tpu.memory_space<vmem>>
      %486 = tpu.memref_slice %arg9[%c0_i32_493, %c1_i32_494, %c4_i32_495] : memref<2x8x6x!tpu.dma_semaphore, #tpu.memory_space<semaphore_mem>> -> memref<1x1x1x!tpu.dma_semaphore, #tpu.memory_space<semaphore_mem>>
      %487 = tpu.memref_squeeze %486 : memref<1x1x1x!tpu.dma_semaphore, #tpu.memory_space<semaphore_mem>> -> memref<!tpu.dma_semaphore, #tpu.memory_space<semaphore_mem>>
      tpu.enqueue_dma source(%483 : memref<128xf32, #tpu.memory_space<any>>) target(%485 : memref<128xf32, #tpu.memory_space<vmem>>) target_semaphore(%487 : memref<!tpu.dma_semaphore, #tpu.memory_space<semaphore_mem>>)
      %c11 = arith.constant 11 : index
      %488 = memref.load %arg2[%c11] : memref<48xi32, #tpu.memory_space<smem>>
      %c0_i32_498 = arith.constant 0 : i32
      %c1_i32_499 = arith.constant 1 : i32
      %c5_i32_500 = arith.constant 5 : i32
      %c0_i32_501 = arith.constant 0 : i32
      %c1_i32_502 = arith.constant 1 : i32
      %c5_i32_503 = arith.constant 5 : i32
      %c0_i32_504 = arith.constant 0 : i32
      %489 = tpu.memref_slice %arg4[%488, %c0_i32_504] : memref<64x128xf32, #tpu.memory_space<any>> -> memref<1x128xf32, #tpu.memory_space<any>>
      %490 = tpu.memref_squeeze %489 : memref<1x128xf32, #tpu.memory_space<any>> -> memref<128xf32, #tpu.memory_space<any>>
      %c0_i32_505 = arith.constant 0 : i32
      %491 = tpu.memref_slice %arg7[%c0_i32_498, %c1_i32_499, %c5_i32_500, %c0_i32_505] : memref<2x8x6x128xf32, #tpu.memory_space<vmem>> -> memref<1x1x1x128xf32, #tpu.memory_space<vmem>>
      %492 = tpu.memref_squeeze %491 : memref<1x1x1x128xf32, #tpu.memory_space<vmem>> -> memref<128xf32, #tpu.memory_space<vmem>>
      %493 = tpu.memref_slice %arg9[%c0_i32_501, %c1_i32_502, %c5_i32_503] : memref<2x8x6x!tpu.dma_semaphore, #tpu.memory_space<semaphore_mem>> -> memref<1x1x1x!tpu.dma_semaphore, #tpu.memory_space<semaphore_mem>>
      %494 = tpu.memref_squeeze %493 : memref<1x1x1x!tpu.dma_semaphore, #tpu.memory_space<semaphore_mem>> -> memref<!tpu.dma_semaphore, #tpu.memory_space<semaphore_mem>>
      tpu.enqueue_dma source(%490 : memref<128xf32, #tpu.memory_space<any>>) target(%492 : memref<128xf32, #tpu.memory_space<vmem>>) target_semaphore(%494 : memref<!tpu.dma_semaphore, #tpu.memory_space<semaphore_mem>>)
      %c2_506 = arith.constant 2 : index
      %495 = memref.load %arg1[%c2_506] : memref<8xi32, #tpu.memory_space<smem>>
      %c0_i32_507 = arith.constant 0 : i32
      %c2_i32_508 = arith.constant 2 : i32
      %c0_i32_509 = arith.constant 0 : i32
      %c2_i32_510 = arith.constant 2 : i32
      %c0_i32_511 = arith.constant 0 : i32
      %496 = tpu.memref_slice %arg3[%495, %c0_i32_511] : memref<64x128xf32, #tpu.memory_space<any>> -> memref<1x128xf32, #tpu.memory_space<any>>
      %497 = tpu.memref_squeeze %496 : memref<1x128xf32, #tpu.memory_space<any>> -> memref<128xf32, #tpu.memory_space<any>>
      %c0_i32_512 = arith.constant 0 : i32
      %498 = tpu.memref_slice %arg6[%c0_i32_507, %c2_i32_508, %c0_i32_512] : memref<2x8x128xf32, #tpu.memory_space<vmem>> -> memref<1x1x128xf32, #tpu.memory_space<vmem>>
      %499 = tpu.memref_squeeze %498 : memref<1x1x128xf32, #tpu.memory_space<vmem>> -> memref<128xf32, #tpu.memory_space<vmem>>
      %500 = tpu.memref_slice %arg8[%c0_i32_509, %c2_i32_510] : memref<2x8x!tpu.dma_semaphore, #tpu.memory_space<semaphore_mem>> -> memref<1x1x!tpu.dma_semaphore, #tpu.memory_space<semaphore_mem>>
      %501 = tpu.memref_squeeze %500 : memref<1x1x!tpu.dma_semaphore, #tpu.memory_space<semaphore_mem>> -> memref<!tpu.dma_semaphore, #tpu.memory_space<semaphore_mem>>
      tpu.enqueue_dma source(%497 : memref<128xf32, #tpu.memory_space<any>>) target(%499 : memref<128xf32, #tpu.memory_space<vmem>>) target_semaphore(%501 : memref<!tpu.dma_semaphore, #tpu.memory_space<semaphore_mem>>)
      %c12 = arith.constant 12 : index
      %502 = memref.load %arg2[%c12] : memref<48xi32, #tpu.memory_space<smem>>
      %c0_i32_513 = arith.constant 0 : i32
      %c2_i32_514 = arith.constant 2 : i32
      %c0_i32_515 = arith.constant 0 : i32
      %c0_i32_516 = arith.constant 0 : i32
      %c2_i32_517 = arith.constant 2 : i32
      %c0_i32_518 = arith.constant 0 : i32
      %c0_i32_519 = arith.constant 0 : i32
      %503 = tpu.memref_slice %arg4[%502, %c0_i32_519] : memref<64x128xf32, #tpu.memory_space<any>> -> memref<1x128xf32, #tpu.memory_space<any>>
      %504 = tpu.memref_squeeze %503 : memref<1x128xf32, #tpu.memory_space<any>> -> memref<128xf32, #tpu.memory_space<any>>
      %c0_i32_520 = arith.constant 0 : i32
      %505 = tpu.memref_slice %arg7[%c0_i32_513, %c2_i32_514, %c0_i32_515, %c0_i32_520] : memref<2x8x6x128xf32, #tpu.memory_space<vmem>> -> memref<1x1x1x128xf32, #tpu.memory_space<vmem>>
      %506 = tpu.memref_squeeze %505 : memref<1x1x1x128xf32, #tpu.memory_space<vmem>> -> memref<128xf32, #tpu.memory_space<vmem>>
      %507 = tpu.memref_slice %arg9[%c0_i32_516, %c2_i32_517, %c0_i32_518] : memref<2x8x6x!tpu.dma_semaphore, #tpu.memory_space<semaphore_mem>> -> memref<1x1x1x!tpu.dma_semaphore, #tpu.memory_space<semaphore_mem>>
      %508 = tpu.memref_squeeze %507 : memref<1x1x1x!tpu.dma_semaphore, #tpu.memory_space<semaphore_mem>> -> memref<!tpu.dma_semaphore, #tpu.memory_space<semaphore_mem>>
      tpu.enqueue_dma source(%504 : memref<128xf32, #tpu.memory_space<any>>) target(%506 : memref<128xf32, #tpu.memory_space<vmem>>) target_semaphore(%508 : memref<!tpu.dma_semaphore, #tpu.memory_space<semaphore_mem>>)
      %c13 = arith.constant 13 : index
      %509 = memref.load %arg2[%c13] : memref<48xi32, #tpu.memory_space<smem>>
      %c0_i32_521 = arith.constant 0 : i32
      %c2_i32_522 = arith.constant 2 : i32
      %c1_i32_523 = arith.constant 1 : i32
      %c0_i32_524 = arith.constant 0 : i32
      %c2_i32_525 = arith.constant 2 : i32
      %c1_i32_526 = arith.constant 1 : i32
      %c0_i32_527 = arith.constant 0 : i32
      %510 = tpu.memref_slice %arg4[%509, %c0_i32_527] : memref<64x128xf32, #tpu.memory_space<any>> -> memref<1x128xf32, #tpu.memory_space<any>>
      %511 = tpu.memref_squeeze %510 : memref<1x128xf32, #tpu.memory_space<any>> -> memref<128xf32, #tpu.memory_space<any>>
      %c0_i32_528 = arith.constant 0 : i32
      %512 = tpu.memref_slice %arg7[%c0_i32_521, %c2_i32_522, %c1_i32_523, %c0_i32_528] : memref<2x8x6x128xf32, #tpu.memory_space<vmem>> -> memref<1x1x1x128xf32, #tpu.memory_space<vmem>>
      %513 = tpu.memref_squeeze %512 : memref<1x1x1x128xf32, #tpu.memory_space<vmem>> -> memref<128xf32, #tpu.memory_space<vmem>>
      %514 = tpu.memref_slice %arg9[%c0_i32_524, %c2_i32_525, %c1_i32_526] : memref<2x8x6x!tpu.dma_semaphore, #tpu.memory_space<semaphore_mem>> -> memref<1x1x1x!tpu.dma_semaphore, #tpu.memory_space<semaphore_mem>>
      %515 = tpu.memref_squeeze %514 : memref<1x1x1x!tpu.dma_semaphore, #tpu.memory_space<semaphore_mem>> -> memref<!tpu.dma_semaphore, #tpu.memory_space<semaphore_mem>>
      tpu.enqueue_dma source(%511 : memref<128xf32, #tpu.memory_space<any>>) target(%513 : memref<128xf32, #tpu.memory_space<vmem>>) target_semaphore(%515 : memref<!tpu.dma_semaphore, #tpu.memory_space<semaphore_mem>>)
      %c14 = arith.constant 14 : index
      %516 = memref.load %arg2[%c14] : memref<48xi32, #tpu.memory_space<smem>>
      %c0_i32_529 = arith.constant 0 : i32
      %c2_i32_530 = arith.constant 2 : i32
      %c2_i32_531 = arith.constant 2 : i32
      %c0_i32_532 = arith.constant 0 : i32
      %c2_i32_533 = arith.constant 2 : i32
      %c2_i32_534 = arith.constant 2 : i32
      %c0_i32_535 = arith.constant 0 : i32
      %517 = tpu.memref_slice %arg4[%516, %c0_i32_535] : memref<64x128xf32, #tpu.memory_space<any>> -> memref<1x128xf32, #tpu.memory_space<any>>
      %518 = tpu.memref_squeeze %517 : memref<1x128xf32, #tpu.memory_space<any>> -> memref<128xf32, #tpu.memory_space<any>>
      %c0_i32_536 = arith.constant 0 : i32
      %519 = tpu.memref_slice %arg7[%c0_i32_529, %c2_i32_530, %c2_i32_531, %c0_i32_536] : memref<2x8x6x128xf32, #tpu.memory_space<vmem>> -> memref<1x1x1x128xf32, #tpu.memory_space<vmem>>
      %520 = tpu.memref_squeeze %519 : memref<1x1x1x128xf32, #tpu.memory_space<vmem>> -> memref<128xf32, #tpu.memory_space<vmem>>
      %521 = tpu.memref_slice %arg9[%c0_i32_532, %c2_i32_533, %c2_i32_534] : memref<2x8x6x!tpu.dma_semaphore, #tpu.memory_space<semaphore_mem>> -> memref<1x1x1x!tpu.dma_semaphore, #tpu.memory_space<semaphore_mem>>
      %522 = tpu.memref_squeeze %521 : memref<1x1x1x!tpu.dma_semaphore, #tpu.memory_space<semaphore_mem>> -> memref<!tpu.dma_semaphore, #tpu.memory_space<semaphore_mem>>
      tpu.enqueue_dma source(%518 : memref<128xf32, #tpu.memory_space<any>>) target(%520 : memref<128xf32, #tpu.memory_space<vmem>>) target_semaphore(%522 : memref<!tpu.dma_semaphore, #tpu.memory_space<semaphore_mem>>)
      %c15 = arith.constant 15 : index
      %523 = memref.load %arg2[%c15] : memref<48xi32, #tpu.memory_space<smem>>
      %c0_i32_537 = arith.constant 0 : i32
      %c2_i32_538 = arith.constant 2 : i32
      %c3_i32_539 = arith.constant 3 : i32
      %c0_i32_540 = arith.constant 0 : i32
      %c2_i32_541 = arith.constant 2 : i32
      %c3_i32_542 = arith.constant 3 : i32
      %c0_i32_543 = arith.constant 0 : i32
      %524 = tpu.memref_slice %arg4[%523, %c0_i32_543] : memref<64x128xf32, #tpu.memory_space<any>> -> memref<1x128xf32, #tpu.memory_space<any>>
      %525 = tpu.memref_squeeze %524 : memref<1x128xf32, #tpu.memory_space<any>> -> memref<128xf32, #tpu.memory_space<any>>
      %c0_i32_544 = arith.constant 0 : i32
      %526 = tpu.memref_slice %arg7[%c0_i32_537, %c2_i32_538, %c3_i32_539, %c0_i32_544] : memref<2x8x6x128xf32, #tpu.memory_space<vmem>> -> memref<1x1x1x128xf32, #tpu.memory_space<vmem>>
      %527 = tpu.memref_squeeze %526 : memref<1x1x1x128xf32, #tpu.memory_space<vmem>> -> memref<128xf32, #tpu.memory_space<vmem>>
      %528 = tpu.memref_slice %arg9[%c0_i32_540, %c2_i32_541, %c3_i32_542] : memref<2x8x6x!tpu.dma_semaphore, #tpu.memory_space<semaphore_mem>> -> memref<1x1x1x!tpu.dma_semaphore, #tpu.memory_space<semaphore_mem>>
      %529 = tpu.memref_squeeze %528 : memref<1x1x1x!tpu.dma_semaphore, #tpu.memory_space<semaphore_mem>> -> memref<!tpu.dma_semaphore, #tpu.memory_space<semaphore_mem>>
      tpu.enqueue_dma source(%525 : memref<128xf32, #tpu.memory_space<any>>) target(%527 : memref<128xf32, #tpu.memory_space<vmem>>) target_semaphore(%529 : memref<!tpu.dma_semaphore, #tpu.memory_space<semaphore_mem>>)
      %c16 = arith.constant 16 : index
      %530 = memref.load %arg2[%c16] : memref<48xi32, #tpu.memory_space<smem>>
      %c0_i32_545 = arith.constant 0 : i32
      %c2_i32_546 = arith.constant 2 : i32
      %c4_i32_547 = arith.constant 4 : i32
      %c0_i32_548 = arith.constant 0 : i32
      %c2_i32_549 = arith.constant 2 : i32
      %c4_i32_550 = arith.constant 4 : i32
      %c0_i32_551 = arith.constant 0 : i32
      %531 = tpu.memref_slice %arg4[%530, %c0_i32_551] : memref<64x128xf32, #tpu.memory_space<any>> -> memref<1x128xf32, #tpu.memory_space<any>>
      %532 = tpu.memref_squeeze %531 : memref<1x128xf32, #tpu.memory_space<any>> -> memref<128xf32, #tpu.memory_space<any>>
      %c0_i32_552 = arith.constant 0 : i32
      %533 = tpu.memref_slice %arg7[%c0_i32_545, %c2_i32_546, %c4_i32_547, %c0_i32_552] : memref<2x8x6x128xf32, #tpu.memory_space<vmem>> -> memref<1x1x1x128xf32, #tpu.memory_space<vmem>>
      %534 = tpu.memref_squeeze %533 : memref<1x1x1x128xf32, #tpu.memory_space<vmem>> -> memref<128xf32, #tpu.memory_space<vmem>>
      %535 = tpu.memref_slice %arg9[%c0_i32_548, %c2_i32_549, %c4_i32_550] : memref<2x8x6x!tpu.dma_semaphore, #tpu.memory_space<semaphore_mem>> -> memref<1x1x1x!tpu.dma_semaphore, #tpu.memory_space<semaphore_mem>>
      %536 = tpu.memref_squeeze %535 : memref<1x1x1x!tpu.dma_semaphore, #tpu.memory_space<semaphore_mem>> -> memref<!tpu.dma_semaphore, #tpu.memory_space<semaphore_mem>>
      tpu.enqueue_dma source(%532 : memref<128xf32, #tpu.memory_space<any>>) target(%534 : memref<128xf32, #tpu.memory_space<vmem>>) target_semaphore(%536 : memref<!tpu.dma_semaphore, #tpu.memory_space<semaphore_mem>>)
      %c17 = arith.constant 17 : index
      %537 = memref.load %arg2[%c17] : memref<48xi32, #tpu.memory_space<smem>>
      %c0_i32_553 = arith.constant 0 : i32
      %c2_i32_554 = arith.constant 2 : i32
      %c5_i32_555 = arith.constant 5 : i32
      %c0_i32_556 = arith.constant 0 : i32
      %c2_i32_557 = arith.constant 2 : i32
      %c5_i32_558 = arith.constant 5 : i32
      %c0_i32_559 = arith.constant 0 : i32
      %538 = tpu.memref_slice %arg4[%537, %c0_i32_559] : memref<64x128xf32, #tpu.memory_space<any>> -> memref<1x128xf32, #tpu.memory_space<any>>
      %539 = tpu.memref_squeeze %538 : memref<1x128xf32, #tpu.memory_space<any>> -> memref<128xf32, #tpu.memory_space<any>>
      %c0_i32_560 = arith.constant 0 : i32
      %540 = tpu.memref_slice %arg7[%c0_i32_553, %c2_i32_554, %c5_i32_555, %c0_i32_560] : memref<2x8x6x128xf32, #tpu.memory_space<vmem>> -> memref<1x1x1x128xf32, #tpu.memory_space<vmem>>
      %541 = tpu.memref_squeeze %540 : memref<1x1x1x128xf32, #tpu.memory_space<vmem>> -> memref<128xf32, #tpu.memory_space<vmem>>
      %542 = tpu.memref_slice %arg9[%c0_i32_556, %c2_i32_557, %c5_i32_558] : memref<2x8x6x!tpu.dma_semaphore, #tpu.memory_space<semaphore_mem>> -> memref<1x1x1x!tpu.dma_semaphore, #tpu.memory_space<semaphore_mem>>
      %543 = tpu.memref_squeeze %542 : memref<1x1x1x!tpu.dma_semaphore, #tpu.memory_space<semaphore_mem>> -> memref<!tpu.dma_semaphore, #tpu.memory_space<semaphore_mem>>
      tpu.enqueue_dma source(%539 : memref<128xf32, #tpu.memory_space<any>>) target(%541 : memref<128xf32, #tpu.memory_space<vmem>>) target_semaphore(%543 : memref<!tpu.dma_semaphore, #tpu.memory_space<semaphore_mem>>)
      %c3_561 = arith.constant 3 : index
      %544 = memref.load %arg1[%c3_561] : memref<8xi32, #tpu.memory_space<smem>>
      %c0_i32_562 = arith.constant 0 : i32
      %c3_i32_563 = arith.constant 3 : i32
      %c0_i32_564 = arith.constant 0 : i32
      %c3_i32_565 = arith.constant 3 : i32
      %c0_i32_566 = arith.constant 0 : i32
      %545 = tpu.memref_slice %arg3[%544, %c0_i32_566] : memref<64x128xf32, #tpu.memory_space<any>> -> memref<1x128xf32, #tpu.memory_space<any>>
      %546 = tpu.memref_squeeze %545 : memref<1x128xf32, #tpu.memory_space<any>> -> memref<128xf32, #tpu.memory_space<any>>
      %c0_i32_567 = arith.constant 0 : i32
      %547 = tpu.memref_slice %arg6[%c0_i32_562, %c3_i32_563, %c0_i32_567] : memref<2x8x128xf32, #tpu.memory_space<vmem>> -> memref<1x1x128xf32, #tpu.memory_space<vmem>>
      %548 = tpu.memref_squeeze %547 : memref<1x1x128xf32, #tpu.memory_space<vmem>> -> memref<128xf32, #tpu.memory_space<vmem>>
      %549 = tpu.memref_slice %arg8[%c0_i32_564, %c3_i32_565] : memref<2x8x!tpu.dma_semaphore, #tpu.memory_space<semaphore_mem>> -> memref<1x1x!tpu.dma_semaphore, #tpu.memory_space<semaphore_mem>>
      %550 = tpu.memref_squeeze %549 : memref<1x1x!tpu.dma_semaphore, #tpu.memory_space<semaphore_mem>> -> memref<!tpu.dma_semaphore, #tpu.memory_space<semaphore_mem>>
      tpu.enqueue_dma source(%546 : memref<128xf32, #tpu.memory_space<any>>) target(%548 : memref<128xf32, #tpu.memory_space<vmem>>) target_semaphore(%550 : memref<!tpu.dma_semaphore, #tpu.memory_space<semaphore_mem>>)
      %c18 = arith.constant 18 : index
      %551 = memref.load %arg2[%c18] : memref<48xi32, #tpu.memory_space<smem>>
      %c0_i32_568 = arith.constant 0 : i32
      %c3_i32_569 = arith.constant 3 : i32
      %c0_i32_570 = arith.constant 0 : i32
      %c0_i32_571 = arith.constant 0 : i32
      %c3_i32_572 = arith.constant 3 : i32
      %c0_i32_573 = arith.constant 0 : i32
      %c0_i32_574 = arith.constant 0 : i32
      %552 = tpu.memref_slice %arg4[%551, %c0_i32_574] : memref<64x128xf32, #tpu.memory_space<any>> -> memref<1x128xf32, #tpu.memory_space<any>>
      %553 = tpu.memref_squeeze %552 : memref<1x128xf32, #tpu.memory_space<any>> -> memref<128xf32, #tpu.memory_space<any>>
      %c0_i32_575 = arith.constant 0 : i32
      %554 = tpu.memref_slice %arg7[%c0_i32_568, %c3_i32_569, %c0_i32_570, %c0_i32_575] : memref<2x8x6x128xf32, #tpu.memory_space<vmem>> -> memref<1x1x1x128xf32, #tpu.memory_space<vmem>>
      %555 = tpu.memref_squeeze %554 : memref<1x1x1x128xf32, #tpu.memory_space<vmem>> -> memref<128xf32, #tpu.memory_space<vmem>>
      %556 = tpu.memref_slice %arg9[%c0_i32_571, %c3_i32_572, %c0_i32_573] : memref<2x8x6x!tpu.dma_semaphore, #tpu.memory_space<semaphore_mem>> -> memref<1x1x1x!tpu.dma_semaphore, #tpu.memory_space<semaphore_mem>>
      %557 = tpu.memref_squeeze %556 : memref<1x1x1x!tpu.dma_semaphore, #tpu.memory_space<semaphore_mem>> -> memref<!tpu.dma_semaphore, #tpu.memory_space<semaphore_mem>>
      tpu.enqueue_dma source(%553 : memref<128xf32, #tpu.memory_space<any>>) target(%555 : memref<128xf32, #tpu.memory_space<vmem>>) target_semaphore(%557 : memref<!tpu.dma_semaphore, #tpu.memory_space<semaphore_mem>>)
      %c19 = arith.constant 19 : index
      %558 = memref.load %arg2[%c19] : memref<48xi32, #tpu.memory_space<smem>>
      %c0_i32_576 = arith.constant 0 : i32
      %c3_i32_577 = arith.constant 3 : i32
      %c1_i32_578 = arith.constant 1 : i32
      %c0_i32_579 = arith.constant 0 : i32
      %c3_i32_580 = arith.constant 3 : i32
      %c1_i32_581 = arith.constant 1 : i32
      %c0_i32_582 = arith.constant 0 : i32
      %559 = tpu.memref_slice %arg4[%558, %c0_i32_582] : memref<64x128xf32, #tpu.memory_space<any>> -> memref<1x128xf32, #tpu.memory_space<any>>
      %560 = tpu.memref_squeeze %559 : memref<1x128xf32, #tpu.memory_space<any>> -> memref<128xf32, #tpu.memory_space<any>>
      %c0_i32_583 = arith.constant 0 : i32
      %561 = tpu.memref_slice %arg7[%c0_i32_576, %c3_i32_577, %c1_i32_578, %c0_i32_583] : memref<2x8x6x128xf32, #tpu.memory_space<vmem>> -> memref<1x1x1x128xf32, #tpu.memory_space<vmem>>
      %562 = tpu.memref_squeeze %561 : memref<1x1x1x128xf32, #tpu.memory_space<vmem>> -> memref<128xf32, #tpu.memory_space<vmem>>
      %563 = tpu.memref_slice %arg9[%c0_i32_579, %c3_i32_580, %c1_i32_581] : memref<2x8x6x!tpu.dma_semaphore, #tpu.memory_space<semaphore_mem>> -> memref<1x1x1x!tpu.dma_semaphore, #tpu.memory_space<semaphore_mem>>
      %564 = tpu.memref_squeeze %563 : memref<1x1x1x!tpu.dma_semaphore, #tpu.memory_space<semaphore_mem>> -> memref<!tpu.dma_semaphore, #tpu.memory_space<semaphore_mem>>
      tpu.enqueue_dma source(%560 : memref<128xf32, #tpu.memory_space<any>>) target(%562 : memref<128xf32, #tpu.memory_space<vmem>>) target_semaphore(%564 : memref<!tpu.dma_semaphore, #tpu.memory_space<semaphore_mem>>)
      %c20 = arith.constant 20 : index
      %565 = memref.load %arg2[%c20] : memref<48xi32, #tpu.memory_space<smem>>
      %c0_i32_584 = arith.constant 0 : i32
      %c3_i32_585 = arith.constant 3 : i32
      %c2_i32_586 = arith.constant 2 : i32
      %c0_i32_587 = arith.constant 0 : i32
      %c3_i32_588 = arith.constant 3 : i32
      %c2_i32_589 = arith.constant 2 : i32
      %c0_i32_590 = arith.constant 0 : i32
      %566 = tpu.memref_slice %arg4[%565, %c0_i32_590] : memref<64x128xf32, #tpu.memory_space<any>> -> memref<1x128xf32, #tpu.memory_space<any>>
      %567 = tpu.memref_squeeze %566 : memref<1x128xf32, #tpu.memory_space<any>> -> memref<128xf32, #tpu.memory_space<any>>
      %c0_i32_591 = arith.constant 0 : i32
      %568 = tpu.memref_slice %arg7[%c0_i32_584, %c3_i32_585, %c2_i32_586, %c0_i32_591] : memref<2x8x6x128xf32, #tpu.memory_space<vmem>> -> memref<1x1x1x128xf32, #tpu.memory_space<vmem>>
      %569 = tpu.memref_squeeze %568 : memref<1x1x1x128xf32, #tpu.memory_space<vmem>> -> memref<128xf32, #tpu.memory_space<vmem>>
      %570 = tpu.memref_slice %arg9[%c0_i32_587, %c3_i32_588, %c2_i32_589] : memref<2x8x6x!tpu.dma_semaphore, #tpu.memory_space<semaphore_mem>> -> memref<1x1x1x!tpu.dma_semaphore, #tpu.memory_space<semaphore_mem>>
      %571 = tpu.memref_squeeze %570 : memref<1x1x1x!tpu.dma_semaphore, #tpu.memory_space<semaphore_mem>> -> memref<!tpu.dma_semaphore, #tpu.memory_space<semaphore_mem>>
      tpu.enqueue_dma source(%567 : memref<128xf32, #tpu.memory_space<any>>) target(%569 : memref<128xf32, #tpu.memory_space<vmem>>) target_semaphore(%571 : memref<!tpu.dma_semaphore, #tpu.memory_space<semaphore_mem>>)
      %c21 = arith.constant 21 : index
      %572 = memref.load %arg2[%c21] : memref<48xi32, #tpu.memory_space<smem>>
      %c0_i32_592 = arith.constant 0 : i32
      %c3_i32_593 = arith.constant 3 : i32
      %c3_i32_594 = arith.constant 3 : i32
      %c0_i32_595 = arith.constant 0 : i32
      %c3_i32_596 = arith.constant 3 : i32
      %c3_i32_597 = arith.constant 3 : i32
      %c0_i32_598 = arith.constant 0 : i32
      %573 = tpu.memref_slice %arg4[%572, %c0_i32_598] : memref<64x128xf32, #tpu.memory_space<any>> -> memref<1x128xf32, #tpu.memory_space<any>>
      %574 = tpu.memref_squeeze %573 : memref<1x128xf32, #tpu.memory_space<any>> -> memref<128xf32, #tpu.memory_space<any>>
      %c0_i32_599 = arith.constant 0 : i32
      %575 = tpu.memref_slice %arg7[%c0_i32_592, %c3_i32_593, %c3_i32_594, %c0_i32_599] : memref<2x8x6x128xf32, #tpu.memory_space<vmem>> -> memref<1x1x1x128xf32, #tpu.memory_space<vmem>>
      %576 = tpu.memref_squeeze %575 : memref<1x1x1x128xf32, #tpu.memory_space<vmem>> -> memref<128xf32, #tpu.memory_space<vmem>>
      %577 = tpu.memref_slice %arg9[%c0_i32_595, %c3_i32_596, %c3_i32_597] : memref<2x8x6x!tpu.dma_semaphore, #tpu.memory_space<semaphore_mem>> -> memref<1x1x1x!tpu.dma_semaphore, #tpu.memory_space<semaphore_mem>>
      %578 = tpu.memref_squeeze %577 : memref<1x1x1x!tpu.dma_semaphore, #tpu.memory_space<semaphore_mem>> -> memref<!tpu.dma_semaphore, #tpu.memory_space<semaphore_mem>>
      tpu.enqueue_dma source(%574 : memref<128xf32, #tpu.memory_space<any>>) target(%576 : memref<128xf32, #tpu.memory_space<vmem>>) target_semaphore(%578 : memref<!tpu.dma_semaphore, #tpu.memory_space<semaphore_mem>>)
      %c22 = arith.constant 22 : index
      %579 = memref.load %arg2[%c22] : memref<48xi32, #tpu.memory_space<smem>>
      %c0_i32_600 = arith.constant 0 : i32
      %c3_i32_601 = arith.constant 3 : i32
      %c4_i32_602 = arith.constant 4 : i32
      %c0_i32_603 = arith.constant 0 : i32
      %c3_i32_604 = arith.constant 3 : i32
      %c4_i32_605 = arith.constant 4 : i32
      %c0_i32_606 = arith.constant 0 : i32
      %580 = tpu.memref_slice %arg4[%579, %c0_i32_606] : memref<64x128xf32, #tpu.memory_space<any>> -> memref<1x128xf32, #tpu.memory_space<any>>
      %581 = tpu.memref_squeeze %580 : memref<1x128xf32, #tpu.memory_space<any>> -> memref<128xf32, #tpu.memory_space<any>>
      %c0_i32_607 = arith.constant 0 : i32
      %582 = tpu.memref_slice %arg7[%c0_i32_600, %c3_i32_601, %c4_i32_602, %c0_i32_607] : memref<2x8x6x128xf32, #tpu.memory_space<vmem>> -> memref<1x1x1x128xf32, #tpu.memory_space<vmem>>
      %583 = tpu.memref_squeeze %582 : memref<1x1x1x128xf32, #tpu.memory_space<vmem>> -> memref<128xf32, #tpu.memory_space<vmem>>
      %584 = tpu.memref_slice %arg9[%c0_i32_603, %c3_i32_604, %c4_i32_605] : memref<2x8x6x!tpu.dma_semaphore, #tpu.memory_space<semaphore_mem>> -> memref<1x1x1x!tpu.dma_semaphore, #tpu.memory_space<semaphore_mem>>
      %585 = tpu.memref_squeeze %584 : memref<1x1x1x!tpu.dma_semaphore, #tpu.memory_space<semaphore_mem>> -> memref<!tpu.dma_semaphore, #tpu.memory_space<semaphore_mem>>
      tpu.enqueue_dma source(%581 : memref<128xf32, #tpu.memory_space<any>>) target(%583 : memref<128xf32, #tpu.memory_space<vmem>>) target_semaphore(%585 : memref<!tpu.dma_semaphore, #tpu.memory_space<semaphore_mem>>)
      %c23 = arith.constant 23 : index
      %586 = memref.load %arg2[%c23] : memref<48xi32, #tpu.memory_space<smem>>
      %c0_i32_608 = arith.constant 0 : i32
      %c3_i32_609 = arith.constant 3 : i32
      %c5_i32_610 = arith.constant 5 : i32
      %c0_i32_611 = arith.constant 0 : i32
      %c3_i32_612 = arith.constant 3 : i32
      %c5_i32_613 = arith.constant 5 : i32
      %c0_i32_614 = arith.constant 0 : i32
      %587 = tpu.memref_slice %arg4[%586, %c0_i32_614] : memref<64x128xf32, #tpu.memory_space<any>> -> memref<1x128xf32, #tpu.memory_space<any>>
      %588 = tpu.memref_squeeze %587 : memref<1x128xf32, #tpu.memory_space<any>> -> memref<128xf32, #tpu.memory_space<any>>
      %c0_i32_615 = arith.constant 0 : i32
      %589 = tpu.memref_slice %arg7[%c0_i32_608, %c3_i32_609, %c5_i32_610, %c0_i32_615] : memref<2x8x6x128xf32, #tpu.memory_space<vmem>> -> memref<1x1x1x128xf32, #tpu.memory_space<vmem>>
      %590 = tpu.memref_squeeze %589 : memref<1x1x1x128xf32, #tpu.memory_space<vmem>> -> memref<128xf32, #tpu.memory_space<vmem>>
      %591 = tpu.memref_slice %arg9[%c0_i32_611, %c3_i32_612, %c5_i32_613] : memref<2x8x6x!tpu.dma_semaphore, #tpu.memory_space<semaphore_mem>> -> memref<1x1x1x!tpu.dma_semaphore, #tpu.memory_space<semaphore_mem>>
      %592 = tpu.memref_squeeze %591 : memref<1x1x1x!tpu.dma_semaphore, #tpu.memory_space<semaphore_mem>> -> memref<!tpu.dma_semaphore, #tpu.memory_space<semaphore_mem>>
      tpu.enqueue_dma source(%588 : memref<128xf32, #tpu.memory_space<any>>) target(%590 : memref<128xf32, #tpu.memory_space<vmem>>) target_semaphore(%592 : memref<!tpu.dma_semaphore, #tpu.memory_space<semaphore_mem>>)
      %c4_616 = arith.constant 4 : index
      %593 = memref.load %arg1[%c4_616] : memref<8xi32, #tpu.memory_space<smem>>
      %c0_i32_617 = arith.constant 0 : i32
      %c4_i32_618 = arith.constant 4 : i32
      %c0_i32_619 = arith.constant 0 : i32
      %c4_i32_620 = arith.constant 4 : i32
      %c0_i32_621 = arith.constant 0 : i32
      %594 = tpu.memref_slice %arg3[%593, %c0_i32_621] : memref<64x128xf32, #tpu.memory_space<any>> -> memref<1x128xf32, #tpu.memory_space<any>>
      %595 = tpu.memref_squeeze %594 : memref<1x128xf32, #tpu.memory_space<any>> -> memref<128xf32, #tpu.memory_space<any>>
      %c0_i32_622 = arith.constant 0 : i32
      %596 = tpu.memref_slice %arg6[%c0_i32_617, %c4_i32_618, %c0_i32_622] : memref<2x8x128xf32, #tpu.memory_space<vmem>> -> memref<1x1x128xf32, #tpu.memory_space<vmem>>
      %597 = tpu.memref_squeeze %596 : memref<1x1x128xf32, #tpu.memory_space<vmem>> -> memref<128xf32, #tpu.memory_space<vmem>>
      %598 = tpu.memref_slice %arg8[%c0_i32_619, %c4_i32_620] : memref<2x8x!tpu.dma_semaphore, #tpu.memory_space<semaphore_mem>> -> memref<1x1x!tpu.dma_semaphore, #tpu.memory_space<semaphore_mem>>
      %599 = tpu.memref_squeeze %598 : memref<1x1x!tpu.dma_semaphore, #tpu.memory_space<semaphore_mem>> -> memref<!tpu.dma_semaphore, #tpu.memory_space<semaphore_mem>>
      tpu.enqueue_dma source(%595 : memref<128xf32, #tpu.memory_space<any>>) target(%597 : memref<128xf32, #tpu.memory_space<vmem>>) target_semaphore(%599 : memref<!tpu.dma_semaphore, #tpu.memory_space<semaphore_mem>>)
      %c24 = arith.constant 24 : index
      %600 = memref.load %arg2[%c24] : memref<48xi32, #tpu.memory_space<smem>>
      %c0_i32_623 = arith.constant 0 : i32
      %c4_i32_624 = arith.constant 4 : i32
      %c0_i32_625 = arith.constant 0 : i32
      %c0_i32_626 = arith.constant 0 : i32
      %c4_i32_627 = arith.constant 4 : i32
      %c0_i32_628 = arith.constant 0 : i32
      %c0_i32_629 = arith.constant 0 : i32
      %601 = tpu.memref_slice %arg4[%600, %c0_i32_629] : memref<64x128xf32, #tpu.memory_space<any>> -> memref<1x128xf32, #tpu.memory_space<any>>
      %602 = tpu.memref_squeeze %601 : memref<1x128xf32, #tpu.memory_space<any>> -> memref<128xf32, #tpu.memory_space<any>>
      %c0_i32_630 = arith.constant 0 : i32
      %603 = tpu.memref_slice %arg7[%c0_i32_623, %c4_i32_624, %c0_i32_625, %c0_i32_630] : memref<2x8x6x128xf32, #tpu.memory_space<vmem>> -> memref<1x1x1x128xf32, #tpu.memory_space<vmem>>
      %604 = tpu.memref_squeeze %603 : memref<1x1x1x128xf32, #tpu.memory_space<vmem>> -> memref<128xf32, #tpu.memory_space<vmem>>
      %605 = tpu.memref_slice %arg9[%c0_i32_626, %c4_i32_627, %c0_i32_628] : memref<2x8x6x!tpu.dma_semaphore, #tpu.memory_space<semaphore_mem>> -> memref<1x1x1x!tpu.dma_semaphore, #tpu.memory_space<semaphore_mem>>
      %606 = tpu.memref_squeeze %605 : memref<1x1x1x!tpu.dma_semaphore, #tpu.memory_space<semaphore_mem>> -> memref<!tpu.dma_semaphore, #tpu.memory_space<semaphore_mem>>
      tpu.enqueue_dma source(%602 : memref<128xf32, #tpu.memory_space<any>>) target(%604 : memref<128xf32, #tpu.memory_space<vmem>>) target_semaphore(%606 : memref<!tpu.dma_semaphore, #tpu.memory_space<semaphore_mem>>)
      %c25 = arith.constant 25 : index
      %607 = memref.load %arg2[%c25] : memref<48xi32, #tpu.memory_space<smem>>
      %c0_i32_631 = arith.constant 0 : i32
      %c4_i32_632 = arith.constant 4 : i32
      %c1_i32_633 = arith.constant 1 : i32
      %c0_i32_634 = arith.constant 0 : i32
      %c4_i32_635 = arith.constant 4 : i32
      %c1_i32_636 = arith.constant 1 : i32
      %c0_i32_637 = arith.constant 0 : i32
      %608 = tpu.memref_slice %arg4[%607, %c0_i32_637] : memref<64x128xf32, #tpu.memory_space<any>> -> memref<1x128xf32, #tpu.memory_space<any>>
      %609 = tpu.memref_squeeze %608 : memref<1x128xf32, #tpu.memory_space<any>> -> memref<128xf32, #tpu.memory_space<any>>
      %c0_i32_638 = arith.constant 0 : i32
      %610 = tpu.memref_slice %arg7[%c0_i32_631, %c4_i32_632, %c1_i32_633, %c0_i32_638] : memref<2x8x6x128xf32, #tpu.memory_space<vmem>> -> memref<1x1x1x128xf32, #tpu.memory_space<vmem>>
      %611 = tpu.memref_squeeze %610 : memref<1x1x1x128xf32, #tpu.memory_space<vmem>> -> memref<128xf32, #tpu.memory_space<vmem>>
      %612 = tpu.memref_slice %arg9[%c0_i32_634, %c4_i32_635, %c1_i32_636] : memref<2x8x6x!tpu.dma_semaphore, #tpu.memory_space<semaphore_mem>> -> memref<1x1x1x!tpu.dma_semaphore, #tpu.memory_space<semaphore_mem>>
      %613 = tpu.memref_squeeze %612 : memref<1x1x1x!tpu.dma_semaphore, #tpu.memory_space<semaphore_mem>> -> memref<!tpu.dma_semaphore, #tpu.memory_space<semaphore_mem>>
      tpu.enqueue_dma source(%609 : memref<128xf32, #tpu.memory_space<any>>) target(%611 : memref<128xf32, #tpu.memory_space<vmem>>) target_semaphore(%613 : memref<!tpu.dma_semaphore, #tpu.memory_space<semaphore_mem>>)
      %c26 = arith.constant 26 : index
      %614 = memref.load %arg2[%c26] : memref<48xi32, #tpu.memory_space<smem>>
      %c0_i32_639 = arith.constant 0 : i32
      %c4_i32_640 = arith.constant 4 : i32
      %c2_i32_641 = arith.constant 2 : i32
      %c0_i32_642 = arith.constant 0 : i32
      %c4_i32_643 = arith.constant 4 : i32
      %c2_i32_644 = arith.constant 2 : i32
      %c0_i32_645 = arith.constant 0 : i32
      %615 = tpu.memref_slice %arg4[%614, %c0_i32_645] : memref<64x128xf32, #tpu.memory_space<any>> -> memref<1x128xf32, #tpu.memory_space<any>>
      %616 = tpu.memref_squeeze %615 : memref<1x128xf32, #tpu.memory_space<any>> -> memref<128xf32, #tpu.memory_space<any>>
      %c0_i32_646 = arith.constant 0 : i32
      %617 = tpu.memref_slice %arg7[%c0_i32_639, %c4_i32_640, %c2_i32_641, %c0_i32_646] : memref<2x8x6x128xf32, #tpu.memory_space<vmem>> -> memref<1x1x1x128xf32, #tpu.memory_space<vmem>>
      %618 = tpu.memref_squeeze %617 : memref<1x1x1x128xf32, #tpu.memory_space<vmem>> -> memref<128xf32, #tpu.memory_space<vmem>>
      %619 = tpu.memref_slice %arg9[%c0_i32_642, %c4_i32_643, %c2_i32_644] : memref<2x8x6x!tpu.dma_semaphore, #tpu.memory_space<semaphore_mem>> -> memref<1x1x1x!tpu.dma_semaphore, #tpu.memory_space<semaphore_mem>>
      %620 = tpu.memref_squeeze %619 : memref<1x1x1x!tpu.dma_semaphore, #tpu.memory_space<semaphore_mem>> -> memref<!tpu.dma_semaphore, #tpu.memory_space<semaphore_mem>>
      tpu.enqueue_dma source(%616 : memref<128xf32, #tpu.memory_space<any>>) target(%618 : memref<128xf32, #tpu.memory_space<vmem>>) target_semaphore(%620 : memref<!tpu.dma_semaphore, #tpu.memory_space<semaphore_mem>>)
      %c27 = arith.constant 27 : index
      %621 = memref.load %arg2[%c27] : memref<48xi32, #tpu.memory_space<smem>>
      %c0_i32_647 = arith.constant 0 : i32
      %c4_i32_648 = arith.constant 4 : i32
      %c3_i32_649 = arith.constant 3 : i32
      %c0_i32_650 = arith.constant 0 : i32
      %c4_i32_651 = arith.constant 4 : i32
      %c3_i32_652 = arith.constant 3 : i32
      %c0_i32_653 = arith.constant 0 : i32
      %622 = tpu.memref_slice %arg4[%621, %c0_i32_653] : memref<64x128xf32, #tpu.memory_space<any>> -> memref<1x128xf32, #tpu.memory_space<any>>
      %623 = tpu.memref_squeeze %622 : memref<1x128xf32, #tpu.memory_space<any>> -> memref<128xf32, #tpu.memory_space<any>>
      %c0_i32_654 = arith.constant 0 : i32
      %624 = tpu.memref_slice %arg7[%c0_i32_647, %c4_i32_648, %c3_i32_649, %c0_i32_654] : memref<2x8x6x128xf32, #tpu.memory_space<vmem>> -> memref<1x1x1x128xf32, #tpu.memory_space<vmem>>
      %625 = tpu.memref_squeeze %624 : memref<1x1x1x128xf32, #tpu.memory_space<vmem>> -> memref<128xf32, #tpu.memory_space<vmem>>
      %626 = tpu.memref_slice %arg9[%c0_i32_650, %c4_i32_651, %c3_i32_652] : memref<2x8x6x!tpu.dma_semaphore, #tpu.memory_space<semaphore_mem>> -> memref<1x1x1x!tpu.dma_semaphore, #tpu.memory_space<semaphore_mem>>
      %627 = tpu.memref_squeeze %626 : memref<1x1x1x!tpu.dma_semaphore, #tpu.memory_space<semaphore_mem>> -> memref<!tpu.dma_semaphore, #tpu.memory_space<semaphore_mem>>
      tpu.enqueue_dma source(%623 : memref<128xf32, #tpu.memory_space<any>>) target(%625 : memref<128xf32, #tpu.memory_space<vmem>>) target_semaphore(%627 : memref<!tpu.dma_semaphore, #tpu.memory_space<semaphore_mem>>)
      %c28 = arith.constant 28 : index
      %628 = memref.load %arg2[%c28] : memref<48xi32, #tpu.memory_space<smem>>
      %c0_i32_655 = arith.constant 0 : i32
      %c4_i32_656 = arith.constant 4 : i32
      %c4_i32_657 = arith.constant 4 : i32
      %c0_i32_658 = arith.constant 0 : i32
      %c4_i32_659 = arith.constant 4 : i32
      %c4_i32_660 = arith.constant 4 : i32
      %c0_i32_661 = arith.constant 0 : i32
      %629 = tpu.memref_slice %arg4[%628, %c0_i32_661] : memref<64x128xf32, #tpu.memory_space<any>> -> memref<1x128xf32, #tpu.memory_space<any>>
      %630 = tpu.memref_squeeze %629 : memref<1x128xf32, #tpu.memory_space<any>> -> memref<128xf32, #tpu.memory_space<any>>
      %c0_i32_662 = arith.constant 0 : i32
      %631 = tpu.memref_slice %arg7[%c0_i32_655, %c4_i32_656, %c4_i32_657, %c0_i32_662] : memref<2x8x6x128xf32, #tpu.memory_space<vmem>> -> memref<1x1x1x128xf32, #tpu.memory_space<vmem>>
      %632 = tpu.memref_squeeze %631 : memref<1x1x1x128xf32, #tpu.memory_space<vmem>> -> memref<128xf32, #tpu.memory_space<vmem>>
      %633 = tpu.memref_slice %arg9[%c0_i32_658, %c4_i32_659, %c4_i32_660] : memref<2x8x6x!tpu.dma_semaphore, #tpu.memory_space<semaphore_mem>> -> memref<1x1x1x!tpu.dma_semaphore, #tpu.memory_space<semaphore_mem>>
      %634 = tpu.memref_squeeze %633 : memref<1x1x1x!tpu.dma_semaphore, #tpu.memory_space<semaphore_mem>> -> memref<!tpu.dma_semaphore, #tpu.memory_space<semaphore_mem>>
      tpu.enqueue_dma source(%630 : memref<128xf32, #tpu.memory_space<any>>) target(%632 : memref<128xf32, #tpu.memory_space<vmem>>) target_semaphore(%634 : memref<!tpu.dma_semaphore, #tpu.memory_space<semaphore_mem>>)
      %c29 = arith.constant 29 : index
      %635 = memref.load %arg2[%c29] : memref<48xi32, #tpu.memory_space<smem>>
      %c0_i32_663 = arith.constant 0 : i32
      %c4_i32_664 = arith.constant 4 : i32
      %c5_i32_665 = arith.constant 5 : i32
      %c0_i32_666 = arith.constant 0 : i32
      %c4_i32_667 = arith.constant 4 : i32
      %c5_i32_668 = arith.constant 5 : i32
      %c0_i32_669 = arith.constant 0 : i32
      %636 = tpu.memref_slice %arg4[%635, %c0_i32_669] : memref<64x128xf32, #tpu.memory_space<any>> -> memref<1x128xf32, #tpu.memory_space<any>>
      %637 = tpu.memref_squeeze %636 : memref<1x128xf32, #tpu.memory_space<any>> -> memref<128xf32, #tpu.memory_space<any>>
      %c0_i32_670 = arith.constant 0 : i32
      %638 = tpu.memref_slice %arg7[%c0_i32_663, %c4_i32_664, %c5_i32_665, %c0_i32_670] : memref<2x8x6x128xf32, #tpu.memory_space<vmem>> -> memref<1x1x1x128xf32, #tpu.memory_space<vmem>>
      %639 = tpu.memref_squeeze %638 : memref<1x1x1x128xf32, #tpu.memory_space<vmem>> -> memref<128xf32, #tpu.memory_space<vmem>>
      %640 = tpu.memref_slice %arg9[%c0_i32_666, %c4_i32_667, %c5_i32_668] : memref<2x8x6x!tpu.dma_semaphore, #tpu.memory_space<semaphore_mem>> -> memref<1x1x1x!tpu.dma_semaphore, #tpu.memory_space<semaphore_mem>>
      %641 = tpu.memref_squeeze %640 : memref<1x1x1x!tpu.dma_semaphore, #tpu.memory_space<semaphore_mem>> -> memref<!tpu.dma_semaphore, #tpu.memory_space<semaphore_mem>>
      tpu.enqueue_dma source(%637 : memref<128xf32, #tpu.memory_space<any>>) target(%639 : memref<128xf32, #tpu.memory_space<vmem>>) target_semaphore(%641 : memref<!tpu.dma_semaphore, #tpu.memory_space<semaphore_mem>>)
      %c5_671 = arith.constant 5 : index
      %642 = memref.load %arg1[%c5_671] : memref<8xi32, #tpu.memory_space<smem>>
      %c0_i32_672 = arith.constant 0 : i32
      %c5_i32_673 = arith.constant 5 : i32
      %c0_i32_674 = arith.constant 0 : i32
      %c5_i32_675 = arith.constant 5 : i32
      %c0_i32_676 = arith.constant 0 : i32
      %643 = tpu.memref_slice %arg3[%642, %c0_i32_676] : memref<64x128xf32, #tpu.memory_space<any>> -> memref<1x128xf32, #tpu.memory_space<any>>
      %644 = tpu.memref_squeeze %643 : memref<1x128xf32, #tpu.memory_space<any>> -> memref<128xf32, #tpu.memory_space<any>>
      %c0_i32_677 = arith.constant 0 : i32
      %645 = tpu.memref_slice %arg6[%c0_i32_672, %c5_i32_673, %c0_i32_677] : memref<2x8x128xf32, #tpu.memory_space<vmem>> -> memref<1x1x128xf32, #tpu.memory_space<vmem>>
      %646 = tpu.memref_squeeze %645 : memref<1x1x128xf32, #tpu.memory_space<vmem>> -> memref<128xf32, #tpu.memory_space<vmem>>
      %647 = tpu.memref_slice %arg8[%c0_i32_674, %c5_i32_675] : memref<2x8x!tpu.dma_semaphore, #tpu.memory_space<semaphore_mem>> -> memref<1x1x!tpu.dma_semaphore, #tpu.memory_space<semaphore_mem>>
      %648 = tpu.memref_squeeze %647 : memref<1x1x!tpu.dma_semaphore, #tpu.memory_space<semaphore_mem>> -> memref<!tpu.dma_semaphore, #tpu.memory_space<semaphore_mem>>
      tpu.enqueue_dma source(%644 : memref<128xf32, #tpu.memory_space<any>>) target(%646 : memref<128xf32, #tpu.memory_space<vmem>>) target_semaphore(%648 : memref<!tpu.dma_semaphore, #tpu.memory_space<semaphore_mem>>)
      %c30 = arith.constant 30 : index
      %649 = memref.load %arg2[%c30] : memref<48xi32, #tpu.memory_space<smem>>
      %c0_i32_678 = arith.constant 0 : i32
      %c5_i32_679 = arith.constant 5 : i32
      %c0_i32_680 = arith.constant 0 : i32
      %c0_i32_681 = arith.constant 0 : i32
      %c5_i32_682 = arith.constant 5 : i32
      %c0_i32_683 = arith.constant 0 : i32
      %c0_i32_684 = arith.constant 0 : i32
      %650 = tpu.memref_slice %arg4[%649, %c0_i32_684] : memref<64x128xf32, #tpu.memory_space<any>> -> memref<1x128xf32, #tpu.memory_space<any>>
      %651 = tpu.memref_squeeze %650 : memref<1x128xf32, #tpu.memory_space<any>> -> memref<128xf32, #tpu.memory_space<any>>
      %c0_i32_685 = arith.constant 0 : i32
      %652 = tpu.memref_slice %arg7[%c0_i32_678, %c5_i32_679, %c0_i32_680, %c0_i32_685] : memref<2x8x6x128xf32, #tpu.memory_space<vmem>> -> memref<1x1x1x128xf32, #tpu.memory_space<vmem>>
      %653 = tpu.memref_squeeze %652 : memref<1x1x1x128xf32, #tpu.memory_space<vmem>> -> memref<128xf32, #tpu.memory_space<vmem>>
      %654 = tpu.memref_slice %arg9[%c0_i32_681, %c5_i32_682, %c0_i32_683] : memref<2x8x6x!tpu.dma_semaphore, #tpu.memory_space<semaphore_mem>> -> memref<1x1x1x!tpu.dma_semaphore, #tpu.memory_space<semaphore_mem>>
      %655 = tpu.memref_squeeze %654 : memref<1x1x1x!tpu.dma_semaphore, #tpu.memory_space<semaphore_mem>> -> memref<!tpu.dma_semaphore, #tpu.memory_space<semaphore_mem>>
      tpu.enqueue_dma source(%651 : memref<128xf32, #tpu.memory_space<any>>) target(%653 : memref<128xf32, #tpu.memory_space<vmem>>) target_semaphore(%655 : memref<!tpu.dma_semaphore, #tpu.memory_space<semaphore_mem>>)
      %c31 = arith.constant 31 : index
      %656 = memref.load %arg2[%c31] : memref<48xi32, #tpu.memory_space<smem>>
      %c0_i32_686 = arith.constant 0 : i32
      %c5_i32_687 = arith.constant 5 : i32
      %c1_i32_688 = arith.constant 1 : i32
      %c0_i32_689 = arith.constant 0 : i32
      %c5_i32_690 = arith.constant 5 : i32
      %c1_i32_691 = arith.constant 1 : i32
      %c0_i32_692 = arith.constant 0 : i32
      %657 = tpu.memref_slice %arg4[%656, %c0_i32_692] : memref<64x128xf32, #tpu.memory_space<any>> -> memref<1x128xf32, #tpu.memory_space<any>>
      %658 = tpu.memref_squeeze %657 : memref<1x128xf32, #tpu.memory_space<any>> -> memref<128xf32, #tpu.memory_space<any>>
      %c0_i32_693 = arith.constant 0 : i32
      %659 = tpu.memref_slice %arg7[%c0_i32_686, %c5_i32_687, %c1_i32_688, %c0_i32_693] : memref<2x8x6x128xf32, #tpu.memory_space<vmem>> -> memref<1x1x1x128xf32, #tpu.memory_space<vmem>>
      %660 = tpu.memref_squeeze %659 : memref<1x1x1x128xf32, #tpu.memory_space<vmem>> -> memref<128xf32, #tpu.memory_space<vmem>>
      %661 = tpu.memref_slice %arg9[%c0_i32_689, %c5_i32_690, %c1_i32_691] : memref<2x8x6x!tpu.dma_semaphore, #tpu.memory_space<semaphore_mem>> -> memref<1x1x1x!tpu.dma_semaphore, #tpu.memory_space<semaphore_mem>>
      %662 = tpu.memref_squeeze %661 : memref<1x1x1x!tpu.dma_semaphore, #tpu.memory_space<semaphore_mem>> -> memref<!tpu.dma_semaphore, #tpu.memory_space<semaphore_mem>>
      tpu.enqueue_dma source(%658 : memref<128xf32, #tpu.memory_space<any>>) target(%660 : memref<128xf32, #tpu.memory_space<vmem>>) target_semaphore(%662 : memref<!tpu.dma_semaphore, #tpu.memory_space<semaphore_mem>>)
      %c32 = arith.constant 32 : index
      %663 = memref.load %arg2[%c32] : memref<48xi32, #tpu.memory_space<smem>>
      %c0_i32_694 = arith.constant 0 : i32
      %c5_i32_695 = arith.constant 5 : i32
      %c2_i32_696 = arith.constant 2 : i32
      %c0_i32_697 = arith.constant 0 : i32
      %c5_i32_698 = arith.constant 5 : i32
      %c2_i32_699 = arith.constant 2 : i32
      %c0_i32_700 = arith.constant 0 : i32
      %664 = tpu.memref_slice %arg4[%663, %c0_i32_700] : memref<64x128xf32, #tpu.memory_space<any>> -> memref<1x128xf32, #tpu.memory_space<any>>
      %665 = tpu.memref_squeeze %664 : memref<1x128xf32, #tpu.memory_space<any>> -> memref<128xf32, #tpu.memory_space<any>>
      %c0_i32_701 = arith.constant 0 : i32
      %666 = tpu.memref_slice %arg7[%c0_i32_694, %c5_i32_695, %c2_i32_696, %c0_i32_701] : memref<2x8x6x128xf32, #tpu.memory_space<vmem>> -> memref<1x1x1x128xf32, #tpu.memory_space<vmem>>
      %667 = tpu.memref_squeeze %666 : memref<1x1x1x128xf32, #tpu.memory_space<vmem>> -> memref<128xf32, #tpu.memory_space<vmem>>
      %668 = tpu.memref_slice %arg9[%c0_i32_697, %c5_i32_698, %c2_i32_699] : memref<2x8x6x!tpu.dma_semaphore, #tpu.memory_space<semaphore_mem>> -> memref<1x1x1x!tpu.dma_semaphore, #tpu.memory_space<semaphore_mem>>
      %669 = tpu.memref_squeeze %668 : memref<1x1x1x!tpu.dma_semaphore, #tpu.memory_space<semaphore_mem>> -> memref<!tpu.dma_semaphore, #tpu.memory_space<semaphore_mem>>
      tpu.enqueue_dma source(%665 : memref<128xf32, #tpu.memory_space<any>>) target(%667 : memref<128xf32, #tpu.memory_space<vmem>>) target_semaphore(%669 : memref<!tpu.dma_semaphore, #tpu.memory_space<semaphore_mem>>)
      %c33 = arith.constant 33 : index
      %670 = memref.load %arg2[%c33] : memref<48xi32, #tpu.memory_space<smem>>
      %c0_i32_702 = arith.constant 0 : i32
      %c5_i32_703 = arith.constant 5 : i32
      %c3_i32_704 = arith.constant 3 : i32
      %c0_i32_705 = arith.constant 0 : i32
      %c5_i32_706 = arith.constant 5 : i32
      %c3_i32_707 = arith.constant 3 : i32
      %c0_i32_708 = arith.constant 0 : i32
      %671 = tpu.memref_slice %arg4[%670, %c0_i32_708] : memref<64x128xf32, #tpu.memory_space<any>> -> memref<1x128xf32, #tpu.memory_space<any>>
      %672 = tpu.memref_squeeze %671 : memref<1x128xf32, #tpu.memory_space<any>> -> memref<128xf32, #tpu.memory_space<any>>
      %c0_i32_709 = arith.constant 0 : i32
      %673 = tpu.memref_slice %arg7[%c0_i32_702, %c5_i32_703, %c3_i32_704, %c0_i32_709] : memref<2x8x6x128xf32, #tpu.memory_space<vmem>> -> memref<1x1x1x128xf32, #tpu.memory_space<vmem>>
      %674 = tpu.memref_squeeze %673 : memref<1x1x1x128xf32, #tpu.memory_space<vmem>> -> memref<128xf32, #tpu.memory_space<vmem>>
      %675 = tpu.memref_slice %arg9[%c0_i32_705, %c5_i32_706, %c3_i32_707] : memref<2x8x6x!tpu.dma_semaphore, #tpu.memory_space<semaphore_mem>> -> memref<1x1x1x!tpu.dma_semaphore, #tpu.memory_space<semaphore_mem>>
      %676 = tpu.memref_squeeze %675 : memref<1x1x1x!tpu.dma_semaphore, #tpu.memory_space<semaphore_mem>> -> memref<!tpu.dma_semaphore, #tpu.memory_space<semaphore_mem>>
      tpu.enqueue_dma source(%672 : memref<128xf32, #tpu.memory_space<any>>) target(%674 : memref<128xf32, #tpu.memory_space<vmem>>) target_semaphore(%676 : memref<!tpu.dma_semaphore, #tpu.memory_space<semaphore_mem>>)
      %c34 = arith.constant 34 : index
      %677 = memref.load %arg2[%c34] : memref<48xi32, #tpu.memory_space<smem>>
      %c0_i32_710 = arith.constant 0 : i32
      %c5_i32_711 = arith.constant 5 : i32
      %c4_i32_712 = arith.constant 4 : i32
      %c0_i32_713 = arith.constant 0 : i32
      %c5_i32_714 = arith.constant 5 : i32
      %c4_i32_715 = arith.constant 4 : i32
      %c0_i32_716 = arith.constant 0 : i32
      %678 = tpu.memref_slice %arg4[%677, %c0_i32_716] : memref<64x128xf32, #tpu.memory_space<any>> -> memref<1x128xf32, #tpu.memory_space<any>>
      %679 = tpu.memref_squeeze %678 : memref<1x128xf32, #tpu.memory_space<any>> -> memref<128xf32, #tpu.memory_space<any>>
      %c0_i32_717 = arith.constant 0 : i32
      %680 = tpu.memref_slice %arg7[%c0_i32_710, %c5_i32_711, %c4_i32_712, %c0_i32_717] : memref<2x8x6x128xf32, #tpu.memory_space<vmem>> -> memref<1x1x1x128xf32, #tpu.memory_space<vmem>>
      %681 = tpu.memref_squeeze %680 : memref<1x1x1x128xf32, #tpu.memory_space<vmem>> -> memref<128xf32, #tpu.memory_space<vmem>>
      %682 = tpu.memref_slice %arg9[%c0_i32_713, %c5_i32_714, %c4_i32_715] : memref<2x8x6x!tpu.dma_semaphore, #tpu.memory_space<semaphore_mem>> -> memref<1x1x1x!tpu.dma_semaphore, #tpu.memory_space<semaphore_mem>>
      %683 = tpu.memref_squeeze %682 : memref<1x1x1x!tpu.dma_semaphore, #tpu.memory_space<semaphore_mem>> -> memref<!tpu.dma_semaphore, #tpu.memory_space<semaphore_mem>>
      tpu.enqueue_dma source(%679 : memref<128xf32, #tpu.memory_space<any>>) target(%681 : memref<128xf32, #tpu.memory_space<vmem>>) target_semaphore(%683 : memref<!tpu.dma_semaphore, #tpu.memory_space<semaphore_mem>>)
      %c35 = arith.constant 35 : index
      %684 = memref.load %arg2[%c35] : memref<48xi32, #tpu.memory_space<smem>>
      %c0_i32_718 = arith.constant 0 : i32
      %c5_i32_719 = arith.constant 5 : i32
      %c5_i32_720 = arith.constant 5 : i32
      %c0_i32_721 = arith.constant 0 : i32
      %c5_i32_722 = arith.constant 5 : i32
      %c5_i32_723 = arith.constant 5 : i32
      %c0_i32_724 = arith.constant 0 : i32
      %685 = tpu.memref_slice %arg4[%684, %c0_i32_724] : memref<64x128xf32, #tpu.memory_space<any>> -> memref<1x128xf32, #tpu.memory_space<any>>
      %686 = tpu.memref_squeeze %685 : memref<1x128xf32, #tpu.memory_space<any>> -> memref<128xf32, #tpu.memory_space<any>>
      %c0_i32_725 = arith.constant 0 : i32
      %687 = tpu.memref_slice %arg7[%c0_i32_718, %c5_i32_719, %c5_i32_720, %c0_i32_725] : memref<2x8x6x128xf32, #tpu.memory_space<vmem>> -> memref<1x1x1x128xf32, #tpu.memory_space<vmem>>
      %688 = tpu.memref_squeeze %687 : memref<1x1x1x128xf32, #tpu.memory_space<vmem>> -> memref<128xf32, #tpu.memory_space<vmem>>
      %689 = tpu.memref_slice %arg9[%c0_i32_721, %c5_i32_722, %c5_i32_723] : memref<2x8x6x!tpu.dma_semaphore, #tpu.memory_space<semaphore_mem>> -> memref<1x1x1x!tpu.dma_semaphore, #tpu.memory_space<semaphore_mem>>
      %690 = tpu.memref_squeeze %689 : memref<1x1x1x!tpu.dma_semaphore, #tpu.memory_space<semaphore_mem>> -> memref<!tpu.dma_semaphore, #tpu.memory_space<semaphore_mem>>
      tpu.enqueue_dma source(%686 : memref<128xf32, #tpu.memory_space<any>>) target(%688 : memref<128xf32, #tpu.memory_space<vmem>>) target_semaphore(%690 : memref<!tpu.dma_semaphore, #tpu.memory_space<semaphore_mem>>)
      %c6_726 = arith.constant 6 : index
      %691 = memref.load %arg1[%c6_726] : memref<8xi32, #tpu.memory_space<smem>>
      %c0_i32_727 = arith.constant 0 : i32
      %c6_i32_728 = arith.constant 6 : i32
      %c0_i32_729 = arith.constant 0 : i32
      %c6_i32_730 = arith.constant 6 : i32
      %c0_i32_731 = arith.constant 0 : i32
      %692 = tpu.memref_slice %arg3[%691, %c0_i32_731] : memref<64x128xf32, #tpu.memory_space<any>> -> memref<1x128xf32, #tpu.memory_space<any>>
      %693 = tpu.memref_squeeze %692 : memref<1x128xf32, #tpu.memory_space<any>> -> memref<128xf32, #tpu.memory_space<any>>
      %c0_i32_732 = arith.constant 0 : i32
      %694 = tpu.memref_slice %arg6[%c0_i32_727, %c6_i32_728, %c0_i32_732] : memref<2x8x128xf32, #tpu.memory_space<vmem>> -> memref<1x1x128xf32, #tpu.memory_space<vmem>>
      %695 = tpu.memref_squeeze %694 : memref<1x1x128xf32, #tpu.memory_space<vmem>> -> memref<128xf32, #tpu.memory_space<vmem>>
      %696 = tpu.memref_slice %arg8[%c0_i32_729, %c6_i32_730] : memref<2x8x!tpu.dma_semaphore, #tpu.memory_space<semaphore_mem>> -> memref<1x1x!tpu.dma_semaphore, #tpu.memory_space<semaphore_mem>>
      %697 = tpu.memref_squeeze %696 : memref<1x1x!tpu.dma_semaphore, #tpu.memory_space<semaphore_mem>> -> memref<!tpu.dma_semaphore, #tpu.memory_space<semaphore_mem>>
      tpu.enqueue_dma source(%693 : memref<128xf32, #tpu.memory_space<any>>) target(%695 : memref<128xf32, #tpu.memory_space<vmem>>) target_semaphore(%697 : memref<!tpu.dma_semaphore, #tpu.memory_space<semaphore_mem>>)
      %c36 = arith.constant 36 : index
      %698 = memref.load %arg2[%c36] : memref<48xi32, #tpu.memory_space<smem>>
      %c0_i32_733 = arith.constant 0 : i32
      %c6_i32_734 = arith.constant 6 : i32
      %c0_i32_735 = arith.constant 0 : i32
      %c0_i32_736 = arith.constant 0 : i32
      %c6_i32_737 = arith.constant 6 : i32
      %c0_i32_738 = arith.constant 0 : i32
      %c0_i32_739 = arith.constant 0 : i32
      %699 = tpu.memref_slice %arg4[%698, %c0_i32_739] : memref<64x128xf32, #tpu.memory_space<any>> -> memref<1x128xf32, #tpu.memory_space<any>>
      %700 = tpu.memref_squeeze %699 : memref<1x128xf32, #tpu.memory_space<any>> -> memref<128xf32, #tpu.memory_space<any>>
      %c0_i32_740 = arith.constant 0 : i32
      %701 = tpu.memref_slice %arg7[%c0_i32_733, %c6_i32_734, %c0_i32_735, %c0_i32_740] : memref<2x8x6x128xf32, #tpu.memory_space<vmem>> -> memref<1x1x1x128xf32, #tpu.memory_space<vmem>>
      %702 = tpu.memref_squeeze %701 : memref<1x1x1x128xf32, #tpu.memory_space<vmem>> -> memref<128xf32, #tpu.memory_space<vmem>>
      %703 = tpu.memref_slice %arg9[%c0_i32_736, %c6_i32_737, %c0_i32_738] : memref<2x8x6x!tpu.dma_semaphore, #tpu.memory_space<semaphore_mem>> -> memref<1x1x1x!tpu.dma_semaphore, #tpu.memory_space<semaphore_mem>>
      %704 = tpu.memref_squeeze %703 : memref<1x1x1x!tpu.dma_semaphore, #tpu.memory_space<semaphore_mem>> -> memref<!tpu.dma_semaphore, #tpu.memory_space<semaphore_mem>>
      tpu.enqueue_dma source(%700 : memref<128xf32, #tpu.memory_space<any>>) target(%702 : memref<128xf32, #tpu.memory_space<vmem>>) target_semaphore(%704 : memref<!tpu.dma_semaphore, #tpu.memory_space<semaphore_mem>>)
      %c37 = arith.constant 37 : index
      %705 = memref.load %arg2[%c37] : memref<48xi32, #tpu.memory_space<smem>>
      %c0_i32_741 = arith.constant 0 : i32
      %c6_i32_742 = arith.constant 6 : i32
      %c1_i32_743 = arith.constant 1 : i32
      %c0_i32_744 = arith.constant 0 : i32
      %c6_i32_745 = arith.constant 6 : i32
      %c1_i32_746 = arith.constant 1 : i32
      %c0_i32_747 = arith.constant 0 : i32
      %706 = tpu.memref_slice %arg4[%705, %c0_i32_747] : memref<64x128xf32, #tpu.memory_space<any>> -> memref<1x128xf32, #tpu.memory_space<any>>
      %707 = tpu.memref_squeeze %706 : memref<1x128xf32, #tpu.memory_space<any>> -> memref<128xf32, #tpu.memory_space<any>>
      %c0_i32_748 = arith.constant 0 : i32
      %708 = tpu.memref_slice %arg7[%c0_i32_741, %c6_i32_742, %c1_i32_743, %c0_i32_748] : memref<2x8x6x128xf32, #tpu.memory_space<vmem>> -> memref<1x1x1x128xf32, #tpu.memory_space<vmem>>
      %709 = tpu.memref_squeeze %708 : memref<1x1x1x128xf32, #tpu.memory_space<vmem>> -> memref<128xf32, #tpu.memory_space<vmem>>
      %710 = tpu.memref_slice %arg9[%c0_i32_744, %c6_i32_745, %c1_i32_746] : memref<2x8x6x!tpu.dma_semaphore, #tpu.memory_space<semaphore_mem>> -> memref<1x1x1x!tpu.dma_semaphore, #tpu.memory_space<semaphore_mem>>
      %711 = tpu.memref_squeeze %710 : memref<1x1x1x!tpu.dma_semaphore, #tpu.memory_space<semaphore_mem>> -> memref<!tpu.dma_semaphore, #tpu.memory_space<semaphore_mem>>
      tpu.enqueue_dma source(%707 : memref<128xf32, #tpu.memory_space<any>>) target(%709 : memref<128xf32, #tpu.memory_space<vmem>>) target_semaphore(%711 : memref<!tpu.dma_semaphore, #tpu.memory_space<semaphore_mem>>)
      %c38 = arith.constant 38 : index
      %712 = memref.load %arg2[%c38] : memref<48xi32, #tpu.memory_space<smem>>
      %c0_i32_749 = arith.constant 0 : i32
      %c6_i32_750 = arith.constant 6 : i32
      %c2_i32_751 = arith.constant 2 : i32
      %c0_i32_752 = arith.constant 0 : i32
      %c6_i32_753 = arith.constant 6 : i32
      %c2_i32_754 = arith.constant 2 : i32
      %c0_i32_755 = arith.constant 0 : i32
      %713 = tpu.memref_slice %arg4[%712, %c0_i32_755] : memref<64x128xf32, #tpu.memory_space<any>> -> memref<1x128xf32, #tpu.memory_space<any>>
      %714 = tpu.memref_squeeze %713 : memref<1x128xf32, #tpu.memory_space<any>> -> memref<128xf32, #tpu.memory_space<any>>
      %c0_i32_756 = arith.constant 0 : i32
      %715 = tpu.memref_slice %arg7[%c0_i32_749, %c6_i32_750, %c2_i32_751, %c0_i32_756] : memref<2x8x6x128xf32, #tpu.memory_space<vmem>> -> memref<1x1x1x128xf32, #tpu.memory_space<vmem>>
      %716 = tpu.memref_squeeze %715 : memref<1x1x1x128xf32, #tpu.memory_space<vmem>> -> memref<128xf32, #tpu.memory_space<vmem>>
      %717 = tpu.memref_slice %arg9[%c0_i32_752, %c6_i32_753, %c2_i32_754] : memref<2x8x6x!tpu.dma_semaphore, #tpu.memory_space<semaphore_mem>> -> memref<1x1x1x!tpu.dma_semaphore, #tpu.memory_space<semaphore_mem>>
      %718 = tpu.memref_squeeze %717 : memref<1x1x1x!tpu.dma_semaphore, #tpu.memory_space<semaphore_mem>> -> memref<!tpu.dma_semaphore, #tpu.memory_space<semaphore_mem>>
      tpu.enqueue_dma source(%714 : memref<128xf32, #tpu.memory_space<any>>) target(%716 : memref<128xf32, #tpu.memory_space<vmem>>) target_semaphore(%718 : memref<!tpu.dma_semaphore, #tpu.memory_space<semaphore_mem>>)
      %c39 = arith.constant 39 : index
      %719 = memref.load %arg2[%c39] : memref<48xi32, #tpu.memory_space<smem>>
      %c0_i32_757 = arith.constant 0 : i32
      %c6_i32_758 = arith.constant 6 : i32
      %c3_i32_759 = arith.constant 3 : i32
      %c0_i32_760 = arith.constant 0 : i32
      %c6_i32_761 = arith.constant 6 : i32
      %c3_i32_762 = arith.constant 3 : i32
      %c0_i32_763 = arith.constant 0 : i32
      %720 = tpu.memref_slice %arg4[%719, %c0_i32_763] : memref<64x128xf32, #tpu.memory_space<any>> -> memref<1x128xf32, #tpu.memory_space<any>>
      %721 = tpu.memref_squeeze %720 : memref<1x128xf32, #tpu.memory_space<any>> -> memref<128xf32, #tpu.memory_space<any>>
      %c0_i32_764 = arith.constant 0 : i32
      %722 = tpu.memref_slice %arg7[%c0_i32_757, %c6_i32_758, %c3_i32_759, %c0_i32_764] : memref<2x8x6x128xf32, #tpu.memory_space<vmem>> -> memref<1x1x1x128xf32, #tpu.memory_space<vmem>>
      %723 = tpu.memref_squeeze %722 : memref<1x1x1x128xf32, #tpu.memory_space<vmem>> -> memref<128xf32, #tpu.memory_space<vmem>>
      %724 = tpu.memref_slice %arg9[%c0_i32_760, %c6_i32_761, %c3_i32_762] : memref<2x8x6x!tpu.dma_semaphore, #tpu.memory_space<semaphore_mem>> -> memref<1x1x1x!tpu.dma_semaphore, #tpu.memory_space<semaphore_mem>>
      %725 = tpu.memref_squeeze %724 : memref<1x1x1x!tpu.dma_semaphore, #tpu.memory_space<semaphore_mem>> -> memref<!tpu.dma_semaphore, #tpu.memory_space<semaphore_mem>>
      tpu.enqueue_dma source(%721 : memref<128xf32, #tpu.memory_space<any>>) target(%723 : memref<128xf32, #tpu.memory_space<vmem>>) target_semaphore(%725 : memref<!tpu.dma_semaphore, #tpu.memory_space<semaphore_mem>>)
      %c40 = arith.constant 40 : index
      %726 = memref.load %arg2[%c40] : memref<48xi32, #tpu.memory_space<smem>>
      %c0_i32_765 = arith.constant 0 : i32
      %c6_i32_766 = arith.constant 6 : i32
      %c4_i32_767 = arith.constant 4 : i32
      %c0_i32_768 = arith.constant 0 : i32
      %c6_i32_769 = arith.constant 6 : i32
      %c4_i32_770 = arith.constant 4 : i32
      %c0_i32_771 = arith.constant 0 : i32
      %727 = tpu.memref_slice %arg4[%726, %c0_i32_771] : memref<64x128xf32, #tpu.memory_space<any>> -> memref<1x128xf32, #tpu.memory_space<any>>
      %728 = tpu.memref_squeeze %727 : memref<1x128xf32, #tpu.memory_space<any>> -> memref<128xf32, #tpu.memory_space<any>>
      %c0_i32_772 = arith.constant 0 : i32
      %729 = tpu.memref_slice %arg7[%c0_i32_765, %c6_i32_766, %c4_i32_767, %c0_i32_772] : memref<2x8x6x128xf32, #tpu.memory_space<vmem>> -> memref<1x1x1x128xf32, #tpu.memory_space<vmem>>
      %730 = tpu.memref_squeeze %729 : memref<1x1x1x128xf32, #tpu.memory_space<vmem>> -> memref<128xf32, #tpu.memory_space<vmem>>
      %731 = tpu.memref_slice %arg9[%c0_i32_768, %c6_i32_769, %c4_i32_770] : memref<2x8x6x!tpu.dma_semaphore, #tpu.memory_space<semaphore_mem>> -> memref<1x1x1x!tpu.dma_semaphore, #tpu.memory_space<semaphore_mem>>
      %732 = tpu.memref_squeeze %731 : memref<1x1x1x!tpu.dma_semaphore, #tpu.memory_space<semaphore_mem>> -> memref<!tpu.dma_semaphore, #tpu.memory_space<semaphore_mem>>
      tpu.enqueue_dma source(%728 : memref<128xf32, #tpu.memory_space<any>>) target(%730 : memref<128xf32, #tpu.memory_space<vmem>>) target_semaphore(%732 : memref<!tpu.dma_semaphore, #tpu.memory_space<semaphore_mem>>)
      %c41 = arith.constant 41 : index
      %733 = memref.load %arg2[%c41] : memref<48xi32, #tpu.memory_space<smem>>
      %c0_i32_773 = arith.constant 0 : i32
      %c6_i32_774 = arith.constant 6 : i32
      %c5_i32_775 = arith.constant 5 : i32
      %c0_i32_776 = arith.constant 0 : i32
      %c6_i32_777 = arith.constant 6 : i32
      %c5_i32_778 = arith.constant 5 : i32
      %c0_i32_779 = arith.constant 0 : i32
      %734 = tpu.memref_slice %arg4[%733, %c0_i32_779] : memref<64x128xf32, #tpu.memory_space<any>> -> memref<1x128xf32, #tpu.memory_space<any>>
      %735 = tpu.memref_squeeze %734 : memref<1x128xf32, #tpu.memory_space<any>> -> memref<128xf32, #tpu.memory_space<any>>
      %c0_i32_780 = arith.constant 0 : i32
      %736 = tpu.memref_slice %arg7[%c0_i32_773, %c6_i32_774, %c5_i32_775, %c0_i32_780] : memref<2x8x6x128xf32, #tpu.memory_space<vmem>> -> memref<1x1x1x128xf32, #tpu.memory_space<vmem>>
      %737 = tpu.memref_squeeze %736 : memref<1x1x1x128xf32, #tpu.memory_space<vmem>> -> memref<128xf32, #tpu.memory_space<vmem>>
      %738 = tpu.memref_slice %arg9[%c0_i32_776, %c6_i32_777, %c5_i32_778] : memref<2x8x6x!tpu.dma_semaphore, #tpu.memory_space<semaphore_mem>> -> memref<1x1x1x!tpu.dma_semaphore, #tpu.memory_space<semaphore_mem>>
      %739 = tpu.memref_squeeze %738 : memref<1x1x1x!tpu.dma_semaphore, #tpu.memory_space<semaphore_mem>> -> memref<!tpu.dma_semaphore, #tpu.memory_space<semaphore_mem>>
      tpu.enqueue_dma source(%735 : memref<128xf32, #tpu.memory_space<any>>) target(%737 : memref<128xf32, #tpu.memory_space<vmem>>) target_semaphore(%739 : memref<!tpu.dma_semaphore, #tpu.memory_space<semaphore_mem>>)
      %c7_781 = arith.constant 7 : index
      %740 = memref.load %arg1[%c7_781] : memref<8xi32, #tpu.memory_space<smem>>
      %c0_i32_782 = arith.constant 0 : i32
      %c7_i32_783 = arith.constant 7 : i32
      %c0_i32_784 = arith.constant 0 : i32
      %c7_i32_785 = arith.constant 7 : i32
      %c0_i32_786 = arith.constant 0 : i32
      %741 = tpu.memref_slice %arg3[%740, %c0_i32_786] : memref<64x128xf32, #tpu.memory_space<any>> -> memref<1x128xf32, #tpu.memory_space<any>>
      %742 = tpu.memref_squeeze %741 : memref<1x128xf32, #tpu.memory_space<any>> -> memref<128xf32, #tpu.memory_space<any>>
      %c0_i32_787 = arith.constant 0 : i32
      %743 = tpu.memref_slice %arg6[%c0_i32_782, %c7_i32_783, %c0_i32_787] : memref<2x8x128xf32, #tpu.memory_space<vmem>> -> memref<1x1x128xf32, #tpu.memory_space<vmem>>
      %744 = tpu.memref_squeeze %743 : memref<1x1x128xf32, #tpu.memory_space<vmem>> -> memref<128xf32, #tpu.memory_space<vmem>>
      %745 = tpu.memref_slice %arg8[%c0_i32_784, %c7_i32_785] : memref<2x8x!tpu.dma_semaphore, #tpu.memory_space<semaphore_mem>> -> memref<1x1x!tpu.dma_semaphore, #tpu.memory_space<semaphore_mem>>
      %746 = tpu.memref_squeeze %745 : memref<1x1x!tpu.dma_semaphore, #tpu.memory_space<semaphore_mem>> -> memref<!tpu.dma_semaphore, #tpu.memory_space<semaphore_mem>>
      tpu.enqueue_dma source(%742 : memref<128xf32, #tpu.memory_space<any>>) target(%744 : memref<128xf32, #tpu.memory_space<vmem>>) target_semaphore(%746 : memref<!tpu.dma_semaphore, #tpu.memory_space<semaphore_mem>>)
      %c42 = arith.constant 42 : index
      %747 = memref.load %arg2[%c42] : memref<48xi32, #tpu.memory_space<smem>>
      %c0_i32_788 = arith.constant 0 : i32
      %c7_i32_789 = arith.constant 7 : i32
      %c0_i32_790 = arith.constant 0 : i32
      %c0_i32_791 = arith.constant 0 : i32
      %c7_i32_792 = arith.constant 7 : i32
      %c0_i32_793 = arith.constant 0 : i32
      %c0_i32_794 = arith.constant 0 : i32
      %748 = tpu.memref_slice %arg4[%747, %c0_i32_794] : memref<64x128xf32, #tpu.memory_space<any>> -> memref<1x128xf32, #tpu.memory_space<any>>
      %749 = tpu.memref_squeeze %748 : memref<1x128xf32, #tpu.memory_space<any>> -> memref<128xf32, #tpu.memory_space<any>>
      %c0_i32_795 = arith.constant 0 : i32
      %750 = tpu.memref_slice %arg7[%c0_i32_788, %c7_i32_789, %c0_i32_790, %c0_i32_795] : memref<2x8x6x128xf32, #tpu.memory_space<vmem>> -> memref<1x1x1x128xf32, #tpu.memory_space<vmem>>
      %751 = tpu.memref_squeeze %750 : memref<1x1x1x128xf32, #tpu.memory_space<vmem>> -> memref<128xf32, #tpu.memory_space<vmem>>
      %752 = tpu.memref_slice %arg9[%c0_i32_791, %c7_i32_792, %c0_i32_793] : memref<2x8x6x!tpu.dma_semaphore, #tpu.memory_space<semaphore_mem>> -> memref<1x1x1x!tpu.dma_semaphore, #tpu.memory_space<semaphore_mem>>
      %753 = tpu.memref_squeeze %752 : memref<1x1x1x!tpu.dma_semaphore, #tpu.memory_space<semaphore_mem>> -> memref<!tpu.dma_semaphore, #tpu.memory_space<semaphore_mem>>
      tpu.enqueue_dma source(%749 : memref<128xf32, #tpu.memory_space<any>>) target(%751 : memref<128xf32, #tpu.memory_space<vmem>>) target_semaphore(%753 : memref<!tpu.dma_semaphore, #tpu.memory_space<semaphore_mem>>)
      %c43 = arith.constant 43 : index
      %754 = memref.load %arg2[%c43] : memref<48xi32, #tpu.memory_space<smem>>
      %c0_i32_796 = arith.constant 0 : i32
      %c7_i32_797 = arith.constant 7 : i32
      %c1_i32_798 = arith.constant 1 : i32
      %c0_i32_799 = arith.constant 0 : i32
      %c7_i32_800 = arith.constant 7 : i32
      %c1_i32_801 = arith.constant 1 : i32
      %c0_i32_802 = arith.constant 0 : i32
      %755 = tpu.memref_slice %arg4[%754, %c0_i32_802] : memref<64x128xf32, #tpu.memory_space<any>> -> memref<1x128xf32, #tpu.memory_space<any>>
      %756 = tpu.memref_squeeze %755 : memref<1x128xf32, #tpu.memory_space<any>> -> memref<128xf32, #tpu.memory_space<any>>
      %c0_i32_803 = arith.constant 0 : i32
      %757 = tpu.memref_slice %arg7[%c0_i32_796, %c7_i32_797, %c1_i32_798, %c0_i32_803] : memref<2x8x6x128xf32, #tpu.memory_space<vmem>> -> memref<1x1x1x128xf32, #tpu.memory_space<vmem>>
      %758 = tpu.memref_squeeze %757 : memref<1x1x1x128xf32, #tpu.memory_space<vmem>> -> memref<128xf32, #tpu.memory_space<vmem>>
      %759 = tpu.memref_slice %arg9[%c0_i32_799, %c7_i32_800, %c1_i32_801] : memref<2x8x6x!tpu.dma_semaphore, #tpu.memory_space<semaphore_mem>> -> memref<1x1x1x!tpu.dma_semaphore, #tpu.memory_space<semaphore_mem>>
      %760 = tpu.memref_squeeze %759 : memref<1x1x1x!tpu.dma_semaphore, #tpu.memory_space<semaphore_mem>> -> memref<!tpu.dma_semaphore, #tpu.memory_space<semaphore_mem>>
      tpu.enqueue_dma source(%756 : memref<128xf32, #tpu.memory_space<any>>) target(%758 : memref<128xf32, #tpu.memory_space<vmem>>) target_semaphore(%760 : memref<!tpu.dma_semaphore, #tpu.memory_space<semaphore_mem>>)
      %c44 = arith.constant 44 : index
      %761 = memref.load %arg2[%c44] : memref<48xi32, #tpu.memory_space<smem>>
      %c0_i32_804 = arith.constant 0 : i32
      %c7_i32_805 = arith.constant 7 : i32
      %c2_i32_806 = arith.constant 2 : i32
      %c0_i32_807 = arith.constant 0 : i32
      %c7_i32_808 = arith.constant 7 : i32
      %c2_i32_809 = arith.constant 2 : i32
      %c0_i32_810 = arith.constant 0 : i32
      %762 = tpu.memref_slice %arg4[%761, %c0_i32_810] : memref<64x128xf32, #tpu.memory_space<any>> -> memref<1x128xf32, #tpu.memory_space<any>>
      %763 = tpu.memref_squeeze %762 : memref<1x128xf32, #tpu.memory_space<any>> -> memref<128xf32, #tpu.memory_space<any>>
      %c0_i32_811 = arith.constant 0 : i32
      %764 = tpu.memref_slice %arg7[%c0_i32_804, %c7_i32_805, %c2_i32_806, %c0_i32_811] : memref<2x8x6x128xf32, #tpu.memory_space<vmem>> -> memref<1x1x1x128xf32, #tpu.memory_space<vmem>>
      %765 = tpu.memref_squeeze %764 : memref<1x1x1x128xf32, #tpu.memory_space<vmem>> -> memref<128xf32, #tpu.memory_space<vmem>>
      %766 = tpu.memref_slice %arg9[%c0_i32_807, %c7_i32_808, %c2_i32_809] : memref<2x8x6x!tpu.dma_semaphore, #tpu.memory_space<semaphore_mem>> -> memref<1x1x1x!tpu.dma_semaphore, #tpu.memory_space<semaphore_mem>>
      %767 = tpu.memref_squeeze %766 : memref<1x1x1x!tpu.dma_semaphore, #tpu.memory_space<semaphore_mem>> -> memref<!tpu.dma_semaphore, #tpu.memory_space<semaphore_mem>>
      tpu.enqueue_dma source(%763 : memref<128xf32, #tpu.memory_space<any>>) target(%765 : memref<128xf32, #tpu.memory_space<vmem>>) target_semaphore(%767 : memref<!tpu.dma_semaphore, #tpu.memory_space<semaphore_mem>>)
      %c45 = arith.constant 45 : index
      %768 = memref.load %arg2[%c45] : memref<48xi32, #tpu.memory_space<smem>>
      %c0_i32_812 = arith.constant 0 : i32
      %c7_i32_813 = arith.constant 7 : i32
      %c3_i32_814 = arith.constant 3 : i32
      %c0_i32_815 = arith.constant 0 : i32
      %c7_i32_816 = arith.constant 7 : i32
      %c3_i32_817 = arith.constant 3 : i32
      %c0_i32_818 = arith.constant 0 : i32
      %769 = tpu.memref_slice %arg4[%768, %c0_i32_818] : memref<64x128xf32, #tpu.memory_space<any>> -> memref<1x128xf32, #tpu.memory_space<any>>
      %770 = tpu.memref_squeeze %769 : memref<1x128xf32, #tpu.memory_space<any>> -> memref<128xf32, #tpu.memory_space<any>>
      %c0_i32_819 = arith.constant 0 : i32
      %771 = tpu.memref_slice %arg7[%c0_i32_812, %c7_i32_813, %c3_i32_814, %c0_i32_819] : memref<2x8x6x128xf32, #tpu.memory_space<vmem>> -> memref<1x1x1x128xf32, #tpu.memory_space<vmem>>
      %772 = tpu.memref_squeeze %771 : memref<1x1x1x128xf32, #tpu.memory_space<vmem>> -> memref<128xf32, #tpu.memory_space<vmem>>
      %773 = tpu.memref_slice %arg9[%c0_i32_815, %c7_i32_816, %c3_i32_817] : memref<2x8x6x!tpu.dma_semaphore, #tpu.memory_space<semaphore_mem>> -> memref<1x1x1x!tpu.dma_semaphore, #tpu.memory_space<semaphore_mem>>
      %774 = tpu.memref_squeeze %773 : memref<1x1x1x!tpu.dma_semaphore, #tpu.memory_space<semaphore_mem>> -> memref<!tpu.dma_semaphore, #tpu.memory_space<semaphore_mem>>
      tpu.enqueue_dma source(%770 : memref<128xf32, #tpu.memory_space<any>>) target(%772 : memref<128xf32, #tpu.memory_space<vmem>>) target_semaphore(%774 : memref<!tpu.dma_semaphore, #tpu.memory_space<semaphore_mem>>)
      %c46 = arith.constant 46 : index
      %775 = memref.load %arg2[%c46] : memref<48xi32, #tpu.memory_space<smem>>
      %c0_i32_820 = arith.constant 0 : i32
      %c7_i32_821 = arith.constant 7 : i32
      %c4_i32_822 = arith.constant 4 : i32
      %c0_i32_823 = arith.constant 0 : i32
      %c7_i32_824 = arith.constant 7 : i32
      %c4_i32_825 = arith.constant 4 : i32
      %c0_i32_826 = arith.constant 0 : i32
      %776 = tpu.memref_slice %arg4[%775, %c0_i32_826] : memref<64x128xf32, #tpu.memory_space<any>> -> memref<1x128xf32, #tpu.memory_space<any>>
      %777 = tpu.memref_squeeze %776 : memref<1x128xf32, #tpu.memory_space<any>> -> memref<128xf32, #tpu.memory_space<any>>
      %c0_i32_827 = arith.constant 0 : i32
      %778 = tpu.memref_slice %arg7[%c0_i32_820, %c7_i32_821, %c4_i32_822, %c0_i32_827] : memref<2x8x6x128xf32, #tpu.memory_space<vmem>> -> memref<1x1x1x128xf32, #tpu.memory_space<vmem>>
      %779 = tpu.memref_squeeze %778 : memref<1x1x1x128xf32, #tpu.memory_space<vmem>> -> memref<128xf32, #tpu.memory_space<vmem>>
      %780 = tpu.memref_slice %arg9[%c0_i32_823, %c7_i32_824, %c4_i32_825] : memref<2x8x6x!tpu.dma_semaphore, #tpu.memory_space<semaphore_mem>> -> memref<1x1x1x!tpu.dma_semaphore, #tpu.memory_space<semaphore_mem>>
      %781 = tpu.memref_squeeze %780 : memref<1x1x1x!tpu.dma_semaphore, #tpu.memory_space<semaphore_mem>> -> memref<!tpu.dma_semaphore, #tpu.memory_space<semaphore_mem>>
      tpu.enqueue_dma source(%777 : memref<128xf32, #tpu.memory_space<any>>) target(%779 : memref<128xf32, #tpu.memory_space<vmem>>) target_semaphore(%781 : memref<!tpu.dma_semaphore, #tpu.memory_space<semaphore_mem>>)
      %c47 = arith.constant 47 : index
      %782 = memref.load %arg2[%c47] : memref<48xi32, #tpu.memory_space<smem>>
      %c0_i32_828 = arith.constant 0 : i32
      %c7_i32_829 = arith.constant 7 : i32
      %c5_i32_830 = arith.constant 5 : i32
      %c0_i32_831 = arith.constant 0 : i32
      %c7_i32_832 = arith.constant 7 : i32
      %c5_i32_833 = arith.constant 5 : i32
      %c0_i32_834 = arith.constant 0 : i32
      %783 = tpu.memref_slice %arg4[%782, %c0_i32_834] : memref<64x128xf32, #tpu.memory_space<any>> -> memref<1x128xf32, #tpu.memory_space<any>>
      %784 = tpu.memref_squeeze %783 : memref<1x128xf32, #tpu.memory_space<any>> -> memref<128xf32, #tpu.memory_space<any>>
      %c0_i32_835 = arith.constant 0 : i32
      %785 = tpu.memref_slice %arg7[%c0_i32_828, %c7_i32_829, %c5_i32_830, %c0_i32_835] : memref<2x8x6x128xf32, #tpu.memory_space<vmem>> -> memref<1x1x1x128xf32, #tpu.memory_space<vmem>>
      %786 = tpu.memref_squeeze %785 : memref<1x1x1x128xf32, #tpu.memory_space<vmem>> -> memref<128xf32, #tpu.memory_space<vmem>>
      %787 = tpu.memref_slice %arg9[%c0_i32_831, %c7_i32_832, %c5_i32_833] : memref<2x8x6x!tpu.dma_semaphore, #tpu.memory_space<semaphore_mem>> -> memref<1x1x1x!tpu.dma_semaphore, #tpu.memory_space<semaphore_mem>>
      %788 = tpu.memref_squeeze %787 : memref<1x1x1x!tpu.dma_semaphore, #tpu.memory_space<semaphore_mem>> -> memref<!tpu.dma_semaphore, #tpu.memory_space<semaphore_mem>>
      tpu.enqueue_dma source(%784 : memref<128xf32, #tpu.memory_space<any>>) target(%786 : memref<128xf32, #tpu.memory_space<vmem>>) target_semaphore(%788 : memref<!tpu.dma_semaphore, #tpu.memory_space<semaphore_mem>>)
    } else {
    }
    %c1_i32_5 = arith.constant 1 : i32
    %13 = arith.addi %arg0, %c1_i32_5 : i32
    %c1_i32_6 = arith.constant 1 : i32
    %14 = arith.cmpi slt, %13, %c1_i32_6 : i32
    %15 = arith.extui %14 : i1 to i32
    %c0_i32_7 = arith.constant 0 : i32
    %16 = arith.cmpi ne, %15, %c0_i32_7 : i32
    scf.if %16 {
      %c1_i32_395 = arith.constant 1 : i32
      %397 = arith.addi %arg0, %c1_i32_395 : i32
      %c1_i32_396 = arith.constant 1 : i32
      %398 = arith.subi %c1_i32_396, %9 : i32
      %c8_i32_397 = arith.constant 8 : i32
      %399 = arith.muli %397, %c8_i32_397 : i32
      %c0_i32_398 = arith.constant 0 : i32
      %400 = arith.addi %399, %c0_i32_398 : i32
      %401 = arith.index_cast %400 : i32 to index
      %402 = memref.load %arg1[%401] : memref<8xi32, #tpu.memory_space<smem>>
      %c0_i32_399 = arith.constant 0 : i32
      %c0_i32_400 = arith.constant 0 : i32
      %c0_i32_401 = arith.constant 0 : i32
      %403 = tpu.memref_slice %arg3[%402, %c0_i32_401] : memref<64x128xf32, #tpu.memory_space<any>> -> memref<1x128xf32, #tpu.memory_space<any>>
      %404 = tpu.memref_squeeze %403 : memref<1x128xf32, #tpu.memory_space<any>> -> memref<128xf32, #tpu.memory_space<any>>
      %c0_i32_402 = arith.constant 0 : i32
      %405 = tpu.memref_slice %arg6[%398, %c0_i32_399, %c0_i32_402] : memref<2x8x128xf32, #tpu.memory_space<vmem>> -> memref<1x1x128xf32, #tpu.memory_space<vmem>>
      %406 = tpu.memref_squeeze %405 : memref<1x1x128xf32, #tpu.memory_space<vmem>> -> memref<128xf32, #tpu.memory_space<vmem>>
      %407 = tpu.memref_slice %arg8[%398, %c0_i32_400] : memref<2x8x!tpu.dma_semaphore, #tpu.memory_space<semaphore_mem>> -> memref<1x1x!tpu.dma_semaphore, #tpu.memory_space<semaphore_mem>>
      %408 = tpu.memref_squeeze %407 : memref<1x1x!tpu.dma_semaphore, #tpu.memory_space<semaphore_mem>> -> memref<!tpu.dma_semaphore, #tpu.memory_space<semaphore_mem>>
      tpu.enqueue_dma source(%404 : memref<128xf32, #tpu.memory_space<any>>) target(%406 : memref<128xf32, #tpu.memory_space<vmem>>) target_semaphore(%408 : memref<!tpu.dma_semaphore, #tpu.memory_space<semaphore_mem>>)
      %c0_i32_403 = arith.constant 0 : i32
      %409 = arith.addi %399, %c0_i32_403 : i32
      %c6_i32_404 = arith.constant 6 : i32
      %410 = arith.muli %409, %c6_i32_404 : i32
      %c0_i32_405 = arith.constant 0 : i32
      %411 = arith.addi %410, %c0_i32_405 : i32
      %412 = arith.index_cast %411 : i32 to index
      %413 = memref.load %arg2[%412] : memref<48xi32, #tpu.memory_space<smem>>
      %c0_i32_406 = arith.constant 0 : i32
      %c0_i32_407 = arith.constant 0 : i32
      %c0_i32_408 = arith.constant 0 : i32
      %c0_i32_409 = arith.constant 0 : i32
      %c0_i32_410 = arith.constant 0 : i32
      %414 = tpu.memref_slice %arg4[%413, %c0_i32_410] : memref<64x128xf32, #tpu.memory_space<any>> -> memref<1x128xf32, #tpu.memory_space<any>>
      %415 = tpu.memref_squeeze %414 : memref<1x128xf32, #tpu.memory_space<any>> -> memref<128xf32, #tpu.memory_space<any>>
      %c0_i32_411 = arith.constant 0 : i32
      %416 = tpu.memref_slice %arg7[%398, %c0_i32_406, %c0_i32_407, %c0_i32_411] : memref<2x8x6x128xf32, #tpu.memory_space<vmem>> -> memref<1x1x1x128xf32, #tpu.memory_space<vmem>>
      %417 = tpu.memref_squeeze %416 : memref<1x1x1x128xf32, #tpu.memory_space<vmem>> -> memref<128xf32, #tpu.memory_space<vmem>>
      %418 = tpu.memref_slice %arg9[%398, %c0_i32_408, %c0_i32_409] : memref<2x8x6x!tpu.dma_semaphore, #tpu.memory_space<semaphore_mem>> -> memref<1x1x1x!tpu.dma_semaphore, #tpu.memory_space<semaphore_mem>>
      %419 = tpu.memref_squeeze %418 : memref<1x1x1x!tpu.dma_semaphore, #tpu.memory_space<semaphore_mem>> -> memref<!tpu.dma_semaphore, #tpu.memory_space<semaphore_mem>>
      tpu.enqueue_dma source(%415 : memref<128xf32, #tpu.memory_space<any>>) target(%417 : memref<128xf32, #tpu.memory_space<vmem>>) target_semaphore(%419 : memref<!tpu.dma_semaphore, #tpu.memory_space<semaphore_mem>>)
      %c0_i32_412 = arith.constant 0 : i32
      %420 = arith.addi %399, %c0_i32_412 : i32
      %c6_i32_413 = arith.constant 6 : i32
      %421 = arith.muli %420, %c6_i32_413 : i32
      %c1_i32_414 = arith.constant 1 : i32
      %422 = arith.addi %421, %c1_i32_414 : i32
      %423 = arith.index_cast %422 : i32 to index
      %424 = memref.load %arg2[%423] : memref<48xi32, #tpu.memory_space<smem>>
      %c0_i32_415 = arith.constant 0 : i32
      %c1_i32_416 = arith.constant 1 : i32
      %c0_i32_417 = arith.constant 0 : i32
      %c1_i32_418 = arith.constant 1 : i32
      %c0_i32_419 = arith.constant 0 : i32
      %425 = tpu.memref_slice %arg4[%424, %c0_i32_419] : memref<64x128xf32, #tpu.memory_space<any>> -> memref<1x128xf32, #tpu.memory_space<any>>
      %426 = tpu.memref_squeeze %425 : memref<1x128xf32, #tpu.memory_space<any>> -> memref<128xf32, #tpu.memory_space<any>>
      %c0_i32_420 = arith.constant 0 : i32
      %427 = tpu.memref_slice %arg7[%398, %c0_i32_415, %c1_i32_416, %c0_i32_420] : memref<2x8x6x128xf32, #tpu.memory_space<vmem>> -> memref<1x1x1x128xf32, #tpu.memory_space<vmem>>
      %428 = tpu.memref_squeeze %427 : memref<1x1x1x128xf32, #tpu.memory_space<vmem>> -> memref<128xf32, #tpu.memory_space<vmem>>
      %429 = tpu.memref_slice %arg9[%398, %c0_i32_417, %c1_i32_418] : memref<2x8x6x!tpu.dma_semaphore, #tpu.memory_space<semaphore_mem>> -> memref<1x1x1x!tpu.dma_semaphore, #tpu.memory_space<semaphore_mem>>
      %430 = tpu.memref_squeeze %429 : memref<1x1x1x!tpu.dma_semaphore, #tpu.memory_space<semaphore_mem>> -> memref<!tpu.dma_semaphore, #tpu.memory_space<semaphore_mem>>
      tpu.enqueue_dma source(%426 : memref<128xf32, #tpu.memory_space<any>>) target(%428 : memref<128xf32, #tpu.memory_space<vmem>>) target_semaphore(%430 : memref<!tpu.dma_semaphore, #tpu.memory_space<semaphore_mem>>)
      %c0_i32_421 = arith.constant 0 : i32
      %431 = arith.addi %399, %c0_i32_421 : i32
      %c6_i32_422 = arith.constant 6 : i32
      %432 = arith.muli %431, %c6_i32_422 : i32
      %c2_i32_423 = arith.constant 2 : i32
      %433 = arith.addi %432, %c2_i32_423 : i32
      %434 = arith.index_cast %433 : i32 to index
      %435 = memref.load %arg2[%434] : memref<48xi32, #tpu.memory_space<smem>>
      %c0_i32_424 = arith.constant 0 : i32
      %c2_i32_425 = arith.constant 2 : i32
      %c0_i32_426 = arith.constant 0 : i32
      %c2_i32_427 = arith.constant 2 : i32
      %c0_i32_428 = arith.constant 0 : i32
      %436 = tpu.memref_slice %arg4[%435, %c0_i32_428] : memref<64x128xf32, #tpu.memory_space<any>> -> memref<1x128xf32, #tpu.memory_space<any>>
      %437 = tpu.memref_squeeze %436 : memref<1x128xf32, #tpu.memory_space<any>> -> memref<128xf32, #tpu.memory_space<any>>
      %c0_i32_429 = arith.constant 0 : i32
      %438 = tpu.memref_slice %arg7[%398, %c0_i32_424, %c2_i32_425, %c0_i32_429] : memref<2x8x6x128xf32, #tpu.memory_space<vmem>> -> memref<1x1x1x128xf32, #tpu.memory_space<vmem>>
      %439 = tpu.memref_squeeze %438 : memref<1x1x1x128xf32, #tpu.memory_space<vmem>> -> memref<128xf32, #tpu.memory_space<vmem>>
      %440 = tpu.memref_slice %arg9[%398, %c0_i32_426, %c2_i32_427] : memref<2x8x6x!tpu.dma_semaphore, #tpu.memory_space<semaphore_mem>> -> memref<1x1x1x!tpu.dma_semaphore, #tpu.memory_space<semaphore_mem>>
      %441 = tpu.memref_squeeze %440 : memref<1x1x1x!tpu.dma_semaphore, #tpu.memory_space<semaphore_mem>> -> memref<!tpu.dma_semaphore, #tpu.memory_space<semaphore_mem>>
      tpu.enqueue_dma source(%437 : memref<128xf32, #tpu.memory_space<any>>) target(%439 : memref<128xf32, #tpu.memory_space<vmem>>) target_semaphore(%441 : memref<!tpu.dma_semaphore, #tpu.memory_space<semaphore_mem>>)
      %c0_i32_430 = arith.constant 0 : i32
      %442 = arith.addi %399, %c0_i32_430 : i32
      %c6_i32_431 = arith.constant 6 : i32
      %443 = arith.muli %442, %c6_i32_431 : i32
      %c3_i32_432 = arith.constant 3 : i32
      %444 = arith.addi %443, %c3_i32_432 : i32
      %445 = arith.index_cast %444 : i32 to index
      %446 = memref.load %arg2[%445] : memref<48xi32, #tpu.memory_space<smem>>
      %c0_i32_433 = arith.constant 0 : i32
      %c3_i32_434 = arith.constant 3 : i32
      %c0_i32_435 = arith.constant 0 : i32
      %c3_i32_436 = arith.constant 3 : i32
      %c0_i32_437 = arith.constant 0 : i32
      %447 = tpu.memref_slice %arg4[%446, %c0_i32_437] : memref<64x128xf32, #tpu.memory_space<any>> -> memref<1x128xf32, #tpu.memory_space<any>>
      %448 = tpu.memref_squeeze %447 : memref<1x128xf32, #tpu.memory_space<any>> -> memref<128xf32, #tpu.memory_space<any>>
      %c0_i32_438 = arith.constant 0 : i32
      %449 = tpu.memref_slice %arg7[%398, %c0_i32_433, %c3_i32_434, %c0_i32_438] : memref<2x8x6x128xf32, #tpu.memory_space<vmem>> -> memref<1x1x1x128xf32, #tpu.memory_space<vmem>>
      %450 = tpu.memref_squeeze %449 : memref<1x1x1x128xf32, #tpu.memory_space<vmem>> -> memref<128xf32, #tpu.memory_space<vmem>>
      %451 = tpu.memref_slice %arg9[%398, %c0_i32_435, %c3_i32_436] : memref<2x8x6x!tpu.dma_semaphore, #tpu.memory_space<semaphore_mem>> -> memref<1x1x1x!tpu.dma_semaphore, #tpu.memory_space<semaphore_mem>>
      %452 = tpu.memref_squeeze %451 : memref<1x1x1x!tpu.dma_semaphore, #tpu.memory_space<semaphore_mem>> -> memref<!tpu.dma_semaphore, #tpu.memory_space<semaphore_mem>>
      tpu.enqueue_dma source(%448 : memref<128xf32, #tpu.memory_space<any>>) target(%450 : memref<128xf32, #tpu.memory_space<vmem>>) target_semaphore(%452 : memref<!tpu.dma_semaphore, #tpu.memory_space<semaphore_mem>>)
      %c0_i32_439 = arith.constant 0 : i32
      %453 = arith.addi %399, %c0_i32_439 : i32
      %c6_i32_440 = arith.constant 6 : i32
      %454 = arith.muli %453, %c6_i32_440 : i32
      %c4_i32_441 = arith.constant 4 : i32
      %455 = arith.addi %454, %c4_i32_441 : i32
      %456 = arith.index_cast %455 : i32 to index
      %457 = memref.load %arg2[%456] : memref<48xi32, #tpu.memory_space<smem>>
      %c0_i32_442 = arith.constant 0 : i32
      %c4_i32_443 = arith.constant 4 : i32
      %c0_i32_444 = arith.constant 0 : i32
      %c4_i32_445 = arith.constant 4 : i32
      %c0_i32_446 = arith.constant 0 : i32
      %458 = tpu.memref_slice %arg4[%457, %c0_i32_446] : memref<64x128xf32, #tpu.memory_space<any>> -> memref<1x128xf32, #tpu.memory_space<any>>
      %459 = tpu.memref_squeeze %458 : memref<1x128xf32, #tpu.memory_space<any>> -> memref<128xf32, #tpu.memory_space<any>>
      %c0_i32_447 = arith.constant 0 : i32
      %460 = tpu.memref_slice %arg7[%398, %c0_i32_442, %c4_i32_443, %c0_i32_447] : memref<2x8x6x128xf32, #tpu.memory_space<vmem>> -> memref<1x1x1x128xf32, #tpu.memory_space<vmem>>
      %461 = tpu.memref_squeeze %460 : memref<1x1x1x128xf32, #tpu.memory_space<vmem>> -> memref<128xf32, #tpu.memory_space<vmem>>
      %462 = tpu.memref_slice %arg9[%398, %c0_i32_444, %c4_i32_445] : memref<2x8x6x!tpu.dma_semaphore, #tpu.memory_space<semaphore_mem>> -> memref<1x1x1x!tpu.dma_semaphore, #tpu.memory_space<semaphore_mem>>
      %463 = tpu.memref_squeeze %462 : memref<1x1x1x!tpu.dma_semaphore, #tpu.memory_space<semaphore_mem>> -> memref<!tpu.dma_semaphore, #tpu.memory_space<semaphore_mem>>
      tpu.enqueue_dma source(%459 : memref<128xf32, #tpu.memory_space<any>>) target(%461 : memref<128xf32, #tpu.memory_space<vmem>>) target_semaphore(%463 : memref<!tpu.dma_semaphore, #tpu.memory_space<semaphore_mem>>)
      %c0_i32_448 = arith.constant 0 : i32
      %464 = arith.addi %399, %c0_i32_448 : i32
      %c6_i32_449 = arith.constant 6 : i32
      %465 = arith.muli %464, %c6_i32_449 : i32
      %c5_i32_450 = arith.constant 5 : i32
      %466 = arith.addi %465, %c5_i32_450 : i32
      %467 = arith.index_cast %466 : i32 to index
      %468 = memref.load %arg2[%467] : memref<48xi32, #tpu.memory_space<smem>>
      %c0_i32_451 = arith.constant 0 : i32
      %c5_i32_452 = arith.constant 5 : i32
      %c0_i32_453 = arith.constant 0 : i32
      %c5_i32_454 = arith.constant 5 : i32
      %c0_i32_455 = arith.constant 0 : i32
      %469 = tpu.memref_slice %arg4[%468, %c0_i32_455] : memref<64x128xf32, #tpu.memory_space<any>> -> memref<1x128xf32, #tpu.memory_space<any>>
      %470 = tpu.memref_squeeze %469 : memref<1x128xf32, #tpu.memory_space<any>> -> memref<128xf32, #tpu.memory_space<any>>
      %c0_i32_456 = arith.constant 0 : i32
      %471 = tpu.memref_slice %arg7[%398, %c0_i32_451, %c5_i32_452, %c0_i32_456] : memref<2x8x6x128xf32, #tpu.memory_space<vmem>> -> memref<1x1x1x128xf32, #tpu.memory_space<vmem>>
      %472 = tpu.memref_squeeze %471 : memref<1x1x1x128xf32, #tpu.memory_space<vmem>> -> memref<128xf32, #tpu.memory_space<vmem>>
      %473 = tpu.memref_slice %arg9[%398, %c0_i32_453, %c5_i32_454] : memref<2x8x6x!tpu.dma_semaphore, #tpu.memory_space<semaphore_mem>> -> memref<1x1x1x!tpu.dma_semaphore, #tpu.memory_space<semaphore_mem>>
      %474 = tpu.memref_squeeze %473 : memref<1x1x1x!tpu.dma_semaphore, #tpu.memory_space<semaphore_mem>> -> memref<!tpu.dma_semaphore, #tpu.memory_space<semaphore_mem>>
      tpu.enqueue_dma source(%470 : memref<128xf32, #tpu.memory_space<any>>) target(%472 : memref<128xf32, #tpu.memory_space<vmem>>) target_semaphore(%474 : memref<!tpu.dma_semaphore, #tpu.memory_space<semaphore_mem>>)
      %c1_i32_457 = arith.constant 1 : i32
      %475 = arith.addi %399, %c1_i32_457 : i32
      %476 = arith.index_cast %475 : i32 to index
      %477 = memref.load %arg1[%476] : memref<8xi32, #tpu.memory_space<smem>>
      %c1_i32_458 = arith.constant 1 : i32
      %c1_i32_459 = arith.constant 1 : i32
      %c0_i32_460 = arith.constant 0 : i32
      %478 = tpu.memref_slice %arg3[%477, %c0_i32_460] : memref<64x128xf32, #tpu.memory_space<any>> -> memref<1x128xf32, #tpu.memory_space<any>>
      %479 = tpu.memref_squeeze %478 : memref<1x128xf32, #tpu.memory_space<any>> -> memref<128xf32, #tpu.memory_space<any>>
      %c0_i32_461 = arith.constant 0 : i32
      %480 = tpu.memref_slice %arg6[%398, %c1_i32_458, %c0_i32_461] : memref<2x8x128xf32, #tpu.memory_space<vmem>> -> memref<1x1x128xf32, #tpu.memory_space<vmem>>
      %481 = tpu.memref_squeeze %480 : memref<1x1x128xf32, #tpu.memory_space<vmem>> -> memref<128xf32, #tpu.memory_space<vmem>>
      %482 = tpu.memref_slice %arg8[%398, %c1_i32_459] : memref<2x8x!tpu.dma_semaphore, #tpu.memory_space<semaphore_mem>> -> memref<1x1x!tpu.dma_semaphore, #tpu.memory_space<semaphore_mem>>
      %483 = tpu.memref_squeeze %482 : memref<1x1x!tpu.dma_semaphore, #tpu.memory_space<semaphore_mem>> -> memref<!tpu.dma_semaphore, #tpu.memory_space<semaphore_mem>>
      tpu.enqueue_dma source(%479 : memref<128xf32, #tpu.memory_space<any>>) target(%481 : memref<128xf32, #tpu.memory_space<vmem>>) target_semaphore(%483 : memref<!tpu.dma_semaphore, #tpu.memory_space<semaphore_mem>>)
      %c1_i32_462 = arith.constant 1 : i32
      %484 = arith.addi %399, %c1_i32_462 : i32
      %c6_i32_463 = arith.constant 6 : i32
      %485 = arith.muli %484, %c6_i32_463 : i32
      %c0_i32_464 = arith.constant 0 : i32
      %486 = arith.addi %485, %c0_i32_464 : i32
      %487 = arith.index_cast %486 : i32 to index
      %488 = memref.load %arg2[%487] : memref<48xi32, #tpu.memory_space<smem>>
      %c1_i32_465 = arith.constant 1 : i32
      %c0_i32_466 = arith.constant 0 : i32
      %c1_i32_467 = arith.constant 1 : i32
      %c0_i32_468 = arith.constant 0 : i32
      %c0_i32_469 = arith.constant 0 : i32
      %489 = tpu.memref_slice %arg4[%488, %c0_i32_469] : memref<64x128xf32, #tpu.memory_space<any>> -> memref<1x128xf32, #tpu.memory_space<any>>
      %490 = tpu.memref_squeeze %489 : memref<1x128xf32, #tpu.memory_space<any>> -> memref<128xf32, #tpu.memory_space<any>>
      %c0_i32_470 = arith.constant 0 : i32
      %491 = tpu.memref_slice %arg7[%398, %c1_i32_465, %c0_i32_466, %c0_i32_470] : memref<2x8x6x128xf32, #tpu.memory_space<vmem>> -> memref<1x1x1x128xf32, #tpu.memory_space<vmem>>
      %492 = tpu.memref_squeeze %491 : memref<1x1x1x128xf32, #tpu.memory_space<vmem>> -> memref<128xf32, #tpu.memory_space<vmem>>
      %493 = tpu.memref_slice %arg9[%398, %c1_i32_467, %c0_i32_468] : memref<2x8x6x!tpu.dma_semaphore, #tpu.memory_space<semaphore_mem>> -> memref<1x1x1x!tpu.dma_semaphore, #tpu.memory_space<semaphore_mem>>
      %494 = tpu.memref_squeeze %493 : memref<1x1x1x!tpu.dma_semaphore, #tpu.memory_space<semaphore_mem>> -> memref<!tpu.dma_semaphore, #tpu.memory_space<semaphore_mem>>
      tpu.enqueue_dma source(%490 : memref<128xf32, #tpu.memory_space<any>>) target(%492 : memref<128xf32, #tpu.memory_space<vmem>>) target_semaphore(%494 : memref<!tpu.dma_semaphore, #tpu.memory_space<semaphore_mem>>)
      %c1_i32_471 = arith.constant 1 : i32
      %495 = arith.addi %399, %c1_i32_471 : i32
      %c6_i32_472 = arith.constant 6 : i32
      %496 = arith.muli %495, %c6_i32_472 : i32
      %c1_i32_473 = arith.constant 1 : i32
      %497 = arith.addi %496, %c1_i32_473 : i32
      %498 = arith.index_cast %497 : i32 to index
      %499 = memref.load %arg2[%498] : memref<48xi32, #tpu.memory_space<smem>>
      %c1_i32_474 = arith.constant 1 : i32
      %c1_i32_475 = arith.constant 1 : i32
      %c1_i32_476 = arith.constant 1 : i32
      %c1_i32_477 = arith.constant 1 : i32
      %c0_i32_478 = arith.constant 0 : i32
      %500 = tpu.memref_slice %arg4[%499, %c0_i32_478] : memref<64x128xf32, #tpu.memory_space<any>> -> memref<1x128xf32, #tpu.memory_space<any>>
      %501 = tpu.memref_squeeze %500 : memref<1x128xf32, #tpu.memory_space<any>> -> memref<128xf32, #tpu.memory_space<any>>
      %c0_i32_479 = arith.constant 0 : i32
      %502 = tpu.memref_slice %arg7[%398, %c1_i32_474, %c1_i32_475, %c0_i32_479] : memref<2x8x6x128xf32, #tpu.memory_space<vmem>> -> memref<1x1x1x128xf32, #tpu.memory_space<vmem>>
      %503 = tpu.memref_squeeze %502 : memref<1x1x1x128xf32, #tpu.memory_space<vmem>> -> memref<128xf32, #tpu.memory_space<vmem>>
      %504 = tpu.memref_slice %arg9[%398, %c1_i32_476, %c1_i32_477] : memref<2x8x6x!tpu.dma_semaphore, #tpu.memory_space<semaphore_mem>> -> memref<1x1x1x!tpu.dma_semaphore, #tpu.memory_space<semaphore_mem>>
      %505 = tpu.memref_squeeze %504 : memref<1x1x1x!tpu.dma_semaphore, #tpu.memory_space<semaphore_mem>> -> memref<!tpu.dma_semaphore, #tpu.memory_space<semaphore_mem>>
      tpu.enqueue_dma source(%501 : memref<128xf32, #tpu.memory_space<any>>) target(%503 : memref<128xf32, #tpu.memory_space<vmem>>) target_semaphore(%505 : memref<!tpu.dma_semaphore, #tpu.memory_space<semaphore_mem>>)
      %c1_i32_480 = arith.constant 1 : i32
      %506 = arith.addi %399, %c1_i32_480 : i32
      %c6_i32_481 = arith.constant 6 : i32
      %507 = arith.muli %506, %c6_i32_481 : i32
      %c2_i32_482 = arith.constant 2 : i32
      %508 = arith.addi %507, %c2_i32_482 : i32
      %509 = arith.index_cast %508 : i32 to index
      %510 = memref.load %arg2[%509] : memref<48xi32, #tpu.memory_space<smem>>
      %c1_i32_483 = arith.constant 1 : i32
      %c2_i32_484 = arith.constant 2 : i32
      %c1_i32_485 = arith.constant 1 : i32
      %c2_i32_486 = arith.constant 2 : i32
      %c0_i32_487 = arith.constant 0 : i32
      %511 = tpu.memref_slice %arg4[%510, %c0_i32_487] : memref<64x128xf32, #tpu.memory_space<any>> -> memref<1x128xf32, #tpu.memory_space<any>>
      %512 = tpu.memref_squeeze %511 : memref<1x128xf32, #tpu.memory_space<any>> -> memref<128xf32, #tpu.memory_space<any>>
      %c0_i32_488 = arith.constant 0 : i32
      %513 = tpu.memref_slice %arg7[%398, %c1_i32_483, %c2_i32_484, %c0_i32_488] : memref<2x8x6x128xf32, #tpu.memory_space<vmem>> -> memref<1x1x1x128xf32, #tpu.memory_space<vmem>>
      %514 = tpu.memref_squeeze %513 : memref<1x1x1x128xf32, #tpu.memory_space<vmem>> -> memref<128xf32, #tpu.memory_space<vmem>>
      %515 = tpu.memref_slice %arg9[%398, %c1_i32_485, %c2_i32_486] : memref<2x8x6x!tpu.dma_semaphore, #tpu.memory_space<semaphore_mem>> -> memref<1x1x1x!tpu.dma_semaphore, #tpu.memory_space<semaphore_mem>>
      %516 = tpu.memref_squeeze %515 : memref<1x1x1x!tpu.dma_semaphore, #tpu.memory_space<semaphore_mem>> -> memref<!tpu.dma_semaphore, #tpu.memory_space<semaphore_mem>>
      tpu.enqueue_dma source(%512 : memref<128xf32, #tpu.memory_space<any>>) target(%514 : memref<128xf32, #tpu.memory_space<vmem>>) target_semaphore(%516 : memref<!tpu.dma_semaphore, #tpu.memory_space<semaphore_mem>>)
      %c1_i32_489 = arith.constant 1 : i32
      %517 = arith.addi %399, %c1_i32_489 : i32
      %c6_i32_490 = arith.constant 6 : i32
      %518 = arith.muli %517, %c6_i32_490 : i32
      %c3_i32_491 = arith.constant 3 : i32
      %519 = arith.addi %518, %c3_i32_491 : i32
      %520 = arith.index_cast %519 : i32 to index
      %521 = memref.load %arg2[%520] : memref<48xi32, #tpu.memory_space<smem>>
      %c1_i32_492 = arith.constant 1 : i32
      %c3_i32_493 = arith.constant 3 : i32
      %c1_i32_494 = arith.constant 1 : i32
      %c3_i32_495 = arith.constant 3 : i32
      %c0_i32_496 = arith.constant 0 : i32
      %522 = tpu.memref_slice %arg4[%521, %c0_i32_496] : memref<64x128xf32, #tpu.memory_space<any>> -> memref<1x128xf32, #tpu.memory_space<any>>
      %523 = tpu.memref_squeeze %522 : memref<1x128xf32, #tpu.memory_space<any>> -> memref<128xf32, #tpu.memory_space<any>>
      %c0_i32_497 = arith.constant 0 : i32
      %524 = tpu.memref_slice %arg7[%398, %c1_i32_492, %c3_i32_493, %c0_i32_497] : memref<2x8x6x128xf32, #tpu.memory_space<vmem>> -> memref<1x1x1x128xf32, #tpu.memory_space<vmem>>
      %525 = tpu.memref_squeeze %524 : memref<1x1x1x128xf32, #tpu.memory_space<vmem>> -> memref<128xf32, #tpu.memory_space<vmem>>
      %526 = tpu.memref_slice %arg9[%398, %c1_i32_494, %c3_i32_495] : memref<2x8x6x!tpu.dma_semaphore, #tpu.memory_space<semaphore_mem>> -> memref<1x1x1x!tpu.dma_semaphore, #tpu.memory_space<semaphore_mem>>
      %527 = tpu.memref_squeeze %526 : memref<1x1x1x!tpu.dma_semaphore, #tpu.memory_space<semaphore_mem>> -> memref<!tpu.dma_semaphore, #tpu.memory_space<semaphore_mem>>
      tpu.enqueue_dma source(%523 : memref<128xf32, #tpu.memory_space<any>>) target(%525 : memref<128xf32, #tpu.memory_space<vmem>>) target_semaphore(%527 : memref<!tpu.dma_semaphore, #tpu.memory_space<semaphore_mem>>)
      %c1_i32_498 = arith.constant 1 : i32
      %528 = arith.addi %399, %c1_i32_498 : i32
      %c6_i32_499 = arith.constant 6 : i32
      %529 = arith.muli %528, %c6_i32_499 : i32
      %c4_i32_500 = arith.constant 4 : i32
      %530 = arith.addi %529, %c4_i32_500 : i32
      %531 = arith.index_cast %530 : i32 to index
      %532 = memref.load %arg2[%531] : memref<48xi32, #tpu.memory_space<smem>>
      %c1_i32_501 = arith.constant 1 : i32
      %c4_i32_502 = arith.constant 4 : i32
      %c1_i32_503 = arith.constant 1 : i32
      %c4_i32_504 = arith.constant 4 : i32
      %c0_i32_505 = arith.constant 0 : i32
      %533 = tpu.memref_slice %arg4[%532, %c0_i32_505] : memref<64x128xf32, #tpu.memory_space<any>> -> memref<1x128xf32, #tpu.memory_space<any>>
      %534 = tpu.memref_squeeze %533 : memref<1x128xf32, #tpu.memory_space<any>> -> memref<128xf32, #tpu.memory_space<any>>
      %c0_i32_506 = arith.constant 0 : i32
      %535 = tpu.memref_slice %arg7[%398, %c1_i32_501, %c4_i32_502, %c0_i32_506] : memref<2x8x6x128xf32, #tpu.memory_space<vmem>> -> memref<1x1x1x128xf32, #tpu.memory_space<vmem>>
      %536 = tpu.memref_squeeze %535 : memref<1x1x1x128xf32, #tpu.memory_space<vmem>> -> memref<128xf32, #tpu.memory_space<vmem>>
      %537 = tpu.memref_slice %arg9[%398, %c1_i32_503, %c4_i32_504] : memref<2x8x6x!tpu.dma_semaphore, #tpu.memory_space<semaphore_mem>> -> memref<1x1x1x!tpu.dma_semaphore, #tpu.memory_space<semaphore_mem>>
      %538 = tpu.memref_squeeze %537 : memref<1x1x1x!tpu.dma_semaphore, #tpu.memory_space<semaphore_mem>> -> memref<!tpu.dma_semaphore, #tpu.memory_space<semaphore_mem>>
      tpu.enqueue_dma source(%534 : memref<128xf32, #tpu.memory_space<any>>) target(%536 : memref<128xf32, #tpu.memory_space<vmem>>) target_semaphore(%538 : memref<!tpu.dma_semaphore, #tpu.memory_space<semaphore_mem>>)
      %c1_i32_507 = arith.constant 1 : i32
      %539 = arith.addi %399, %c1_i32_507 : i32
      %c6_i32_508 = arith.constant 6 : i32
      %540 = arith.muli %539, %c6_i32_508 : i32
      %c5_i32_509 = arith.constant 5 : i32
      %541 = arith.addi %540, %c5_i32_509 : i32
      %542 = arith.index_cast %541 : i32 to index
      %543 = memref.load %arg2[%542] : memref<48xi32, #tpu.memory_space<smem>>
      %c1_i32_510 = arith.constant 1 : i32
      %c5_i32_511 = arith.constant 5 : i32
      %c1_i32_512 = arith.constant 1 : i32
      %c5_i32_513 = arith.constant 5 : i32
      %c0_i32_514 = arith.constant 0 : i32
      %544 = tpu.memref_slice %arg4[%543, %c0_i32_514] : memref<64x128xf32, #tpu.memory_space<any>> -> memref<1x128xf32, #tpu.memory_space<any>>
      %545 = tpu.memref_squeeze %544 : memref<1x128xf32, #tpu.memory_space<any>> -> memref<128xf32, #tpu.memory_space<any>>
      %c0_i32_515 = arith.constant 0 : i32
      %546 = tpu.memref_slice %arg7[%398, %c1_i32_510, %c5_i32_511, %c0_i32_515] : memref<2x8x6x128xf32, #tpu.memory_space<vmem>> -> memref<1x1x1x128xf32, #tpu.memory_space<vmem>>
      %547 = tpu.memref_squeeze %546 : memref<1x1x1x128xf32, #tpu.memory_space<vmem>> -> memref<128xf32, #tpu.memory_space<vmem>>
      %548 = tpu.memref_slice %arg9[%398, %c1_i32_512, %c5_i32_513] : memref<2x8x6x!tpu.dma_semaphore, #tpu.memory_space<semaphore_mem>> -> memref<1x1x1x!tpu.dma_semaphore, #tpu.memory_space<semaphore_mem>>
      %549 = tpu.memref_squeeze %548 : memref<1x1x1x!tpu.dma_semaphore, #tpu.memory_space<semaphore_mem>> -> memref<!tpu.dma_semaphore, #tpu.memory_space<semaphore_mem>>
      tpu.enqueue_dma source(%545 : memref<128xf32, #tpu.memory_space<any>>) target(%547 : memref<128xf32, #tpu.memory_space<vmem>>) target_semaphore(%549 : memref<!tpu.dma_semaphore, #tpu.memory_space<semaphore_mem>>)
      %c2_i32_516 = arith.constant 2 : i32
      %550 = arith.addi %399, %c2_i32_516 : i32
      %551 = arith.index_cast %550 : i32 to index
      %552 = memref.load %arg1[%551] : memref<8xi32, #tpu.memory_space<smem>>
      %c2_i32_517 = arith.constant 2 : i32
      %c2_i32_518 = arith.constant 2 : i32
      %c0_i32_519 = arith.constant 0 : i32
      %553 = tpu.memref_slice %arg3[%552, %c0_i32_519] : memref<64x128xf32, #tpu.memory_space<any>> -> memref<1x128xf32, #tpu.memory_space<any>>
      %554 = tpu.memref_squeeze %553 : memref<1x128xf32, #tpu.memory_space<any>> -> memref<128xf32, #tpu.memory_space<any>>
      %c0_i32_520 = arith.constant 0 : i32
      %555 = tpu.memref_slice %arg6[%398, %c2_i32_517, %c0_i32_520] : memref<2x8x128xf32, #tpu.memory_space<vmem>> -> memref<1x1x128xf32, #tpu.memory_space<vmem>>
      %556 = tpu.memref_squeeze %555 : memref<1x1x128xf32, #tpu.memory_space<vmem>> -> memref<128xf32, #tpu.memory_space<vmem>>
      %557 = tpu.memref_slice %arg8[%398, %c2_i32_518] : memref<2x8x!tpu.dma_semaphore, #tpu.memory_space<semaphore_mem>> -> memref<1x1x!tpu.dma_semaphore, #tpu.memory_space<semaphore_mem>>
      %558 = tpu.memref_squeeze %557 : memref<1x1x!tpu.dma_semaphore, #tpu.memory_space<semaphore_mem>> -> memref<!tpu.dma_semaphore, #tpu.memory_space<semaphore_mem>>
      tpu.enqueue_dma source(%554 : memref<128xf32, #tpu.memory_space<any>>) target(%556 : memref<128xf32, #tpu.memory_space<vmem>>) target_semaphore(%558 : memref<!tpu.dma_semaphore, #tpu.memory_space<semaphore_mem>>)
      %c2_i32_521 = arith.constant 2 : i32
      %559 = arith.addi %399, %c2_i32_521 : i32
      %c6_i32_522 = arith.constant 6 : i32
      %560 = arith.muli %559, %c6_i32_522 : i32
      %c0_i32_523 = arith.constant 0 : i32
      %561 = arith.addi %560, %c0_i32_523 : i32
      %562 = arith.index_cast %561 : i32 to index
      %563 = memref.load %arg2[%562] : memref<48xi32, #tpu.memory_space<smem>>
      %c2_i32_524 = arith.constant 2 : i32
      %c0_i32_525 = arith.constant 0 : i32
      %c2_i32_526 = arith.constant 2 : i32
      %c0_i32_527 = arith.constant 0 : i32
      %c0_i32_528 = arith.constant 0 : i32
      %564 = tpu.memref_slice %arg4[%563, %c0_i32_528] : memref<64x128xf32, #tpu.memory_space<any>> -> memref<1x128xf32, #tpu.memory_space<any>>
      %565 = tpu.memref_squeeze %564 : memref<1x128xf32, #tpu.memory_space<any>> -> memref<128xf32, #tpu.memory_space<any>>
      %c0_i32_529 = arith.constant 0 : i32
      %566 = tpu.memref_slice %arg7[%398, %c2_i32_524, %c0_i32_525, %c0_i32_529] : memref<2x8x6x128xf32, #tpu.memory_space<vmem>> -> memref<1x1x1x128xf32, #tpu.memory_space<vmem>>
      %567 = tpu.memref_squeeze %566 : memref<1x1x1x128xf32, #tpu.memory_space<vmem>> -> memref<128xf32, #tpu.memory_space<vmem>>
      %568 = tpu.memref_slice %arg9[%398, %c2_i32_526, %c0_i32_527] : memref<2x8x6x!tpu.dma_semaphore, #tpu.memory_space<semaphore_mem>> -> memref<1x1x1x!tpu.dma_semaphore, #tpu.memory_space<semaphore_mem>>
      %569 = tpu.memref_squeeze %568 : memref<1x1x1x!tpu.dma_semaphore, #tpu.memory_space<semaphore_mem>> -> memref<!tpu.dma_semaphore, #tpu.memory_space<semaphore_mem>>
      tpu.enqueue_dma source(%565 : memref<128xf32, #tpu.memory_space<any>>) target(%567 : memref<128xf32, #tpu.memory_space<vmem>>) target_semaphore(%569 : memref<!tpu.dma_semaphore, #tpu.memory_space<semaphore_mem>>)
      %c2_i32_530 = arith.constant 2 : i32
      %570 = arith.addi %399, %c2_i32_530 : i32
      %c6_i32_531 = arith.constant 6 : i32
      %571 = arith.muli %570, %c6_i32_531 : i32
      %c1_i32_532 = arith.constant 1 : i32
      %572 = arith.addi %571, %c1_i32_532 : i32
      %573 = arith.index_cast %572 : i32 to index
      %574 = memref.load %arg2[%573] : memref<48xi32, #tpu.memory_space<smem>>
      %c2_i32_533 = arith.constant 2 : i32
      %c1_i32_534 = arith.constant 1 : i32
      %c2_i32_535 = arith.constant 2 : i32
      %c1_i32_536 = arith.constant 1 : i32
      %c0_i32_537 = arith.constant 0 : i32
      %575 = tpu.memref_slice %arg4[%574, %c0_i32_537] : memref<64x128xf32, #tpu.memory_space<any>> -> memref<1x128xf32, #tpu.memory_space<any>>
      %576 = tpu.memref_squeeze %575 : memref<1x128xf32, #tpu.memory_space<any>> -> memref<128xf32, #tpu.memory_space<any>>
      %c0_i32_538 = arith.constant 0 : i32
      %577 = tpu.memref_slice %arg7[%398, %c2_i32_533, %c1_i32_534, %c0_i32_538] : memref<2x8x6x128xf32, #tpu.memory_space<vmem>> -> memref<1x1x1x128xf32, #tpu.memory_space<vmem>>
      %578 = tpu.memref_squeeze %577 : memref<1x1x1x128xf32, #tpu.memory_space<vmem>> -> memref<128xf32, #tpu.memory_space<vmem>>
      %579 = tpu.memref_slice %arg9[%398, %c2_i32_535, %c1_i32_536] : memref<2x8x6x!tpu.dma_semaphore, #tpu.memory_space<semaphore_mem>> -> memref<1x1x1x!tpu.dma_semaphore, #tpu.memory_space<semaphore_mem>>
      %580 = tpu.memref_squeeze %579 : memref<1x1x1x!tpu.dma_semaphore, #tpu.memory_space<semaphore_mem>> -> memref<!tpu.dma_semaphore, #tpu.memory_space<semaphore_mem>>
      tpu.enqueue_dma source(%576 : memref<128xf32, #tpu.memory_space<any>>) target(%578 : memref<128xf32, #tpu.memory_space<vmem>>) target_semaphore(%580 : memref<!tpu.dma_semaphore, #tpu.memory_space<semaphore_mem>>)
      %c2_i32_539 = arith.constant 2 : i32
      %581 = arith.addi %399, %c2_i32_539 : i32
      %c6_i32_540 = arith.constant 6 : i32
      %582 = arith.muli %581, %c6_i32_540 : i32
      %c2_i32_541 = arith.constant 2 : i32
      %583 = arith.addi %582, %c2_i32_541 : i32
      %584 = arith.index_cast %583 : i32 to index
      %585 = memref.load %arg2[%584] : memref<48xi32, #tpu.memory_space<smem>>
      %c2_i32_542 = arith.constant 2 : i32
      %c2_i32_543 = arith.constant 2 : i32
      %c2_i32_544 = arith.constant 2 : i32
      %c2_i32_545 = arith.constant 2 : i32
      %c0_i32_546 = arith.constant 0 : i32
      %586 = tpu.memref_slice %arg4[%585, %c0_i32_546] : memref<64x128xf32, #tpu.memory_space<any>> -> memref<1x128xf32, #tpu.memory_space<any>>
      %587 = tpu.memref_squeeze %586 : memref<1x128xf32, #tpu.memory_space<any>> -> memref<128xf32, #tpu.memory_space<any>>
      %c0_i32_547 = arith.constant 0 : i32
      %588 = tpu.memref_slice %arg7[%398, %c2_i32_542, %c2_i32_543, %c0_i32_547] : memref<2x8x6x128xf32, #tpu.memory_space<vmem>> -> memref<1x1x1x128xf32, #tpu.memory_space<vmem>>
      %589 = tpu.memref_squeeze %588 : memref<1x1x1x128xf32, #tpu.memory_space<vmem>> -> memref<128xf32, #tpu.memory_space<vmem>>
      %590 = tpu.memref_slice %arg9[%398, %c2_i32_544, %c2_i32_545] : memref<2x8x6x!tpu.dma_semaphore, #tpu.memory_space<semaphore_mem>> -> memref<1x1x1x!tpu.dma_semaphore, #tpu.memory_space<semaphore_mem>>
      %591 = tpu.memref_squeeze %590 : memref<1x1x1x!tpu.dma_semaphore, #tpu.memory_space<semaphore_mem>> -> memref<!tpu.dma_semaphore, #tpu.memory_space<semaphore_mem>>
      tpu.enqueue_dma source(%587 : memref<128xf32, #tpu.memory_space<any>>) target(%589 : memref<128xf32, #tpu.memory_space<vmem>>) target_semaphore(%591 : memref<!tpu.dma_semaphore, #tpu.memory_space<semaphore_mem>>)
      %c2_i32_548 = arith.constant 2 : i32
      %592 = arith.addi %399, %c2_i32_548 : i32
      %c6_i32_549 = arith.constant 6 : i32
      %593 = arith.muli %592, %c6_i32_549 : i32
      %c3_i32_550 = arith.constant 3 : i32
      %594 = arith.addi %593, %c3_i32_550 : i32
      %595 = arith.index_cast %594 : i32 to index
      %596 = memref.load %arg2[%595] : memref<48xi32, #tpu.memory_space<smem>>
      %c2_i32_551 = arith.constant 2 : i32
      %c3_i32_552 = arith.constant 3 : i32
      %c2_i32_553 = arith.constant 2 : i32
      %c3_i32_554 = arith.constant 3 : i32
      %c0_i32_555 = arith.constant 0 : i32
      %597 = tpu.memref_slice %arg4[%596, %c0_i32_555] : memref<64x128xf32, #tpu.memory_space<any>> -> memref<1x128xf32, #tpu.memory_space<any>>
      %598 = tpu.memref_squeeze %597 : memref<1x128xf32, #tpu.memory_space<any>> -> memref<128xf32, #tpu.memory_space<any>>
      %c0_i32_556 = arith.constant 0 : i32
      %599 = tpu.memref_slice %arg7[%398, %c2_i32_551, %c3_i32_552, %c0_i32_556] : memref<2x8x6x128xf32, #tpu.memory_space<vmem>> -> memref<1x1x1x128xf32, #tpu.memory_space<vmem>>
      %600 = tpu.memref_squeeze %599 : memref<1x1x1x128xf32, #tpu.memory_space<vmem>> -> memref<128xf32, #tpu.memory_space<vmem>>
      %601 = tpu.memref_slice %arg9[%398, %c2_i32_553, %c3_i32_554] : memref<2x8x6x!tpu.dma_semaphore, #tpu.memory_space<semaphore_mem>> -> memref<1x1x1x!tpu.dma_semaphore, #tpu.memory_space<semaphore_mem>>
      %602 = tpu.memref_squeeze %601 : memref<1x1x1x!tpu.dma_semaphore, #tpu.memory_space<semaphore_mem>> -> memref<!tpu.dma_semaphore, #tpu.memory_space<semaphore_mem>>
      tpu.enqueue_dma source(%598 : memref<128xf32, #tpu.memory_space<any>>) target(%600 : memref<128xf32, #tpu.memory_space<vmem>>) target_semaphore(%602 : memref<!tpu.dma_semaphore, #tpu.memory_space<semaphore_mem>>)
      %c2_i32_557 = arith.constant 2 : i32
      %603 = arith.addi %399, %c2_i32_557 : i32
      %c6_i32_558 = arith.constant 6 : i32
      %604 = arith.muli %603, %c6_i32_558 : i32
      %c4_i32_559 = arith.constant 4 : i32
      %605 = arith.addi %604, %c4_i32_559 : i32
      %606 = arith.index_cast %605 : i32 to index
      %607 = memref.load %arg2[%606] : memref<48xi32, #tpu.memory_space<smem>>
      %c2_i32_560 = arith.constant 2 : i32
      %c4_i32_561 = arith.constant 4 : i32
      %c2_i32_562 = arith.constant 2 : i32
      %c4_i32_563 = arith.constant 4 : i32
      %c0_i32_564 = arith.constant 0 : i32
      %608 = tpu.memref_slice %arg4[%607, %c0_i32_564] : memref<64x128xf32, #tpu.memory_space<any>> -> memref<1x128xf32, #tpu.memory_space<any>>
      %609 = tpu.memref_squeeze %608 : memref<1x128xf32, #tpu.memory_space<any>> -> memref<128xf32, #tpu.memory_space<any>>
      %c0_i32_565 = arith.constant 0 : i32
      %610 = tpu.memref_slice %arg7[%398, %c2_i32_560, %c4_i32_561, %c0_i32_565] : memref<2x8x6x128xf32, #tpu.memory_space<vmem>> -> memref<1x1x1x128xf32, #tpu.memory_space<vmem>>
      %611 = tpu.memref_squeeze %610 : memref<1x1x1x128xf32, #tpu.memory_space<vmem>> -> memref<128xf32, #tpu.memory_space<vmem>>
      %612 = tpu.memref_slice %arg9[%398, %c2_i32_562, %c4_i32_563] : memref<2x8x6x!tpu.dma_semaphore, #tpu.memory_space<semaphore_mem>> -> memref<1x1x1x!tpu.dma_semaphore, #tpu.memory_space<semaphore_mem>>
      %613 = tpu.memref_squeeze %612 : memref<1x1x1x!tpu.dma_semaphore, #tpu.memory_space<semaphore_mem>> -> memref<!tpu.dma_semaphore, #tpu.memory_space<semaphore_mem>>
      tpu.enqueue_dma source(%609 : memref<128xf32, #tpu.memory_space<any>>) target(%611 : memref<128xf32, #tpu.memory_space<vmem>>) target_semaphore(%613 : memref<!tpu.dma_semaphore, #tpu.memory_space<semaphore_mem>>)
      %c2_i32_566 = arith.constant 2 : i32
      %614 = arith.addi %399, %c2_i32_566 : i32
      %c6_i32_567 = arith.constant 6 : i32
      %615 = arith.muli %614, %c6_i32_567 : i32
      %c5_i32_568 = arith.constant 5 : i32
      %616 = arith.addi %615, %c5_i32_568 : i32
      %617 = arith.index_cast %616 : i32 to index
      %618 = memref.load %arg2[%617] : memref<48xi32, #tpu.memory_space<smem>>
      %c2_i32_569 = arith.constant 2 : i32
      %c5_i32_570 = arith.constant 5 : i32
      %c2_i32_571 = arith.constant 2 : i32
      %c5_i32_572 = arith.constant 5 : i32
      %c0_i32_573 = arith.constant 0 : i32
      %619 = tpu.memref_slice %arg4[%618, %c0_i32_573] : memref<64x128xf32, #tpu.memory_space<any>> -> memref<1x128xf32, #tpu.memory_space<any>>
      %620 = tpu.memref_squeeze %619 : memref<1x128xf32, #tpu.memory_space<any>> -> memref<128xf32, #tpu.memory_space<any>>
      %c0_i32_574 = arith.constant 0 : i32
      %621 = tpu.memref_slice %arg7[%398, %c2_i32_569, %c5_i32_570, %c0_i32_574] : memref<2x8x6x128xf32, #tpu.memory_space<vmem>> -> memref<1x1x1x128xf32, #tpu.memory_space<vmem>>
      %622 = tpu.memref_squeeze %621 : memref<1x1x1x128xf32, #tpu.memory_space<vmem>> -> memref<128xf32, #tpu.memory_space<vmem>>
      %623 = tpu.memref_slice %arg9[%398, %c2_i32_571, %c5_i32_572] : memref<2x8x6x!tpu.dma_semaphore, #tpu.memory_space<semaphore_mem>> -> memref<1x1x1x!tpu.dma_semaphore, #tpu.memory_space<semaphore_mem>>
      %624 = tpu.memref_squeeze %623 : memref<1x1x1x!tpu.dma_semaphore, #tpu.memory_space<semaphore_mem>> -> memref<!tpu.dma_semaphore, #tpu.memory_space<semaphore_mem>>
      tpu.enqueue_dma source(%620 : memref<128xf32, #tpu.memory_space<any>>) target(%622 : memref<128xf32, #tpu.memory_space<vmem>>) target_semaphore(%624 : memref<!tpu.dma_semaphore, #tpu.memory_space<semaphore_mem>>)
      %c3_i32_575 = arith.constant 3 : i32
      %625 = arith.addi %399, %c3_i32_575 : i32
      %626 = arith.index_cast %625 : i32 to index
      %627 = memref.load %arg1[%626] : memref<8xi32, #tpu.memory_space<smem>>
      %c3_i32_576 = arith.constant 3 : i32
      %c3_i32_577 = arith.constant 3 : i32
      %c0_i32_578 = arith.constant 0 : i32
      %628 = tpu.memref_slice %arg3[%627, %c0_i32_578] : memref<64x128xf32, #tpu.memory_space<any>> -> memref<1x128xf32, #tpu.memory_space<any>>
      %629 = tpu.memref_squeeze %628 : memref<1x128xf32, #tpu.memory_space<any>> -> memref<128xf32, #tpu.memory_space<any>>
      %c0_i32_579 = arith.constant 0 : i32
      %630 = tpu.memref_slice %arg6[%398, %c3_i32_576, %c0_i32_579] : memref<2x8x128xf32, #tpu.memory_space<vmem>> -> memref<1x1x128xf32, #tpu.memory_space<vmem>>
      %631 = tpu.memref_squeeze %630 : memref<1x1x128xf32, #tpu.memory_space<vmem>> -> memref<128xf32, #tpu.memory_space<vmem>>
      %632 = tpu.memref_slice %arg8[%398, %c3_i32_577] : memref<2x8x!tpu.dma_semaphore, #tpu.memory_space<semaphore_mem>> -> memref<1x1x!tpu.dma_semaphore, #tpu.memory_space<semaphore_mem>>
      %633 = tpu.memref_squeeze %632 : memref<1x1x!tpu.dma_semaphore, #tpu.memory_space<semaphore_mem>> -> memref<!tpu.dma_semaphore, #tpu.memory_space<semaphore_mem>>
      tpu.enqueue_dma source(%629 : memref<128xf32, #tpu.memory_space<any>>) target(%631 : memref<128xf32, #tpu.memory_space<vmem>>) target_semaphore(%633 : memref<!tpu.dma_semaphore, #tpu.memory_space<semaphore_mem>>)
      %c3_i32_580 = arith.constant 3 : i32
      %634 = arith.addi %399, %c3_i32_580 : i32
      %c6_i32_581 = arith.constant 6 : i32
      %635 = arith.muli %634, %c6_i32_581 : i32
      %c0_i32_582 = arith.constant 0 : i32
      %636 = arith.addi %635, %c0_i32_582 : i32
      %637 = arith.index_cast %636 : i32 to index
      %638 = memref.load %arg2[%637] : memref<48xi32, #tpu.memory_space<smem>>
      %c3_i32_583 = arith.constant 3 : i32
      %c0_i32_584 = arith.constant 0 : i32
      %c3_i32_585 = arith.constant 3 : i32
      %c0_i32_586 = arith.constant 0 : i32
      %c0_i32_587 = arith.constant 0 : i32
      %639 = tpu.memref_slice %arg4[%638, %c0_i32_587] : memref<64x128xf32, #tpu.memory_space<any>> -> memref<1x128xf32, #tpu.memory_space<any>>
      %640 = tpu.memref_squeeze %639 : memref<1x128xf32, #tpu.memory_space<any>> -> memref<128xf32, #tpu.memory_space<any>>
      %c0_i32_588 = arith.constant 0 : i32
      %641 = tpu.memref_slice %arg7[%398, %c3_i32_583, %c0_i32_584, %c0_i32_588] : memref<2x8x6x128xf32, #tpu.memory_space<vmem>> -> memref<1x1x1x128xf32, #tpu.memory_space<vmem>>
      %642 = tpu.memref_squeeze %641 : memref<1x1x1x128xf32, #tpu.memory_space<vmem>> -> memref<128xf32, #tpu.memory_space<vmem>>
      %643 = tpu.memref_slice %arg9[%398, %c3_i32_585, %c0_i32_586] : memref<2x8x6x!tpu.dma_semaphore, #tpu.memory_space<semaphore_mem>> -> memref<1x1x1x!tpu.dma_semaphore, #tpu.memory_space<semaphore_mem>>
      %644 = tpu.memref_squeeze %643 : memref<1x1x1x!tpu.dma_semaphore, #tpu.memory_space<semaphore_mem>> -> memref<!tpu.dma_semaphore, #tpu.memory_space<semaphore_mem>>
      tpu.enqueue_dma source(%640 : memref<128xf32, #tpu.memory_space<any>>) target(%642 : memref<128xf32, #tpu.memory_space<vmem>>) target_semaphore(%644 : memref<!tpu.dma_semaphore, #tpu.memory_space<semaphore_mem>>)
      %c3_i32_589 = arith.constant 3 : i32
      %645 = arith.addi %399, %c3_i32_589 : i32
      %c6_i32_590 = arith.constant 6 : i32
      %646 = arith.muli %645, %c6_i32_590 : i32
      %c1_i32_591 = arith.constant 1 : i32
      %647 = arith.addi %646, %c1_i32_591 : i32
      %648 = arith.index_cast %647 : i32 to index
      %649 = memref.load %arg2[%648] : memref<48xi32, #tpu.memory_space<smem>>
      %c3_i32_592 = arith.constant 3 : i32
      %c1_i32_593 = arith.constant 1 : i32
      %c3_i32_594 = arith.constant 3 : i32
      %c1_i32_595 = arith.constant 1 : i32
      %c0_i32_596 = arith.constant 0 : i32
      %650 = tpu.memref_slice %arg4[%649, %c0_i32_596] : memref<64x128xf32, #tpu.memory_space<any>> -> memref<1x128xf32, #tpu.memory_space<any>>
      %651 = tpu.memref_squeeze %650 : memref<1x128xf32, #tpu.memory_space<any>> -> memref<128xf32, #tpu.memory_space<any>>
      %c0_i32_597 = arith.constant 0 : i32
      %652 = tpu.memref_slice %arg7[%398, %c3_i32_592, %c1_i32_593, %c0_i32_597] : memref<2x8x6x128xf32, #tpu.memory_space<vmem>> -> memref<1x1x1x128xf32, #tpu.memory_space<vmem>>
      %653 = tpu.memref_squeeze %652 : memref<1x1x1x128xf32, #tpu.memory_space<vmem>> -> memref<128xf32, #tpu.memory_space<vmem>>
      %654 = tpu.memref_slice %arg9[%398, %c3_i32_594, %c1_i32_595] : memref<2x8x6x!tpu.dma_semaphore, #tpu.memory_space<semaphore_mem>> -> memref<1x1x1x!tpu.dma_semaphore, #tpu.memory_space<semaphore_mem>>
      %655 = tpu.memref_squeeze %654 : memref<1x1x1x!tpu.dma_semaphore, #tpu.memory_space<semaphore_mem>> -> memref<!tpu.dma_semaphore, #tpu.memory_space<semaphore_mem>>
      tpu.enqueue_dma source(%651 : memref<128xf32, #tpu.memory_space<any>>) target(%653 : memref<128xf32, #tpu.memory_space<vmem>>) target_semaphore(%655 : memref<!tpu.dma_semaphore, #tpu.memory_space<semaphore_mem>>)
      %c3_i32_598 = arith.constant 3 : i32
      %656 = arith.addi %399, %c3_i32_598 : i32
      %c6_i32_599 = arith.constant 6 : i32
      %657 = arith.muli %656, %c6_i32_599 : i32
      %c2_i32_600 = arith.constant 2 : i32
      %658 = arith.addi %657, %c2_i32_600 : i32
      %659 = arith.index_cast %658 : i32 to index
      %660 = memref.load %arg2[%659] : memref<48xi32, #tpu.memory_space<smem>>
      %c3_i32_601 = arith.constant 3 : i32
      %c2_i32_602 = arith.constant 2 : i32
      %c3_i32_603 = arith.constant 3 : i32
      %c2_i32_604 = arith.constant 2 : i32
      %c0_i32_605 = arith.constant 0 : i32
      %661 = tpu.memref_slice %arg4[%660, %c0_i32_605] : memref<64x128xf32, #tpu.memory_space<any>> -> memref<1x128xf32, #tpu.memory_space<any>>
      %662 = tpu.memref_squeeze %661 : memref<1x128xf32, #tpu.memory_space<any>> -> memref<128xf32, #tpu.memory_space<any>>
      %c0_i32_606 = arith.constant 0 : i32
      %663 = tpu.memref_slice %arg7[%398, %c3_i32_601, %c2_i32_602, %c0_i32_606] : memref<2x8x6x128xf32, #tpu.memory_space<vmem>> -> memref<1x1x1x128xf32, #tpu.memory_space<vmem>>
      %664 = tpu.memref_squeeze %663 : memref<1x1x1x128xf32, #tpu.memory_space<vmem>> -> memref<128xf32, #tpu.memory_space<vmem>>
      %665 = tpu.memref_slice %arg9[%398, %c3_i32_603, %c2_i32_604] : memref<2x8x6x!tpu.dma_semaphore, #tpu.memory_space<semaphore_mem>> -> memref<1x1x1x!tpu.dma_semaphore, #tpu.memory_space<semaphore_mem>>
      %666 = tpu.memref_squeeze %665 : memref<1x1x1x!tpu.dma_semaphore, #tpu.memory_space<semaphore_mem>> -> memref<!tpu.dma_semaphore, #tpu.memory_space<semaphore_mem>>
      tpu.enqueue_dma source(%662 : memref<128xf32, #tpu.memory_space<any>>) target(%664 : memref<128xf32, #tpu.memory_space<vmem>>) target_semaphore(%666 : memref<!tpu.dma_semaphore, #tpu.memory_space<semaphore_mem>>)
      %c3_i32_607 = arith.constant 3 : i32
      %667 = arith.addi %399, %c3_i32_607 : i32
      %c6_i32_608 = arith.constant 6 : i32
      %668 = arith.muli %667, %c6_i32_608 : i32
      %c3_i32_609 = arith.constant 3 : i32
      %669 = arith.addi %668, %c3_i32_609 : i32
      %670 = arith.index_cast %669 : i32 to index
      %671 = memref.load %arg2[%670] : memref<48xi32, #tpu.memory_space<smem>>
      %c3_i32_610 = arith.constant 3 : i32
      %c3_i32_611 = arith.constant 3 : i32
      %c3_i32_612 = arith.constant 3 : i32
      %c3_i32_613 = arith.constant 3 : i32
      %c0_i32_614 = arith.constant 0 : i32
      %672 = tpu.memref_slice %arg4[%671, %c0_i32_614] : memref<64x128xf32, #tpu.memory_space<any>> -> memref<1x128xf32, #tpu.memory_space<any>>
      %673 = tpu.memref_squeeze %672 : memref<1x128xf32, #tpu.memory_space<any>> -> memref<128xf32, #tpu.memory_space<any>>
      %c0_i32_615 = arith.constant 0 : i32
      %674 = tpu.memref_slice %arg7[%398, %c3_i32_610, %c3_i32_611, %c0_i32_615] : memref<2x8x6x128xf32, #tpu.memory_space<vmem>> -> memref<1x1x1x128xf32, #tpu.memory_space<vmem>>
      %675 = tpu.memref_squeeze %674 : memref<1x1x1x128xf32, #tpu.memory_space<vmem>> -> memref<128xf32, #tpu.memory_space<vmem>>
      %676 = tpu.memref_slice %arg9[%398, %c3_i32_612, %c3_i32_613] : memref<2x8x6x!tpu.dma_semaphore, #tpu.memory_space<semaphore_mem>> -> memref<1x1x1x!tpu.dma_semaphore, #tpu.memory_space<semaphore_mem>>
      %677 = tpu.memref_squeeze %676 : memref<1x1x1x!tpu.dma_semaphore, #tpu.memory_space<semaphore_mem>> -> memref<!tpu.dma_semaphore, #tpu.memory_space<semaphore_mem>>
      tpu.enqueue_dma source(%673 : memref<128xf32, #tpu.memory_space<any>>) target(%675 : memref<128xf32, #tpu.memory_space<vmem>>) target_semaphore(%677 : memref<!tpu.dma_semaphore, #tpu.memory_space<semaphore_mem>>)
      %c3_i32_616 = arith.constant 3 : i32
      %678 = arith.addi %399, %c3_i32_616 : i32
      %c6_i32_617 = arith.constant 6 : i32
      %679 = arith.muli %678, %c6_i32_617 : i32
      %c4_i32_618 = arith.constant 4 : i32
      %680 = arith.addi %679, %c4_i32_618 : i32
      %681 = arith.index_cast %680 : i32 to index
      %682 = memref.load %arg2[%681] : memref<48xi32, #tpu.memory_space<smem>>
      %c3_i32_619 = arith.constant 3 : i32
      %c4_i32_620 = arith.constant 4 : i32
      %c3_i32_621 = arith.constant 3 : i32
      %c4_i32_622 = arith.constant 4 : i32
      %c0_i32_623 = arith.constant 0 : i32
      %683 = tpu.memref_slice %arg4[%682, %c0_i32_623] : memref<64x128xf32, #tpu.memory_space<any>> -> memref<1x128xf32, #tpu.memory_space<any>>
      %684 = tpu.memref_squeeze %683 : memref<1x128xf32, #tpu.memory_space<any>> -> memref<128xf32, #tpu.memory_space<any>>
      %c0_i32_624 = arith.constant 0 : i32
      %685 = tpu.memref_slice %arg7[%398, %c3_i32_619, %c4_i32_620, %c0_i32_624] : memref<2x8x6x128xf32, #tpu.memory_space<vmem>> -> memref<1x1x1x128xf32, #tpu.memory_space<vmem>>
      %686 = tpu.memref_squeeze %685 : memref<1x1x1x128xf32, #tpu.memory_space<vmem>> -> memref<128xf32, #tpu.memory_space<vmem>>
      %687 = tpu.memref_slice %arg9[%398, %c3_i32_621, %c4_i32_622] : memref<2x8x6x!tpu.dma_semaphore, #tpu.memory_space<semaphore_mem>> -> memref<1x1x1x!tpu.dma_semaphore, #tpu.memory_space<semaphore_mem>>
      %688 = tpu.memref_squeeze %687 : memref<1x1x1x!tpu.dma_semaphore, #tpu.memory_space<semaphore_mem>> -> memref<!tpu.dma_semaphore, #tpu.memory_space<semaphore_mem>>
      tpu.enqueue_dma source(%684 : memref<128xf32, #tpu.memory_space<any>>) target(%686 : memref<128xf32, #tpu.memory_space<vmem>>) target_semaphore(%688 : memref<!tpu.dma_semaphore, #tpu.memory_space<semaphore_mem>>)
      %c3_i32_625 = arith.constant 3 : i32
      %689 = arith.addi %399, %c3_i32_625 : i32
      %c6_i32_626 = arith.constant 6 : i32
      %690 = arith.muli %689, %c6_i32_626 : i32
      %c5_i32_627 = arith.constant 5 : i32
      %691 = arith.addi %690, %c5_i32_627 : i32
      %692 = arith.index_cast %691 : i32 to index
      %693 = memref.load %arg2[%692] : memref<48xi32, #tpu.memory_space<smem>>
      %c3_i32_628 = arith.constant 3 : i32
      %c5_i32_629 = arith.constant 5 : i32
      %c3_i32_630 = arith.constant 3 : i32
      %c5_i32_631 = arith.constant 5 : i32
      %c0_i32_632 = arith.constant 0 : i32
      %694 = tpu.memref_slice %arg4[%693, %c0_i32_632] : memref<64x128xf32, #tpu.memory_space<any>> -> memref<1x128xf32, #tpu.memory_space<any>>
      %695 = tpu.memref_squeeze %694 : memref<1x128xf32, #tpu.memory_space<any>> -> memref<128xf32, #tpu.memory_space<any>>
      %c0_i32_633 = arith.constant 0 : i32
      %696 = tpu.memref_slice %arg7[%398, %c3_i32_628, %c5_i32_629, %c0_i32_633] : memref<2x8x6x128xf32, #tpu.memory_space<vmem>> -> memref<1x1x1x128xf32, #tpu.memory_space<vmem>>
      %697 = tpu.memref_squeeze %696 : memref<1x1x1x128xf32, #tpu.memory_space<vmem>> -> memref<128xf32, #tpu.memory_space<vmem>>
      %698 = tpu.memref_slice %arg9[%398, %c3_i32_630, %c5_i32_631] : memref<2x8x6x!tpu.dma_semaphore, #tpu.memory_space<semaphore_mem>> -> memref<1x1x1x!tpu.dma_semaphore, #tpu.memory_space<semaphore_mem>>
      %699 = tpu.memref_squeeze %698 : memref<1x1x1x!tpu.dma_semaphore, #tpu.memory_space<semaphore_mem>> -> memref<!tpu.dma_semaphore, #tpu.memory_space<semaphore_mem>>
      tpu.enqueue_dma source(%695 : memref<128xf32, #tpu.memory_space<any>>) target(%697 : memref<128xf32, #tpu.memory_space<vmem>>) target_semaphore(%699 : memref<!tpu.dma_semaphore, #tpu.memory_space<semaphore_mem>>)
      %c4_i32_634 = arith.constant 4 : i32
      %700 = arith.addi %399, %c4_i32_634 : i32
      %701 = arith.index_cast %700 : i32 to index
      %702 = memref.load %arg1[%701] : memref<8xi32, #tpu.memory_space<smem>>
      %c4_i32_635 = arith.constant 4 : i32
      %c4_i32_636 = arith.constant 4 : i32
      %c0_i32_637 = arith.constant 0 : i32
      %703 = tpu.memref_slice %arg3[%702, %c0_i32_637] : memref<64x128xf32, #tpu.memory_space<any>> -> memref<1x128xf32, #tpu.memory_space<any>>
      %704 = tpu.memref_squeeze %703 : memref<1x128xf32, #tpu.memory_space<any>> -> memref<128xf32, #tpu.memory_space<any>>
      %c0_i32_638 = arith.constant 0 : i32
      %705 = tpu.memref_slice %arg6[%398, %c4_i32_635, %c0_i32_638] : memref<2x8x128xf32, #tpu.memory_space<vmem>> -> memref<1x1x128xf32, #tpu.memory_space<vmem>>
      %706 = tpu.memref_squeeze %705 : memref<1x1x128xf32, #tpu.memory_space<vmem>> -> memref<128xf32, #tpu.memory_space<vmem>>
      %707 = tpu.memref_slice %arg8[%398, %c4_i32_636] : memref<2x8x!tpu.dma_semaphore, #tpu.memory_space<semaphore_mem>> -> memref<1x1x!tpu.dma_semaphore, #tpu.memory_space<semaphore_mem>>
      %708 = tpu.memref_squeeze %707 : memref<1x1x!tpu.dma_semaphore, #tpu.memory_space<semaphore_mem>> -> memref<!tpu.dma_semaphore, #tpu.memory_space<semaphore_mem>>
      tpu.enqueue_dma source(%704 : memref<128xf32, #tpu.memory_space<any>>) target(%706 : memref<128xf32, #tpu.memory_space<vmem>>) target_semaphore(%708 : memref<!tpu.dma_semaphore, #tpu.memory_space<semaphore_mem>>)
      %c4_i32_639 = arith.constant 4 : i32
      %709 = arith.addi %399, %c4_i32_639 : i32
      %c6_i32_640 = arith.constant 6 : i32
      %710 = arith.muli %709, %c6_i32_640 : i32
      %c0_i32_641 = arith.constant 0 : i32
      %711 = arith.addi %710, %c0_i32_641 : i32
      %712 = arith.index_cast %711 : i32 to index
      %713 = memref.load %arg2[%712] : memref<48xi32, #tpu.memory_space<smem>>
      %c4_i32_642 = arith.constant 4 : i32
      %c0_i32_643 = arith.constant 0 : i32
      %c4_i32_644 = arith.constant 4 : i32
      %c0_i32_645 = arith.constant 0 : i32
      %c0_i32_646 = arith.constant 0 : i32
      %714 = tpu.memref_slice %arg4[%713, %c0_i32_646] : memref<64x128xf32, #tpu.memory_space<any>> -> memref<1x128xf32, #tpu.memory_space<any>>
      %715 = tpu.memref_squeeze %714 : memref<1x128xf32, #tpu.memory_space<any>> -> memref<128xf32, #tpu.memory_space<any>>
      %c0_i32_647 = arith.constant 0 : i32
      %716 = tpu.memref_slice %arg7[%398, %c4_i32_642, %c0_i32_643, %c0_i32_647] : memref<2x8x6x128xf32, #tpu.memory_space<vmem>> -> memref<1x1x1x128xf32, #tpu.memory_space<vmem>>
      %717 = tpu.memref_squeeze %716 : memref<1x1x1x128xf32, #tpu.memory_space<vmem>> -> memref<128xf32, #tpu.memory_space<vmem>>
      %718 = tpu.memref_slice %arg9[%398, %c4_i32_644, %c0_i32_645] : memref<2x8x6x!tpu.dma_semaphore, #tpu.memory_space<semaphore_mem>> -> memref<1x1x1x!tpu.dma_semaphore, #tpu.memory_space<semaphore_mem>>
      %719 = tpu.memref_squeeze %718 : memref<1x1x1x!tpu.dma_semaphore, #tpu.memory_space<semaphore_mem>> -> memref<!tpu.dma_semaphore, #tpu.memory_space<semaphore_mem>>
      tpu.enqueue_dma source(%715 : memref<128xf32, #tpu.memory_space<any>>) target(%717 : memref<128xf32, #tpu.memory_space<vmem>>) target_semaphore(%719 : memref<!tpu.dma_semaphore, #tpu.memory_space<semaphore_mem>>)
      %c4_i32_648 = arith.constant 4 : i32
      %720 = arith.addi %399, %c4_i32_648 : i32
      %c6_i32_649 = arith.constant 6 : i32
      %721 = arith.muli %720, %c6_i32_649 : i32
      %c1_i32_650 = arith.constant 1 : i32
      %722 = arith.addi %721, %c1_i32_650 : i32
      %723 = arith.index_cast %722 : i32 to index
      %724 = memref.load %arg2[%723] : memref<48xi32, #tpu.memory_space<smem>>
      %c4_i32_651 = arith.constant 4 : i32
      %c1_i32_652 = arith.constant 1 : i32
      %c4_i32_653 = arith.constant 4 : i32
      %c1_i32_654 = arith.constant 1 : i32
      %c0_i32_655 = arith.constant 0 : i32
      %725 = tpu.memref_slice %arg4[%724, %c0_i32_655] : memref<64x128xf32, #tpu.memory_space<any>> -> memref<1x128xf32, #tpu.memory_space<any>>
      %726 = tpu.memref_squeeze %725 : memref<1x128xf32, #tpu.memory_space<any>> -> memref<128xf32, #tpu.memory_space<any>>
      %c0_i32_656 = arith.constant 0 : i32
      %727 = tpu.memref_slice %arg7[%398, %c4_i32_651, %c1_i32_652, %c0_i32_656] : memref<2x8x6x128xf32, #tpu.memory_space<vmem>> -> memref<1x1x1x128xf32, #tpu.memory_space<vmem>>
      %728 = tpu.memref_squeeze %727 : memref<1x1x1x128xf32, #tpu.memory_space<vmem>> -> memref<128xf32, #tpu.memory_space<vmem>>
      %729 = tpu.memref_slice %arg9[%398, %c4_i32_653, %c1_i32_654] : memref<2x8x6x!tpu.dma_semaphore, #tpu.memory_space<semaphore_mem>> -> memref<1x1x1x!tpu.dma_semaphore, #tpu.memory_space<semaphore_mem>>
      %730 = tpu.memref_squeeze %729 : memref<1x1x1x!tpu.dma_semaphore, #tpu.memory_space<semaphore_mem>> -> memref<!tpu.dma_semaphore, #tpu.memory_space<semaphore_mem>>
      tpu.enqueue_dma source(%726 : memref<128xf32, #tpu.memory_space<any>>) target(%728 : memref<128xf32, #tpu.memory_space<vmem>>) target_semaphore(%730 : memref<!tpu.dma_semaphore, #tpu.memory_space<semaphore_mem>>)
      %c4_i32_657 = arith.constant 4 : i32
      %731 = arith.addi %399, %c4_i32_657 : i32
      %c6_i32_658 = arith.constant 6 : i32
      %732 = arith.muli %731, %c6_i32_658 : i32
      %c2_i32_659 = arith.constant 2 : i32
      %733 = arith.addi %732, %c2_i32_659 : i32
      %734 = arith.index_cast %733 : i32 to index
      %735 = memref.load %arg2[%734] : memref<48xi32, #tpu.memory_space<smem>>
      %c4_i32_660 = arith.constant 4 : i32
      %c2_i32_661 = arith.constant 2 : i32
      %c4_i32_662 = arith.constant 4 : i32
      %c2_i32_663 = arith.constant 2 : i32
      %c0_i32_664 = arith.constant 0 : i32
      %736 = tpu.memref_slice %arg4[%735, %c0_i32_664] : memref<64x128xf32, #tpu.memory_space<any>> -> memref<1x128xf32, #tpu.memory_space<any>>
      %737 = tpu.memref_squeeze %736 : memref<1x128xf32, #tpu.memory_space<any>> -> memref<128xf32, #tpu.memory_space<any>>
      %c0_i32_665 = arith.constant 0 : i32
      %738 = tpu.memref_slice %arg7[%398, %c4_i32_660, %c2_i32_661, %c0_i32_665] : memref<2x8x6x128xf32, #tpu.memory_space<vmem>> -> memref<1x1x1x128xf32, #tpu.memory_space<vmem>>
      %739 = tpu.memref_squeeze %738 : memref<1x1x1x128xf32, #tpu.memory_space<vmem>> -> memref<128xf32, #tpu.memory_space<vmem>>
      %740 = tpu.memref_slice %arg9[%398, %c4_i32_662, %c2_i32_663] : memref<2x8x6x!tpu.dma_semaphore, #tpu.memory_space<semaphore_mem>> -> memref<1x1x1x!tpu.dma_semaphore, #tpu.memory_space<semaphore_mem>>
      %741 = tpu.memref_squeeze %740 : memref<1x1x1x!tpu.dma_semaphore, #tpu.memory_space<semaphore_mem>> -> memref<!tpu.dma_semaphore, #tpu.memory_space<semaphore_mem>>
      tpu.enqueue_dma source(%737 : memref<128xf32, #tpu.memory_space<any>>) target(%739 : memref<128xf32, #tpu.memory_space<vmem>>) target_semaphore(%741 : memref<!tpu.dma_semaphore, #tpu.memory_space<semaphore_mem>>)
      %c4_i32_666 = arith.constant 4 : i32
      %742 = arith.addi %399, %c4_i32_666 : i32
      %c6_i32_667 = arith.constant 6 : i32
      %743 = arith.muli %742, %c6_i32_667 : i32
      %c3_i32_668 = arith.constant 3 : i32
      %744 = arith.addi %743, %c3_i32_668 : i32
      %745 = arith.index_cast %744 : i32 to index
      %746 = memref.load %arg2[%745] : memref<48xi32, #tpu.memory_space<smem>>
      %c4_i32_669 = arith.constant 4 : i32
      %c3_i32_670 = arith.constant 3 : i32
      %c4_i32_671 = arith.constant 4 : i32
      %c3_i32_672 = arith.constant 3 : i32
      %c0_i32_673 = arith.constant 0 : i32
      %747 = tpu.memref_slice %arg4[%746, %c0_i32_673] : memref<64x128xf32, #tpu.memory_space<any>> -> memref<1x128xf32, #tpu.memory_space<any>>
      %748 = tpu.memref_squeeze %747 : memref<1x128xf32, #tpu.memory_space<any>> -> memref<128xf32, #tpu.memory_space<any>>
      %c0_i32_674 = arith.constant 0 : i32
      %749 = tpu.memref_slice %arg7[%398, %c4_i32_669, %c3_i32_670, %c0_i32_674] : memref<2x8x6x128xf32, #tpu.memory_space<vmem>> -> memref<1x1x1x128xf32, #tpu.memory_space<vmem>>
      %750 = tpu.memref_squeeze %749 : memref<1x1x1x128xf32, #tpu.memory_space<vmem>> -> memref<128xf32, #tpu.memory_space<vmem>>
      %751 = tpu.memref_slice %arg9[%398, %c4_i32_671, %c3_i32_672] : memref<2x8x6x!tpu.dma_semaphore, #tpu.memory_space<semaphore_mem>> -> memref<1x1x1x!tpu.dma_semaphore, #tpu.memory_space<semaphore_mem>>
      %752 = tpu.memref_squeeze %751 : memref<1x1x1x!tpu.dma_semaphore, #tpu.memory_space<semaphore_mem>> -> memref<!tpu.dma_semaphore, #tpu.memory_space<semaphore_mem>>
      tpu.enqueue_dma source(%748 : memref<128xf32, #tpu.memory_space<any>>) target(%750 : memref<128xf32, #tpu.memory_space<vmem>>) target_semaphore(%752 : memref<!tpu.dma_semaphore, #tpu.memory_space<semaphore_mem>>)
      %c4_i32_675 = arith.constant 4 : i32
      %753 = arith.addi %399, %c4_i32_675 : i32
      %c6_i32_676 = arith.constant 6 : i32
      %754 = arith.muli %753, %c6_i32_676 : i32
      %c4_i32_677 = arith.constant 4 : i32
      %755 = arith.addi %754, %c4_i32_677 : i32
      %756 = arith.index_cast %755 : i32 to index
      %757 = memref.load %arg2[%756] : memref<48xi32, #tpu.memory_space<smem>>
      %c4_i32_678 = arith.constant 4 : i32
      %c4_i32_679 = arith.constant 4 : i32
      %c4_i32_680 = arith.constant 4 : i32
      %c4_i32_681 = arith.constant 4 : i32
      %c0_i32_682 = arith.constant 0 : i32
      %758 = tpu.memref_slice %arg4[%757, %c0_i32_682] : memref<64x128xf32, #tpu.memory_space<any>> -> memref<1x128xf32, #tpu.memory_space<any>>
      %759 = tpu.memref_squeeze %758 : memref<1x128xf32, #tpu.memory_space<any>> -> memref<128xf32, #tpu.memory_space<any>>
      %c0_i32_683 = arith.constant 0 : i32
      %760 = tpu.memref_slice %arg7[%398, %c4_i32_678, %c4_i32_679, %c0_i32_683] : memref<2x8x6x128xf32, #tpu.memory_space<vmem>> -> memref<1x1x1x128xf32, #tpu.memory_space<vmem>>
      %761 = tpu.memref_squeeze %760 : memref<1x1x1x128xf32, #tpu.memory_space<vmem>> -> memref<128xf32, #tpu.memory_space<vmem>>
      %762 = tpu.memref_slice %arg9[%398, %c4_i32_680, %c4_i32_681] : memref<2x8x6x!tpu.dma_semaphore, #tpu.memory_space<semaphore_mem>> -> memref<1x1x1x!tpu.dma_semaphore, #tpu.memory_space<semaphore_mem>>
      %763 = tpu.memref_squeeze %762 : memref<1x1x1x!tpu.dma_semaphore, #tpu.memory_space<semaphore_mem>> -> memref<!tpu.dma_semaphore, #tpu.memory_space<semaphore_mem>>
      tpu.enqueue_dma source(%759 : memref<128xf32, #tpu.memory_space<any>>) target(%761 : memref<128xf32, #tpu.memory_space<vmem>>) target_semaphore(%763 : memref<!tpu.dma_semaphore, #tpu.memory_space<semaphore_mem>>)
      %c4_i32_684 = arith.constant 4 : i32
      %764 = arith.addi %399, %c4_i32_684 : i32
      %c6_i32_685 = arith.constant 6 : i32
      %765 = arith.muli %764, %c6_i32_685 : i32
      %c5_i32_686 = arith.constant 5 : i32
      %766 = arith.addi %765, %c5_i32_686 : i32
      %767 = arith.index_cast %766 : i32 to index
      %768 = memref.load %arg2[%767] : memref<48xi32, #tpu.memory_space<smem>>
      %c4_i32_687 = arith.constant 4 : i32
      %c5_i32_688 = arith.constant 5 : i32
      %c4_i32_689 = arith.constant 4 : i32
      %c5_i32_690 = arith.constant 5 : i32
      %c0_i32_691 = arith.constant 0 : i32
      %769 = tpu.memref_slice %arg4[%768, %c0_i32_691] : memref<64x128xf32, #tpu.memory_space<any>> -> memref<1x128xf32, #tpu.memory_space<any>>
      %770 = tpu.memref_squeeze %769 : memref<1x128xf32, #tpu.memory_space<any>> -> memref<128xf32, #tpu.memory_space<any>>
      %c0_i32_692 = arith.constant 0 : i32
      %771 = tpu.memref_slice %arg7[%398, %c4_i32_687, %c5_i32_688, %c0_i32_692] : memref<2x8x6x128xf32, #tpu.memory_space<vmem>> -> memref<1x1x1x128xf32, #tpu.memory_space<vmem>>
      %772 = tpu.memref_squeeze %771 : memref<1x1x1x128xf32, #tpu.memory_space<vmem>> -> memref<128xf32, #tpu.memory_space<vmem>>
      %773 = tpu.memref_slice %arg9[%398, %c4_i32_689, %c5_i32_690] : memref<2x8x6x!tpu.dma_semaphore, #tpu.memory_space<semaphore_mem>> -> memref<1x1x1x!tpu.dma_semaphore, #tpu.memory_space<semaphore_mem>>
      %774 = tpu.memref_squeeze %773 : memref<1x1x1x!tpu.dma_semaphore, #tpu.memory_space<semaphore_mem>> -> memref<!tpu.dma_semaphore, #tpu.memory_space<semaphore_mem>>
      tpu.enqueue_dma source(%770 : memref<128xf32, #tpu.memory_space<any>>) target(%772 : memref<128xf32, #tpu.memory_space<vmem>>) target_semaphore(%774 : memref<!tpu.dma_semaphore, #tpu.memory_space<semaphore_mem>>)
      %c5_i32_693 = arith.constant 5 : i32
      %775 = arith.addi %399, %c5_i32_693 : i32
      %776 = arith.index_cast %775 : i32 to index
      %777 = memref.load %arg1[%776] : memref<8xi32, #tpu.memory_space<smem>>
      %c5_i32_694 = arith.constant 5 : i32
      %c5_i32_695 = arith.constant 5 : i32
      %c0_i32_696 = arith.constant 0 : i32
      %778 = tpu.memref_slice %arg3[%777, %c0_i32_696] : memref<64x128xf32, #tpu.memory_space<any>> -> memref<1x128xf32, #tpu.memory_space<any>>
      %779 = tpu.memref_squeeze %778 : memref<1x128xf32, #tpu.memory_space<any>> -> memref<128xf32, #tpu.memory_space<any>>
      %c0_i32_697 = arith.constant 0 : i32
      %780 = tpu.memref_slice %arg6[%398, %c5_i32_694, %c0_i32_697] : memref<2x8x128xf32, #tpu.memory_space<vmem>> -> memref<1x1x128xf32, #tpu.memory_space<vmem>>
      %781 = tpu.memref_squeeze %780 : memref<1x1x128xf32, #tpu.memory_space<vmem>> -> memref<128xf32, #tpu.memory_space<vmem>>
      %782 = tpu.memref_slice %arg8[%398, %c5_i32_695] : memref<2x8x!tpu.dma_semaphore, #tpu.memory_space<semaphore_mem>> -> memref<1x1x!tpu.dma_semaphore, #tpu.memory_space<semaphore_mem>>
      %783 = tpu.memref_squeeze %782 : memref<1x1x!tpu.dma_semaphore, #tpu.memory_space<semaphore_mem>> -> memref<!tpu.dma_semaphore, #tpu.memory_space<semaphore_mem>>
      tpu.enqueue_dma source(%779 : memref<128xf32, #tpu.memory_space<any>>) target(%781 : memref<128xf32, #tpu.memory_space<vmem>>) target_semaphore(%783 : memref<!tpu.dma_semaphore, #tpu.memory_space<semaphore_mem>>)
      %c5_i32_698 = arith.constant 5 : i32
      %784 = arith.addi %399, %c5_i32_698 : i32
      %c6_i32_699 = arith.constant 6 : i32
      %785 = arith.muli %784, %c6_i32_699 : i32
      %c0_i32_700 = arith.constant 0 : i32
      %786 = arith.addi %785, %c0_i32_700 : i32
      %787 = arith.index_cast %786 : i32 to index
      %788 = memref.load %arg2[%787] : memref<48xi32, #tpu.memory_space<smem>>
      %c5_i32_701 = arith.constant 5 : i32
      %c0_i32_702 = arith.constant 0 : i32
      %c5_i32_703 = arith.constant 5 : i32
      %c0_i32_704 = arith.constant 0 : i32
      %c0_i32_705 = arith.constant 0 : i32
      %789 = tpu.memref_slice %arg4[%788, %c0_i32_705] : memref<64x128xf32, #tpu.memory_space<any>> -> memref<1x128xf32, #tpu.memory_space<any>>
      %790 = tpu.memref_squeeze %789 : memref<1x128xf32, #tpu.memory_space<any>> -> memref<128xf32, #tpu.memory_space<any>>
      %c0_i32_706 = arith.constant 0 : i32
      %791 = tpu.memref_slice %arg7[%398, %c5_i32_701, %c0_i32_702, %c0_i32_706] : memref<2x8x6x128xf32, #tpu.memory_space<vmem>> -> memref<1x1x1x128xf32, #tpu.memory_space<vmem>>
      %792 = tpu.memref_squeeze %791 : memref<1x1x1x128xf32, #tpu.memory_space<vmem>> -> memref<128xf32, #tpu.memory_space<vmem>>
      %793 = tpu.memref_slice %arg9[%398, %c5_i32_703, %c0_i32_704] : memref<2x8x6x!tpu.dma_semaphore, #tpu.memory_space<semaphore_mem>> -> memref<1x1x1x!tpu.dma_semaphore, #tpu.memory_space<semaphore_mem>>
      %794 = tpu.memref_squeeze %793 : memref<1x1x1x!tpu.dma_semaphore, #tpu.memory_space<semaphore_mem>> -> memref<!tpu.dma_semaphore, #tpu.memory_space<semaphore_mem>>
      tpu.enqueue_dma source(%790 : memref<128xf32, #tpu.memory_space<any>>) target(%792 : memref<128xf32, #tpu.memory_space<vmem>>) target_semaphore(%794 : memref<!tpu.dma_semaphore, #tpu.memory_space<semaphore_mem>>)
      %c5_i32_707 = arith.constant 5 : i32
      %795 = arith.addi %399, %c5_i32_707 : i32
      %c6_i32_708 = arith.constant 6 : i32
      %796 = arith.muli %795, %c6_i32_708 : i32
      %c1_i32_709 = arith.constant 1 : i32
      %797 = arith.addi %796, %c1_i32_709 : i32
      %798 = arith.index_cast %797 : i32 to index
      %799 = memref.load %arg2[%798] : memref<48xi32, #tpu.memory_space<smem>>
      %c5_i32_710 = arith.constant 5 : i32
      %c1_i32_711 = arith.constant 1 : i32
      %c5_i32_712 = arith.constant 5 : i32
      %c1_i32_713 = arith.constant 1 : i32
      %c0_i32_714 = arith.constant 0 : i32
      %800 = tpu.memref_slice %arg4[%799, %c0_i32_714] : memref<64x128xf32, #tpu.memory_space<any>> -> memref<1x128xf32, #tpu.memory_space<any>>
      %801 = tpu.memref_squeeze %800 : memref<1x128xf32, #tpu.memory_space<any>> -> memref<128xf32, #tpu.memory_space<any>>
      %c0_i32_715 = arith.constant 0 : i32
      %802 = tpu.memref_slice %arg7[%398, %c5_i32_710, %c1_i32_711, %c0_i32_715] : memref<2x8x6x128xf32, #tpu.memory_space<vmem>> -> memref<1x1x1x128xf32, #tpu.memory_space<vmem>>
      %803 = tpu.memref_squeeze %802 : memref<1x1x1x128xf32, #tpu.memory_space<vmem>> -> memref<128xf32, #tpu.memory_space<vmem>>
      %804 = tpu.memref_slice %arg9[%398, %c5_i32_712, %c1_i32_713] : memref<2x8x6x!tpu.dma_semaphore, #tpu.memory_space<semaphore_mem>> -> memref<1x1x1x!tpu.dma_semaphore, #tpu.memory_space<semaphore_mem>>
      %805 = tpu.memref_squeeze %804 : memref<1x1x1x!tpu.dma_semaphore, #tpu.memory_space<semaphore_mem>> -> memref<!tpu.dma_semaphore, #tpu.memory_space<semaphore_mem>>
      tpu.enqueue_dma source(%801 : memref<128xf32, #tpu.memory_space<any>>) target(%803 : memref<128xf32, #tpu.memory_space<vmem>>) target_semaphore(%805 : memref<!tpu.dma_semaphore, #tpu.memory_space<semaphore_mem>>)
      %c5_i32_716 = arith.constant 5 : i32
      %806 = arith.addi %399, %c5_i32_716 : i32
      %c6_i32_717 = arith.constant 6 : i32
      %807 = arith.muli %806, %c6_i32_717 : i32
      %c2_i32_718 = arith.constant 2 : i32
      %808 = arith.addi %807, %c2_i32_718 : i32
      %809 = arith.index_cast %808 : i32 to index
      %810 = memref.load %arg2[%809] : memref<48xi32, #tpu.memory_space<smem>>
      %c5_i32_719 = arith.constant 5 : i32
      %c2_i32_720 = arith.constant 2 : i32
      %c5_i32_721 = arith.constant 5 : i32
      %c2_i32_722 = arith.constant 2 : i32
      %c0_i32_723 = arith.constant 0 : i32
      %811 = tpu.memref_slice %arg4[%810, %c0_i32_723] : memref<64x128xf32, #tpu.memory_space<any>> -> memref<1x128xf32, #tpu.memory_space<any>>
      %812 = tpu.memref_squeeze %811 : memref<1x128xf32, #tpu.memory_space<any>> -> memref<128xf32, #tpu.memory_space<any>>
      %c0_i32_724 = arith.constant 0 : i32
      %813 = tpu.memref_slice %arg7[%398, %c5_i32_719, %c2_i32_720, %c0_i32_724] : memref<2x8x6x128xf32, #tpu.memory_space<vmem>> -> memref<1x1x1x128xf32, #tpu.memory_space<vmem>>
      %814 = tpu.memref_squeeze %813 : memref<1x1x1x128xf32, #tpu.memory_space<vmem>> -> memref<128xf32, #tpu.memory_space<vmem>>
      %815 = tpu.memref_slice %arg9[%398, %c5_i32_721, %c2_i32_722] : memref<2x8x6x!tpu.dma_semaphore, #tpu.memory_space<semaphore_mem>> -> memref<1x1x1x!tpu.dma_semaphore, #tpu.memory_space<semaphore_mem>>
      %816 = tpu.memref_squeeze %815 : memref<1x1x1x!tpu.dma_semaphore, #tpu.memory_space<semaphore_mem>> -> memref<!tpu.dma_semaphore, #tpu.memory_space<semaphore_mem>>
      tpu.enqueue_dma source(%812 : memref<128xf32, #tpu.memory_space<any>>) target(%814 : memref<128xf32, #tpu.memory_space<vmem>>) target_semaphore(%816 : memref<!tpu.dma_semaphore, #tpu.memory_space<semaphore_mem>>)
      %c5_i32_725 = arith.constant 5 : i32
      %817 = arith.addi %399, %c5_i32_725 : i32
      %c6_i32_726 = arith.constant 6 : i32
      %818 = arith.muli %817, %c6_i32_726 : i32
      %c3_i32_727 = arith.constant 3 : i32
      %819 = arith.addi %818, %c3_i32_727 : i32
      %820 = arith.index_cast %819 : i32 to index
      %821 = memref.load %arg2[%820] : memref<48xi32, #tpu.memory_space<smem>>
      %c5_i32_728 = arith.constant 5 : i32
      %c3_i32_729 = arith.constant 3 : i32
      %c5_i32_730 = arith.constant 5 : i32
      %c3_i32_731 = arith.constant 3 : i32
      %c0_i32_732 = arith.constant 0 : i32
      %822 = tpu.memref_slice %arg4[%821, %c0_i32_732] : memref<64x128xf32, #tpu.memory_space<any>> -> memref<1x128xf32, #tpu.memory_space<any>>
      %823 = tpu.memref_squeeze %822 : memref<1x128xf32, #tpu.memory_space<any>> -> memref<128xf32, #tpu.memory_space<any>>
      %c0_i32_733 = arith.constant 0 : i32
      %824 = tpu.memref_slice %arg7[%398, %c5_i32_728, %c3_i32_729, %c0_i32_733] : memref<2x8x6x128xf32, #tpu.memory_space<vmem>> -> memref<1x1x1x128xf32, #tpu.memory_space<vmem>>
      %825 = tpu.memref_squeeze %824 : memref<1x1x1x128xf32, #tpu.memory_space<vmem>> -> memref<128xf32, #tpu.memory_space<vmem>>
      %826 = tpu.memref_slice %arg9[%398, %c5_i32_730, %c3_i32_731] : memref<2x8x6x!tpu.dma_semaphore, #tpu.memory_space<semaphore_mem>> -> memref<1x1x1x!tpu.dma_semaphore, #tpu.memory_space<semaphore_mem>>
      %827 = tpu.memref_squeeze %826 : memref<1x1x1x!tpu.dma_semaphore, #tpu.memory_space<semaphore_mem>> -> memref<!tpu.dma_semaphore, #tpu.memory_space<semaphore_mem>>
      tpu.enqueue_dma source(%823 : memref<128xf32, #tpu.memory_space<any>>) target(%825 : memref<128xf32, #tpu.memory_space<vmem>>) target_semaphore(%827 : memref<!tpu.dma_semaphore, #tpu.memory_space<semaphore_mem>>)
      %c5_i32_734 = arith.constant 5 : i32
      %828 = arith.addi %399, %c5_i32_734 : i32
      %c6_i32_735 = arith.constant 6 : i32
      %829 = arith.muli %828, %c6_i32_735 : i32
      %c4_i32_736 = arith.constant 4 : i32
      %830 = arith.addi %829, %c4_i32_736 : i32
      %831 = arith.index_cast %830 : i32 to index
      %832 = memref.load %arg2[%831] : memref<48xi32, #tpu.memory_space<smem>>
      %c5_i32_737 = arith.constant 5 : i32
      %c4_i32_738 = arith.constant 4 : i32
      %c5_i32_739 = arith.constant 5 : i32
      %c4_i32_740 = arith.constant 4 : i32
      %c0_i32_741 = arith.constant 0 : i32
      %833 = tpu.memref_slice %arg4[%832, %c0_i32_741] : memref<64x128xf32, #tpu.memory_space<any>> -> memref<1x128xf32, #tpu.memory_space<any>>
      %834 = tpu.memref_squeeze %833 : memref<1x128xf32, #tpu.memory_space<any>> -> memref<128xf32, #tpu.memory_space<any>>
      %c0_i32_742 = arith.constant 0 : i32
      %835 = tpu.memref_slice %arg7[%398, %c5_i32_737, %c4_i32_738, %c0_i32_742] : memref<2x8x6x128xf32, #tpu.memory_space<vmem>> -> memref<1x1x1x128xf32, #tpu.memory_space<vmem>>
      %836 = tpu.memref_squeeze %835 : memref<1x1x1x128xf32, #tpu.memory_space<vmem>> -> memref<128xf32, #tpu.memory_space<vmem>>
      %837 = tpu.memref_slice %arg9[%398, %c5_i32_739, %c4_i32_740] : memref<2x8x6x!tpu.dma_semaphore, #tpu.memory_space<semaphore_mem>> -> memref<1x1x1x!tpu.dma_semaphore, #tpu.memory_space<semaphore_mem>>
      %838 = tpu.memref_squeeze %837 : memref<1x1x1x!tpu.dma_semaphore, #tpu.memory_space<semaphore_mem>> -> memref<!tpu.dma_semaphore, #tpu.memory_space<semaphore_mem>>
      tpu.enqueue_dma source(%834 : memref<128xf32, #tpu.memory_space<any>>) target(%836 : memref<128xf32, #tpu.memory_space<vmem>>) target_semaphore(%838 : memref<!tpu.dma_semaphore, #tpu.memory_space<semaphore_mem>>)
      %c5_i32_743 = arith.constant 5 : i32
      %839 = arith.addi %399, %c5_i32_743 : i32
      %c6_i32_744 = arith.constant 6 : i32
      %840 = arith.muli %839, %c6_i32_744 : i32
      %c5_i32_745 = arith.constant 5 : i32
      %841 = arith.addi %840, %c5_i32_745 : i32
      %842 = arith.index_cast %841 : i32 to index
      %843 = memref.load %arg2[%842] : memref<48xi32, #tpu.memory_space<smem>>
      %c5_i32_746 = arith.constant 5 : i32
      %c5_i32_747 = arith.constant 5 : i32
      %c5_i32_748 = arith.constant 5 : i32
      %c5_i32_749 = arith.constant 5 : i32
      %c0_i32_750 = arith.constant 0 : i32
      %844 = tpu.memref_slice %arg4[%843, %c0_i32_750] : memref<64x128xf32, #tpu.memory_space<any>> -> memref<1x128xf32, #tpu.memory_space<any>>
      %845 = tpu.memref_squeeze %844 : memref<1x128xf32, #tpu.memory_space<any>> -> memref<128xf32, #tpu.memory_space<any>>
      %c0_i32_751 = arith.constant 0 : i32
      %846 = tpu.memref_slice %arg7[%398, %c5_i32_746, %c5_i32_747, %c0_i32_751] : memref<2x8x6x128xf32, #tpu.memory_space<vmem>> -> memref<1x1x1x128xf32, #tpu.memory_space<vmem>>
      %847 = tpu.memref_squeeze %846 : memref<1x1x1x128xf32, #tpu.memory_space<vmem>> -> memref<128xf32, #tpu.memory_space<vmem>>
      %848 = tpu.memref_slice %arg9[%398, %c5_i32_748, %c5_i32_749] : memref<2x8x6x!tpu.dma_semaphore, #tpu.memory_space<semaphore_mem>> -> memref<1x1x1x!tpu.dma_semaphore, #tpu.memory_space<semaphore_mem>>
      %849 = tpu.memref_squeeze %848 : memref<1x1x1x!tpu.dma_semaphore, #tpu.memory_space<semaphore_mem>> -> memref<!tpu.dma_semaphore, #tpu.memory_space<semaphore_mem>>
      tpu.enqueue_dma source(%845 : memref<128xf32, #tpu.memory_space<any>>) target(%847 : memref<128xf32, #tpu.memory_space<vmem>>) target_semaphore(%849 : memref<!tpu.dma_semaphore, #tpu.memory_space<semaphore_mem>>)
      %c6_i32_752 = arith.constant 6 : i32
      %850 = arith.addi %399, %c6_i32_752 : i32
      %851 = arith.index_cast %850 : i32 to index
      %852 = memref.load %arg1[%851] : memref<8xi32, #tpu.memory_space<smem>>
      %c6_i32_753 = arith.constant 6 : i32
      %c6_i32_754 = arith.constant 6 : i32
      %c0_i32_755 = arith.constant 0 : i32
      %853 = tpu.memref_slice %arg3[%852, %c0_i32_755] : memref<64x128xf32, #tpu.memory_space<any>> -> memref<1x128xf32, #tpu.memory_space<any>>
      %854 = tpu.memref_squeeze %853 : memref<1x128xf32, #tpu.memory_space<any>> -> memref<128xf32, #tpu.memory_space<any>>
      %c0_i32_756 = arith.constant 0 : i32
      %855 = tpu.memref_slice %arg6[%398, %c6_i32_753, %c0_i32_756] : memref<2x8x128xf32, #tpu.memory_space<vmem>> -> memref<1x1x128xf32, #tpu.memory_space<vmem>>
      %856 = tpu.memref_squeeze %855 : memref<1x1x128xf32, #tpu.memory_space<vmem>> -> memref<128xf32, #tpu.memory_space<vmem>>
      %857 = tpu.memref_slice %arg8[%398, %c6_i32_754] : memref<2x8x!tpu.dma_semaphore, #tpu.memory_space<semaphore_mem>> -> memref<1x1x!tpu.dma_semaphore, #tpu.memory_space<semaphore_mem>>
      %858 = tpu.memref_squeeze %857 : memref<1x1x!tpu.dma_semaphore, #tpu.memory_space<semaphore_mem>> -> memref<!tpu.dma_semaphore, #tpu.memory_space<semaphore_mem>>
      tpu.enqueue_dma source(%854 : memref<128xf32, #tpu.memory_space<any>>) target(%856 : memref<128xf32, #tpu.memory_space<vmem>>) target_semaphore(%858 : memref<!tpu.dma_semaphore, #tpu.memory_space<semaphore_mem>>)
      %c6_i32_757 = arith.constant 6 : i32
      %859 = arith.addi %399, %c6_i32_757 : i32
      %c6_i32_758 = arith.constant 6 : i32
      %860 = arith.muli %859, %c6_i32_758 : i32
      %c0_i32_759 = arith.constant 0 : i32
      %861 = arith.addi %860, %c0_i32_759 : i32
      %862 = arith.index_cast %861 : i32 to index
      %863 = memref.load %arg2[%862] : memref<48xi32, #tpu.memory_space<smem>>
      %c6_i32_760 = arith.constant 6 : i32
      %c0_i32_761 = arith.constant 0 : i32
      %c6_i32_762 = arith.constant 6 : i32
      %c0_i32_763 = arith.constant 0 : i32
      %c0_i32_764 = arith.constant 0 : i32
      %864 = tpu.memref_slice %arg4[%863, %c0_i32_764] : memref<64x128xf32, #tpu.memory_space<any>> -> memref<1x128xf32, #tpu.memory_space<any>>
      %865 = tpu.memref_squeeze %864 : memref<1x128xf32, #tpu.memory_space<any>> -> memref<128xf32, #tpu.memory_space<any>>
      %c0_i32_765 = arith.constant 0 : i32
      %866 = tpu.memref_slice %arg7[%398, %c6_i32_760, %c0_i32_761, %c0_i32_765] : memref<2x8x6x128xf32, #tpu.memory_space<vmem>> -> memref<1x1x1x128xf32, #tpu.memory_space<vmem>>
      %867 = tpu.memref_squeeze %866 : memref<1x1x1x128xf32, #tpu.memory_space<vmem>> -> memref<128xf32, #tpu.memory_space<vmem>>
      %868 = tpu.memref_slice %arg9[%398, %c6_i32_762, %c0_i32_763] : memref<2x8x6x!tpu.dma_semaphore, #tpu.memory_space<semaphore_mem>> -> memref<1x1x1x!tpu.dma_semaphore, #tpu.memory_space<semaphore_mem>>
      %869 = tpu.memref_squeeze %868 : memref<1x1x1x!tpu.dma_semaphore, #tpu.memory_space<semaphore_mem>> -> memref<!tpu.dma_semaphore, #tpu.memory_space<semaphore_mem>>
      tpu.enqueue_dma source(%865 : memref<128xf32, #tpu.memory_space<any>>) target(%867 : memref<128xf32, #tpu.memory_space<vmem>>) target_semaphore(%869 : memref<!tpu.dma_semaphore, #tpu.memory_space<semaphore_mem>>)
      %c6_i32_766 = arith.constant 6 : i32
      %870 = arith.addi %399, %c6_i32_766 : i32
      %c6_i32_767 = arith.constant 6 : i32
      %871 = arith.muli %870, %c6_i32_767 : i32
      %c1_i32_768 = arith.constant 1 : i32
      %872 = arith.addi %871, %c1_i32_768 : i32
      %873 = arith.index_cast %872 : i32 to index
      %874 = memref.load %arg2[%873] : memref<48xi32, #tpu.memory_space<smem>>
      %c6_i32_769 = arith.constant 6 : i32
      %c1_i32_770 = arith.constant 1 : i32
      %c6_i32_771 = arith.constant 6 : i32
      %c1_i32_772 = arith.constant 1 : i32
      %c0_i32_773 = arith.constant 0 : i32
      %875 = tpu.memref_slice %arg4[%874, %c0_i32_773] : memref<64x128xf32, #tpu.memory_space<any>> -> memref<1x128xf32, #tpu.memory_space<any>>
      %876 = tpu.memref_squeeze %875 : memref<1x128xf32, #tpu.memory_space<any>> -> memref<128xf32, #tpu.memory_space<any>>
      %c0_i32_774 = arith.constant 0 : i32
      %877 = tpu.memref_slice %arg7[%398, %c6_i32_769, %c1_i32_770, %c0_i32_774] : memref<2x8x6x128xf32, #tpu.memory_space<vmem>> -> memref<1x1x1x128xf32, #tpu.memory_space<vmem>>
      %878 = tpu.memref_squeeze %877 : memref<1x1x1x128xf32, #tpu.memory_space<vmem>> -> memref<128xf32, #tpu.memory_space<vmem>>
      %879 = tpu.memref_slice %arg9[%398, %c6_i32_771, %c1_i32_772] : memref<2x8x6x!tpu.dma_semaphore, #tpu.memory_space<semaphore_mem>> -> memref<1x1x1x!tpu.dma_semaphore, #tpu.memory_space<semaphore_mem>>
      %880 = tpu.memref_squeeze %879 : memref<1x1x1x!tpu.dma_semaphore, #tpu.memory_space<semaphore_mem>> -> memref<!tpu.dma_semaphore, #tpu.memory_space<semaphore_mem>>
      tpu.enqueue_dma source(%876 : memref<128xf32, #tpu.memory_space<any>>) target(%878 : memref<128xf32, #tpu.memory_space<vmem>>) target_semaphore(%880 : memref<!tpu.dma_semaphore, #tpu.memory_space<semaphore_mem>>)
      %c6_i32_775 = arith.constant 6 : i32
      %881 = arith.addi %399, %c6_i32_775 : i32
      %c6_i32_776 = arith.constant 6 : i32
      %882 = arith.muli %881, %c6_i32_776 : i32
      %c2_i32_777 = arith.constant 2 : i32
      %883 = arith.addi %882, %c2_i32_777 : i32
      %884 = arith.index_cast %883 : i32 to index
      %885 = memref.load %arg2[%884] : memref<48xi32, #tpu.memory_space<smem>>
      %c6_i32_778 = arith.constant 6 : i32
      %c2_i32_779 = arith.constant 2 : i32
      %c6_i32_780 = arith.constant 6 : i32
      %c2_i32_781 = arith.constant 2 : i32
      %c0_i32_782 = arith.constant 0 : i32
      %886 = tpu.memref_slice %arg4[%885, %c0_i32_782] : memref<64x128xf32, #tpu.memory_space<any>> -> memref<1x128xf32, #tpu.memory_space<any>>
      %887 = tpu.memref_squeeze %886 : memref<1x128xf32, #tpu.memory_space<any>> -> memref<128xf32, #tpu.memory_space<any>>
      %c0_i32_783 = arith.constant 0 : i32
      %888 = tpu.memref_slice %arg7[%398, %c6_i32_778, %c2_i32_779, %c0_i32_783] : memref<2x8x6x128xf32, #tpu.memory_space<vmem>> -> memref<1x1x1x128xf32, #tpu.memory_space<vmem>>
      %889 = tpu.memref_squeeze %888 : memref<1x1x1x128xf32, #tpu.memory_space<vmem>> -> memref<128xf32, #tpu.memory_space<vmem>>
      %890 = tpu.memref_slice %arg9[%398, %c6_i32_780, %c2_i32_781] : memref<2x8x6x!tpu.dma_semaphore, #tpu.memory_space<semaphore_mem>> -> memref<1x1x1x!tpu.dma_semaphore, #tpu.memory_space<semaphore_mem>>
      %891 = tpu.memref_squeeze %890 : memref<1x1x1x!tpu.dma_semaphore, #tpu.memory_space<semaphore_mem>> -> memref<!tpu.dma_semaphore, #tpu.memory_space<semaphore_mem>>
      tpu.enqueue_dma source(%887 : memref<128xf32, #tpu.memory_space<any>>) target(%889 : memref<128xf32, #tpu.memory_space<vmem>>) target_semaphore(%891 : memref<!tpu.dma_semaphore, #tpu.memory_space<semaphore_mem>>)
      %c6_i32_784 = arith.constant 6 : i32
      %892 = arith.addi %399, %c6_i32_784 : i32
      %c6_i32_785 = arith.constant 6 : i32
      %893 = arith.muli %892, %c6_i32_785 : i32
      %c3_i32_786 = arith.constant 3 : i32
      %894 = arith.addi %893, %c3_i32_786 : i32
      %895 = arith.index_cast %894 : i32 to index
      %896 = memref.load %arg2[%895] : memref<48xi32, #tpu.memory_space<smem>>
      %c6_i32_787 = arith.constant 6 : i32
      %c3_i32_788 = arith.constant 3 : i32
      %c6_i32_789 = arith.constant 6 : i32
      %c3_i32_790 = arith.constant 3 : i32
      %c0_i32_791 = arith.constant 0 : i32
      %897 = tpu.memref_slice %arg4[%896, %c0_i32_791] : memref<64x128xf32, #tpu.memory_space<any>> -> memref<1x128xf32, #tpu.memory_space<any>>
      %898 = tpu.memref_squeeze %897 : memref<1x128xf32, #tpu.memory_space<any>> -> memref<128xf32, #tpu.memory_space<any>>
      %c0_i32_792 = arith.constant 0 : i32
      %899 = tpu.memref_slice %arg7[%398, %c6_i32_787, %c3_i32_788, %c0_i32_792] : memref<2x8x6x128xf32, #tpu.memory_space<vmem>> -> memref<1x1x1x128xf32, #tpu.memory_space<vmem>>
      %900 = tpu.memref_squeeze %899 : memref<1x1x1x128xf32, #tpu.memory_space<vmem>> -> memref<128xf32, #tpu.memory_space<vmem>>
      %901 = tpu.memref_slice %arg9[%398, %c6_i32_789, %c3_i32_790] : memref<2x8x6x!tpu.dma_semaphore, #tpu.memory_space<semaphore_mem>> -> memref<1x1x1x!tpu.dma_semaphore, #tpu.memory_space<semaphore_mem>>
      %902 = tpu.memref_squeeze %901 : memref<1x1x1x!tpu.dma_semaphore, #tpu.memory_space<semaphore_mem>> -> memref<!tpu.dma_semaphore, #tpu.memory_space<semaphore_mem>>
      tpu.enqueue_dma source(%898 : memref<128xf32, #tpu.memory_space<any>>) target(%900 : memref<128xf32, #tpu.memory_space<vmem>>) target_semaphore(%902 : memref<!tpu.dma_semaphore, #tpu.memory_space<semaphore_mem>>)
      %c6_i32_793 = arith.constant 6 : i32
      %903 = arith.addi %399, %c6_i32_793 : i32
      %c6_i32_794 = arith.constant 6 : i32
      %904 = arith.muli %903, %c6_i32_794 : i32
      %c4_i32_795 = arith.constant 4 : i32
      %905 = arith.addi %904, %c4_i32_795 : i32
      %906 = arith.index_cast %905 : i32 to index
      %907 = memref.load %arg2[%906] : memref<48xi32, #tpu.memory_space<smem>>
      %c6_i32_796 = arith.constant 6 : i32
      %c4_i32_797 = arith.constant 4 : i32
      %c6_i32_798 = arith.constant 6 : i32
      %c4_i32_799 = arith.constant 4 : i32
      %c0_i32_800 = arith.constant 0 : i32
      %908 = tpu.memref_slice %arg4[%907, %c0_i32_800] : memref<64x128xf32, #tpu.memory_space<any>> -> memref<1x128xf32, #tpu.memory_space<any>>
      %909 = tpu.memref_squeeze %908 : memref<1x128xf32, #tpu.memory_space<any>> -> memref<128xf32, #tpu.memory_space<any>>
      %c0_i32_801 = arith.constant 0 : i32
      %910 = tpu.memref_slice %arg7[%398, %c6_i32_796, %c4_i32_797, %c0_i32_801] : memref<2x8x6x128xf32, #tpu.memory_space<vmem>> -> memref<1x1x1x128xf32, #tpu.memory_space<vmem>>
      %911 = tpu.memref_squeeze %910 : memref<1x1x1x128xf32, #tpu.memory_space<vmem>> -> memref<128xf32, #tpu.memory_space<vmem>>
      %912 = tpu.memref_slice %arg9[%398, %c6_i32_798, %c4_i32_799] : memref<2x8x6x!tpu.dma_semaphore, #tpu.memory_space<semaphore_mem>> -> memref<1x1x1x!tpu.dma_semaphore, #tpu.memory_space<semaphore_mem>>
      %913 = tpu.memref_squeeze %912 : memref<1x1x1x!tpu.dma_semaphore, #tpu.memory_space<semaphore_mem>> -> memref<!tpu.dma_semaphore, #tpu.memory_space<semaphore_mem>>
      tpu.enqueue_dma source(%909 : memref<128xf32, #tpu.memory_space<any>>) target(%911 : memref<128xf32, #tpu.memory_space<vmem>>) target_semaphore(%913 : memref<!tpu.dma_semaphore, #tpu.memory_space<semaphore_mem>>)
      %c6_i32_802 = arith.constant 6 : i32
      %914 = arith.addi %399, %c6_i32_802 : i32
      %c6_i32_803 = arith.constant 6 : i32
      %915 = arith.muli %914, %c6_i32_803 : i32
      %c5_i32_804 = arith.constant 5 : i32
      %916 = arith.addi %915, %c5_i32_804 : i32
      %917 = arith.index_cast %916 : i32 to index
      %918 = memref.load %arg2[%917] : memref<48xi32, #tpu.memory_space<smem>>
      %c6_i32_805 = arith.constant 6 : i32
      %c5_i32_806 = arith.constant 5 : i32
      %c6_i32_807 = arith.constant 6 : i32
      %c5_i32_808 = arith.constant 5 : i32
      %c0_i32_809 = arith.constant 0 : i32
      %919 = tpu.memref_slice %arg4[%918, %c0_i32_809] : memref<64x128xf32, #tpu.memory_space<any>> -> memref<1x128xf32, #tpu.memory_space<any>>
      %920 = tpu.memref_squeeze %919 : memref<1x128xf32, #tpu.memory_space<any>> -> memref<128xf32, #tpu.memory_space<any>>
      %c0_i32_810 = arith.constant 0 : i32
      %921 = tpu.memref_slice %arg7[%398, %c6_i32_805, %c5_i32_806, %c0_i32_810] : memref<2x8x6x128xf32, #tpu.memory_space<vmem>> -> memref<1x1x1x128xf32, #tpu.memory_space<vmem>>
      %922 = tpu.memref_squeeze %921 : memref<1x1x1x128xf32, #tpu.memory_space<vmem>> -> memref<128xf32, #tpu.memory_space<vmem>>
      %923 = tpu.memref_slice %arg9[%398, %c6_i32_807, %c5_i32_808] : memref<2x8x6x!tpu.dma_semaphore, #tpu.memory_space<semaphore_mem>> -> memref<1x1x1x!tpu.dma_semaphore, #tpu.memory_space<semaphore_mem>>
      %924 = tpu.memref_squeeze %923 : memref<1x1x1x!tpu.dma_semaphore, #tpu.memory_space<semaphore_mem>> -> memref<!tpu.dma_semaphore, #tpu.memory_space<semaphore_mem>>
      tpu.enqueue_dma source(%920 : memref<128xf32, #tpu.memory_space<any>>) target(%922 : memref<128xf32, #tpu.memory_space<vmem>>) target_semaphore(%924 : memref<!tpu.dma_semaphore, #tpu.memory_space<semaphore_mem>>)
      %c7_i32_811 = arith.constant 7 : i32
      %925 = arith.addi %399, %c7_i32_811 : i32
      %926 = arith.index_cast %925 : i32 to index
      %927 = memref.load %arg1[%926] : memref<8xi32, #tpu.memory_space<smem>>
      %c7_i32_812 = arith.constant 7 : i32
      %c7_i32_813 = arith.constant 7 : i32
      %c0_i32_814 = arith.constant 0 : i32
      %928 = tpu.memref_slice %arg3[%927, %c0_i32_814] : memref<64x128xf32, #tpu.memory_space<any>> -> memref<1x128xf32, #tpu.memory_space<any>>
      %929 = tpu.memref_squeeze %928 : memref<1x128xf32, #tpu.memory_space<any>> -> memref<128xf32, #tpu.memory_space<any>>
      %c0_i32_815 = arith.constant 0 : i32
      %930 = tpu.memref_slice %arg6[%398, %c7_i32_812, %c0_i32_815] : memref<2x8x128xf32, #tpu.memory_space<vmem>> -> memref<1x1x128xf32, #tpu.memory_space<vmem>>
      %931 = tpu.memref_squeeze %930 : memref<1x1x128xf32, #tpu.memory_space<vmem>> -> memref<128xf32, #tpu.memory_space<vmem>>
      %932 = tpu.memref_slice %arg8[%398, %c7_i32_813] : memref<2x8x!tpu.dma_semaphore, #tpu.memory_space<semaphore_mem>> -> memref<1x1x!tpu.dma_semaphore, #tpu.memory_space<semaphore_mem>>
      %933 = tpu.memref_squeeze %932 : memref<1x1x!tpu.dma_semaphore, #tpu.memory_space<semaphore_mem>> -> memref<!tpu.dma_semaphore, #tpu.memory_space<semaphore_mem>>
      tpu.enqueue_dma source(%929 : memref<128xf32, #tpu.memory_space<any>>) target(%931 : memref<128xf32, #tpu.memory_space<vmem>>) target_semaphore(%933 : memref<!tpu.dma_semaphore, #tpu.memory_space<semaphore_mem>>)
      %c7_i32_816 = arith.constant 7 : i32
      %934 = arith.addi %399, %c7_i32_816 : i32
      %c6_i32_817 = arith.constant 6 : i32
      %935 = arith.muli %934, %c6_i32_817 : i32
      %c0_i32_818 = arith.constant 0 : i32
      %936 = arith.addi %935, %c0_i32_818 : i32
      %937 = arith.index_cast %936 : i32 to index
      %938 = memref.load %arg2[%937] : memref<48xi32, #tpu.memory_space<smem>>
      %c7_i32_819 = arith.constant 7 : i32
      %c0_i32_820 = arith.constant 0 : i32
      %c7_i32_821 = arith.constant 7 : i32
      %c0_i32_822 = arith.constant 0 : i32
      %c0_i32_823 = arith.constant 0 : i32
      %939 = tpu.memref_slice %arg4[%938, %c0_i32_823] : memref<64x128xf32, #tpu.memory_space<any>> -> memref<1x128xf32, #tpu.memory_space<any>>
      %940 = tpu.memref_squeeze %939 : memref<1x128xf32, #tpu.memory_space<any>> -> memref<128xf32, #tpu.memory_space<any>>
      %c0_i32_824 = arith.constant 0 : i32
      %941 = tpu.memref_slice %arg7[%398, %c7_i32_819, %c0_i32_820, %c0_i32_824] : memref<2x8x6x128xf32, #tpu.memory_space<vmem>> -> memref<1x1x1x128xf32, #tpu.memory_space<vmem>>
      %942 = tpu.memref_squeeze %941 : memref<1x1x1x128xf32, #tpu.memory_space<vmem>> -> memref<128xf32, #tpu.memory_space<vmem>>
      %943 = tpu.memref_slice %arg9[%398, %c7_i32_821, %c0_i32_822] : memref<2x8x6x!tpu.dma_semaphore, #tpu.memory_space<semaphore_mem>> -> memref<1x1x1x!tpu.dma_semaphore, #tpu.memory_space<semaphore_mem>>
      %944 = tpu.memref_squeeze %943 : memref<1x1x1x!tpu.dma_semaphore, #tpu.memory_space<semaphore_mem>> -> memref<!tpu.dma_semaphore, #tpu.memory_space<semaphore_mem>>
      tpu.enqueue_dma source(%940 : memref<128xf32, #tpu.memory_space<any>>) target(%942 : memref<128xf32, #tpu.memory_space<vmem>>) target_semaphore(%944 : memref<!tpu.dma_semaphore, #tpu.memory_space<semaphore_mem>>)
      %c7_i32_825 = arith.constant 7 : i32
      %945 = arith.addi %399, %c7_i32_825 : i32
      %c6_i32_826 = arith.constant 6 : i32
      %946 = arith.muli %945, %c6_i32_826 : i32
      %c1_i32_827 = arith.constant 1 : i32
      %947 = arith.addi %946, %c1_i32_827 : i32
      %948 = arith.index_cast %947 : i32 to index
      %949 = memref.load %arg2[%948] : memref<48xi32, #tpu.memory_space<smem>>
      %c7_i32_828 = arith.constant 7 : i32
      %c1_i32_829 = arith.constant 1 : i32
      %c7_i32_830 = arith.constant 7 : i32
      %c1_i32_831 = arith.constant 1 : i32
      %c0_i32_832 = arith.constant 0 : i32
      %950 = tpu.memref_slice %arg4[%949, %c0_i32_832] : memref<64x128xf32, #tpu.memory_space<any>> -> memref<1x128xf32, #tpu.memory_space<any>>
      %951 = tpu.memref_squeeze %950 : memref<1x128xf32, #tpu.memory_space<any>> -> memref<128xf32, #tpu.memory_space<any>>
      %c0_i32_833 = arith.constant 0 : i32
      %952 = tpu.memref_slice %arg7[%398, %c7_i32_828, %c1_i32_829, %c0_i32_833] : memref<2x8x6x128xf32, #tpu.memory_space<vmem>> -> memref<1x1x1x128xf32, #tpu.memory_space<vmem>>
      %953 = tpu.memref_squeeze %952 : memref<1x1x1x128xf32, #tpu.memory_space<vmem>> -> memref<128xf32, #tpu.memory_space<vmem>>
      %954 = tpu.memref_slice %arg9[%398, %c7_i32_830, %c1_i32_831] : memref<2x8x6x!tpu.dma_semaphore, #tpu.memory_space<semaphore_mem>> -> memref<1x1x1x!tpu.dma_semaphore, #tpu.memory_space<semaphore_mem>>
      %955 = tpu.memref_squeeze %954 : memref<1x1x1x!tpu.dma_semaphore, #tpu.memory_space<semaphore_mem>> -> memref<!tpu.dma_semaphore, #tpu.memory_space<semaphore_mem>>
      tpu.enqueue_dma source(%951 : memref<128xf32, #tpu.memory_space<any>>) target(%953 : memref<128xf32, #tpu.memory_space<vmem>>) target_semaphore(%955 : memref<!tpu.dma_semaphore, #tpu.memory_space<semaphore_mem>>)
      %c7_i32_834 = arith.constant 7 : i32
      %956 = arith.addi %399, %c7_i32_834 : i32
      %c6_i32_835 = arith.constant 6 : i32
      %957 = arith.muli %956, %c6_i32_835 : i32
      %c2_i32_836 = arith.constant 2 : i32
      %958 = arith.addi %957, %c2_i32_836 : i32
      %959 = arith.index_cast %958 : i32 to index
      %960 = memref.load %arg2[%959] : memref<48xi32, #tpu.memory_space<smem>>
      %c7_i32_837 = arith.constant 7 : i32
      %c2_i32_838 = arith.constant 2 : i32
      %c7_i32_839 = arith.constant 7 : i32
      %c2_i32_840 = arith.constant 2 : i32
      %c0_i32_841 = arith.constant 0 : i32
      %961 = tpu.memref_slice %arg4[%960, %c0_i32_841] : memref<64x128xf32, #tpu.memory_space<any>> -> memref<1x128xf32, #tpu.memory_space<any>>
      %962 = tpu.memref_squeeze %961 : memref<1x128xf32, #tpu.memory_space<any>> -> memref<128xf32, #tpu.memory_space<any>>
      %c0_i32_842 = arith.constant 0 : i32
      %963 = tpu.memref_slice %arg7[%398, %c7_i32_837, %c2_i32_838, %c0_i32_842] : memref<2x8x6x128xf32, #tpu.memory_space<vmem>> -> memref<1x1x1x128xf32, #tpu.memory_space<vmem>>
      %964 = tpu.memref_squeeze %963 : memref<1x1x1x128xf32, #tpu.memory_space<vmem>> -> memref<128xf32, #tpu.memory_space<vmem>>
      %965 = tpu.memref_slice %arg9[%398, %c7_i32_839, %c2_i32_840] : memref<2x8x6x!tpu.dma_semaphore, #tpu.memory_space<semaphore_mem>> -> memref<1x1x1x!tpu.dma_semaphore, #tpu.memory_space<semaphore_mem>>
      %966 = tpu.memref_squeeze %965 : memref<1x1x1x!tpu.dma_semaphore, #tpu.memory_space<semaphore_mem>> -> memref<!tpu.dma_semaphore, #tpu.memory_space<semaphore_mem>>
      tpu.enqueue_dma source(%962 : memref<128xf32, #tpu.memory_space<any>>) target(%964 : memref<128xf32, #tpu.memory_space<vmem>>) target_semaphore(%966 : memref<!tpu.dma_semaphore, #tpu.memory_space<semaphore_mem>>)
      %c7_i32_843 = arith.constant 7 : i32
      %967 = arith.addi %399, %c7_i32_843 : i32
      %c6_i32_844 = arith.constant 6 : i32
      %968 = arith.muli %967, %c6_i32_844 : i32
      %c3_i32_845 = arith.constant 3 : i32
      %969 = arith.addi %968, %c3_i32_845 : i32
      %970 = arith.index_cast %969 : i32 to index
      %971 = memref.load %arg2[%970] : memref<48xi32, #tpu.memory_space<smem>>
      %c7_i32_846 = arith.constant 7 : i32
      %c3_i32_847 = arith.constant 3 : i32
      %c7_i32_848 = arith.constant 7 : i32
      %c3_i32_849 = arith.constant 3 : i32
      %c0_i32_850 = arith.constant 0 : i32
      %972 = tpu.memref_slice %arg4[%971, %c0_i32_850] : memref<64x128xf32, #tpu.memory_space<any>> -> memref<1x128xf32, #tpu.memory_space<any>>
      %973 = tpu.memref_squeeze %972 : memref<1x128xf32, #tpu.memory_space<any>> -> memref<128xf32, #tpu.memory_space<any>>
      %c0_i32_851 = arith.constant 0 : i32
      %974 = tpu.memref_slice %arg7[%398, %c7_i32_846, %c3_i32_847, %c0_i32_851] : memref<2x8x6x128xf32, #tpu.memory_space<vmem>> -> memref<1x1x1x128xf32, #tpu.memory_space<vmem>>
      %975 = tpu.memref_squeeze %974 : memref<1x1x1x128xf32, #tpu.memory_space<vmem>> -> memref<128xf32, #tpu.memory_space<vmem>>
      %976 = tpu.memref_slice %arg9[%398, %c7_i32_848, %c3_i32_849] : memref<2x8x6x!tpu.dma_semaphore, #tpu.memory_space<semaphore_mem>> -> memref<1x1x1x!tpu.dma_semaphore, #tpu.memory_space<semaphore_mem>>
      %977 = tpu.memref_squeeze %976 : memref<1x1x1x!tpu.dma_semaphore, #tpu.memory_space<semaphore_mem>> -> memref<!tpu.dma_semaphore, #tpu.memory_space<semaphore_mem>>
      tpu.enqueue_dma source(%973 : memref<128xf32, #tpu.memory_space<any>>) target(%975 : memref<128xf32, #tpu.memory_space<vmem>>) target_semaphore(%977 : memref<!tpu.dma_semaphore, #tpu.memory_space<semaphore_mem>>)
      %c7_i32_852 = arith.constant 7 : i32
      %978 = arith.addi %399, %c7_i32_852 : i32
      %c6_i32_853 = arith.constant 6 : i32
      %979 = arith.muli %978, %c6_i32_853 : i32
      %c4_i32_854 = arith.constant 4 : i32
      %980 = arith.addi %979, %c4_i32_854 : i32
      %981 = arith.index_cast %980 : i32 to index
      %982 = memref.load %arg2[%981] : memref<48xi32, #tpu.memory_space<smem>>
      %c7_i32_855 = arith.constant 7 : i32
      %c4_i32_856 = arith.constant 4 : i32
      %c7_i32_857 = arith.constant 7 : i32
      %c4_i32_858 = arith.constant 4 : i32
      %c0_i32_859 = arith.constant 0 : i32
      %983 = tpu.memref_slice %arg4[%982, %c0_i32_859] : memref<64x128xf32, #tpu.memory_space<any>> -> memref<1x128xf32, #tpu.memory_space<any>>
      %984 = tpu.memref_squeeze %983 : memref<1x128xf32, #tpu.memory_space<any>> -> memref<128xf32, #tpu.memory_space<any>>
      %c0_i32_860 = arith.constant 0 : i32
      %985 = tpu.memref_slice %arg7[%398, %c7_i32_855, %c4_i32_856, %c0_i32_860] : memref<2x8x6x128xf32, #tpu.memory_space<vmem>> -> memref<1x1x1x128xf32, #tpu.memory_space<vmem>>
      %986 = tpu.memref_squeeze %985 : memref<1x1x1x128xf32, #tpu.memory_space<vmem>> -> memref<128xf32, #tpu.memory_space<vmem>>
      %987 = tpu.memref_slice %arg9[%398, %c7_i32_857, %c4_i32_858] : memref<2x8x6x!tpu.dma_semaphore, #tpu.memory_space<semaphore_mem>> -> memref<1x1x1x!tpu.dma_semaphore, #tpu.memory_space<semaphore_mem>>
      %988 = tpu.memref_squeeze %987 : memref<1x1x1x!tpu.dma_semaphore, #tpu.memory_space<semaphore_mem>> -> memref<!tpu.dma_semaphore, #tpu.memory_space<semaphore_mem>>
      tpu.enqueue_dma source(%984 : memref<128xf32, #tpu.memory_space<any>>) target(%986 : memref<128xf32, #tpu.memory_space<vmem>>) target_semaphore(%988 : memref<!tpu.dma_semaphore, #tpu.memory_space<semaphore_mem>>)
      %c7_i32_861 = arith.constant 7 : i32
      %989 = arith.addi %399, %c7_i32_861 : i32
      %c6_i32_862 = arith.constant 6 : i32
      %990 = arith.muli %989, %c6_i32_862 : i32
      %c5_i32_863 = arith.constant 5 : i32
      %991 = arith.addi %990, %c5_i32_863 : i32
      %992 = arith.index_cast %991 : i32 to index
      %993 = memref.load %arg2[%992] : memref<48xi32, #tpu.memory_space<smem>>
      %c7_i32_864 = arith.constant 7 : i32
      %c5_i32_865 = arith.constant 5 : i32
      %c7_i32_866 = arith.constant 7 : i32
      %c5_i32_867 = arith.constant 5 : i32
      %c0_i32_868 = arith.constant 0 : i32
      %994 = tpu.memref_slice %arg4[%993, %c0_i32_868] : memref<64x128xf32, #tpu.memory_space<any>> -> memref<1x128xf32, #tpu.memory_space<any>>
      %995 = tpu.memref_squeeze %994 : memref<1x128xf32, #tpu.memory_space<any>> -> memref<128xf32, #tpu.memory_space<any>>
      %c0_i32_869 = arith.constant 0 : i32
      %996 = tpu.memref_slice %arg7[%398, %c7_i32_864, %c5_i32_865, %c0_i32_869] : memref<2x8x6x128xf32, #tpu.memory_space<vmem>> -> memref<1x1x1x128xf32, #tpu.memory_space<vmem>>
      %997 = tpu.memref_squeeze %996 : memref<1x1x1x128xf32, #tpu.memory_space<vmem>> -> memref<128xf32, #tpu.memory_space<vmem>>
      %998 = tpu.memref_slice %arg9[%398, %c7_i32_866, %c5_i32_867] : memref<2x8x6x!tpu.dma_semaphore, #tpu.memory_space<semaphore_mem>> -> memref<1x1x1x!tpu.dma_semaphore, #tpu.memory_space<semaphore_mem>>
      %999 = tpu.memref_squeeze %998 : memref<1x1x1x!tpu.dma_semaphore, #tpu.memory_space<semaphore_mem>> -> memref<!tpu.dma_semaphore, #tpu.memory_space<semaphore_mem>>
      tpu.enqueue_dma source(%995 : memref<128xf32, #tpu.memory_space<any>>) target(%997 : memref<128xf32, #tpu.memory_space<vmem>>) target_semaphore(%999 : memref<!tpu.dma_semaphore, #tpu.memory_space<semaphore_mem>>)
    } else {
    }
    %c0_i32_8 = arith.constant 0 : i32
    %c0_i32_9 = arith.constant 0 : i32
    %c0_i32_10 = arith.constant 0 : i32
    %c0_i32_11 = arith.constant 0 : i32
    %17 = tpu.memref_slice %arg3[%c0_i32_8, %c0_i32_11] : memref<64x128xf32, #tpu.memory_space<any>> -> memref<1x128xf32, #tpu.memory_space<any>>
    %18 = tpu.memref_squeeze %17 : memref<1x128xf32, #tpu.memory_space<any>> -> memref<128xf32, #tpu.memory_space<any>>
    %c0_i32_12 = arith.constant 0 : i32
    %19 = tpu.memref_slice %arg6[%9, %c0_i32_9, %c0_i32_12] : memref<2x8x128xf32, #tpu.memory_space<vmem>> -> memref<1x1x128xf32, #tpu.memory_space<vmem>>
    %20 = tpu.memref_squeeze %19 : memref<1x1x128xf32, #tpu.memory_space<vmem>> -> memref<128xf32, #tpu.memory_space<vmem>>
    %21 = tpu.memref_slice %arg8[%9, %c0_i32_10] : memref<2x8x!tpu.dma_semaphore, #tpu.memory_space<semaphore_mem>> -> memref<1x1x!tpu.dma_semaphore, #tpu.memory_space<semaphore_mem>>
    %22 = tpu.memref_squeeze %21 : memref<1x1x!tpu.dma_semaphore, #tpu.memory_space<semaphore_mem>> -> memref<!tpu.dma_semaphore, #tpu.memory_space<semaphore_mem>>
    tpu.wait_dma2 semaphore(%22 : memref<!tpu.dma_semaphore, #tpu.memory_space<semaphore_mem>>) src(%18 : memref<128xf32, #tpu.memory_space<any>>) dst(%20 : memref<128xf32, #tpu.memory_space<vmem>>)
    %c0_i32_13 = arith.constant 0 : i32
    %c0_i32_14 = arith.constant 0 : i32
    %c0_i32_15 = arith.constant 0 : i32
    %c0_i32_16 = arith.constant 0 : i32
    %c0_i32_17 = arith.constant 0 : i32
    %c0_i32_18 = arith.constant 0 : i32
    %23 = tpu.memref_slice %arg4[%c0_i32_13, %c0_i32_18] : memref<64x128xf32, #tpu.memory_space<any>> -> memref<1x128xf32, #tpu.memory_space<any>>
    %24 = tpu.memref_squeeze %23 : memref<1x128xf32, #tpu.memory_space<any>> -> memref<128xf32, #tpu.memory_space<any>>
    %c0_i32_19 = arith.constant 0 : i32
    %25 = tpu.memref_slice %arg7[%9, %c0_i32_14, %c0_i32_15, %c0_i32_19] : memref<2x8x6x128xf32, #tpu.memory_space<vmem>> -> memref<1x1x1x128xf32, #tpu.memory_space<vmem>>
    %26 = tpu.memref_squeeze %25 : memref<1x1x1x128xf32, #tpu.memory_space<vmem>> -> memref<128xf32, #tpu.memory_space<vmem>>
    %27 = tpu.memref_slice %arg9[%9, %c0_i32_16, %c0_i32_17] : memref<2x8x6x!tpu.dma_semaphore, #tpu.memory_space<semaphore_mem>> -> memref<1x1x1x!tpu.dma_semaphore, #tpu.memory_space<semaphore_mem>>
    %28 = tpu.memref_squeeze %27 : memref<1x1x1x!tpu.dma_semaphore, #tpu.memory_space<semaphore_mem>> -> memref<!tpu.dma_semaphore, #tpu.memory_space<semaphore_mem>>
    tpu.wait_dma2 semaphore(%28 : memref<!tpu.dma_semaphore, #tpu.memory_space<semaphore_mem>>) src(%24 : memref<128xf32, #tpu.memory_space<any>>) dst(%26 : memref<128xf32, #tpu.memory_space<vmem>>)
    %c0_i32_20 = arith.constant 0 : i32
    %c0_i32_21 = arith.constant 0 : i32
    %c1_i32_22 = arith.constant 1 : i32
    %c0_i32_23 = arith.constant 0 : i32
    %c1_i32_24 = arith.constant 1 : i32
    %c0_i32_25 = arith.constant 0 : i32
    %29 = tpu.memref_slice %arg4[%c0_i32_20, %c0_i32_25] : memref<64x128xf32, #tpu.memory_space<any>> -> memref<1x128xf32, #tpu.memory_space<any>>
    %30 = tpu.memref_squeeze %29 : memref<1x128xf32, #tpu.memory_space<any>> -> memref<128xf32, #tpu.memory_space<any>>
    %c0_i32_26 = arith.constant 0 : i32
    %31 = tpu.memref_slice %arg7[%9, %c0_i32_21, %c1_i32_22, %c0_i32_26] : memref<2x8x6x128xf32, #tpu.memory_space<vmem>> -> memref<1x1x1x128xf32, #tpu.memory_space<vmem>>
    %32 = tpu.memref_squeeze %31 : memref<1x1x1x128xf32, #tpu.memory_space<vmem>> -> memref<128xf32, #tpu.memory_space<vmem>>
    %33 = tpu.memref_slice %arg9[%9, %c0_i32_23, %c1_i32_24] : memref<2x8x6x!tpu.dma_semaphore, #tpu.memory_space<semaphore_mem>> -> memref<1x1x1x!tpu.dma_semaphore, #tpu.memory_space<semaphore_mem>>
    %34 = tpu.memref_squeeze %33 : memref<1x1x1x!tpu.dma_semaphore, #tpu.memory_space<semaphore_mem>> -> memref<!tpu.dma_semaphore, #tpu.memory_space<semaphore_mem>>
    tpu.wait_dma2 semaphore(%34 : memref<!tpu.dma_semaphore, #tpu.memory_space<semaphore_mem>>) src(%30 : memref<128xf32, #tpu.memory_space<any>>) dst(%32 : memref<128xf32, #tpu.memory_space<vmem>>)
    %c0_i32_27 = arith.constant 0 : i32
    %c0_i32_28 = arith.constant 0 : i32
    %c2_i32_29 = arith.constant 2 : i32
    %c0_i32_30 = arith.constant 0 : i32
    %c2_i32_31 = arith.constant 2 : i32
    %c0_i32_32 = arith.constant 0 : i32
    %35 = tpu.memref_slice %arg4[%c0_i32_27, %c0_i32_32] : memref<64x128xf32, #tpu.memory_space<any>> -> memref<1x128xf32, #tpu.memory_space<any>>
    %36 = tpu.memref_squeeze %35 : memref<1x128xf32, #tpu.memory_space<any>> -> memref<128xf32, #tpu.memory_space<any>>
    %c0_i32_33 = arith.constant 0 : i32
    %37 = tpu.memref_slice %arg7[%9, %c0_i32_28, %c2_i32_29, %c0_i32_33] : memref<2x8x6x128xf32, #tpu.memory_space<vmem>> -> memref<1x1x1x128xf32, #tpu.memory_space<vmem>>
    %38 = tpu.memref_squeeze %37 : memref<1x1x1x128xf32, #tpu.memory_space<vmem>> -> memref<128xf32, #tpu.memory_space<vmem>>
    %39 = tpu.memref_slice %arg9[%9, %c0_i32_30, %c2_i32_31] : memref<2x8x6x!tpu.dma_semaphore, #tpu.memory_space<semaphore_mem>> -> memref<1x1x1x!tpu.dma_semaphore, #tpu.memory_space<semaphore_mem>>
    %40 = tpu.memref_squeeze %39 : memref<1x1x1x!tpu.dma_semaphore, #tpu.memory_space<semaphore_mem>> -> memref<!tpu.dma_semaphore, #tpu.memory_space<semaphore_mem>>
    tpu.wait_dma2 semaphore(%40 : memref<!tpu.dma_semaphore, #tpu.memory_space<semaphore_mem>>) src(%36 : memref<128xf32, #tpu.memory_space<any>>) dst(%38 : memref<128xf32, #tpu.memory_space<vmem>>)
    %c0_i32_34 = arith.constant 0 : i32
    %c0_i32_35 = arith.constant 0 : i32
    %c3_i32 = arith.constant 3 : i32
    %c0_i32_36 = arith.constant 0 : i32
    %c3_i32_37 = arith.constant 3 : i32
    %c0_i32_38 = arith.constant 0 : i32
    %41 = tpu.memref_slice %arg4[%c0_i32_34, %c0_i32_38] : memref<64x128xf32, #tpu.memory_space<any>> -> memref<1x128xf32, #tpu.memory_space<any>>
    %42 = tpu.memref_squeeze %41 : memref<1x128xf32, #tpu.memory_space<any>> -> memref<128xf32, #tpu.memory_space<any>>
    %c0_i32_39 = arith.constant 0 : i32
    %43 = tpu.memref_slice %arg7[%9, %c0_i32_35, %c3_i32, %c0_i32_39] : memref<2x8x6x128xf32, #tpu.memory_space<vmem>> -> memref<1x1x1x128xf32, #tpu.memory_space<vmem>>
    %44 = tpu.memref_squeeze %43 : memref<1x1x1x128xf32, #tpu.memory_space<vmem>> -> memref<128xf32, #tpu.memory_space<vmem>>
    %45 = tpu.memref_slice %arg9[%9, %c0_i32_36, %c3_i32_37] : memref<2x8x6x!tpu.dma_semaphore, #tpu.memory_space<semaphore_mem>> -> memref<1x1x1x!tpu.dma_semaphore, #tpu.memory_space<semaphore_mem>>
    %46 = tpu.memref_squeeze %45 : memref<1x1x1x!tpu.dma_semaphore, #tpu.memory_space<semaphore_mem>> -> memref<!tpu.dma_semaphore, #tpu.memory_space<semaphore_mem>>
    tpu.wait_dma2 semaphore(%46 : memref<!tpu.dma_semaphore, #tpu.memory_space<semaphore_mem>>) src(%42 : memref<128xf32, #tpu.memory_space<any>>) dst(%44 : memref<128xf32, #tpu.memory_space<vmem>>)
    %c0_i32_40 = arith.constant 0 : i32
    %c0_i32_41 = arith.constant 0 : i32
    %c4_i32 = arith.constant 4 : i32
    %c0_i32_42 = arith.constant 0 : i32
    %c4_i32_43 = arith.constant 4 : i32
    %c0_i32_44 = arith.constant 0 : i32
    %47 = tpu.memref_slice %arg4[%c0_i32_40, %c0_i32_44] : memref<64x128xf32, #tpu.memory_space<any>> -> memref<1x128xf32, #tpu.memory_space<any>>
    %48 = tpu.memref_squeeze %47 : memref<1x128xf32, #tpu.memory_space<any>> -> memref<128xf32, #tpu.memory_space<any>>
    %c0_i32_45 = arith.constant 0 : i32
    %49 = tpu.memref_slice %arg7[%9, %c0_i32_41, %c4_i32, %c0_i32_45] : memref<2x8x6x128xf32, #tpu.memory_space<vmem>> -> memref<1x1x1x128xf32, #tpu.memory_space<vmem>>
    %50 = tpu.memref_squeeze %49 : memref<1x1x1x128xf32, #tpu.memory_space<vmem>> -> memref<128xf32, #tpu.memory_space<vmem>>
    %51 = tpu.memref_slice %arg9[%9, %c0_i32_42, %c4_i32_43] : memref<2x8x6x!tpu.dma_semaphore, #tpu.memory_space<semaphore_mem>> -> memref<1x1x1x!tpu.dma_semaphore, #tpu.memory_space<semaphore_mem>>
    %52 = tpu.memref_squeeze %51 : memref<1x1x1x!tpu.dma_semaphore, #tpu.memory_space<semaphore_mem>> -> memref<!tpu.dma_semaphore, #tpu.memory_space<semaphore_mem>>
    tpu.wait_dma2 semaphore(%52 : memref<!tpu.dma_semaphore, #tpu.memory_space<semaphore_mem>>) src(%48 : memref<128xf32, #tpu.memory_space<any>>) dst(%50 : memref<128xf32, #tpu.memory_space<vmem>>)
    %c0_i32_46 = arith.constant 0 : i32
    %c0_i32_47 = arith.constant 0 : i32
    %c5_i32 = arith.constant 5 : i32
    %c0_i32_48 = arith.constant 0 : i32
    %c5_i32_49 = arith.constant 5 : i32
    %c0_i32_50 = arith.constant 0 : i32
    %53 = tpu.memref_slice %arg4[%c0_i32_46, %c0_i32_50] : memref<64x128xf32, #tpu.memory_space<any>> -> memref<1x128xf32, #tpu.memory_space<any>>
    %54 = tpu.memref_squeeze %53 : memref<1x128xf32, #tpu.memory_space<any>> -> memref<128xf32, #tpu.memory_space<any>>
    %c0_i32_51 = arith.constant 0 : i32
    %55 = tpu.memref_slice %arg7[%9, %c0_i32_47, %c5_i32, %c0_i32_51] : memref<2x8x6x128xf32, #tpu.memory_space<vmem>> -> memref<1x1x1x128xf32, #tpu.memory_space<vmem>>
    %56 = tpu.memref_squeeze %55 : memref<1x1x1x128xf32, #tpu.memory_space<vmem>> -> memref<128xf32, #tpu.memory_space<vmem>>
    %57 = tpu.memref_slice %arg9[%9, %c0_i32_48, %c5_i32_49] : memref<2x8x6x!tpu.dma_semaphore, #tpu.memory_space<semaphore_mem>> -> memref<1x1x1x!tpu.dma_semaphore, #tpu.memory_space<semaphore_mem>>
    %58 = tpu.memref_squeeze %57 : memref<1x1x1x!tpu.dma_semaphore, #tpu.memory_space<semaphore_mem>> -> memref<!tpu.dma_semaphore, #tpu.memory_space<semaphore_mem>>
    tpu.wait_dma2 semaphore(%58 : memref<!tpu.dma_semaphore, #tpu.memory_space<semaphore_mem>>) src(%54 : memref<128xf32, #tpu.memory_space<any>>) dst(%56 : memref<128xf32, #tpu.memory_space<vmem>>)
    %c0_i32_52 = arith.constant 0 : i32
    %c1_i32_53 = arith.constant 1 : i32
    %c1_i32_54 = arith.constant 1 : i32
    %c0_i32_55 = arith.constant 0 : i32
    %59 = tpu.memref_slice %arg3[%c0_i32_52, %c0_i32_55] : memref<64x128xf32, #tpu.memory_space<any>> -> memref<1x128xf32, #tpu.memory_space<any>>
    %60 = tpu.memref_squeeze %59 : memref<1x128xf32, #tpu.memory_space<any>> -> memref<128xf32, #tpu.memory_space<any>>
    %c0_i32_56 = arith.constant 0 : i32
    %61 = tpu.memref_slice %arg6[%9, %c1_i32_53, %c0_i32_56] : memref<2x8x128xf32, #tpu.memory_space<vmem>> -> memref<1x1x128xf32, #tpu.memory_space<vmem>>
    %62 = tpu.memref_squeeze %61 : memref<1x1x128xf32, #tpu.memory_space<vmem>> -> memref<128xf32, #tpu.memory_space<vmem>>
    %63 = tpu.memref_slice %arg8[%9, %c1_i32_54] : memref<2x8x!tpu.dma_semaphore, #tpu.memory_space<semaphore_mem>> -> memref<1x1x!tpu.dma_semaphore, #tpu.memory_space<semaphore_mem>>
    %64 = tpu.memref_squeeze %63 : memref<1x1x!tpu.dma_semaphore, #tpu.memory_space<semaphore_mem>> -> memref<!tpu.dma_semaphore, #tpu.memory_space<semaphore_mem>>
    tpu.wait_dma2 semaphore(%64 : memref<!tpu.dma_semaphore, #tpu.memory_space<semaphore_mem>>) src(%60 : memref<128xf32, #tpu.memory_space<any>>) dst(%62 : memref<128xf32, #tpu.memory_space<vmem>>)
    %c0_i32_57 = arith.constant 0 : i32
    %c1_i32_58 = arith.constant 1 : i32
    %c0_i32_59 = arith.constant 0 : i32
    %c1_i32_60 = arith.constant 1 : i32
    %c0_i32_61 = arith.constant 0 : i32
    %c0_i32_62 = arith.constant 0 : i32
    %65 = tpu.memref_slice %arg4[%c0_i32_57, %c0_i32_62] : memref<64x128xf32, #tpu.memory_space<any>> -> memref<1x128xf32, #tpu.memory_space<any>>
    %66 = tpu.memref_squeeze %65 : memref<1x128xf32, #tpu.memory_space<any>> -> memref<128xf32, #tpu.memory_space<any>>
    %c0_i32_63 = arith.constant 0 : i32
    %67 = tpu.memref_slice %arg7[%9, %c1_i32_58, %c0_i32_59, %c0_i32_63] : memref<2x8x6x128xf32, #tpu.memory_space<vmem>> -> memref<1x1x1x128xf32, #tpu.memory_space<vmem>>
    %68 = tpu.memref_squeeze %67 : memref<1x1x1x128xf32, #tpu.memory_space<vmem>> -> memref<128xf32, #tpu.memory_space<vmem>>
    %69 = tpu.memref_slice %arg9[%9, %c1_i32_60, %c0_i32_61] : memref<2x8x6x!tpu.dma_semaphore, #tpu.memory_space<semaphore_mem>> -> memref<1x1x1x!tpu.dma_semaphore, #tpu.memory_space<semaphore_mem>>
    %70 = tpu.memref_squeeze %69 : memref<1x1x1x!tpu.dma_semaphore, #tpu.memory_space<semaphore_mem>> -> memref<!tpu.dma_semaphore, #tpu.memory_space<semaphore_mem>>
    tpu.wait_dma2 semaphore(%70 : memref<!tpu.dma_semaphore, #tpu.memory_space<semaphore_mem>>) src(%66 : memref<128xf32, #tpu.memory_space<any>>) dst(%68 : memref<128xf32, #tpu.memory_space<vmem>>)
    %c0_i32_64 = arith.constant 0 : i32
    %c1_i32_65 = arith.constant 1 : i32
    %c1_i32_66 = arith.constant 1 : i32
    %c1_i32_67 = arith.constant 1 : i32
    %c1_i32_68 = arith.constant 1 : i32
    %c0_i32_69 = arith.constant 0 : i32
    %71 = tpu.memref_slice %arg4[%c0_i32_64, %c0_i32_69] : memref<64x128xf32, #tpu.memory_space<any>> -> memref<1x128xf32, #tpu.memory_space<any>>
    %72 = tpu.memref_squeeze %71 : memref<1x128xf32, #tpu.memory_space<any>> -> memref<128xf32, #tpu.memory_space<any>>
    %c0_i32_70 = arith.constant 0 : i32
    %73 = tpu.memref_slice %arg7[%9, %c1_i32_65, %c1_i32_66, %c0_i32_70] : memref<2x8x6x128xf32, #tpu.memory_space<vmem>> -> memref<1x1x1x128xf32, #tpu.memory_space<vmem>>
    %74 = tpu.memref_squeeze %73 : memref<1x1x1x128xf32, #tpu.memory_space<vmem>> -> memref<128xf32, #tpu.memory_space<vmem>>
    %75 = tpu.memref_slice %arg9[%9, %c1_i32_67, %c1_i32_68] : memref<2x8x6x!tpu.dma_semaphore, #tpu.memory_space<semaphore_mem>> -> memref<1x1x1x!tpu.dma_semaphore, #tpu.memory_space<semaphore_mem>>
    %76 = tpu.memref_squeeze %75 : memref<1x1x1x!tpu.dma_semaphore, #tpu.memory_space<semaphore_mem>> -> memref<!tpu.dma_semaphore, #tpu.memory_space<semaphore_mem>>
    tpu.wait_dma2 semaphore(%76 : memref<!tpu.dma_semaphore, #tpu.memory_space<semaphore_mem>>) src(%72 : memref<128xf32, #tpu.memory_space<any>>) dst(%74 : memref<128xf32, #tpu.memory_space<vmem>>)
    %c0_i32_71 = arith.constant 0 : i32
    %c1_i32_72 = arith.constant 1 : i32
    %c2_i32_73 = arith.constant 2 : i32
    %c1_i32_74 = arith.constant 1 : i32
    %c2_i32_75 = arith.constant 2 : i32
    %c0_i32_76 = arith.constant 0 : i32
    %77 = tpu.memref_slice %arg4[%c0_i32_71, %c0_i32_76] : memref<64x128xf32, #tpu.memory_space<any>> -> memref<1x128xf32, #tpu.memory_space<any>>
    %78 = tpu.memref_squeeze %77 : memref<1x128xf32, #tpu.memory_space<any>> -> memref<128xf32, #tpu.memory_space<any>>
    %c0_i32_77 = arith.constant 0 : i32
    %79 = tpu.memref_slice %arg7[%9, %c1_i32_72, %c2_i32_73, %c0_i32_77] : memref<2x8x6x128xf32, #tpu.memory_space<vmem>> -> memref<1x1x1x128xf32, #tpu.memory_space<vmem>>
    %80 = tpu.memref_squeeze %79 : memref<1x1x1x128xf32, #tpu.memory_space<vmem>> -> memref<128xf32, #tpu.memory_space<vmem>>
    %81 = tpu.memref_slice %arg9[%9, %c1_i32_74, %c2_i32_75] : memref<2x8x6x!tpu.dma_semaphore, #tpu.memory_space<semaphore_mem>> -> memref<1x1x1x!tpu.dma_semaphore, #tpu.memory_space<semaphore_mem>>
    %82 = tpu.memref_squeeze %81 : memref<1x1x1x!tpu.dma_semaphore, #tpu.memory_space<semaphore_mem>> -> memref<!tpu.dma_semaphore, #tpu.memory_space<semaphore_mem>>
    tpu.wait_dma2 semaphore(%82 : memref<!tpu.dma_semaphore, #tpu.memory_space<semaphore_mem>>) src(%78 : memref<128xf32, #tpu.memory_space<any>>) dst(%80 : memref<128xf32, #tpu.memory_space<vmem>>)
    %c0_i32_78 = arith.constant 0 : i32
    %c1_i32_79 = arith.constant 1 : i32
    %c3_i32_80 = arith.constant 3 : i32
    %c1_i32_81 = arith.constant 1 : i32
    %c3_i32_82 = arith.constant 3 : i32
    %c0_i32_83 = arith.constant 0 : i32
    %83 = tpu.memref_slice %arg4[%c0_i32_78, %c0_i32_83] : memref<64x128xf32, #tpu.memory_space<any>> -> memref<1x128xf32, #tpu.memory_space<any>>
    %84 = tpu.memref_squeeze %83 : memref<1x128xf32, #tpu.memory_space<any>> -> memref<128xf32, #tpu.memory_space<any>>
    %c0_i32_84 = arith.constant 0 : i32
    %85 = tpu.memref_slice %arg7[%9, %c1_i32_79, %c3_i32_80, %c0_i32_84] : memref<2x8x6x128xf32, #tpu.memory_space<vmem>> -> memref<1x1x1x128xf32, #tpu.memory_space<vmem>>
    %86 = tpu.memref_squeeze %85 : memref<1x1x1x128xf32, #tpu.memory_space<vmem>> -> memref<128xf32, #tpu.memory_space<vmem>>
    %87 = tpu.memref_slice %arg9[%9, %c1_i32_81, %c3_i32_82] : memref<2x8x6x!tpu.dma_semaphore, #tpu.memory_space<semaphore_mem>> -> memref<1x1x1x!tpu.dma_semaphore, #tpu.memory_space<semaphore_mem>>
    %88 = tpu.memref_squeeze %87 : memref<1x1x1x!tpu.dma_semaphore, #tpu.memory_space<semaphore_mem>> -> memref<!tpu.dma_semaphore, #tpu.memory_space<semaphore_mem>>
    tpu.wait_dma2 semaphore(%88 : memref<!tpu.dma_semaphore, #tpu.memory_space<semaphore_mem>>) src(%84 : memref<128xf32, #tpu.memory_space<any>>) dst(%86 : memref<128xf32, #tpu.memory_space<vmem>>)
    %c0_i32_85 = arith.constant 0 : i32
    %c1_i32_86 = arith.constant 1 : i32
    %c4_i32_87 = arith.constant 4 : i32
    %c1_i32_88 = arith.constant 1 : i32
    %c4_i32_89 = arith.constant 4 : i32
    %c0_i32_90 = arith.constant 0 : i32
    %89 = tpu.memref_slice %arg4[%c0_i32_85, %c0_i32_90] : memref<64x128xf32, #tpu.memory_space<any>> -> memref<1x128xf32, #tpu.memory_space<any>>
    %90 = tpu.memref_squeeze %89 : memref<1x128xf32, #tpu.memory_space<any>> -> memref<128xf32, #tpu.memory_space<any>>
    %c0_i32_91 = arith.constant 0 : i32
    %91 = tpu.memref_slice %arg7[%9, %c1_i32_86, %c4_i32_87, %c0_i32_91] : memref<2x8x6x128xf32, #tpu.memory_space<vmem>> -> memref<1x1x1x128xf32, #tpu.memory_space<vmem>>
    %92 = tpu.memref_squeeze %91 : memref<1x1x1x128xf32, #tpu.memory_space<vmem>> -> memref<128xf32, #tpu.memory_space<vmem>>
    %93 = tpu.memref_slice %arg9[%9, %c1_i32_88, %c4_i32_89] : memref<2x8x6x!tpu.dma_semaphore, #tpu.memory_space<semaphore_mem>> -> memref<1x1x1x!tpu.dma_semaphore, #tpu.memory_space<semaphore_mem>>
    %94 = tpu.memref_squeeze %93 : memref<1x1x1x!tpu.dma_semaphore, #tpu.memory_space<semaphore_mem>> -> memref<!tpu.dma_semaphore, #tpu.memory_space<semaphore_mem>>
    tpu.wait_dma2 semaphore(%94 : memref<!tpu.dma_semaphore, #tpu.memory_space<semaphore_mem>>) src(%90 : memref<128xf32, #tpu.memory_space<any>>) dst(%92 : memref<128xf32, #tpu.memory_space<vmem>>)
    %c0_i32_92 = arith.constant 0 : i32
    %c1_i32_93 = arith.constant 1 : i32
    %c5_i32_94 = arith.constant 5 : i32
    %c1_i32_95 = arith.constant 1 : i32
    %c5_i32_96 = arith.constant 5 : i32
    %c0_i32_97 = arith.constant 0 : i32
    %95 = tpu.memref_slice %arg4[%c0_i32_92, %c0_i32_97] : memref<64x128xf32, #tpu.memory_space<any>> -> memref<1x128xf32, #tpu.memory_space<any>>
    %96 = tpu.memref_squeeze %95 : memref<1x128xf32, #tpu.memory_space<any>> -> memref<128xf32, #tpu.memory_space<any>>
    %c0_i32_98 = arith.constant 0 : i32
    %97 = tpu.memref_slice %arg7[%9, %c1_i32_93, %c5_i32_94, %c0_i32_98] : memref<2x8x6x128xf32, #tpu.memory_space<vmem>> -> memref<1x1x1x128xf32, #tpu.memory_space<vmem>>
    %98 = tpu.memref_squeeze %97 : memref<1x1x1x128xf32, #tpu.memory_space<vmem>> -> memref<128xf32, #tpu.memory_space<vmem>>
    %99 = tpu.memref_slice %arg9[%9, %c1_i32_95, %c5_i32_96] : memref<2x8x6x!tpu.dma_semaphore, #tpu.memory_space<semaphore_mem>> -> memref<1x1x1x!tpu.dma_semaphore, #tpu.memory_space<semaphore_mem>>
    %100 = tpu.memref_squeeze %99 : memref<1x1x1x!tpu.dma_semaphore, #tpu.memory_space<semaphore_mem>> -> memref<!tpu.dma_semaphore, #tpu.memory_space<semaphore_mem>>
    tpu.wait_dma2 semaphore(%100 : memref<!tpu.dma_semaphore, #tpu.memory_space<semaphore_mem>>) src(%96 : memref<128xf32, #tpu.memory_space<any>>) dst(%98 : memref<128xf32, #tpu.memory_space<vmem>>)
    %c0_i32_99 = arith.constant 0 : i32
    %c2_i32_100 = arith.constant 2 : i32
    %c2_i32_101 = arith.constant 2 : i32
    %c0_i32_102 = arith.constant 0 : i32
    %101 = tpu.memref_slice %arg3[%c0_i32_99, %c0_i32_102] : memref<64x128xf32, #tpu.memory_space<any>> -> memref<1x128xf32, #tpu.memory_space<any>>
    %102 = tpu.memref_squeeze %101 : memref<1x128xf32, #tpu.memory_space<any>> -> memref<128xf32, #tpu.memory_space<any>>
    %c0_i32_103 = arith.constant 0 : i32
    %103 = tpu.memref_slice %arg6[%9, %c2_i32_100, %c0_i32_103] : memref<2x8x128xf32, #tpu.memory_space<vmem>> -> memref<1x1x128xf32, #tpu.memory_space<vmem>>
    %104 = tpu.memref_squeeze %103 : memref<1x1x128xf32, #tpu.memory_space<vmem>> -> memref<128xf32, #tpu.memory_space<vmem>>
    %105 = tpu.memref_slice %arg8[%9, %c2_i32_101] : memref<2x8x!tpu.dma_semaphore, #tpu.memory_space<semaphore_mem>> -> memref<1x1x!tpu.dma_semaphore, #tpu.memory_space<semaphore_mem>>
    %106 = tpu.memref_squeeze %105 : memref<1x1x!tpu.dma_semaphore, #tpu.memory_space<semaphore_mem>> -> memref<!tpu.dma_semaphore, #tpu.memory_space<semaphore_mem>>
    tpu.wait_dma2 semaphore(%106 : memref<!tpu.dma_semaphore, #tpu.memory_space<semaphore_mem>>) src(%102 : memref<128xf32, #tpu.memory_space<any>>) dst(%104 : memref<128xf32, #tpu.memory_space<vmem>>)
    %c0_i32_104 = arith.constant 0 : i32
    %c2_i32_105 = arith.constant 2 : i32
    %c0_i32_106 = arith.constant 0 : i32
    %c2_i32_107 = arith.constant 2 : i32
    %c0_i32_108 = arith.constant 0 : i32
    %c0_i32_109 = arith.constant 0 : i32
    %107 = tpu.memref_slice %arg4[%c0_i32_104, %c0_i32_109] : memref<64x128xf32, #tpu.memory_space<any>> -> memref<1x128xf32, #tpu.memory_space<any>>
    %108 = tpu.memref_squeeze %107 : memref<1x128xf32, #tpu.memory_space<any>> -> memref<128xf32, #tpu.memory_space<any>>
    %c0_i32_110 = arith.constant 0 : i32
    %109 = tpu.memref_slice %arg7[%9, %c2_i32_105, %c0_i32_106, %c0_i32_110] : memref<2x8x6x128xf32, #tpu.memory_space<vmem>> -> memref<1x1x1x128xf32, #tpu.memory_space<vmem>>
    %110 = tpu.memref_squeeze %109 : memref<1x1x1x128xf32, #tpu.memory_space<vmem>> -> memref<128xf32, #tpu.memory_space<vmem>>
    %111 = tpu.memref_slice %arg9[%9, %c2_i32_107, %c0_i32_108] : memref<2x8x6x!tpu.dma_semaphore, #tpu.memory_space<semaphore_mem>> -> memref<1x1x1x!tpu.dma_semaphore, #tpu.memory_space<semaphore_mem>>
    %112 = tpu.memref_squeeze %111 : memref<1x1x1x!tpu.dma_semaphore, #tpu.memory_space<semaphore_mem>> -> memref<!tpu.dma_semaphore, #tpu.memory_space<semaphore_mem>>
    tpu.wait_dma2 semaphore(%112 : memref<!tpu.dma_semaphore, #tpu.memory_space<semaphore_mem>>) src(%108 : memref<128xf32, #tpu.memory_space<any>>) dst(%110 : memref<128xf32, #tpu.memory_space<vmem>>)
    %c0_i32_111 = arith.constant 0 : i32
    %c2_i32_112 = arith.constant 2 : i32
    %c1_i32_113 = arith.constant 1 : i32
    %c2_i32_114 = arith.constant 2 : i32
    %c1_i32_115 = arith.constant 1 : i32
    %c0_i32_116 = arith.constant 0 : i32
    %113 = tpu.memref_slice %arg4[%c0_i32_111, %c0_i32_116] : memref<64x128xf32, #tpu.memory_space<any>> -> memref<1x128xf32, #tpu.memory_space<any>>
    %114 = tpu.memref_squeeze %113 : memref<1x128xf32, #tpu.memory_space<any>> -> memref<128xf32, #tpu.memory_space<any>>
    %c0_i32_117 = arith.constant 0 : i32
    %115 = tpu.memref_slice %arg7[%9, %c2_i32_112, %c1_i32_113, %c0_i32_117] : memref<2x8x6x128xf32, #tpu.memory_space<vmem>> -> memref<1x1x1x128xf32, #tpu.memory_space<vmem>>
    %116 = tpu.memref_squeeze %115 : memref<1x1x1x128xf32, #tpu.memory_space<vmem>> -> memref<128xf32, #tpu.memory_space<vmem>>
    %117 = tpu.memref_slice %arg9[%9, %c2_i32_114, %c1_i32_115] : memref<2x8x6x!tpu.dma_semaphore, #tpu.memory_space<semaphore_mem>> -> memref<1x1x1x!tpu.dma_semaphore, #tpu.memory_space<semaphore_mem>>
    %118 = tpu.memref_squeeze %117 : memref<1x1x1x!tpu.dma_semaphore, #tpu.memory_space<semaphore_mem>> -> memref<!tpu.dma_semaphore, #tpu.memory_space<semaphore_mem>>
    tpu.wait_dma2 semaphore(%118 : memref<!tpu.dma_semaphore, #tpu.memory_space<semaphore_mem>>) src(%114 : memref<128xf32, #tpu.memory_space<any>>) dst(%116 : memref<128xf32, #tpu.memory_space<vmem>>)
    %c0_i32_118 = arith.constant 0 : i32
    %c2_i32_119 = arith.constant 2 : i32
    %c2_i32_120 = arith.constant 2 : i32
    %c2_i32_121 = arith.constant 2 : i32
    %c2_i32_122 = arith.constant 2 : i32
    %c0_i32_123 = arith.constant 0 : i32
    %119 = tpu.memref_slice %arg4[%c0_i32_118, %c0_i32_123] : memref<64x128xf32, #tpu.memory_space<any>> -> memref<1x128xf32, #tpu.memory_space<any>>
    %120 = tpu.memref_squeeze %119 : memref<1x128xf32, #tpu.memory_space<any>> -> memref<128xf32, #tpu.memory_space<any>>
    %c0_i32_124 = arith.constant 0 : i32
    %121 = tpu.memref_slice %arg7[%9, %c2_i32_119, %c2_i32_120, %c0_i32_124] : memref<2x8x6x128xf32, #tpu.memory_space<vmem>> -> memref<1x1x1x128xf32, #tpu.memory_space<vmem>>
    %122 = tpu.memref_squeeze %121 : memref<1x1x1x128xf32, #tpu.memory_space<vmem>> -> memref<128xf32, #tpu.memory_space<vmem>>
    %123 = tpu.memref_slice %arg9[%9, %c2_i32_121, %c2_i32_122] : memref<2x8x6x!tpu.dma_semaphore, #tpu.memory_space<semaphore_mem>> -> memref<1x1x1x!tpu.dma_semaphore, #tpu.memory_space<semaphore_mem>>
    %124 = tpu.memref_squeeze %123 : memref<1x1x1x!tpu.dma_semaphore, #tpu.memory_space<semaphore_mem>> -> memref<!tpu.dma_semaphore, #tpu.memory_space<semaphore_mem>>
    tpu.wait_dma2 semaphore(%124 : memref<!tpu.dma_semaphore, #tpu.memory_space<semaphore_mem>>) src(%120 : memref<128xf32, #tpu.memory_space<any>>) dst(%122 : memref<128xf32, #tpu.memory_space<vmem>>)
    %c0_i32_125 = arith.constant 0 : i32
    %c2_i32_126 = arith.constant 2 : i32
    %c3_i32_127 = arith.constant 3 : i32
    %c2_i32_128 = arith.constant 2 : i32
    %c3_i32_129 = arith.constant 3 : i32
    %c0_i32_130 = arith.constant 0 : i32
    %125 = tpu.memref_slice %arg4[%c0_i32_125, %c0_i32_130] : memref<64x128xf32, #tpu.memory_space<any>> -> memref<1x128xf32, #tpu.memory_space<any>>
    %126 = tpu.memref_squeeze %125 : memref<1x128xf32, #tpu.memory_space<any>> -> memref<128xf32, #tpu.memory_space<any>>
    %c0_i32_131 = arith.constant 0 : i32
    %127 = tpu.memref_slice %arg7[%9, %c2_i32_126, %c3_i32_127, %c0_i32_131] : memref<2x8x6x128xf32, #tpu.memory_space<vmem>> -> memref<1x1x1x128xf32, #tpu.memory_space<vmem>>
    %128 = tpu.memref_squeeze %127 : memref<1x1x1x128xf32, #tpu.memory_space<vmem>> -> memref<128xf32, #tpu.memory_space<vmem>>
    %129 = tpu.memref_slice %arg9[%9, %c2_i32_128, %c3_i32_129] : memref<2x8x6x!tpu.dma_semaphore, #tpu.memory_space<semaphore_mem>> -> memref<1x1x1x!tpu.dma_semaphore, #tpu.memory_space<semaphore_mem>>
    %130 = tpu.memref_squeeze %129 : memref<1x1x1x!tpu.dma_semaphore, #tpu.memory_space<semaphore_mem>> -> memref<!tpu.dma_semaphore, #tpu.memory_space<semaphore_mem>>
    tpu.wait_dma2 semaphore(%130 : memref<!tpu.dma_semaphore, #tpu.memory_space<semaphore_mem>>) src(%126 : memref<128xf32, #tpu.memory_space<any>>) dst(%128 : memref<128xf32, #tpu.memory_space<vmem>>)
    %c0_i32_132 = arith.constant 0 : i32
    %c2_i32_133 = arith.constant 2 : i32
    %c4_i32_134 = arith.constant 4 : i32
    %c2_i32_135 = arith.constant 2 : i32
    %c4_i32_136 = arith.constant 4 : i32
    %c0_i32_137 = arith.constant 0 : i32
    %131 = tpu.memref_slice %arg4[%c0_i32_132, %c0_i32_137] : memref<64x128xf32, #tpu.memory_space<any>> -> memref<1x128xf32, #tpu.memory_space<any>>
    %132 = tpu.memref_squeeze %131 : memref<1x128xf32, #tpu.memory_space<any>> -> memref<128xf32, #tpu.memory_space<any>>
    %c0_i32_138 = arith.constant 0 : i32
    %133 = tpu.memref_slice %arg7[%9, %c2_i32_133, %c4_i32_134, %c0_i32_138] : memref<2x8x6x128xf32, #tpu.memory_space<vmem>> -> memref<1x1x1x128xf32, #tpu.memory_space<vmem>>
    %134 = tpu.memref_squeeze %133 : memref<1x1x1x128xf32, #tpu.memory_space<vmem>> -> memref<128xf32, #tpu.memory_space<vmem>>
    %135 = tpu.memref_slice %arg9[%9, %c2_i32_135, %c4_i32_136] : memref<2x8x6x!tpu.dma_semaphore, #tpu.memory_space<semaphore_mem>> -> memref<1x1x1x!tpu.dma_semaphore, #tpu.memory_space<semaphore_mem>>
    %136 = tpu.memref_squeeze %135 : memref<1x1x1x!tpu.dma_semaphore, #tpu.memory_space<semaphore_mem>> -> memref<!tpu.dma_semaphore, #tpu.memory_space<semaphore_mem>>
    tpu.wait_dma2 semaphore(%136 : memref<!tpu.dma_semaphore, #tpu.memory_space<semaphore_mem>>) src(%132 : memref<128xf32, #tpu.memory_space<any>>) dst(%134 : memref<128xf32, #tpu.memory_space<vmem>>)
    %c0_i32_139 = arith.constant 0 : i32
    %c2_i32_140 = arith.constant 2 : i32
    %c5_i32_141 = arith.constant 5 : i32
    %c2_i32_142 = arith.constant 2 : i32
    %c5_i32_143 = arith.constant 5 : i32
    %c0_i32_144 = arith.constant 0 : i32
    %137 = tpu.memref_slice %arg4[%c0_i32_139, %c0_i32_144] : memref<64x128xf32, #tpu.memory_space<any>> -> memref<1x128xf32, #tpu.memory_space<any>>
    %138 = tpu.memref_squeeze %137 : memref<1x128xf32, #tpu.memory_space<any>> -> memref<128xf32, #tpu.memory_space<any>>
    %c0_i32_145 = arith.constant 0 : i32
    %139 = tpu.memref_slice %arg7[%9, %c2_i32_140, %c5_i32_141, %c0_i32_145] : memref<2x8x6x128xf32, #tpu.memory_space<vmem>> -> memref<1x1x1x128xf32, #tpu.memory_space<vmem>>
    %140 = tpu.memref_squeeze %139 : memref<1x1x1x128xf32, #tpu.memory_space<vmem>> -> memref<128xf32, #tpu.memory_space<vmem>>
    %141 = tpu.memref_slice %arg9[%9, %c2_i32_142, %c5_i32_143] : memref<2x8x6x!tpu.dma_semaphore, #tpu.memory_space<semaphore_mem>> -> memref<1x1x1x!tpu.dma_semaphore, #tpu.memory_space<semaphore_mem>>
    %142 = tpu.memref_squeeze %141 : memref<1x1x1x!tpu.dma_semaphore, #tpu.memory_space<semaphore_mem>> -> memref<!tpu.dma_semaphore, #tpu.memory_space<semaphore_mem>>
    tpu.wait_dma2 semaphore(%142 : memref<!tpu.dma_semaphore, #tpu.memory_space<semaphore_mem>>) src(%138 : memref<128xf32, #tpu.memory_space<any>>) dst(%140 : memref<128xf32, #tpu.memory_space<vmem>>)
    %c0_i32_146 = arith.constant 0 : i32
    %c3_i32_147 = arith.constant 3 : i32
    %c3_i32_148 = arith.constant 3 : i32
    %c0_i32_149 = arith.constant 0 : i32
    %143 = tpu.memref_slice %arg3[%c0_i32_146, %c0_i32_149] : memref<64x128xf32, #tpu.memory_space<any>> -> memref<1x128xf32, #tpu.memory_space<any>>
    %144 = tpu.memref_squeeze %143 : memref<1x128xf32, #tpu.memory_space<any>> -> memref<128xf32, #tpu.memory_space<any>>
    %c0_i32_150 = arith.constant 0 : i32
    %145 = tpu.memref_slice %arg6[%9, %c3_i32_147, %c0_i32_150] : memref<2x8x128xf32, #tpu.memory_space<vmem>> -> memref<1x1x128xf32, #tpu.memory_space<vmem>>
    %146 = tpu.memref_squeeze %145 : memref<1x1x128xf32, #tpu.memory_space<vmem>> -> memref<128xf32, #tpu.memory_space<vmem>>
    %147 = tpu.memref_slice %arg8[%9, %c3_i32_148] : memref<2x8x!tpu.dma_semaphore, #tpu.memory_space<semaphore_mem>> -> memref<1x1x!tpu.dma_semaphore, #tpu.memory_space<semaphore_mem>>
    %148 = tpu.memref_squeeze %147 : memref<1x1x!tpu.dma_semaphore, #tpu.memory_space<semaphore_mem>> -> memref<!tpu.dma_semaphore, #tpu.memory_space<semaphore_mem>>
    tpu.wait_dma2 semaphore(%148 : memref<!tpu.dma_semaphore, #tpu.memory_space<semaphore_mem>>) src(%144 : memref<128xf32, #tpu.memory_space<any>>) dst(%146 : memref<128xf32, #tpu.memory_space<vmem>>)
    %c0_i32_151 = arith.constant 0 : i32
    %c3_i32_152 = arith.constant 3 : i32
    %c0_i32_153 = arith.constant 0 : i32
    %c3_i32_154 = arith.constant 3 : i32
    %c0_i32_155 = arith.constant 0 : i32
    %c0_i32_156 = arith.constant 0 : i32
    %149 = tpu.memref_slice %arg4[%c0_i32_151, %c0_i32_156] : memref<64x128xf32, #tpu.memory_space<any>> -> memref<1x128xf32, #tpu.memory_space<any>>
    %150 = tpu.memref_squeeze %149 : memref<1x128xf32, #tpu.memory_space<any>> -> memref<128xf32, #tpu.memory_space<any>>
    %c0_i32_157 = arith.constant 0 : i32
    %151 = tpu.memref_slice %arg7[%9, %c3_i32_152, %c0_i32_153, %c0_i32_157] : memref<2x8x6x128xf32, #tpu.memory_space<vmem>> -> memref<1x1x1x128xf32, #tpu.memory_space<vmem>>
    %152 = tpu.memref_squeeze %151 : memref<1x1x1x128xf32, #tpu.memory_space<vmem>> -> memref<128xf32, #tpu.memory_space<vmem>>
    %153 = tpu.memref_slice %arg9[%9, %c3_i32_154, %c0_i32_155] : memref<2x8x6x!tpu.dma_semaphore, #tpu.memory_space<semaphore_mem>> -> memref<1x1x1x!tpu.dma_semaphore, #tpu.memory_space<semaphore_mem>>
    %154 = tpu.memref_squeeze %153 : memref<1x1x1x!tpu.dma_semaphore, #tpu.memory_space<semaphore_mem>> -> memref<!tpu.dma_semaphore, #tpu.memory_space<semaphore_mem>>
    tpu.wait_dma2 semaphore(%154 : memref<!tpu.dma_semaphore, #tpu.memory_space<semaphore_mem>>) src(%150 : memref<128xf32, #tpu.memory_space<any>>) dst(%152 : memref<128xf32, #tpu.memory_space<vmem>>)
    %c0_i32_158 = arith.constant 0 : i32
    %c3_i32_159 = arith.constant 3 : i32
    %c1_i32_160 = arith.constant 1 : i32
    %c3_i32_161 = arith.constant 3 : i32
    %c1_i32_162 = arith.constant 1 : i32
    %c0_i32_163 = arith.constant 0 : i32
    %155 = tpu.memref_slice %arg4[%c0_i32_158, %c0_i32_163] : memref<64x128xf32, #tpu.memory_space<any>> -> memref<1x128xf32, #tpu.memory_space<any>>
    %156 = tpu.memref_squeeze %155 : memref<1x128xf32, #tpu.memory_space<any>> -> memref<128xf32, #tpu.memory_space<any>>
    %c0_i32_164 = arith.constant 0 : i32
    %157 = tpu.memref_slice %arg7[%9, %c3_i32_159, %c1_i32_160, %c0_i32_164] : memref<2x8x6x128xf32, #tpu.memory_space<vmem>> -> memref<1x1x1x128xf32, #tpu.memory_space<vmem>>
    %158 = tpu.memref_squeeze %157 : memref<1x1x1x128xf32, #tpu.memory_space<vmem>> -> memref<128xf32, #tpu.memory_space<vmem>>
    %159 = tpu.memref_slice %arg9[%9, %c3_i32_161, %c1_i32_162] : memref<2x8x6x!tpu.dma_semaphore, #tpu.memory_space<semaphore_mem>> -> memref<1x1x1x!tpu.dma_semaphore, #tpu.memory_space<semaphore_mem>>
    %160 = tpu.memref_squeeze %159 : memref<1x1x1x!tpu.dma_semaphore, #tpu.memory_space<semaphore_mem>> -> memref<!tpu.dma_semaphore, #tpu.memory_space<semaphore_mem>>
    tpu.wait_dma2 semaphore(%160 : memref<!tpu.dma_semaphore, #tpu.memory_space<semaphore_mem>>) src(%156 : memref<128xf32, #tpu.memory_space<any>>) dst(%158 : memref<128xf32, #tpu.memory_space<vmem>>)
    %c0_i32_165 = arith.constant 0 : i32
    %c3_i32_166 = arith.constant 3 : i32
    %c2_i32_167 = arith.constant 2 : i32
    %c3_i32_168 = arith.constant 3 : i32
    %c2_i32_169 = arith.constant 2 : i32
    %c0_i32_170 = arith.constant 0 : i32
    %161 = tpu.memref_slice %arg4[%c0_i32_165, %c0_i32_170] : memref<64x128xf32, #tpu.memory_space<any>> -> memref<1x128xf32, #tpu.memory_space<any>>
    %162 = tpu.memref_squeeze %161 : memref<1x128xf32, #tpu.memory_space<any>> -> memref<128xf32, #tpu.memory_space<any>>
    %c0_i32_171 = arith.constant 0 : i32
    %163 = tpu.memref_slice %arg7[%9, %c3_i32_166, %c2_i32_167, %c0_i32_171] : memref<2x8x6x128xf32, #tpu.memory_space<vmem>> -> memref<1x1x1x128xf32, #tpu.memory_space<vmem>>
    %164 = tpu.memref_squeeze %163 : memref<1x1x1x128xf32, #tpu.memory_space<vmem>> -> memref<128xf32, #tpu.memory_space<vmem>>
    %165 = tpu.memref_slice %arg9[%9, %c3_i32_168, %c2_i32_169] : memref<2x8x6x!tpu.dma_semaphore, #tpu.memory_space<semaphore_mem>> -> memref<1x1x1x!tpu.dma_semaphore, #tpu.memory_space<semaphore_mem>>
    %166 = tpu.memref_squeeze %165 : memref<1x1x1x!tpu.dma_semaphore, #tpu.memory_space<semaphore_mem>> -> memref<!tpu.dma_semaphore, #tpu.memory_space<semaphore_mem>>
    tpu.wait_dma2 semaphore(%166 : memref<!tpu.dma_semaphore, #tpu.memory_space<semaphore_mem>>) src(%162 : memref<128xf32, #tpu.memory_space<any>>) dst(%164 : memref<128xf32, #tpu.memory_space<vmem>>)
    %c0_i32_172 = arith.constant 0 : i32
    %c3_i32_173 = arith.constant 3 : i32
    %c3_i32_174 = arith.constant 3 : i32
    %c3_i32_175 = arith.constant 3 : i32
    %c3_i32_176 = arith.constant 3 : i32
    %c0_i32_177 = arith.constant 0 : i32
    %167 = tpu.memref_slice %arg4[%c0_i32_172, %c0_i32_177] : memref<64x128xf32, #tpu.memory_space<any>> -> memref<1x128xf32, #tpu.memory_space<any>>
    %168 = tpu.memref_squeeze %167 : memref<1x128xf32, #tpu.memory_space<any>> -> memref<128xf32, #tpu.memory_space<any>>
    %c0_i32_178 = arith.constant 0 : i32
    %169 = tpu.memref_slice %arg7[%9, %c3_i32_173, %c3_i32_174, %c0_i32_178] : memref<2x8x6x128xf32, #tpu.memory_space<vmem>> -> memref<1x1x1x128xf32, #tpu.memory_space<vmem>>
    %170 = tpu.memref_squeeze %169 : memref<1x1x1x128xf32, #tpu.memory_space<vmem>> -> memref<128xf32, #tpu.memory_space<vmem>>
    %171 = tpu.memref_slice %arg9[%9, %c3_i32_175, %c3_i32_176] : memref<2x8x6x!tpu.dma_semaphore, #tpu.memory_space<semaphore_mem>> -> memref<1x1x1x!tpu.dma_semaphore, #tpu.memory_space<semaphore_mem>>
    %172 = tpu.memref_squeeze %171 : memref<1x1x1x!tpu.dma_semaphore, #tpu.memory_space<semaphore_mem>> -> memref<!tpu.dma_semaphore, #tpu.memory_space<semaphore_mem>>
    tpu.wait_dma2 semaphore(%172 : memref<!tpu.dma_semaphore, #tpu.memory_space<semaphore_mem>>) src(%168 : memref<128xf32, #tpu.memory_space<any>>) dst(%170 : memref<128xf32, #tpu.memory_space<vmem>>)
    %c0_i32_179 = arith.constant 0 : i32
    %c3_i32_180 = arith.constant 3 : i32
    %c4_i32_181 = arith.constant 4 : i32
    %c3_i32_182 = arith.constant 3 : i32
    %c4_i32_183 = arith.constant 4 : i32
    %c0_i32_184 = arith.constant 0 : i32
    %173 = tpu.memref_slice %arg4[%c0_i32_179, %c0_i32_184] : memref<64x128xf32, #tpu.memory_space<any>> -> memref<1x128xf32, #tpu.memory_space<any>>
    %174 = tpu.memref_squeeze %173 : memref<1x128xf32, #tpu.memory_space<any>> -> memref<128xf32, #tpu.memory_space<any>>
    %c0_i32_185 = arith.constant 0 : i32
    %175 = tpu.memref_slice %arg7[%9, %c3_i32_180, %c4_i32_181, %c0_i32_185] : memref<2x8x6x128xf32, #tpu.memory_space<vmem>> -> memref<1x1x1x128xf32, #tpu.memory_space<vmem>>
    %176 = tpu.memref_squeeze %175 : memref<1x1x1x128xf32, #tpu.memory_space<vmem>> -> memref<128xf32, #tpu.memory_space<vmem>>
    %177 = tpu.memref_slice %arg9[%9, %c3_i32_182, %c4_i32_183] : memref<2x8x6x!tpu.dma_semaphore, #tpu.memory_space<semaphore_mem>> -> memref<1x1x1x!tpu.dma_semaphore, #tpu.memory_space<semaphore_mem>>
    %178 = tpu.memref_squeeze %177 : memref<1x1x1x!tpu.dma_semaphore, #tpu.memory_space<semaphore_mem>> -> memref<!tpu.dma_semaphore, #tpu.memory_space<semaphore_mem>>
    tpu.wait_dma2 semaphore(%178 : memref<!tpu.dma_semaphore, #tpu.memory_space<semaphore_mem>>) src(%174 : memref<128xf32, #tpu.memory_space<any>>) dst(%176 : memref<128xf32, #tpu.memory_space<vmem>>)
    %c0_i32_186 = arith.constant 0 : i32
    %c3_i32_187 = arith.constant 3 : i32
    %c5_i32_188 = arith.constant 5 : i32
    %c3_i32_189 = arith.constant 3 : i32
    %c5_i32_190 = arith.constant 5 : i32
    %c0_i32_191 = arith.constant 0 : i32
    %179 = tpu.memref_slice %arg4[%c0_i32_186, %c0_i32_191] : memref<64x128xf32, #tpu.memory_space<any>> -> memref<1x128xf32, #tpu.memory_space<any>>
    %180 = tpu.memref_squeeze %179 : memref<1x128xf32, #tpu.memory_space<any>> -> memref<128xf32, #tpu.memory_space<any>>
    %c0_i32_192 = arith.constant 0 : i32
    %181 = tpu.memref_slice %arg7[%9, %c3_i32_187, %c5_i32_188, %c0_i32_192] : memref<2x8x6x128xf32, #tpu.memory_space<vmem>> -> memref<1x1x1x128xf32, #tpu.memory_space<vmem>>
    %182 = tpu.memref_squeeze %181 : memref<1x1x1x128xf32, #tpu.memory_space<vmem>> -> memref<128xf32, #tpu.memory_space<vmem>>
    %183 = tpu.memref_slice %arg9[%9, %c3_i32_189, %c5_i32_190] : memref<2x8x6x!tpu.dma_semaphore, #tpu.memory_space<semaphore_mem>> -> memref<1x1x1x!tpu.dma_semaphore, #tpu.memory_space<semaphore_mem>>
    %184 = tpu.memref_squeeze %183 : memref<1x1x1x!tpu.dma_semaphore, #tpu.memory_space<semaphore_mem>> -> memref<!tpu.dma_semaphore, #tpu.memory_space<semaphore_mem>>
    tpu.wait_dma2 semaphore(%184 : memref<!tpu.dma_semaphore, #tpu.memory_space<semaphore_mem>>) src(%180 : memref<128xf32, #tpu.memory_space<any>>) dst(%182 : memref<128xf32, #tpu.memory_space<vmem>>)
    %c0_i32_193 = arith.constant 0 : i32
    %c4_i32_194 = arith.constant 4 : i32
    %c4_i32_195 = arith.constant 4 : i32
    %c0_i32_196 = arith.constant 0 : i32
    %185 = tpu.memref_slice %arg3[%c0_i32_193, %c0_i32_196] : memref<64x128xf32, #tpu.memory_space<any>> -> memref<1x128xf32, #tpu.memory_space<any>>
    %186 = tpu.memref_squeeze %185 : memref<1x128xf32, #tpu.memory_space<any>> -> memref<128xf32, #tpu.memory_space<any>>
    %c0_i32_197 = arith.constant 0 : i32
    %187 = tpu.memref_slice %arg6[%9, %c4_i32_194, %c0_i32_197] : memref<2x8x128xf32, #tpu.memory_space<vmem>> -> memref<1x1x128xf32, #tpu.memory_space<vmem>>
    %188 = tpu.memref_squeeze %187 : memref<1x1x128xf32, #tpu.memory_space<vmem>> -> memref<128xf32, #tpu.memory_space<vmem>>
    %189 = tpu.memref_slice %arg8[%9, %c4_i32_195] : memref<2x8x!tpu.dma_semaphore, #tpu.memory_space<semaphore_mem>> -> memref<1x1x!tpu.dma_semaphore, #tpu.memory_space<semaphore_mem>>
    %190 = tpu.memref_squeeze %189 : memref<1x1x!tpu.dma_semaphore, #tpu.memory_space<semaphore_mem>> -> memref<!tpu.dma_semaphore, #tpu.memory_space<semaphore_mem>>
    tpu.wait_dma2 semaphore(%190 : memref<!tpu.dma_semaphore, #tpu.memory_space<semaphore_mem>>) src(%186 : memref<128xf32, #tpu.memory_space<any>>) dst(%188 : memref<128xf32, #tpu.memory_space<vmem>>)
    %c0_i32_198 = arith.constant 0 : i32
    %c4_i32_199 = arith.constant 4 : i32
    %c0_i32_200 = arith.constant 0 : i32
    %c4_i32_201 = arith.constant 4 : i32
    %c0_i32_202 = arith.constant 0 : i32
    %c0_i32_203 = arith.constant 0 : i32
    %191 = tpu.memref_slice %arg4[%c0_i32_198, %c0_i32_203] : memref<64x128xf32, #tpu.memory_space<any>> -> memref<1x128xf32, #tpu.memory_space<any>>
    %192 = tpu.memref_squeeze %191 : memref<1x128xf32, #tpu.memory_space<any>> -> memref<128xf32, #tpu.memory_space<any>>
    %c0_i32_204 = arith.constant 0 : i32
    %193 = tpu.memref_slice %arg7[%9, %c4_i32_199, %c0_i32_200, %c0_i32_204] : memref<2x8x6x128xf32, #tpu.memory_space<vmem>> -> memref<1x1x1x128xf32, #tpu.memory_space<vmem>>
    %194 = tpu.memref_squeeze %193 : memref<1x1x1x128xf32, #tpu.memory_space<vmem>> -> memref<128xf32, #tpu.memory_space<vmem>>
    %195 = tpu.memref_slice %arg9[%9, %c4_i32_201, %c0_i32_202] : memref<2x8x6x!tpu.dma_semaphore, #tpu.memory_space<semaphore_mem>> -> memref<1x1x1x!tpu.dma_semaphore, #tpu.memory_space<semaphore_mem>>
    %196 = tpu.memref_squeeze %195 : memref<1x1x1x!tpu.dma_semaphore, #tpu.memory_space<semaphore_mem>> -> memref<!tpu.dma_semaphore, #tpu.memory_space<semaphore_mem>>
    tpu.wait_dma2 semaphore(%196 : memref<!tpu.dma_semaphore, #tpu.memory_space<semaphore_mem>>) src(%192 : memref<128xf32, #tpu.memory_space<any>>) dst(%194 : memref<128xf32, #tpu.memory_space<vmem>>)
    %c0_i32_205 = arith.constant 0 : i32
    %c4_i32_206 = arith.constant 4 : i32
    %c1_i32_207 = arith.constant 1 : i32
    %c4_i32_208 = arith.constant 4 : i32
    %c1_i32_209 = arith.constant 1 : i32
    %c0_i32_210 = arith.constant 0 : i32
    %197 = tpu.memref_slice %arg4[%c0_i32_205, %c0_i32_210] : memref<64x128xf32, #tpu.memory_space<any>> -> memref<1x128xf32, #tpu.memory_space<any>>
    %198 = tpu.memref_squeeze %197 : memref<1x128xf32, #tpu.memory_space<any>> -> memref<128xf32, #tpu.memory_space<any>>
    %c0_i32_211 = arith.constant 0 : i32
    %199 = tpu.memref_slice %arg7[%9, %c4_i32_206, %c1_i32_207, %c0_i32_211] : memref<2x8x6x128xf32, #tpu.memory_space<vmem>> -> memref<1x1x1x128xf32, #tpu.memory_space<vmem>>
    %200 = tpu.memref_squeeze %199 : memref<1x1x1x128xf32, #tpu.memory_space<vmem>> -> memref<128xf32, #tpu.memory_space<vmem>>
    %201 = tpu.memref_slice %arg9[%9, %c4_i32_208, %c1_i32_209] : memref<2x8x6x!tpu.dma_semaphore, #tpu.memory_space<semaphore_mem>> -> memref<1x1x1x!tpu.dma_semaphore, #tpu.memory_space<semaphore_mem>>
    %202 = tpu.memref_squeeze %201 : memref<1x1x1x!tpu.dma_semaphore, #tpu.memory_space<semaphore_mem>> -> memref<!tpu.dma_semaphore, #tpu.memory_space<semaphore_mem>>
    tpu.wait_dma2 semaphore(%202 : memref<!tpu.dma_semaphore, #tpu.memory_space<semaphore_mem>>) src(%198 : memref<128xf32, #tpu.memory_space<any>>) dst(%200 : memref<128xf32, #tpu.memory_space<vmem>>)
    %c0_i32_212 = arith.constant 0 : i32
    %c4_i32_213 = arith.constant 4 : i32
    %c2_i32_214 = arith.constant 2 : i32
    %c4_i32_215 = arith.constant 4 : i32
    %c2_i32_216 = arith.constant 2 : i32
    %c0_i32_217 = arith.constant 0 : i32
    %203 = tpu.memref_slice %arg4[%c0_i32_212, %c0_i32_217] : memref<64x128xf32, #tpu.memory_space<any>> -> memref<1x128xf32, #tpu.memory_space<any>>
    %204 = tpu.memref_squeeze %203 : memref<1x128xf32, #tpu.memory_space<any>> -> memref<128xf32, #tpu.memory_space<any>>
    %c0_i32_218 = arith.constant 0 : i32
    %205 = tpu.memref_slice %arg7[%9, %c4_i32_213, %c2_i32_214, %c0_i32_218] : memref<2x8x6x128xf32, #tpu.memory_space<vmem>> -> memref<1x1x1x128xf32, #tpu.memory_space<vmem>>
    %206 = tpu.memref_squeeze %205 : memref<1x1x1x128xf32, #tpu.memory_space<vmem>> -> memref<128xf32, #tpu.memory_space<vmem>>
    %207 = tpu.memref_slice %arg9[%9, %c4_i32_215, %c2_i32_216] : memref<2x8x6x!tpu.dma_semaphore, #tpu.memory_space<semaphore_mem>> -> memref<1x1x1x!tpu.dma_semaphore, #tpu.memory_space<semaphore_mem>>
    %208 = tpu.memref_squeeze %207 : memref<1x1x1x!tpu.dma_semaphore, #tpu.memory_space<semaphore_mem>> -> memref<!tpu.dma_semaphore, #tpu.memory_space<semaphore_mem>>
    tpu.wait_dma2 semaphore(%208 : memref<!tpu.dma_semaphore, #tpu.memory_space<semaphore_mem>>) src(%204 : memref<128xf32, #tpu.memory_space<any>>) dst(%206 : memref<128xf32, #tpu.memory_space<vmem>>)
    %c0_i32_219 = arith.constant 0 : i32
    %c4_i32_220 = arith.constant 4 : i32
    %c3_i32_221 = arith.constant 3 : i32
    %c4_i32_222 = arith.constant 4 : i32
    %c3_i32_223 = arith.constant 3 : i32
    %c0_i32_224 = arith.constant 0 : i32
    %209 = tpu.memref_slice %arg4[%c0_i32_219, %c0_i32_224] : memref<64x128xf32, #tpu.memory_space<any>> -> memref<1x128xf32, #tpu.memory_space<any>>
    %210 = tpu.memref_squeeze %209 : memref<1x128xf32, #tpu.memory_space<any>> -> memref<128xf32, #tpu.memory_space<any>>
    %c0_i32_225 = arith.constant 0 : i32
    %211 = tpu.memref_slice %arg7[%9, %c4_i32_220, %c3_i32_221, %c0_i32_225] : memref<2x8x6x128xf32, #tpu.memory_space<vmem>> -> memref<1x1x1x128xf32, #tpu.memory_space<vmem>>
    %212 = tpu.memref_squeeze %211 : memref<1x1x1x128xf32, #tpu.memory_space<vmem>> -> memref<128xf32, #tpu.memory_space<vmem>>
    %213 = tpu.memref_slice %arg9[%9, %c4_i32_222, %c3_i32_223] : memref<2x8x6x!tpu.dma_semaphore, #tpu.memory_space<semaphore_mem>> -> memref<1x1x1x!tpu.dma_semaphore, #tpu.memory_space<semaphore_mem>>
    %214 = tpu.memref_squeeze %213 : memref<1x1x1x!tpu.dma_semaphore, #tpu.memory_space<semaphore_mem>> -> memref<!tpu.dma_semaphore, #tpu.memory_space<semaphore_mem>>
    tpu.wait_dma2 semaphore(%214 : memref<!tpu.dma_semaphore, #tpu.memory_space<semaphore_mem>>) src(%210 : memref<128xf32, #tpu.memory_space<any>>) dst(%212 : memref<128xf32, #tpu.memory_space<vmem>>)
    %c0_i32_226 = arith.constant 0 : i32
    %c4_i32_227 = arith.constant 4 : i32
    %c4_i32_228 = arith.constant 4 : i32
    %c4_i32_229 = arith.constant 4 : i32
    %c4_i32_230 = arith.constant 4 : i32
    %c0_i32_231 = arith.constant 0 : i32
    %215 = tpu.memref_slice %arg4[%c0_i32_226, %c0_i32_231] : memref<64x128xf32, #tpu.memory_space<any>> -> memref<1x128xf32, #tpu.memory_space<any>>
    %216 = tpu.memref_squeeze %215 : memref<1x128xf32, #tpu.memory_space<any>> -> memref<128xf32, #tpu.memory_space<any>>
    %c0_i32_232 = arith.constant 0 : i32
    %217 = tpu.memref_slice %arg7[%9, %c4_i32_227, %c4_i32_228, %c0_i32_232] : memref<2x8x6x128xf32, #tpu.memory_space<vmem>> -> memref<1x1x1x128xf32, #tpu.memory_space<vmem>>
    %218 = tpu.memref_squeeze %217 : memref<1x1x1x128xf32, #tpu.memory_space<vmem>> -> memref<128xf32, #tpu.memory_space<vmem>>
    %219 = tpu.memref_slice %arg9[%9, %c4_i32_229, %c4_i32_230] : memref<2x8x6x!tpu.dma_semaphore, #tpu.memory_space<semaphore_mem>> -> memref<1x1x1x!tpu.dma_semaphore, #tpu.memory_space<semaphore_mem>>
    %220 = tpu.memref_squeeze %219 : memref<1x1x1x!tpu.dma_semaphore, #tpu.memory_space<semaphore_mem>> -> memref<!tpu.dma_semaphore, #tpu.memory_space<semaphore_mem>>
    tpu.wait_dma2 semaphore(%220 : memref<!tpu.dma_semaphore, #tpu.memory_space<semaphore_mem>>) src(%216 : memref<128xf32, #tpu.memory_space<any>>) dst(%218 : memref<128xf32, #tpu.memory_space<vmem>>)
    %c0_i32_233 = arith.constant 0 : i32
    %c4_i32_234 = arith.constant 4 : i32
    %c5_i32_235 = arith.constant 5 : i32
    %c4_i32_236 = arith.constant 4 : i32
    %c5_i32_237 = arith.constant 5 : i32
    %c0_i32_238 = arith.constant 0 : i32
    %221 = tpu.memref_slice %arg4[%c0_i32_233, %c0_i32_238] : memref<64x128xf32, #tpu.memory_space<any>> -> memref<1x128xf32, #tpu.memory_space<any>>
    %222 = tpu.memref_squeeze %221 : memref<1x128xf32, #tpu.memory_space<any>> -> memref<128xf32, #tpu.memory_space<any>>
    %c0_i32_239 = arith.constant 0 : i32
    %223 = tpu.memref_slice %arg7[%9, %c4_i32_234, %c5_i32_235, %c0_i32_239] : memref<2x8x6x128xf32, #tpu.memory_space<vmem>> -> memref<1x1x1x128xf32, #tpu.memory_space<vmem>>
    %224 = tpu.memref_squeeze %223 : memref<1x1x1x128xf32, #tpu.memory_space<vmem>> -> memref<128xf32, #tpu.memory_space<vmem>>
    %225 = tpu.memref_slice %arg9[%9, %c4_i32_236, %c5_i32_237] : memref<2x8x6x!tpu.dma_semaphore, #tpu.memory_space<semaphore_mem>> -> memref<1x1x1x!tpu.dma_semaphore, #tpu.memory_space<semaphore_mem>>
    %226 = tpu.memref_squeeze %225 : memref<1x1x1x!tpu.dma_semaphore, #tpu.memory_space<semaphore_mem>> -> memref<!tpu.dma_semaphore, #tpu.memory_space<semaphore_mem>>
    tpu.wait_dma2 semaphore(%226 : memref<!tpu.dma_semaphore, #tpu.memory_space<semaphore_mem>>) src(%222 : memref<128xf32, #tpu.memory_space<any>>) dst(%224 : memref<128xf32, #tpu.memory_space<vmem>>)
    %c0_i32_240 = arith.constant 0 : i32
    %c5_i32_241 = arith.constant 5 : i32
    %c5_i32_242 = arith.constant 5 : i32
    %c0_i32_243 = arith.constant 0 : i32
    %227 = tpu.memref_slice %arg3[%c0_i32_240, %c0_i32_243] : memref<64x128xf32, #tpu.memory_space<any>> -> memref<1x128xf32, #tpu.memory_space<any>>
    %228 = tpu.memref_squeeze %227 : memref<1x128xf32, #tpu.memory_space<any>> -> memref<128xf32, #tpu.memory_space<any>>
    %c0_i32_244 = arith.constant 0 : i32
    %229 = tpu.memref_slice %arg6[%9, %c5_i32_241, %c0_i32_244] : memref<2x8x128xf32, #tpu.memory_space<vmem>> -> memref<1x1x128xf32, #tpu.memory_space<vmem>>
    %230 = tpu.memref_squeeze %229 : memref<1x1x128xf32, #tpu.memory_space<vmem>> -> memref<128xf32, #tpu.memory_space<vmem>>
    %231 = tpu.memref_slice %arg8[%9, %c5_i32_242] : memref<2x8x!tpu.dma_semaphore, #tpu.memory_space<semaphore_mem>> -> memref<1x1x!tpu.dma_semaphore, #tpu.memory_space<semaphore_mem>>
    %232 = tpu.memref_squeeze %231 : memref<1x1x!tpu.dma_semaphore, #tpu.memory_space<semaphore_mem>> -> memref<!tpu.dma_semaphore, #tpu.memory_space<semaphore_mem>>
    tpu.wait_dma2 semaphore(%232 : memref<!tpu.dma_semaphore, #tpu.memory_space<semaphore_mem>>) src(%228 : memref<128xf32, #tpu.memory_space<any>>) dst(%230 : memref<128xf32, #tpu.memory_space<vmem>>)
    %c0_i32_245 = arith.constant 0 : i32
    %c5_i32_246 = arith.constant 5 : i32
    %c0_i32_247 = arith.constant 0 : i32
    %c5_i32_248 = arith.constant 5 : i32
    %c0_i32_249 = arith.constant 0 : i32
    %c0_i32_250 = arith.constant 0 : i32
    %233 = tpu.memref_slice %arg4[%c0_i32_245, %c0_i32_250] : memref<64x128xf32, #tpu.memory_space<any>> -> memref<1x128xf32, #tpu.memory_space<any>>
    %234 = tpu.memref_squeeze %233 : memref<1x128xf32, #tpu.memory_space<any>> -> memref<128xf32, #tpu.memory_space<any>>
    %c0_i32_251 = arith.constant 0 : i32
    %235 = tpu.memref_slice %arg7[%9, %c5_i32_246, %c0_i32_247, %c0_i32_251] : memref<2x8x6x128xf32, #tpu.memory_space<vmem>> -> memref<1x1x1x128xf32, #tpu.memory_space<vmem>>
    %236 = tpu.memref_squeeze %235 : memref<1x1x1x128xf32, #tpu.memory_space<vmem>> -> memref<128xf32, #tpu.memory_space<vmem>>
    %237 = tpu.memref_slice %arg9[%9, %c5_i32_248, %c0_i32_249] : memref<2x8x6x!tpu.dma_semaphore, #tpu.memory_space<semaphore_mem>> -> memref<1x1x1x!tpu.dma_semaphore, #tpu.memory_space<semaphore_mem>>
    %238 = tpu.memref_squeeze %237 : memref<1x1x1x!tpu.dma_semaphore, #tpu.memory_space<semaphore_mem>> -> memref<!tpu.dma_semaphore, #tpu.memory_space<semaphore_mem>>
    tpu.wait_dma2 semaphore(%238 : memref<!tpu.dma_semaphore, #tpu.memory_space<semaphore_mem>>) src(%234 : memref<128xf32, #tpu.memory_space<any>>) dst(%236 : memref<128xf32, #tpu.memory_space<vmem>>)
    %c0_i32_252 = arith.constant 0 : i32
    %c5_i32_253 = arith.constant 5 : i32
    %c1_i32_254 = arith.constant 1 : i32
    %c5_i32_255 = arith.constant 5 : i32
    %c1_i32_256 = arith.constant 1 : i32
    %c0_i32_257 = arith.constant 0 : i32
    %239 = tpu.memref_slice %arg4[%c0_i32_252, %c0_i32_257] : memref<64x128xf32, #tpu.memory_space<any>> -> memref<1x128xf32, #tpu.memory_space<any>>
    %240 = tpu.memref_squeeze %239 : memref<1x128xf32, #tpu.memory_space<any>> -> memref<128xf32, #tpu.memory_space<any>>
    %c0_i32_258 = arith.constant 0 : i32
    %241 = tpu.memref_slice %arg7[%9, %c5_i32_253, %c1_i32_254, %c0_i32_258] : memref<2x8x6x128xf32, #tpu.memory_space<vmem>> -> memref<1x1x1x128xf32, #tpu.memory_space<vmem>>
    %242 = tpu.memref_squeeze %241 : memref<1x1x1x128xf32, #tpu.memory_space<vmem>> -> memref<128xf32, #tpu.memory_space<vmem>>
    %243 = tpu.memref_slice %arg9[%9, %c5_i32_255, %c1_i32_256] : memref<2x8x6x!tpu.dma_semaphore, #tpu.memory_space<semaphore_mem>> -> memref<1x1x1x!tpu.dma_semaphore, #tpu.memory_space<semaphore_mem>>
    %244 = tpu.memref_squeeze %243 : memref<1x1x1x!tpu.dma_semaphore, #tpu.memory_space<semaphore_mem>> -> memref<!tpu.dma_semaphore, #tpu.memory_space<semaphore_mem>>
    tpu.wait_dma2 semaphore(%244 : memref<!tpu.dma_semaphore, #tpu.memory_space<semaphore_mem>>) src(%240 : memref<128xf32, #tpu.memory_space<any>>) dst(%242 : memref<128xf32, #tpu.memory_space<vmem>>)
    %c0_i32_259 = arith.constant 0 : i32
    %c5_i32_260 = arith.constant 5 : i32
    %c2_i32_261 = arith.constant 2 : i32
    %c5_i32_262 = arith.constant 5 : i32
    %c2_i32_263 = arith.constant 2 : i32
    %c0_i32_264 = arith.constant 0 : i32
    %245 = tpu.memref_slice %arg4[%c0_i32_259, %c0_i32_264] : memref<64x128xf32, #tpu.memory_space<any>> -> memref<1x128xf32, #tpu.memory_space<any>>
    %246 = tpu.memref_squeeze %245 : memref<1x128xf32, #tpu.memory_space<any>> -> memref<128xf32, #tpu.memory_space<any>>
    %c0_i32_265 = arith.constant 0 : i32
    %247 = tpu.memref_slice %arg7[%9, %c5_i32_260, %c2_i32_261, %c0_i32_265] : memref<2x8x6x128xf32, #tpu.memory_space<vmem>> -> memref<1x1x1x128xf32, #tpu.memory_space<vmem>>
    %248 = tpu.memref_squeeze %247 : memref<1x1x1x128xf32, #tpu.memory_space<vmem>> -> memref<128xf32, #tpu.memory_space<vmem>>
    %249 = tpu.memref_slice %arg9[%9, %c5_i32_262, %c2_i32_263] : memref<2x8x6x!tpu.dma_semaphore, #tpu.memory_space<semaphore_mem>> -> memref<1x1x1x!tpu.dma_semaphore, #tpu.memory_space<semaphore_mem>>
    %250 = tpu.memref_squeeze %249 : memref<1x1x1x!tpu.dma_semaphore, #tpu.memory_space<semaphore_mem>> -> memref<!tpu.dma_semaphore, #tpu.memory_space<semaphore_mem>>
    tpu.wait_dma2 semaphore(%250 : memref<!tpu.dma_semaphore, #tpu.memory_space<semaphore_mem>>) src(%246 : memref<128xf32, #tpu.memory_space<any>>) dst(%248 : memref<128xf32, #tpu.memory_space<vmem>>)
    %c0_i32_266 = arith.constant 0 : i32
    %c5_i32_267 = arith.constant 5 : i32
    %c3_i32_268 = arith.constant 3 : i32
    %c5_i32_269 = arith.constant 5 : i32
    %c3_i32_270 = arith.constant 3 : i32
    %c0_i32_271 = arith.constant 0 : i32
    %251 = tpu.memref_slice %arg4[%c0_i32_266, %c0_i32_271] : memref<64x128xf32, #tpu.memory_space<any>> -> memref<1x128xf32, #tpu.memory_space<any>>
    %252 = tpu.memref_squeeze %251 : memref<1x128xf32, #tpu.memory_space<any>> -> memref<128xf32, #tpu.memory_space<any>>
    %c0_i32_272 = arith.constant 0 : i32
    %253 = tpu.memref_slice %arg7[%9, %c5_i32_267, %c3_i32_268, %c0_i32_272] : memref<2x8x6x128xf32, #tpu.memory_space<vmem>> -> memref<1x1x1x128xf32, #tpu.memory_space<vmem>>
    %254 = tpu.memref_squeeze %253 : memref<1x1x1x128xf32, #tpu.memory_space<vmem>> -> memref<128xf32, #tpu.memory_space<vmem>>
    %255 = tpu.memref_slice %arg9[%9, %c5_i32_269, %c3_i32_270] : memref<2x8x6x!tpu.dma_semaphore, #tpu.memory_space<semaphore_mem>> -> memref<1x1x1x!tpu.dma_semaphore, #tpu.memory_space<semaphore_mem>>
    %256 = tpu.memref_squeeze %255 : memref<1x1x1x!tpu.dma_semaphore, #tpu.memory_space<semaphore_mem>> -> memref<!tpu.dma_semaphore, #tpu.memory_space<semaphore_mem>>
    tpu.wait_dma2 semaphore(%256 : memref<!tpu.dma_semaphore, #tpu.memory_space<semaphore_mem>>) src(%252 : memref<128xf32, #tpu.memory_space<any>>) dst(%254 : memref<128xf32, #tpu.memory_space<vmem>>)
    %c0_i32_273 = arith.constant 0 : i32
    %c5_i32_274 = arith.constant 5 : i32
    %c4_i32_275 = arith.constant 4 : i32
    %c5_i32_276 = arith.constant 5 : i32
    %c4_i32_277 = arith.constant 4 : i32
    %c0_i32_278 = arith.constant 0 : i32
    %257 = tpu.memref_slice %arg4[%c0_i32_273, %c0_i32_278] : memref<64x128xf32, #tpu.memory_space<any>> -> memref<1x128xf32, #tpu.memory_space<any>>
    %258 = tpu.memref_squeeze %257 : memref<1x128xf32, #tpu.memory_space<any>> -> memref<128xf32, #tpu.memory_space<any>>
    %c0_i32_279 = arith.constant 0 : i32
    %259 = tpu.memref_slice %arg7[%9, %c5_i32_274, %c4_i32_275, %c0_i32_279] : memref<2x8x6x128xf32, #tpu.memory_space<vmem>> -> memref<1x1x1x128xf32, #tpu.memory_space<vmem>>
    %260 = tpu.memref_squeeze %259 : memref<1x1x1x128xf32, #tpu.memory_space<vmem>> -> memref<128xf32, #tpu.memory_space<vmem>>
    %261 = tpu.memref_slice %arg9[%9, %c5_i32_276, %c4_i32_277] : memref<2x8x6x!tpu.dma_semaphore, #tpu.memory_space<semaphore_mem>> -> memref<1x1x1x!tpu.dma_semaphore, #tpu.memory_space<semaphore_mem>>
    %262 = tpu.memref_squeeze %261 : memref<1x1x1x!tpu.dma_semaphore, #tpu.memory_space<semaphore_mem>> -> memref<!tpu.dma_semaphore, #tpu.memory_space<semaphore_mem>>
    tpu.wait_dma2 semaphore(%262 : memref<!tpu.dma_semaphore, #tpu.memory_space<semaphore_mem>>) src(%258 : memref<128xf32, #tpu.memory_space<any>>) dst(%260 : memref<128xf32, #tpu.memory_space<vmem>>)
    %c0_i32_280 = arith.constant 0 : i32
    %c5_i32_281 = arith.constant 5 : i32
    %c5_i32_282 = arith.constant 5 : i32
    %c5_i32_283 = arith.constant 5 : i32
    %c5_i32_284 = arith.constant 5 : i32
    %c0_i32_285 = arith.constant 0 : i32
    %263 = tpu.memref_slice %arg4[%c0_i32_280, %c0_i32_285] : memref<64x128xf32, #tpu.memory_space<any>> -> memref<1x128xf32, #tpu.memory_space<any>>
    %264 = tpu.memref_squeeze %263 : memref<1x128xf32, #tpu.memory_space<any>> -> memref<128xf32, #tpu.memory_space<any>>
    %c0_i32_286 = arith.constant 0 : i32
    %265 = tpu.memref_slice %arg7[%9, %c5_i32_281, %c5_i32_282, %c0_i32_286] : memref<2x8x6x128xf32, #tpu.memory_space<vmem>> -> memref<1x1x1x128xf32, #tpu.memory_space<vmem>>
    %266 = tpu.memref_squeeze %265 : memref<1x1x1x128xf32, #tpu.memory_space<vmem>> -> memref<128xf32, #tpu.memory_space<vmem>>
    %267 = tpu.memref_slice %arg9[%9, %c5_i32_283, %c5_i32_284] : memref<2x8x6x!tpu.dma_semaphore, #tpu.memory_space<semaphore_mem>> -> memref<1x1x1x!tpu.dma_semaphore, #tpu.memory_space<semaphore_mem>>
    %268 = tpu.memref_squeeze %267 : memref<1x1x1x!tpu.dma_semaphore, #tpu.memory_space<semaphore_mem>> -> memref<!tpu.dma_semaphore, #tpu.memory_space<semaphore_mem>>
    tpu.wait_dma2 semaphore(%268 : memref<!tpu.dma_semaphore, #tpu.memory_space<semaphore_mem>>) src(%264 : memref<128xf32, #tpu.memory_space<any>>) dst(%266 : memref<128xf32, #tpu.memory_space<vmem>>)
    %c0_i32_287 = arith.constant 0 : i32
    %c6_i32 = arith.constant 6 : i32
    %c6_i32_288 = arith.constant 6 : i32
    %c0_i32_289 = arith.constant 0 : i32
    %269 = tpu.memref_slice %arg3[%c0_i32_287, %c0_i32_289] : memref<64x128xf32, #tpu.memory_space<any>> -> memref<1x128xf32, #tpu.memory_space<any>>
    %270 = tpu.memref_squeeze %269 : memref<1x128xf32, #tpu.memory_space<any>> -> memref<128xf32, #tpu.memory_space<any>>
    %c0_i32_290 = arith.constant 0 : i32
    %271 = tpu.memref_slice %arg6[%9, %c6_i32, %c0_i32_290] : memref<2x8x128xf32, #tpu.memory_space<vmem>> -> memref<1x1x128xf32, #tpu.memory_space<vmem>>
    %272 = tpu.memref_squeeze %271 : memref<1x1x128xf32, #tpu.memory_space<vmem>> -> memref<128xf32, #tpu.memory_space<vmem>>
    %273 = tpu.memref_slice %arg8[%9, %c6_i32_288] : memref<2x8x!tpu.dma_semaphore, #tpu.memory_space<semaphore_mem>> -> memref<1x1x!tpu.dma_semaphore, #tpu.memory_space<semaphore_mem>>
    %274 = tpu.memref_squeeze %273 : memref<1x1x!tpu.dma_semaphore, #tpu.memory_space<semaphore_mem>> -> memref<!tpu.dma_semaphore, #tpu.memory_space<semaphore_mem>>
    tpu.wait_dma2 semaphore(%274 : memref<!tpu.dma_semaphore, #tpu.memory_space<semaphore_mem>>) src(%270 : memref<128xf32, #tpu.memory_space<any>>) dst(%272 : memref<128xf32, #tpu.memory_space<vmem>>)
    %c0_i32_291 = arith.constant 0 : i32
    %c6_i32_292 = arith.constant 6 : i32
    %c0_i32_293 = arith.constant 0 : i32
    %c6_i32_294 = arith.constant 6 : i32
    %c0_i32_295 = arith.constant 0 : i32
    %c0_i32_296 = arith.constant 0 : i32
    %275 = tpu.memref_slice %arg4[%c0_i32_291, %c0_i32_296] : memref<64x128xf32, #tpu.memory_space<any>> -> memref<1x128xf32, #tpu.memory_space<any>>
    %276 = tpu.memref_squeeze %275 : memref<1x128xf32, #tpu.memory_space<any>> -> memref<128xf32, #tpu.memory_space<any>>
    %c0_i32_297 = arith.constant 0 : i32
    %277 = tpu.memref_slice %arg7[%9, %c6_i32_292, %c0_i32_293, %c0_i32_297] : memref<2x8x6x128xf32, #tpu.memory_space<vmem>> -> memref<1x1x1x128xf32, #tpu.memory_space<vmem>>
    %278 = tpu.memref_squeeze %277 : memref<1x1x1x128xf32, #tpu.memory_space<vmem>> -> memref<128xf32, #tpu.memory_space<vmem>>
    %279 = tpu.memref_slice %arg9[%9, %c6_i32_294, %c0_i32_295] : memref<2x8x6x!tpu.dma_semaphore, #tpu.memory_space<semaphore_mem>> -> memref<1x1x1x!tpu.dma_semaphore, #tpu.memory_space<semaphore_mem>>
    %280 = tpu.memref_squeeze %279 : memref<1x1x1x!tpu.dma_semaphore, #tpu.memory_space<semaphore_mem>> -> memref<!tpu.dma_semaphore, #tpu.memory_space<semaphore_mem>>
    tpu.wait_dma2 semaphore(%280 : memref<!tpu.dma_semaphore, #tpu.memory_space<semaphore_mem>>) src(%276 : memref<128xf32, #tpu.memory_space<any>>) dst(%278 : memref<128xf32, #tpu.memory_space<vmem>>)
    %c0_i32_298 = arith.constant 0 : i32
    %c6_i32_299 = arith.constant 6 : i32
    %c1_i32_300 = arith.constant 1 : i32
    %c6_i32_301 = arith.constant 6 : i32
    %c1_i32_302 = arith.constant 1 : i32
    %c0_i32_303 = arith.constant 0 : i32
    %281 = tpu.memref_slice %arg4[%c0_i32_298, %c0_i32_303] : memref<64x128xf32, #tpu.memory_space<any>> -> memref<1x128xf32, #tpu.memory_space<any>>
    %282 = tpu.memref_squeeze %281 : memref<1x128xf32, #tpu.memory_space<any>> -> memref<128xf32, #tpu.memory_space<any>>
    %c0_i32_304 = arith.constant 0 : i32
    %283 = tpu.memref_slice %arg7[%9, %c6_i32_299, %c1_i32_300, %c0_i32_304] : memref<2x8x6x128xf32, #tpu.memory_space<vmem>> -> memref<1x1x1x128xf32, #tpu.memory_space<vmem>>
    %284 = tpu.memref_squeeze %283 : memref<1x1x1x128xf32, #tpu.memory_space<vmem>> -> memref<128xf32, #tpu.memory_space<vmem>>
    %285 = tpu.memref_slice %arg9[%9, %c6_i32_301, %c1_i32_302] : memref<2x8x6x!tpu.dma_semaphore, #tpu.memory_space<semaphore_mem>> -> memref<1x1x1x!tpu.dma_semaphore, #tpu.memory_space<semaphore_mem>>
    %286 = tpu.memref_squeeze %285 : memref<1x1x1x!tpu.dma_semaphore, #tpu.memory_space<semaphore_mem>> -> memref<!tpu.dma_semaphore, #tpu.memory_space<semaphore_mem>>
    tpu.wait_dma2 semaphore(%286 : memref<!tpu.dma_semaphore, #tpu.memory_space<semaphore_mem>>) src(%282 : memref<128xf32, #tpu.memory_space<any>>) dst(%284 : memref<128xf32, #tpu.memory_space<vmem>>)
    %c0_i32_305 = arith.constant 0 : i32
    %c6_i32_306 = arith.constant 6 : i32
    %c2_i32_307 = arith.constant 2 : i32
    %c6_i32_308 = arith.constant 6 : i32
    %c2_i32_309 = arith.constant 2 : i32
    %c0_i32_310 = arith.constant 0 : i32
    %287 = tpu.memref_slice %arg4[%c0_i32_305, %c0_i32_310] : memref<64x128xf32, #tpu.memory_space<any>> -> memref<1x128xf32, #tpu.memory_space<any>>
    %288 = tpu.memref_squeeze %287 : memref<1x128xf32, #tpu.memory_space<any>> -> memref<128xf32, #tpu.memory_space<any>>
    %c0_i32_311 = arith.constant 0 : i32
    %289 = tpu.memref_slice %arg7[%9, %c6_i32_306, %c2_i32_307, %c0_i32_311] : memref<2x8x6x128xf32, #tpu.memory_space<vmem>> -> memref<1x1x1x128xf32, #tpu.memory_space<vmem>>
    %290 = tpu.memref_squeeze %289 : memref<1x1x1x128xf32, #tpu.memory_space<vmem>> -> memref<128xf32, #tpu.memory_space<vmem>>
    %291 = tpu.memref_slice %arg9[%9, %c6_i32_308, %c2_i32_309] : memref<2x8x6x!tpu.dma_semaphore, #tpu.memory_space<semaphore_mem>> -> memref<1x1x1x!tpu.dma_semaphore, #tpu.memory_space<semaphore_mem>>
    %292 = tpu.memref_squeeze %291 : memref<1x1x1x!tpu.dma_semaphore, #tpu.memory_space<semaphore_mem>> -> memref<!tpu.dma_semaphore, #tpu.memory_space<semaphore_mem>>
    tpu.wait_dma2 semaphore(%292 : memref<!tpu.dma_semaphore, #tpu.memory_space<semaphore_mem>>) src(%288 : memref<128xf32, #tpu.memory_space<any>>) dst(%290 : memref<128xf32, #tpu.memory_space<vmem>>)
    %c0_i32_312 = arith.constant 0 : i32
    %c6_i32_313 = arith.constant 6 : i32
    %c3_i32_314 = arith.constant 3 : i32
    %c6_i32_315 = arith.constant 6 : i32
    %c3_i32_316 = arith.constant 3 : i32
    %c0_i32_317 = arith.constant 0 : i32
    %293 = tpu.memref_slice %arg4[%c0_i32_312, %c0_i32_317] : memref<64x128xf32, #tpu.memory_space<any>> -> memref<1x128xf32, #tpu.memory_space<any>>
    %294 = tpu.memref_squeeze %293 : memref<1x128xf32, #tpu.memory_space<any>> -> memref<128xf32, #tpu.memory_space<any>>
    %c0_i32_318 = arith.constant 0 : i32
    %295 = tpu.memref_slice %arg7[%9, %c6_i32_313, %c3_i32_314, %c0_i32_318] : memref<2x8x6x128xf32, #tpu.memory_space<vmem>> -> memref<1x1x1x128xf32, #tpu.memory_space<vmem>>
    %296 = tpu.memref_squeeze %295 : memref<1x1x1x128xf32, #tpu.memory_space<vmem>> -> memref<128xf32, #tpu.memory_space<vmem>>
    %297 = tpu.memref_slice %arg9[%9, %c6_i32_315, %c3_i32_316] : memref<2x8x6x!tpu.dma_semaphore, #tpu.memory_space<semaphore_mem>> -> memref<1x1x1x!tpu.dma_semaphore, #tpu.memory_space<semaphore_mem>>
    %298 = tpu.memref_squeeze %297 : memref<1x1x1x!tpu.dma_semaphore, #tpu.memory_space<semaphore_mem>> -> memref<!tpu.dma_semaphore, #tpu.memory_space<semaphore_mem>>
    tpu.wait_dma2 semaphore(%298 : memref<!tpu.dma_semaphore, #tpu.memory_space<semaphore_mem>>) src(%294 : memref<128xf32, #tpu.memory_space<any>>) dst(%296 : memref<128xf32, #tpu.memory_space<vmem>>)
    %c0_i32_319 = arith.constant 0 : i32
    %c6_i32_320 = arith.constant 6 : i32
    %c4_i32_321 = arith.constant 4 : i32
    %c6_i32_322 = arith.constant 6 : i32
    %c4_i32_323 = arith.constant 4 : i32
    %c0_i32_324 = arith.constant 0 : i32
    %299 = tpu.memref_slice %arg4[%c0_i32_319, %c0_i32_324] : memref<64x128xf32, #tpu.memory_space<any>> -> memref<1x128xf32, #tpu.memory_space<any>>
    %300 = tpu.memref_squeeze %299 : memref<1x128xf32, #tpu.memory_space<any>> -> memref<128xf32, #tpu.memory_space<any>>
    %c0_i32_325 = arith.constant 0 : i32
    %301 = tpu.memref_slice %arg7[%9, %c6_i32_320, %c4_i32_321, %c0_i32_325] : memref<2x8x6x128xf32, #tpu.memory_space<vmem>> -> memref<1x1x1x128xf32, #tpu.memory_space<vmem>>
    %302 = tpu.memref_squeeze %301 : memref<1x1x1x128xf32, #tpu.memory_space<vmem>> -> memref<128xf32, #tpu.memory_space<vmem>>
    %303 = tpu.memref_slice %arg9[%9, %c6_i32_322, %c4_i32_323] : memref<2x8x6x!tpu.dma_semaphore, #tpu.memory_space<semaphore_mem>> -> memref<1x1x1x!tpu.dma_semaphore, #tpu.memory_space<semaphore_mem>>
    %304 = tpu.memref_squeeze %303 : memref<1x1x1x!tpu.dma_semaphore, #tpu.memory_space<semaphore_mem>> -> memref<!tpu.dma_semaphore, #tpu.memory_space<semaphore_mem>>
    tpu.wait_dma2 semaphore(%304 : memref<!tpu.dma_semaphore, #tpu.memory_space<semaphore_mem>>) src(%300 : memref<128xf32, #tpu.memory_space<any>>) dst(%302 : memref<128xf32, #tpu.memory_space<vmem>>)
    %c0_i32_326 = arith.constant 0 : i32
    %c6_i32_327 = arith.constant 6 : i32
    %c5_i32_328 = arith.constant 5 : i32
    %c6_i32_329 = arith.constant 6 : i32
    %c5_i32_330 = arith.constant 5 : i32
    %c0_i32_331 = arith.constant 0 : i32
    %305 = tpu.memref_slice %arg4[%c0_i32_326, %c0_i32_331] : memref<64x128xf32, #tpu.memory_space<any>> -> memref<1x128xf32, #tpu.memory_space<any>>
    %306 = tpu.memref_squeeze %305 : memref<1x128xf32, #tpu.memory_space<any>> -> memref<128xf32, #tpu.memory_space<any>>
    %c0_i32_332 = arith.constant 0 : i32
    %307 = tpu.memref_slice %arg7[%9, %c6_i32_327, %c5_i32_328, %c0_i32_332] : memref<2x8x6x128xf32, #tpu.memory_space<vmem>> -> memref<1x1x1x128xf32, #tpu.memory_space<vmem>>
    %308 = tpu.memref_squeeze %307 : memref<1x1x1x128xf32, #tpu.memory_space<vmem>> -> memref<128xf32, #tpu.memory_space<vmem>>
    %309 = tpu.memref_slice %arg9[%9, %c6_i32_329, %c5_i32_330] : memref<2x8x6x!tpu.dma_semaphore, #tpu.memory_space<semaphore_mem>> -> memref<1x1x1x!tpu.dma_semaphore, #tpu.memory_space<semaphore_mem>>
    %310 = tpu.memref_squeeze %309 : memref<1x1x1x!tpu.dma_semaphore, #tpu.memory_space<semaphore_mem>> -> memref<!tpu.dma_semaphore, #tpu.memory_space<semaphore_mem>>
    tpu.wait_dma2 semaphore(%310 : memref<!tpu.dma_semaphore, #tpu.memory_space<semaphore_mem>>) src(%306 : memref<128xf32, #tpu.memory_space<any>>) dst(%308 : memref<128xf32, #tpu.memory_space<vmem>>)
    %c0_i32_333 = arith.constant 0 : i32
    %c7_i32 = arith.constant 7 : i32
    %c7_i32_334 = arith.constant 7 : i32
    %c0_i32_335 = arith.constant 0 : i32
    %311 = tpu.memref_slice %arg3[%c0_i32_333, %c0_i32_335] : memref<64x128xf32, #tpu.memory_space<any>> -> memref<1x128xf32, #tpu.memory_space<any>>
    %312 = tpu.memref_squeeze %311 : memref<1x128xf32, #tpu.memory_space<any>> -> memref<128xf32, #tpu.memory_space<any>>
    %c0_i32_336 = arith.constant 0 : i32
    %313 = tpu.memref_slice %arg6[%9, %c7_i32, %c0_i32_336] : memref<2x8x128xf32, #tpu.memory_space<vmem>> -> memref<1x1x128xf32, #tpu.memory_space<vmem>>
    %314 = tpu.memref_squeeze %313 : memref<1x1x128xf32, #tpu.memory_space<vmem>> -> memref<128xf32, #tpu.memory_space<vmem>>
    %315 = tpu.memref_slice %arg8[%9, %c7_i32_334] : memref<2x8x!tpu.dma_semaphore, #tpu.memory_space<semaphore_mem>> -> memref<1x1x!tpu.dma_semaphore, #tpu.memory_space<semaphore_mem>>
    %316 = tpu.memref_squeeze %315 : memref<1x1x!tpu.dma_semaphore, #tpu.memory_space<semaphore_mem>> -> memref<!tpu.dma_semaphore, #tpu.memory_space<semaphore_mem>>
    tpu.wait_dma2 semaphore(%316 : memref<!tpu.dma_semaphore, #tpu.memory_space<semaphore_mem>>) src(%312 : memref<128xf32, #tpu.memory_space<any>>) dst(%314 : memref<128xf32, #tpu.memory_space<vmem>>)
    %c0_i32_337 = arith.constant 0 : i32
    %c7_i32_338 = arith.constant 7 : i32
    %c0_i32_339 = arith.constant 0 : i32
    %c7_i32_340 = arith.constant 7 : i32
    %c0_i32_341 = arith.constant 0 : i32
    %c0_i32_342 = arith.constant 0 : i32
    %317 = tpu.memref_slice %arg4[%c0_i32_337, %c0_i32_342] : memref<64x128xf32, #tpu.memory_space<any>> -> memref<1x128xf32, #tpu.memory_space<any>>
    %318 = tpu.memref_squeeze %317 : memref<1x128xf32, #tpu.memory_space<any>> -> memref<128xf32, #tpu.memory_space<any>>
    %c0_i32_343 = arith.constant 0 : i32
    %319 = tpu.memref_slice %arg7[%9, %c7_i32_338, %c0_i32_339, %c0_i32_343] : memref<2x8x6x128xf32, #tpu.memory_space<vmem>> -> memref<1x1x1x128xf32, #tpu.memory_space<vmem>>
    %320 = tpu.memref_squeeze %319 : memref<1x1x1x128xf32, #tpu.memory_space<vmem>> -> memref<128xf32, #tpu.memory_space<vmem>>
    %321 = tpu.memref_slice %arg9[%9, %c7_i32_340, %c0_i32_341] : memref<2x8x6x!tpu.dma_semaphore, #tpu.memory_space<semaphore_mem>> -> memref<1x1x1x!tpu.dma_semaphore, #tpu.memory_space<semaphore_mem>>
    %322 = tpu.memref_squeeze %321 : memref<1x1x1x!tpu.dma_semaphore, #tpu.memory_space<semaphore_mem>> -> memref<!tpu.dma_semaphore, #tpu.memory_space<semaphore_mem>>
    tpu.wait_dma2 semaphore(%322 : memref<!tpu.dma_semaphore, #tpu.memory_space<semaphore_mem>>) src(%318 : memref<128xf32, #tpu.memory_space<any>>) dst(%320 : memref<128xf32, #tpu.memory_space<vmem>>)
    %c0_i32_344 = arith.constant 0 : i32
    %c7_i32_345 = arith.constant 7 : i32
    %c1_i32_346 = arith.constant 1 : i32
    %c7_i32_347 = arith.constant 7 : i32
    %c1_i32_348 = arith.constant 1 : i32
    %c0_i32_349 = arith.constant 0 : i32
    %323 = tpu.memref_slice %arg4[%c0_i32_344, %c0_i32_349] : memref<64x128xf32, #tpu.memory_space<any>> -> memref<1x128xf32, #tpu.memory_space<any>>
    %324 = tpu.memref_squeeze %323 : memref<1x128xf32, #tpu.memory_space<any>> -> memref<128xf32, #tpu.memory_space<any>>
    %c0_i32_350 = arith.constant 0 : i32
    %325 = tpu.memref_slice %arg7[%9, %c7_i32_345, %c1_i32_346, %c0_i32_350] : memref<2x8x6x128xf32, #tpu.memory_space<vmem>> -> memref<1x1x1x128xf32, #tpu.memory_space<vmem>>
    %326 = tpu.memref_squeeze %325 : memref<1x1x1x128xf32, #tpu.memory_space<vmem>> -> memref<128xf32, #tpu.memory_space<vmem>>
    %327 = tpu.memref_slice %arg9[%9, %c7_i32_347, %c1_i32_348] : memref<2x8x6x!tpu.dma_semaphore, #tpu.memory_space<semaphore_mem>> -> memref<1x1x1x!tpu.dma_semaphore, #tpu.memory_space<semaphore_mem>>
    %328 = tpu.memref_squeeze %327 : memref<1x1x1x!tpu.dma_semaphore, #tpu.memory_space<semaphore_mem>> -> memref<!tpu.dma_semaphore, #tpu.memory_space<semaphore_mem>>
    tpu.wait_dma2 semaphore(%328 : memref<!tpu.dma_semaphore, #tpu.memory_space<semaphore_mem>>) src(%324 : memref<128xf32, #tpu.memory_space<any>>) dst(%326 : memref<128xf32, #tpu.memory_space<vmem>>)
    %c0_i32_351 = arith.constant 0 : i32
    %c7_i32_352 = arith.constant 7 : i32
    %c2_i32_353 = arith.constant 2 : i32
    %c7_i32_354 = arith.constant 7 : i32
    %c2_i32_355 = arith.constant 2 : i32
    %c0_i32_356 = arith.constant 0 : i32
    %329 = tpu.memref_slice %arg4[%c0_i32_351, %c0_i32_356] : memref<64x128xf32, #tpu.memory_space<any>> -> memref<1x128xf32, #tpu.memory_space<any>>
    %330 = tpu.memref_squeeze %329 : memref<1x128xf32, #tpu.memory_space<any>> -> memref<128xf32, #tpu.memory_space<any>>
    %c0_i32_357 = arith.constant 0 : i32
    %331 = tpu.memref_slice %arg7[%9, %c7_i32_352, %c2_i32_353, %c0_i32_357] : memref<2x8x6x128xf32, #tpu.memory_space<vmem>> -> memref<1x1x1x128xf32, #tpu.memory_space<vmem>>
    %332 = tpu.memref_squeeze %331 : memref<1x1x1x128xf32, #tpu.memory_space<vmem>> -> memref<128xf32, #tpu.memory_space<vmem>>
    %333 = tpu.memref_slice %arg9[%9, %c7_i32_354, %c2_i32_355] : memref<2x8x6x!tpu.dma_semaphore, #tpu.memory_space<semaphore_mem>> -> memref<1x1x1x!tpu.dma_semaphore, #tpu.memory_space<semaphore_mem>>
    %334 = tpu.memref_squeeze %333 : memref<1x1x1x!tpu.dma_semaphore, #tpu.memory_space<semaphore_mem>> -> memref<!tpu.dma_semaphore, #tpu.memory_space<semaphore_mem>>
    tpu.wait_dma2 semaphore(%334 : memref<!tpu.dma_semaphore, #tpu.memory_space<semaphore_mem>>) src(%330 : memref<128xf32, #tpu.memory_space<any>>) dst(%332 : memref<128xf32, #tpu.memory_space<vmem>>)
    %c0_i32_358 = arith.constant 0 : i32
    %c7_i32_359 = arith.constant 7 : i32
    %c3_i32_360 = arith.constant 3 : i32
    %c7_i32_361 = arith.constant 7 : i32
    %c3_i32_362 = arith.constant 3 : i32
    %c0_i32_363 = arith.constant 0 : i32
    %335 = tpu.memref_slice %arg4[%c0_i32_358, %c0_i32_363] : memref<64x128xf32, #tpu.memory_space<any>> -> memref<1x128xf32, #tpu.memory_space<any>>
    %336 = tpu.memref_squeeze %335 : memref<1x128xf32, #tpu.memory_space<any>> -> memref<128xf32, #tpu.memory_space<any>>
    %c0_i32_364 = arith.constant 0 : i32
    %337 = tpu.memref_slice %arg7[%9, %c7_i32_359, %c3_i32_360, %c0_i32_364] : memref<2x8x6x128xf32, #tpu.memory_space<vmem>> -> memref<1x1x1x128xf32, #tpu.memory_space<vmem>>
    %338 = tpu.memref_squeeze %337 : memref<1x1x1x128xf32, #tpu.memory_space<vmem>> -> memref<128xf32, #tpu.memory_space<vmem>>
    %339 = tpu.memref_slice %arg9[%9, %c7_i32_361, %c3_i32_362] : memref<2x8x6x!tpu.dma_semaphore, #tpu.memory_space<semaphore_mem>> -> memref<1x1x1x!tpu.dma_semaphore, #tpu.memory_space<semaphore_mem>>
    %340 = tpu.memref_squeeze %339 : memref<1x1x1x!tpu.dma_semaphore, #tpu.memory_space<semaphore_mem>> -> memref<!tpu.dma_semaphore, #tpu.memory_space<semaphore_mem>>
    tpu.wait_dma2 semaphore(%340 : memref<!tpu.dma_semaphore, #tpu.memory_space<semaphore_mem>>) src(%336 : memref<128xf32, #tpu.memory_space<any>>) dst(%338 : memref<128xf32, #tpu.memory_space<vmem>>)
    %c0_i32_365 = arith.constant 0 : i32
    %c7_i32_366 = arith.constant 7 : i32
    %c4_i32_367 = arith.constant 4 : i32
    %c7_i32_368 = arith.constant 7 : i32
    %c4_i32_369 = arith.constant 4 : i32
    %c0_i32_370 = arith.constant 0 : i32
    %341 = tpu.memref_slice %arg4[%c0_i32_365, %c0_i32_370] : memref<64x128xf32, #tpu.memory_space<any>> -> memref<1x128xf32, #tpu.memory_space<any>>
    %342 = tpu.memref_squeeze %341 : memref<1x128xf32, #tpu.memory_space<any>> -> memref<128xf32, #tpu.memory_space<any>>
    %c0_i32_371 = arith.constant 0 : i32
    %343 = tpu.memref_slice %arg7[%9, %c7_i32_366, %c4_i32_367, %c0_i32_371] : memref<2x8x6x128xf32, #tpu.memory_space<vmem>> -> memref<1x1x1x128xf32, #tpu.memory_space<vmem>>
    %344 = tpu.memref_squeeze %343 : memref<1x1x1x128xf32, #tpu.memory_space<vmem>> -> memref<128xf32, #tpu.memory_space<vmem>>
    %345 = tpu.memref_slice %arg9[%9, %c7_i32_368, %c4_i32_369] : memref<2x8x6x!tpu.dma_semaphore, #tpu.memory_space<semaphore_mem>> -> memref<1x1x1x!tpu.dma_semaphore, #tpu.memory_space<semaphore_mem>>
    %346 = tpu.memref_squeeze %345 : memref<1x1x1x!tpu.dma_semaphore, #tpu.memory_space<semaphore_mem>> -> memref<!tpu.dma_semaphore, #tpu.memory_space<semaphore_mem>>
    tpu.wait_dma2 semaphore(%346 : memref<!tpu.dma_semaphore, #tpu.memory_space<semaphore_mem>>) src(%342 : memref<128xf32, #tpu.memory_space<any>>) dst(%344 : memref<128xf32, #tpu.memory_space<vmem>>)
    %c0_i32_372 = arith.constant 0 : i32
    %c7_i32_373 = arith.constant 7 : i32
    %c5_i32_374 = arith.constant 5 : i32
    %c7_i32_375 = arith.constant 7 : i32
    %c5_i32_376 = arith.constant 5 : i32
    %c0_i32_377 = arith.constant 0 : i32
    %347 = tpu.memref_slice %arg4[%c0_i32_372, %c0_i32_377] : memref<64x128xf32, #tpu.memory_space<any>> -> memref<1x128xf32, #tpu.memory_space<any>>
    %348 = tpu.memref_squeeze %347 : memref<1x128xf32, #tpu.memory_space<any>> -> memref<128xf32, #tpu.memory_space<any>>
    %c0_i32_378 = arith.constant 0 : i32
    %349 = tpu.memref_slice %arg7[%9, %c7_i32_373, %c5_i32_374, %c0_i32_378] : memref<2x8x6x128xf32, #tpu.memory_space<vmem>> -> memref<1x1x1x128xf32, #tpu.memory_space<vmem>>
    %350 = tpu.memref_squeeze %349 : memref<1x1x1x128xf32, #tpu.memory_space<vmem>> -> memref<128xf32, #tpu.memory_space<vmem>>
    %351 = tpu.memref_slice %arg9[%9, %c7_i32_375, %c5_i32_376] : memref<2x8x6x!tpu.dma_semaphore, #tpu.memory_space<semaphore_mem>> -> memref<1x1x1x!tpu.dma_semaphore, #tpu.memory_space<semaphore_mem>>
    %352 = tpu.memref_squeeze %351 : memref<1x1x1x!tpu.dma_semaphore, #tpu.memory_space<semaphore_mem>> -> memref<!tpu.dma_semaphore, #tpu.memory_space<semaphore_mem>>
    tpu.wait_dma2 semaphore(%352 : memref<!tpu.dma_semaphore, #tpu.memory_space<semaphore_mem>>) src(%348 : memref<128xf32, #tpu.memory_space<any>>) dst(%350 : memref<128xf32, #tpu.memory_space<vmem>>)
    %353 = arith.index_cast %9 : i32 to index
    %c0 = arith.constant 0 : index
    %c0_379 = arith.constant 0 : index
    %354 = vector.load %arg6[%353, %c0, %c0_379] : memref<2x8x128xf32, #tpu.memory_space<vmem>>, vector<1x8x128xf32>
    %355 = vector.shape_cast %354 : vector<1x8x128xf32> to vector<8x128xf32>
    %356 = arith.index_cast %9 : i32 to index
    %c0_380 = arith.constant 0 : index
    %c0_381 = arith.constant 0 : index
    %c0_382 = arith.constant 0 : index
    %357 = vector.load %arg7[%356, %c0_380, %c0_381, %c0_382] : memref<2x8x6x128xf32, #tpu.memory_space<vmem>>, vector<1x8x6x128xf32>
    %358 = vector.shape_cast %357 : vector<1x8x6x128xf32> to vector<8x6x128xf32>
    %359 = vector.shape_cast %355 : vector<8x128xf32> to vector<8x1x128xf32>
    %360 = vector.broadcast %359 : vector<8x1x128xf32> to vector<8x6x128xf32>
    %361 = arith.mulf %358, %360 : vector<8x6x128xf32>
    %cst = arith.constant dense<0.000000e+00> : vector<8x6xf32>
    %362 = vector.multi_reduction <add>, %361, %cst [2] : vector<8x6x128xf32> to vector<8x6xf32>
    %363 = tpu.iota {dimensions = array<i32: 1>} : vector<8x6xi32>
    %c0_i32_383 = arith.constant 0 : i32
    %364 = vector.broadcast %c0_i32_383 : i32 to vector<8x6xi32>
    %365 = arith.cmpi eq, %363, %364 : vector<8x6xi32>
    %cst_384 = arith.constant 0.000000e+00 : f32
    %366 = vector.broadcast %cst_384 : f32 to vector<8x6xf32>
    %367 = arith.subf %366, %362 : vector<8x6xf32>
    %368 = arith.select %365, %362, %367 : vector<8x6xi1>, vector<8x6xf32>
    %cst_385 = arith.constant 0.000000e+00 : f32
    %369 = vector.broadcast %cst_385 : f32 to vector<8x6xf32>
    %370 = arith.minimumf %368, %369 : vector<8x6xf32>
    %371 = math.absf %368 : vector<8x6xf32>
    %cst_386 = arith.constant 0.000000e+00 : f32
    %372 = vector.broadcast %cst_386 : f32 to vector<8x6xf32>
    %373 = arith.subf %372, %371 : vector<8x6xf32>
    %374 = math.exp %373 : vector<8x6xf32>
    %375 = math.log1p %374 : vector<8x6xf32>
    %376 = arith.subf %370, %375 : vector<8x6xf32>
    %c8_i32 = arith.constant 8 : i32
    %377 = arith.muli %arg0, %c8_i32 : i32
    %378 = tpu.iota {dimensions = array<i32: 0>} : vector<8x6xi32>
    %379 = vector.broadcast %377 : i32 to vector<8x6xi32>
    %380 = arith.addi %379, %378 : vector<8x6xi32>
    %c8_i32_387 = arith.constant 8 : i32
    %381 = vector.broadcast %c8_i32_387 : i32 to vector<8x6xi32>
    %382 = arith.cmpi slt, %380, %381 : vector<8x6xi32>
    %cst_388 = arith.constant 0.000000e+00 : f32
    %383 = vector.broadcast %cst_388 : f32 to vector<8x6xf32>
    %384 = arith.select %382, %376, %383 : vector<8x6xi1>, vector<8x6xf32>
    %cst_389 = arith.constant dense<0.000000e+00> : vector<8xf32>
    %385 = vector.multi_reduction <add>, %384, %cst_389 [1] : vector<8x6xf32> to vector<8xf32>
    %386 = vector.shape_cast %385 : vector<8xf32> to vector<8x1xf32>
    %cst_390 = arith.constant 0.000000e+00 : f32
    %387 = vector.broadcast %cst_390 : f32 to vector<8x1xf32>
    %388 = arith.subf %387, %386 : vector<8x1xf32>
    %389 = tpu.iota {dimensions = array<i32: 1>} : vector<8x128xi32>
    %c0_i32_391 = arith.constant 0 : i32
    %390 = vector.broadcast %c0_i32_391 : i32 to vector<8x128xi32>
    %391 = arith.cmpi eq, %389, %390 : vector<8x128xi32>
    %cst_392 = arith.constant 0.000000e+00 : f32
    %392 = vector.shape_cast %388 : vector<8x1xf32> to vector<8x1xf32>
    %393 = vector.broadcast %392 : vector<8x1xf32> to vector<8x128xf32>
    %394 = vector.broadcast %cst_392 : f32 to vector<8x128xf32>
    %395 = arith.select %391, %393, %394 : vector<8x128xi1>, vector<8x128xf32>
    %c0_393 = arith.constant 0 : index
    %c0_394 = arith.constant 0 : index
    %396 = vector.load %arg5[%c0_393, %c0_394] : memref<8x128xf32, #tpu.memory_space<vmem>>, vector<8x128xf32>
    tpu.vector_store %arg5[%c0_393, %c0_394], %395 {strides = array<i32>} : memref<8x128xf32, #tpu.memory_space<vmem>>, vector<8x128xf32>,
    return
  }
  func.func @transform_2(%arg0: i32, %arg1: memref<8xi32, #tpu.memory_space<smem>>, %arg2: memref<48xi32, #tpu.memory_space<smem>>) -> (i32, i32) {
    %c0_i32 = arith.constant 0 : i32
    %c0_i32_0 = arith.constant 0 : i32
    return %arg0, %c0_i32 : i32, i32
  }
}

</mosaic_0001>

<bundles_post_ra>
// kernel: tpu_custom_call.1
= control target key start
LH: loop header
LB: loop body
LE: loop exit
PB: predicated region body
PF: predicated region fallthrough
CT: control target
= control target key end

     0   :  { %s5695_s21 = smov [#allocation7]   ;;  %s5696_s22 = smov [#allocation8]   ;;  %s6403_s0 = inlined_call_operand.hbm [shape: s32[8], index: 0, kind: input, shape index: {}]   ;;  %s6404_s2 = inlined_call_operand.hbm [shape: f32[64,128], index: 2, kind: input, shape index: {}]   ;;  %s6405_s3 = inlined_call_operand.hbm [shape: f32[64,128], index: 3, kind: input, shape index: {}]   ;;  %s6406_s4 = inlined_call_operand.hbm [shape: f32[8,128], index: 4, kind: output, shape index: {}]   ;;  %s6407_s1 = inlined_call_operand.hbm [shape: s32[48], index: 1, kind: input, shape index: {}]  }
   0x1   :  { %s10_s17 = sshll.u32 %s6403_s0, 4  ;;  %s15_s20 = sshll.u32 %s6407_s1, 4  ;;  %s11_s17 = int_to_ptr.hbm [resolvable:$true] %s10_s17  ;;  %s16_s20 = int_to_ptr.hbm [resolvable:$true] %s15_s20 }
   0x2   :  { %13 = dma.hbm_to_smem %s11_s17, 16, %s5695_s21, [#allocation6] }
   0x3   :  { %18 = dma.hbm_to_smem %s16_s20, 16, %s5696_s22, [#allocation6] }
   0x4   :  { %5579 = dma.done.wait [#allocation6], 32 }
   0x5   :  { %5580 = vsyncadd [#allocation6], 4294967264 }
   0x6   :  { %21 = sfence }
   0x7   :  { %s50_s23 = sld [smem:[#allocation8]] }
   0x8   :  { %22 = vsyncpa [#allocation10], 0  ;;  %s5697_s24 = smov [#allocation3]   ;;  %s3902_s26 = sld [smem:[#allocation8 + $0x1]] }
   0x9   :  { %s61_s25 = sshll.u32 %s5697_s24, 4  ;;  %s5698_s0 = smov [#allocation3 + $0x1]   ;;  %s62_s25 = int_to_ptr.vmem [resolvable:$true] %s61_s25 }
   0xa   :  { %s5785_s27 = sshll.u32 %s5698_s0, 4  ;;  %s5787_s1 = sld [smem:[#allocation8 + $0x2]]  ;;  %s79_s27 = int_to_ptr.vmem [resolvable:$true] %s5785_s27 }
   0xb   :  { %s5699_s28 = smov [#allocation3 + $0x2]   ;;  %s5792_s30 = sld [smem:[#allocation8 + $0x3]] }
   0xc   :  { %s5790_s29 = sshll.u32 %s5699_s28, 4  ;;  %s5804_s17 = scalar_lea.hbm %s6405_s3, 64  ;;  %s96_s29 = int_to_ptr.vmem [resolvable:$true] %s5790_s29 }
   0xd   :  { %s51_s7 = scalar_lea.hbm %s6405_s3, %s50_s23 }
   0xe   :  { %s59_s8 = sshll.u32 %s51_s7, 4  ;;  %s66_s11 = scalar_lea.hbm %s6405_s3, %s3902_s26  ;;  %s60_s8 = int_to_ptr.hbm [resolvable:$true] %s59_s8 }
   0xf   :  { %s76_s12 = sshll.u32 %s66_s11, 4  ;;  %s4211_s13 = sshra.s32 %s60_s8, 4  ;;  %s4212_s13 = int_to_ptr.hbm [resolvable:$true] %s4211_s13  ;;  %s77_s12 = int_to_ptr.hbm [resolvable:$true] %s76_s12 }
  0x10   :  { %s4213_s14 = scalar_lea.hbm %s4212_s13, 1  ;;  %p4216_p1 = scmp.lt.s32.totalorder %s4212_s13, %s6405_s3 }
  0x11   :  { %p4214_p0 = scmp.ne.s32.totalorder %s4212_s13, %s4213_s14  ;;  %p4217_p2 = scmp.lt.s32.totalorder %s5804_s17, %s4213_s14 }
  0x13   :  { %p4218_p3 = por %p4217_p2, %p4216_p1 }
  0x15   :  { %p4219_p4 = pnand %p4218_p3, %p4214_p0 }
  0x17   :  { %4222 = shalt.err (!%p4219_p4)  }
  0x18   :  { %64 = dma.hbm_to_vmem [thread:$0]  %s60_s8, 16, %s62_s25, [#allocation5] }
  0x19   :  { %s83_s22 = scalar_lea.hbm %s6405_s3, %s5787_s1  ;;  %s4235_s23 = sshra.s32 %s77_s12, 4  ;;  %s4236_s23 = int_to_ptr.hbm [resolvable:$true] %s4235_s23 }
  0x1a   :  { %s4237_s24 = scalar_lea.hbm %s4236_s23, 1  ;;  %p4240_p6 = scmp.lt.s32.totalorder %s4236_s23, %s6405_s3 }
  0x1b   :  { %p4238_p5 = scmp.ne.s32.totalorder %s4236_s23, %s4237_s24  ;;  %p4241_p7 = scmp.lt.s32.totalorder %s5804_s17, %s4237_s24 }
  0x1d   :  { %p4242_p8 = por %p4241_p7, %p4240_p6 }
  0x1f   :  { %p4243_p9 = pnand %p4242_p8, %p4238_p5 }
  0x21   :  { %4246 = shalt.err (!%p4243_p9)  }
  0x22   :  { %81 = dma.hbm_to_vmem [thread:$0]  %s77_s12, 16, %s79_s27, [#allocation5 + $0x1] }
  0x23   :  { %s93_s25 = sshll.u32 %s83_s22, 4  ;;  %s100_s5 = scalar_lea.hbm %s6405_s3, %s5792_s30  ;;  %s94_s25 = int_to_ptr.hbm [resolvable:$true] %s93_s25 }
  0x24   :  { %s110_s6 = sshll.u32 %s100_s5, 4  ;;  %s4259_s7 = sshra.s32 %s94_s25, 4  ;;  %s4260_s7 = int_to_ptr.hbm [resolvable:$true] %s4259_s7  ;;  %s111_s6 = int_to_ptr.hbm [resolvable:$true] %s110_s6 }
  0x25   :  { %s4261_s8 = scalar_lea.hbm %s4260_s7, 1  ;;  %p4264_p11 = scmp.lt.s32.totalorder %s4260_s7, %s6405_s3 }
  0x26   :  { %p4262_p10 = scmp.ne.s32.totalorder %s4260_s7, %s4261_s8  ;;  %p4265_p12 = scmp.lt.s32.totalorder %s5804_s17, %s4261_s8 }
  0x28   :  { %p4266_p13 = por %p4265_p12, %p4264_p11 }
  0x2a   :  { %p4267_p0 = pnand %p4266_p13, %p4262_p10 }
  0x2c   :  { %4270 = shalt.err (!%p4267_p0)  }
  0x2d   :  { %98 = dma.hbm_to_vmem [thread:$0]  %s94_s25, 16, %s96_s29, [#allocation5 + $0x2] }
  0x2e   :  { %s5700_s27 = smov [#allocation3 + $0x3]   ;;  %s3905_s11 = sld [smem:[#allocation8 + $0x4]] }
  0x2f   :  { %s112_s30 = sshll.u32 %s5700_s27, 4  ;;  %s4283_s12 = sshra.s32 %s111_s6, 4  ;;  %s113_s30 = int_to_ptr.vmem [resolvable:$true] %s112_s30  ;;  %s4284_s12 = int_to_ptr.hbm [resolvable:$true] %s4283_s12 }
  0x30   :  { %s4285_s13 = scalar_lea.hbm %s4284_s12, 1  ;;  %p4288_p2 = scmp.lt.s32.totalorder %s4284_s12, %s6405_s3 }
  0x31   :  { %p4286_p1 = scmp.ne.s32.totalorder %s4284_s12, %s4285_s13  ;;  %p4289_p3 = scmp.lt.s32.totalorder %s5804_s17, %s4285_s13 }
  0x33   :  { %p4290_p4 = por %p4289_p3, %p4288_p2 }
  0x35   :  { %p4291_p5 = pnand %p4290_p4, %p4286_p1 }
  0x37   :  { %4294 = shalt.err (!%p4291_p5)  }
  0x38   :  { %115 = dma.hbm_to_vmem [thread:$0]  %s111_s6, 16, %s113_s30, [#allocation5 + $0x3] }
  0x39   :  { %s5701_s16 = smov [#allocation3 + $0x4]   ;;  %s3906_s18 = sld [smem:[#allocation8 + $0x5]] }
  0x3a   :  { %s129_s29 = sshll.u32 %s5701_s16, 4  ;;  %s5702_s19 = smov [#allocation3 + $0x5]   ;;  %s130_s29 = int_to_ptr.vmem [resolvable:$true] %s129_s29 }
  0x3b   :  { %s5834_s20 = sshll.u32 %s5702_s19, 4  ;;  %s3908_s21 = sld [smem:[#allocation8 + $0x6]]  ;;  %s147_s20 = int_to_ptr.vmem [resolvable:$true] %s5834_s20 }
  0x3c   :  { %s117_s24 = scalar_lea.hbm %s6405_s3, %s3905_s11  ;;  %s5703_s0 = smov [#allocation3 + $0x8]  }
  0x3d   :  { %s127_s26 = sshll.u32 %s117_s24, 4  ;;  %s5840_s25 = sshll.u32 %s5703_s0, 4  ;;  %s128_s26 = int_to_ptr.hbm [resolvable:$true] %s127_s26  ;;  %s181_s25 = int_to_ptr.vmem [resolvable:$true] %s5840_s25 }
  0x3e   :  { %s4307_s28 = sshra.s32 %s128_s26, 4  ;;  %s4308_s28 = int_to_ptr.hbm [resolvable:$true] %s4307_s28 }
  0x3f   :  { %s4309_s1 = scalar_lea.hbm %s4308_s28, 1  ;;  %p4312_p7 = scmp.lt.s32.totalorder %s4308_s28, %s6405_s3 }
  0x40   :  { %p4310_p6 = scmp.ne.s32.totalorder %s4308_s28, %s4309_s1  ;;  %p4313_p8 = scmp.lt.s32.totalorder %s5804_s17, %s4309_s1 }
  0x42   :  { %p4314_p9 = por %p4313_p8, %p4312_p7 }
  0x44   :  { %p4315_p10 = pnand %p4314_p9, %p4310_p6 }
  0x46   :  { %4318 = shalt.err (!%p4315_p10)  }
  0x47   :  { %132 = dma.hbm_to_vmem [thread:$0]  %s128_s26, 16, %s130_s29, [#allocation5 + $0x4] }
  0x48   :  { %s134_s9 = scalar_lea.hbm %s6405_s3, %s3906_s18  ;;  %s168_s11 = scalar_lea.hbm %s6405_s3, %s3908_s21 }
  0x49   :  { %s144_s10 = sshll.u32 %s134_s9, 4  ;;  %s178_s12 = sshll.u32 %s168_s11, 4  ;;  %s145_s10 = int_to_ptr.hbm [resolvable:$true] %s144_s10  ;;  %s179_s12 = int_to_ptr.hbm [resolvable:$true] %s178_s12 }
  0x4a   :  { %s4331_s13 = sshra.s32 %s145_s10, 4  ;;  %s4332_s13 = int_to_ptr.hbm [resolvable:$true] %s4331_s13 }
  0x4b   :  { %s4333_s14 = scalar_lea.hbm %s4332_s13, 1  ;;  %p4336_p12 = scmp.lt.s32.totalorder %s4332_s13, %s6405_s3 }
  0x4c   :  { %p4334_p11 = scmp.ne.s32.totalorder %s4332_s13, %s4333_s14  ;;  %p4337_p13 = scmp.lt.s32.totalorder %s5804_s17, %s4333_s14 }
  0x4e   :  { %p4338_p0 = por %p4337_p13, %p4336_p12 }
  0x50   :  { %p4339_p1 = pnand %p4338_p0, %p4334_p11 }
  0x52   :  { %4342 = shalt.err (!%p4339_p1)  }
  0x53   :  { %149 = dma.hbm_to_vmem [thread:$0]  %s145_s10, 16, %s147_s20, [#allocation5 + $0x5] }
  0x54   :  { %s3909_s29 = sld [smem:[#allocation8 + $0x7]]  ;;  %s4355_s18 = sshra.s32 %s179_s12, 4  ;;  %s4356_s18 = int_to_ptr.hbm [resolvable:$true] %s4355_s18 }
  0x55   :  { %s4357_s19 = scalar_lea.hbm %s4356_s18, 1  ;;  %p4360_p3 = scmp.lt.s32.totalorder %s4356_s18, %s6405_s3 }
  0x56   :  { %p4358_p2 = scmp.ne.s32.totalorder %s4356_s18, %s4357_s19  ;;  %p4361_p4 = scmp.lt.s32.totalorder %s5804_s17, %s4357_s19 }
  0x58   :  { %p4362_p5 = por %p4361_p4, %p4360_p3 }
  0x5a   :  { %p4363_p6 = pnand %p4362_p5, %p4358_p2 }
  0x5c   :  { %4366 = shalt.err (!%p4363_p6)  }
  0x5d   :  { %183 = dma.hbm_to_vmem [thread:$0]  %s179_s12, 16, %s181_s25, [#allocation5 + $0x6] }
  0x5e   :  { %s3910_s23 = sld [smem:[#allocation8 + $0x8]]  ;;  %s5704_s24 = smov [#allocation3 + $0x9]  }
  0x5f   :  { %s197_s26 = sshll.u32 %s5704_s24, 4  ;;  %s5705_s20 = smov [#allocation3 + $0xa]   ;;  %s198_s26 = int_to_ptr.vmem [resolvable:$true] %s197_s26 }
  0x60   :  { %s5863_s0 = sshll.u32 %s5705_s20, 4  ;;  %s5866_s28 = sld [smem:[#allocation8 + $0x9]]  ;;  %s215_s0 = int_to_ptr.vmem [resolvable:$true] %s5863_s0 }
  0x61   :  { %s185_s6 = scalar_lea.hbm %s6405_s3, %s3909_s29  ;;  %s5706_s8 = smov [#allocation3 + $0xb]  }
  0x62   :  { %s195_s7 = sshll.u32 %s185_s6, 4  ;;  %s5871_s9 = sshll.u32 %s5706_s8, 4  ;;  %s196_s7 = int_to_ptr.hbm [resolvable:$true] %s195_s7  ;;  %s232_s9 = int_to_ptr.vmem [resolvable:$true] %s5871_s9 }
  0x63   :  { %s4379_s30 = sshra.s32 %s196_s7, 4  ;;  %s4380_s30 = int_to_ptr.hbm [resolvable:$true] %s4379_s30 }
  0x64   :  { %s202_s27 = scalar_lea.hbm %s6405_s3, %s3910_s23  ;;  %s4381_s11 = scalar_lea.hbm %s4380_s30, 1 }
  0x65   :  { %p4382_p7 = scmp.ne.s32.totalorder %s4380_s30, %s4381_s11  ;;  %p4384_p8 = scmp.lt.s32.totalorder %s4380_s30, %s6405_s3 }
  0x66   :  { %p4385_p9 = scmp.lt.s32.totalorder %s5804_s17, %s4381_s11 }
  0x68   :  { %p4386_p10 = por %p4385_p9, %p4384_p8 }
  0x6a   :  { %p4387_p11 = pnand %p4386_p10, %p4382_p7 }
  0x6c   :  { %4390 = shalt.err (!%p4387_p11)  }
  0x6d   :  { %200 = dma.hbm_to_vmem [thread:$0]  %s196_s7, 16, %s198_s26, [#allocation5 + $0x7] }
  0x6e   :  { %s212_s14 = sshll.u32 %s202_s27, 4  ;;  %s219_s29 = scalar_lea.hbm %s6405_s3, %s5866_s28  ;;  %s213_s14 = int_to_ptr.hbm [resolvable:$true] %s212_s14 }
  0x6f   :  { %s4403_s18 = sshra.s32 %s213_s14, 4  ;;  %s4404_s18 = int_to_ptr.hbm [resolvable:$true] %s4403_s18 }
  0x70   :  { %s4405_s19 = scalar_lea.hbm %s4404_s18, 1  ;;  %p4408_p13 = scmp.lt.s32.totalorder %s4404_s18, %s6405_s3 }
  0x71   :  { %p4406_p12 = scmp.ne.s32.totalorder %s4404_s18, %s4405_s19  ;;  %p4409_p0 = scmp.lt.s32.totalorder %s5804_s17, %s4405_s19 }
  0x73   :  { %p4410_p1 = por %p4409_p0, %p4408_p13 }
  0x75   :  { %p4411_p2 = pnand %p4410_p1, %p4406_p12 }
  0x77   :  { %4414 = shalt.err (!%p4411_p2)  }
  0x78   :  { %217 = dma.hbm_to_vmem [thread:$0]  %s213_s14, 16, %s215_s0, [#allocation5 + $0x8] }
  0x79   :  { %s229_s23 = sshll.u32 %s219_s29, 4  ;;  %s3912_s24 = sld [smem:[#allocation8 + $0xa]]  ;;  %s230_s23 = int_to_ptr.hbm [resolvable:$true] %s229_s23 }
  0x7a   :  { %s4427_s26 = sshra.s32 %s230_s23, 4  ;;  %s4428_s26 = int_to_ptr.hbm [resolvable:$true] %s4427_s26 }
  0x7b   :  { %s4429_s20 = scalar_lea.hbm %s4428_s26, 1  ;;  %p4432_p4 = scmp.lt.s32.totalorder %s4428_s26, %s6405_s3 }
  0x7c   :  { %p4430_p3 = scmp.ne.s32.totalorder %s4428_s26, %s4429_s20  ;;  %p4433_p5 = scmp.lt.s32.totalorder %s5804_s17, %s4429_s20 }
  0x7e   :  { %p4434_p6 = por %p4433_p5, %p4432_p4 }
  0x80   :  { %p4435_p7 = pnand %p4434_p6, %p4430_p3 }
  0x82   :  { %4438 = shalt.err (!%p4435_p7)  }
  0x83   :  { %234 = dma.hbm_to_vmem [thread:$0]  %s230_s23, 16, %s232_s9, [#allocation5 + $0x9] }
  0x84   :  { %s5707_s5 = smov [#allocation3 + $0xc]   ;;  %s3913_s7 = sld [smem:[#allocation8 + $0xb]] }
  0x85   :  { %s248_s6 = sshll.u32 %s5707_s5, 4  ;;  %s5708_s0 = smov [#allocation3 + $0xd]   ;;  %s249_s6 = int_to_ptr.vmem [resolvable:$true] %s248_s6 }
  0x86   :  { %s5895_s8 = sshll.u32 %s5708_s0, 4  ;;  %s3915_s25 = sld [smem:[#allocation8 + $0xc]]  ;;  %s266_s8 = int_to_ptr.vmem [resolvable:$true] %s5895_s8 }
  0x87   :  { %s236_s30 = scalar_lea.hbm %s6405_s3, %s3912_s24  ;;  %s5709_s12 = smov [#allocation3 + $0x10]  }
  0x88   :  { %s246_s11 = sshll.u32 %s236_s30, 4  ;;  %s5901_s13 = sshll.u32 %s5709_s12, 4  ;;  %s247_s11 = int_to_ptr.hbm [resolvable:$true] %s246_s11  ;;  %s300_s13 = int_to_ptr.vmem [resolvable:$true] %s5901_s13 }
  0x89   :  { %s4451_s9 = sshra.s32 %s247_s11, 4  ;;  %s4452_s9 = int_to_ptr.hbm [resolvable:$true] %s4451_s9 }
  0x8a   :  { %s4453_s14 = scalar_lea.hbm %s4452_s9, 1  ;;  %p4456_p9 = scmp.lt.s32.totalorder %s4452_s9, %s6405_s3 }
  0x8b   :  { %p4454_p8 = scmp.ne.s32.totalorder %s4452_s9, %s4453_s14  ;;  %p4457_p10 = scmp.lt.s32.totalorder %s5804_s17, %s4453_s14 }
  0x8d   :  { %p4458_p11 = por %p4457_p10, %p4456_p9 }
  0x8f   :  { %p4459_p12 = pnand %p4458_p11, %p4454_p8 }
  0x91   :  { %4462 = shalt.err (!%p4459_p12)  }
  0x92   :  { %251 = dma.hbm_to_vmem [thread:$0]  %s247_s11, 16, %s249_s6, [#allocation5 + $0xa] }
  0x93   :  { %s253_s19 = scalar_lea.hbm %s6405_s3, %s3913_s7  ;;  %s287_s24 = scalar_lea.hbm %s6405_s3, %s3915_s25 }
  0x94   :  { %s263_s21 = sshll.u32 %s253_s19, 4  ;;  %s297_s26 = sshll.u32 %s287_s24, 4  ;;  %s264_s21 = int_to_ptr.hbm [resolvable:$true] %s263_s21  ;;  %s298_s26 = int_to_ptr.hbm [resolvable:$true] %s297_s26 }
  0x95   :  { %s4475_s20 = sshra.s32 %s264_s21, 4  ;;  %s4476_s20 = int_to_ptr.hbm [resolvable:$true] %s4475_s20 }
  0x96   :  { %s4477_s28 = scalar_lea.hbm %s4476_s20, 1  ;;  %p4480_p0 = scmp.lt.s32.totalorder %s4476_s20, %s6405_s3 }
  0x97   :  { %p4478_p13 = scmp.ne.s32.totalorder %s4476_s20, %s4477_s28  ;;  %p4481_p1 = scmp.lt.s32.totalorder %s5804_s17, %s4477_s28 }
  0x99   :  { %p4482_p2 = por %p4481_p1, %p4480_p0 }
  0x9b   :  { %p4483_p3 = pnand %p4482_p2, %p4478_p13 }
  0x9d   :  { %4486 = shalt.err (!%p4483_p3)  }
  0x9e   :  { %268 = dma.hbm_to_vmem [thread:$0]  %s264_s21, 16, %s266_s8, [#allocation5 + $0xb] }
  0x9f   :  { %s3916_s6 = sld [smem:[#allocation8 + $0xd]]  ;;  %s4499_s7 = sshra.s32 %s298_s26, 4  ;;  %s4500_s7 = int_to_ptr.hbm [resolvable:$true] %s4499_s7 }
  0xa0   :  { %s4501_s0 = scalar_lea.hbm %s4500_s7, 1  ;;  %p4504_p5 = scmp.lt.s32.totalorder %s4500_s7, %s6405_s3 }
  0xa1   :  { %p4502_p4 = scmp.ne.s32.totalorder %s4500_s7, %s4501_s0  ;;  %p4505_p6 = scmp.lt.s32.totalorder %s5804_s17, %s4501_s0 }
  0xa3   :  { %p4506_p7 = por %p4505_p6, %p4504_p5 }
  0xa5   :  { %p4507_p8 = pnand %p4506_p7, %p4502_p4 }
  0xa7   :  { %4510 = shalt.err (!%p4507_p8)  }
  0xa8   :  { %302 = dma.hbm_to_vmem [thread:$0]  %s298_s26, 16, %s300_s13, [#allocation5 + $0xc] }
  0xa9   :  { %s3917_s27 = sld [smem:[#allocation8 + $0xe]]  ;;  %s5710_s30 = smov [#allocation3 + $0x11]  }
  0xaa   :  { %s316_s11 = sshll.u32 %s5710_s30, 4  ;;  %s5711_s8 = smov [#allocation3 + $0x12]   ;;  %s317_s11 = int_to_ptr.vmem [resolvable:$true] %s316_s11 }
  0xab   :  { %s5924_s12 = sshll.u32 %s5711_s8, 4  ;;  %s5927_s9 = sld [smem:[#allocation8 + $0xf]]  ;;  %s334_s12 = int_to_ptr.vmem [resolvable:$true] %s5924_s12 }
  0xac   :  { %s304_s16 = scalar_lea.hbm %s6405_s3, %s3916_s6  ;;  %s5712_s18 = smov [#allocation3 + $0x13]  }
  0xad   :  { %s314_s29 = sshll.u32 %s304_s16, 4  ;;  %s5932_s19 = sshll.u32 %s5712_s18, 4  ;;  %s315_s29 = int_to_ptr.hbm [resolvable:$true] %s314_s29  ;;  %s351_s19 = int_to_ptr.vmem [resolvable:$true] %s5932_s19 }
  0xae   :  { %s4523_s23 = sshra.s32 %s315_s29, 4  ;;  %s4524_s23 = int_to_ptr.hbm [resolvable:$true] %s4523_s23 }
  0xaf   :  { %s321_s22 = scalar_lea.hbm %s6405_s3, %s3917_s27  ;;  %s4525_s24 = scalar_lea.hbm %s4524_s23, 1 }
  0xb0   :  { %p4526_p9 = scmp.ne.s32.totalorder %s4524_s23, %s4525_s24  ;;  %p4528_p10 = scmp.lt.s32.totalorder %s4524_s23, %s6405_s3 }
  0xb1   :  { %p4529_p11 = scmp.lt.s32.totalorder %s5804_s17, %s4525_s24 }
  0xb3   :  { %p4530_p12 = por %p4529_p11, %p4528_p10 }
  0xb5   :  { %p4531_p13 = pnand %p4530_p12, %p4526_p9 }
  0xb7   :  { %4534 = shalt.err (!%p4531_p13)  }
  0xb8   :  { %319 = dma.hbm_to_vmem [thread:$0]  %s315_s29, 16, %s317_s11, [#allocation5 + $0xd] }
  0xb9   :  { %s331_s28 = sshll.u32 %s321_s22, 4  ;;  %s338_s6 = scalar_lea.hbm %s6405_s3, %s5927_s9  ;;  %s332_s28 = int_to_ptr.hbm [resolvable:$true] %s331_s28 }
  0xba   :  { %s4547_s7 = sshra.s32 %s332_s28, 4  ;;  %s4548_s7 = int_to_ptr.hbm [resolvable:$true] %s4547_s7 }
  0xbb   :  { %s4549_s0 = scalar_lea.hbm %s4548_s7, 1  ;;  %p4552_p1 = scmp.lt.s32.totalorder %s4548_s7, %s6405_s3 }
  0xbc   :  { %p4550_p0 = scmp.ne.s32.totalorder %s4548_s7, %s4549_s0  ;;  %p4553_p2 = scmp.lt.s32.totalorder %s5804_s17, %s4549_s0 }
  0xbe   :  { %p4554_p3 = por %p4553_p2, %p4552_p1 }
  0xc0   :  { %p4555_p4 = pnand %p4554_p3, %p4550_p0 }
  0xc2   :  { %4558 = shalt.err (!%p4555_p4)  }
  0xc3   :  { %336 = dma.hbm_to_vmem [thread:$0]  %s332_s28, 16, %s334_s12, [#allocation5 + $0xe] }
  0xc4   :  { %s348_s27 = sshll.u32 %s338_s6, 4  ;;  %s3919_s30 = sld [smem:[#allocation8 + $0x10]]  ;;  %s349_s27 = int_to_ptr.hbm [resolvable:$true] %s348_s27 }
  0xc5   :  { %s4571_s11 = sshra.s32 %s349_s27, 4  ;;  %s4572_s11 = int_to_ptr.hbm [resolvable:$true] %s4571_s11 }
  0xc6   :  { %s4573_s8 = scalar_lea.hbm %s4572_s11, 1  ;;  %p4576_p6 = scmp.lt.s32.totalorder %s4572_s11, %s6405_s3 }
  0xc7   :  { %p4574_p5 = scmp.ne.s32.totalorder %s4572_s11, %s4573_s8  ;;  %p4577_p7 = scmp.lt.s32.totalorder %s5804_s17, %s4573_s8 }
  0xc9   :  { %p4578_p8 = por %p4577_p7, %p4576_p6 }
  0xcb   :  { %p4579_p9 = pnand %p4578_p8, %p4574_p5 }
  0xcd   :  { %4582 = shalt.err (!%p4579_p9)  }
  0xce   :  { %353 = dma.hbm_to_vmem [thread:$0]  %s349_s27, 16, %s351_s19, [#allocation5 + $0xf] }
  0xcf   :  { %s5713_s15 = smov [#allocation3 + $0x14]   ;;  %s3920_s29 = sld [smem:[#allocation8 + $0x11]] }
  0xd0   :  { %s367_s16 = sshll.u32 %s5713_s15, 4  ;;  %s5714_s12 = smov [#allocation3 + $0x15]   ;;  %s368_s16 = int_to_ptr.vmem [resolvable:$true] %s367_s16 }
  0xd1   :  { %s5956_s18 = sshll.u32 %s5714_s12, 4  ;;  %s3922_s13 = sld [smem:[#allocation8 + $0x12]]  ;;  %s385_s18 = int_to_ptr.vmem [resolvable:$true] %s5956_s18 }
  0xd2   :  { %s355_s23 = scalar_lea.hbm %s6405_s3, %s3919_s30  ;;  %s5715_s26 = smov [#allocation3 + $0x18]  }
  0xd3   :  { %s365_s24 = sshll.u32 %s355_s23, 4  ;;  %s5962_s20 = sshll.u32 %s5715_s26, 4  ;;  %s366_s24 = int_to_ptr.hbm [resolvable:$true] %s365_s24  ;;  %s419_s20 = int_to_ptr.vmem [resolvable:$true] %s5962_s20 }
  0xd4   :  { %s4595_s19 = sshra.s32 %s366_s24, 4  ;;  %s4596_s19 = int_to_ptr.hbm [resolvable:$true] %s4595_s19 }
  0xd5   :  { %s4597_s28 = scalar_lea.hbm %s4596_s19, 1  ;;  %p4600_p11 = scmp.lt.s32.totalorder %s4596_s19, %s6405_s3 }
  0xd6   :  { %p4598_p10 = scmp.ne.s32.totalorder %s4596_s19, %s4597_s28  ;;  %p4601_p12 = scmp.lt.s32.totalorder %s5804_s17, %s4597_s28 }
  0xd8   :  { %p4602_p13 = por %p4601_p12, %p4600_p11 }
  0xda   :  { %p4603_p0 = pnand %p4602_p13, %p4598_p10 }
  0xdc   :  { %4606 = shalt.err (!%p4603_p0)  }
  0xdd   :  { %370 = dma.hbm_to_vmem [thread:$0]  %s366_s24, 16, %s368_s16, [#allocation5 + $0x10] }
  0xde   :  { %s372_s0 = scalar_lea.hbm %s6405_s3, %s3920_s29  ;;  %s406_s30 = scalar_lea.hbm %s6405_s3, %s3922_s13 }
  0xdf   :  { %s382_s25 = sshll.u32 %s372_s0, 4  ;;  %s416_s11 = sshll.u32 %s406_s30, 4  ;;  %s383_s25 = int_to_ptr.hbm [resolvable:$true] %s382_s25  ;;  %s417_s11 = int_to_ptr.hbm [resolvable:$true] %s416_s11 }
  0xe0   :  { %s4619_s8 = sshra.s32 %s383_s25, 4  ;;  %s4620_s8 = int_to_ptr.hbm [resolvable:$true] %s4619_s8 }
  0xe1   :  { %s4621_s9 = scalar_lea.hbm %s4620_s8, 1  ;;  %p4624_p2 = scmp.lt.s32.totalorder %s4620_s8, %s6405_s3 }
  0xe2   :  { %p4622_p1 = scmp.ne.s32.totalorder %s4620_s8, %s4621_s9  ;;  %p4625_p3 = scmp.lt.s32.totalorder %s5804_s17, %s4621_s9 }
  0xe4   :  { %p4626_p4 = por %p4625_p3, %p4624_p2 }
  0xe6   :  { %p4627_p5 = pnand %p4626_p4, %p4622_p1 }
  0xe8   :  { %4630 = shalt.err (!%p4627_p5)  }
  0xe9   :  { %387 = dma.hbm_to_vmem [thread:$0]  %s383_s25, 16, %s385_s18, [#allocation5 + $0x11] }
  0xea   :  { %s3923_s16 = sld [smem:[#allocation8 + $0x13]]  ;;  %s4643_s29 = sshra.s32 %s417_s11, 4  ;;  %s4644_s29 = int_to_ptr.hbm [resolvable:$true] %s4643_s29 }
  0xeb   :  { %s4645_s12 = scalar_lea.hbm %s4644_s29, 1  ;;  %p4648_p7 = scmp.lt.s32.totalorder %s4644_s29, %s6405_s3 }
  0xec   :  { %p4646_p6 = scmp.ne.s32.totalorder %s4644_s29, %s4645_s12  ;;  %p4649_p8 = scmp.lt.s32.totalorder %s5804_s17, %s4645_s12 }
  0xee   :  { %p4650_p9 = por %p4649_p8, %p4648_p7 }
  0xf0   :  { %p4651_p10 = pnand %p4650_p9, %p4646_p6 }
  0xf2   :  { %4654 = shalt.err (!%p4651_p10)  }
  0xf3   :  { %421 = dma.hbm_to_vmem [thread:$0]  %s417_s11, 16, %s419_s20, [#allocation5 + $0x12] }
  0xf4   :  { %s3924_s22 = sld [smem:[#allocation8 + $0x14]]  ;;  %s5716_s23 = smov [#allocation3 + $0x19]  }
  0xf5   :  { %s435_s24 = sshll.u32 %s5716_s23, 4  ;;  %s5717_s18 = smov [#allocation3 + $0x1a]   ;;  %s436_s24 = int_to_ptr.vmem [resolvable:$true] %s435_s24 }
  0xf6   :  { %s5985_s26 = sshll.u32 %s5717_s18, 4  ;;  %s5988_s19 = sld [smem:[#allocation8 + $0x15]]  ;;  %s453_s26 = int_to_ptr.vmem [resolvable:$true] %s5985_s26 }
  0xf7   :  { %s423_s5 = scalar_lea.hbm %s6405_s3, %s3923_s16  ;;  %s5718_s7 = smov [#allocation3 + $0x1b]  }
  0xf8   :  { %s433_s6 = sshll.u32 %s423_s5, 4  ;;  %s5993_s0 = sshll.u32 %s5718_s7, 4  ;;  %s434_s6 = int_to_ptr.hbm [resolvable:$true] %s433_s6  ;;  %s470_s0 = int_to_ptr.vmem [resolvable:$true] %s5993_s0 }
  0xf9   :  { %s4667_s27 = sshra.s32 %s434_s6, 4  ;;  %s4668_s27 = int_to_ptr.hbm [resolvable:$true] %s4667_s27 }
  0xfa   :  { %s440_s10 = scalar_lea.hbm %s6405_s3, %s3924_s22  ;;  %s4669_s30 = scalar_lea.hbm %s4668_s27, 1 }
  0xfb   :  { %p4670_p11 = scmp.ne.s32.totalorder %s4668_s27, %s4669_s30  ;;  %p4672_p12 = scmp.lt.s32.totalorder %s4668_s27, %s6405_s3 }
  0xfc   :  { %p4673_p13 = scmp.lt.s32.totalorder %s5804_s17, %s4669_s30 }
  0xfe   :  { %p4674_p0 = por %p4673_p13, %p4672_p12 }
 0x100   :  { %p4675_p1 = pnand %p4674_p0, %p4670_p11 }
 0x102   :  { %4678 = shalt.err (!%p4675_p1)  }
 0x103   :  { %438 = dma.hbm_to_vmem [thread:$0]  %s434_s6, 16, %s436_s24, [#allocation5 + $0x13] }
 0x104   :  { %s450_s9 = sshll.u32 %s440_s10, 4  ;;  %s457_s16 = scalar_lea.hbm %s6405_s3, %s5988_s19  ;;  %s451_s9 = int_to_ptr.hbm [resolvable:$true] %s450_s9 }
 0x105   :  { %s4691_s29 = sshra.s32 %s451_s9, 4  ;;  %s4692_s29 = int_to_ptr.hbm [resolvable:$true] %s4691_s29 }
 0x106   :  { %s4693_s12 = scalar_lea.hbm %s4692_s29, 1  ;;  %p4696_p3 = scmp.lt.s32.totalorder %s4692_s29, %s6405_s3 }
 0x107   :  { %p4694_p2 = scmp.ne.s32.totalorder %s4692_s29, %s4693_s12  ;;  %p4697_p4 = scmp.lt.s32.totalorder %s5804_s17, %s4693_s12 }
 0x109   :  { %p4698_p5 = por %p4697_p4, %p4696_p3 }
 0x10b   :  { %p4699_p6 = pnand %p4698_p5, %p4694_p2 }
 0x10d   :  { %4702 = shalt.err (!%p4699_p6)  }
 0x10e   :  { %455 = dma.hbm_to_vmem [thread:$0]  %s451_s9, 16, %s453_s26, [#allocation5 + $0x14] }
 0x10f   :  { %s467_s22 = sshll.u32 %s457_s16, 4  ;;  %s3926_s23 = sld [smem:[#allocation8 + $0x16]]  ;;  %s468_s22 = int_to_ptr.hbm [resolvable:$true] %s467_s22 }
 0x110   :  { %s4715_s24 = sshra.s32 %s468_s22, 4  ;;  %s4716_s24 = int_to_ptr.hbm [resolvable:$true] %s4715_s24 }
 0x111   :  { %s4717_s18 = scalar_lea.hbm %s4716_s24, 1  ;;  %p4720_p8 = scmp.lt.s32.totalorder %s4716_s24, %s6405_s3 }
 0x112   :  { %p4718_p7 = scmp.ne.s32.totalorder %s4716_s24, %s4717_s18  ;;  %p4721_p9 = scmp.lt.s32.totalorder %s5804_s17, %s4717_s18 }
 0x114   :  { %p4722_p10 = por %p4721_p9, %p4720_p8 }
 0x116   :  { %p4723_p11 = pnand %p4722_p10, %p4718_p7 }
 0x118   :  { %4726 = shalt.err (!%p4723_p11)  }
 0x119   :  { %472 = dma.hbm_to_vmem [thread:$0]  %s468_s22, 16, %s470_s0, [#allocation5 + $0x15] }
 0x11a   :  { %s5719_s1 = smov [#allocation3 + $0x1c]   ;;  %s3927_s6 = sld [smem:[#allocation8 + $0x17]] }
 0x11b   :  { %s486_s5 = sshll.u32 %s5719_s1, 4  ;;  %s5720_s26 = smov [#allocation3 + $0x1d]   ;;  %s487_s5 = int_to_ptr.vmem [resolvable:$true] %s486_s5 }
 0x11c   :  { %s6017_s7 = sshll.u32 %s5720_s26, 4  ;;  %s3929_s20 = sld [smem:[#allocation8 + $0x18]]  ;;  %s504_s7 = int_to_ptr.vmem [resolvable:$true] %s6017_s7 }
 0x11d   :  { %s474_s27 = scalar_lea.hbm %s6405_s3, %s3926_s23  ;;  %s5721_s11 = smov [#allocation3 + $0x20]  }
 0x11e   :  { %s484_s30 = sshll.u32 %s474_s27, 4  ;;  %s6023_s8 = sshll.u32 %s5721_s11, 4  ;;  %s485_s30 = int_to_ptr.hbm [resolvable:$true] %s484_s30  ;;  %s538_s8 = int_to_ptr.vmem [resolvable:$true] %s6023_s8 }
 0x11f   :  { %s4739_s0 = sshra.s32 %s485_s30, 4  ;;  %s4740_s0 = int_to_ptr.hbm [resolvable:$true] %s4739_s0 }
 0x120   :  { %s4741_s9 = scalar_lea.hbm %s4740_s0, 1  ;;  %p4744_p13 = scmp.lt.s32.totalorder %s4740_s0, %s6405_s3 }
 0x121   :  { %p4742_p12 = scmp.ne.s32.totalorder %s4740_s0, %s4741_s9  ;;  %p4745_p0 = scmp.lt.s32.totalorder %s5804_s17, %s4741_s9 }
 0x123   :  { %p4746_p1 = por %p4745_p0, %p4744_p13 }
 0x125   :  { %p4747_p2 = pnand %p4746_p1, %p4742_p12 }
 0x127   :  { %4750 = shalt.err (!%p4747_p2)  }
 0x128   :  { %489 = dma.hbm_to_vmem [thread:$0]  %s485_s30, 16, %s487_s5, [#allocation5 + $0x16] }
 0x129   :  { %s491_s12 = scalar_lea.hbm %s6405_s3, %s3927_s6  ;;  %s525_s23 = scalar_lea.hbm %s6405_s3, %s3929_s20 }
 0x12a   :  { %s501_s13 = sshll.u32 %s491_s12, 4  ;;  %s535_s24 = sshll.u32 %s525_s23, 4  ;;  %s502_s13 = int_to_ptr.hbm [resolvable:$true] %s501_s13  ;;  %s536_s24 = int_to_ptr.hbm [resolvable:$true] %s535_s24 }
 0x12b   :  { %s4763_s18 = sshra.s32 %s502_s13, 4  ;;  %s4764_s18 = int_to_ptr.hbm [resolvable:$true] %s4763_s18 }
 0x12c   :  { %s4765_s19 = scalar_lea.hbm %s4764_s18, 1  ;;  %p4768_p4 = scmp.lt.s32.totalorder %s4764_s18, %s6405_s3 }
 0x12d   :  { %p4766_p3 = scmp.ne.s32.totalorder %s4764_s18, %s4765_s19  ;;  %p4769_p5 = scmp.lt.s32.totalorder %s5804_s17, %s4765_s19 }
 0x12f   :  { %p4770_p6 = por %p4769_p5, %p4768_p4 }
 0x131   :  { %p4771_p7 = pnand %p4770_p6, %p4766_p3 }
 0x133   :  { %4774 = shalt.err (!%p4771_p7)  }
 0x134   :  { %506 = dma.hbm_to_vmem [thread:$0]  %s502_s13, 16, %s504_s7, [#allocation5 + $0x17] }
 0x135   :  { %s3930_s5 = sld [smem:[#allocation8 + $0x19]]  ;;  %s4787_s6 = sshra.s32 %s536_s24, 4  ;;  %s4788_s6 = int_to_ptr.hbm [resolvable:$true] %s4787_s6 }
 0x136   :  { %s4789_s26 = scalar_lea.hbm %s4788_s6, 1  ;;  %p4792_p9 = scmp.lt.s32.totalorder %s4788_s6, %s6405_s3 }
 0x137   :  { %p4790_p8 = scmp.ne.s32.totalorder %s4788_s6, %s4789_s26  ;;  %p4793_p10 = scmp.lt.s32.totalorder %s5804_s17, %s4789_s26 }
 0x139   :  { %p4794_p11 = por %p4793_p10, %p4792_p9 }
 0x13b   :  { %p4795_p12 = pnand %p4794_p11, %p4790_p8 }
 0x13d   :  { %4798 = shalt.err (!%p4795_p12)  }
 0x13e   :  { %540 = dma.hbm_to_vmem [thread:$0]  %s536_s24, 16, %s538_s8, [#allocation5 + $0x18] }
 0x13f   :  { %s3931_s10 = sld [smem:[#allocation8 + $0x1a]]  ;;  %s5722_s27 = smov [#allocation3 + $0x21]  }
 0x140   :  { %s554_s30 = sshll.u32 %s5722_s27, 4  ;;  %s5723_s7 = smov [#allocation3 + $0x22]   ;;  %s555_s30 = int_to_ptr.vmem [resolvable:$true] %s554_s30 }
 0x141   :  { %s6046_s11 = sshll.u32 %s5723_s7, 4  ;;  %s6049_s0 = sld [smem:[#allocation8 + $0x1b]]  ;;  %s572_s11 = int_to_ptr.vmem [resolvable:$true] %s6046_s11 }
 0x142   :  { %s542_s15 = scalar_lea.hbm %s6405_s3, %s3930_s5  ;;  %s5724_s29 = smov [#allocation3 + $0x23]  }
 0x143   :  { %s552_s16 = sshll.u32 %s542_s15, 4  ;;  %s6054_s12 = sshll.u32 %s5724_s29, 4  ;;  %s553_s16 = int_to_ptr.hbm [resolvable:$true] %s552_s16  ;;  %s589_s12 = int_to_ptr.vmem [resolvable:$true] %s6054_s12 }
 0x144   :  { %s4811_s22 = sshra.s32 %s553_s16, 4  ;;  %s4812_s22 = int_to_ptr.hbm [resolvable:$true] %s4811_s22 }
 0x145   :  { %s559_s21 = scalar_lea.hbm %s6405_s3, %s3931_s10  ;;  %s4813_s23 = scalar_lea.hbm %s4812_s22, 1 }
 0x146   :  { %p4814_p13 = scmp.ne.s32.totalorder %s4812_s22, %s4813_s23  ;;  %p4816_p0 = scmp.lt.s32.totalorder %s4812_s22, %s6405_s3 }
 0x147   :  { %p4817_p1 = scmp.lt.s32.totalorder %s5804_s17, %s4813_s23 }
 0x149   :  { %p4818_p2 = por %p4817_p1, %p4816_p0 }
 0x14b   :  { %p4819_p3 = pnand %p4818_p2, %p4814_p13 }
 0x14d   :  { %4822 = shalt.err (!%p4819_p3)  }
 0x14e   :  { %557 = dma.hbm_to_vmem [thread:$0]  %s553_s16, 16, %s555_s30, [#allocation5 + $0x19] }
 0x14f   :  { %s569_s19 = sshll.u32 %s559_s21, 4  ;;  %s576_s5 = scalar_lea.hbm %s6405_s3, %s6049_s0  ;;  %s570_s19 = int_to_ptr.hbm [resolvable:$true] %s569_s19 }
 0x150   :  { %s4835_s6 = sshra.s32 %s570_s19, 4  ;;  %s4836_s6 = int_to_ptr.hbm [resolvable:$true] %s4835_s6 }
 0x151   :  { %s4837_s26 = scalar_lea.hbm %s4836_s6, 1  ;;  %p4840_p5 = scmp.lt.s32.totalorder %s4836_s6, %s6405_s3 }
 0x152   :  { %p4838_p4 = scmp.ne.s32.totalorder %s4836_s6, %s4837_s26  ;;  %p4841_p6 = scmp.lt.s32.totalorder %s5804_s17, %s4837_s26 }
 0x154   :  { %p4842_p7 = por %p4841_p6, %p4840_p5 }
 0x156   :  { %p4843_p8 = pnand %p4842_p7, %p4838_p4 }
 0x158   :  { %4846 = shalt.err (!%p4843_p8)  }
 0x159   :  { %574 = dma.hbm_to_vmem [thread:$0]  %s570_s19, 16, %s572_s11, [#allocation5 + $0x1a] }
 0x15a   :  { %s586_s10 = sshll.u32 %s576_s5, 4  ;;  %s3933_s27 = sld [smem:[#allocation8 + $0x1c]]  ;;  %s587_s10 = int_to_ptr.hbm [resolvable:$true] %s586_s10 }
 0x15b   :  { %s4859_s30 = sshra.s32 %s587_s10, 4  ;;  %s4860_s30 = int_to_ptr.hbm [resolvable:$true] %s4859_s30 }
 0x15c   :  { %s4861_s7 = scalar_lea.hbm %s4860_s30, 1  ;;  %p4864_p10 = scmp.lt.s32.totalorder %s4860_s30, %s6405_s3 }
 0x15d   :  { %p4862_p9 = scmp.ne.s32.totalorder %s4860_s30, %s4861_s7  ;;  %p4865_p11 = scmp.lt.s32.totalorder %s5804_s17, %s4861_s7 }
 0x15f   :  { %p4866_p12 = por %p4865_p11, %p4864_p10 }
 0x161   :  { %p4867_p13 = pnand %p4866_p12, %p4862_p9 }
 0x163   :  { %4870 = shalt.err (!%p4867_p13)  }
 0x164   :  { %591 = dma.hbm_to_vmem [thread:$0]  %s587_s10, 16, %s589_s12, [#allocation5 + $0x1b] }
 0x165   :  { %s5725_s14 = smov [#allocation3 + $0x24]   ;;  %s3934_s16 = sld [smem:[#allocation8 + $0x1d]] }
 0x166   :  { %s605_s15 = sshll.u32 %s5725_s14, 4  ;;  %s5726_s11 = smov [#allocation3 + $0x25]   ;;  %s606_s15 = int_to_ptr.vmem [resolvable:$true] %s605_s15 }
 0x167   :  { %s6078_s29 = sshll.u32 %s5726_s11, 4  ;;  %s3936_s8 = sld [smem:[#allocation8 + $0x1e]]  ;;  %s623_s29 = int_to_ptr.vmem [resolvable:$true] %s6078_s29 }
 0x168   :  { %s593_s22 = scalar_lea.hbm %s6405_s3, %s3933_s27  ;;  %s5727_s24 = smov [#allocation3 + $0x28]  }
 0x169   :  { %s603_s23 = sshll.u32 %s593_s22, 4  ;;  %s6084_s18 = sshll.u32 %s5727_s24, 4  ;;  %s604_s23 = int_to_ptr.hbm [resolvable:$true] %s603_s23  ;;  %s657_s18 = int_to_ptr.vmem [resolvable:$true] %s6084_s18 }
 0x16a   :  { %s4883_s12 = sshra.s32 %s604_s23, 4  ;;  %s4884_s12 = int_to_ptr.hbm [resolvable:$true] %s4883_s12 }
 0x16b   :  { %s4885_s19 = scalar_lea.hbm %s4884_s12, 1  ;;  %p4888_p1 = scmp.lt.s32.totalorder %s4884_s12, %s6405_s3 }
 0x16c   :  { %p4886_p0 = scmp.ne.s32.totalorder %s4884_s12, %s4885_s19  ;;  %p4889_p2 = scmp.lt.s32.totalorder %s5804_s17, %s4885_s19 }
 0x16e   :  { %p4890_p3 = por %p4889_p2, %p4888_p1 }
 0x170   :  { %p4891_p4 = pnand %p4890_p3, %p4886_p0 }
 0x172   :  { %4894 = shalt.err (!%p4891_p4)  }
 0x173   :  { %608 = dma.hbm_to_vmem [thread:$0]  %s604_s23, 16, %s606_s15, [#allocation5 + $0x1c] }
 0x174   :  { %s610_s26 = scalar_lea.hbm %s6405_s3, %s3934_s16  ;;  %s644_s27 = scalar_lea.hbm %s6405_s3, %s3936_s8 }
 0x175   :  { %s620_s20 = sshll.u32 %s610_s26, 4  ;;  %s654_s30 = sshll.u32 %s644_s27, 4  ;;  %s621_s20 = int_to_ptr.hbm [resolvable:$true] %s620_s20  ;;  %s655_s30 = int_to_ptr.hbm [resolvable:$true] %s654_s30 }
 0x176   :  { %s4907_s7 = sshra.s32 %s621_s20, 4  ;;  %s4908_s7 = int_to_ptr.hbm [resolvable:$true] %s4907_s7 }
 0x177   :  { %s4909_s0 = scalar_lea.hbm %s4908_s7, 1  ;;  %p4912_p6 = scmp.lt.s32.totalorder %s4908_s7, %s6405_s3 }
 0x178   :  { %p4910_p5 = scmp.ne.s32.totalorder %s4908_s7, %s4909_s0  ;;  %p4913_p7 = scmp.lt.s32.totalorder %s5804_s17, %s4909_s0 }
 0x17a   :  { %p4914_p8 = por %p4913_p7, %p4912_p6 }
 0x17c   :  { %p4915_p9 = pnand %p4914_p8, %p4910_p5 }
 0x17e   :  { %4918 = shalt.err (!%p4915_p9)  }
 0x17f   :  { %625 = dma.hbm_to_vmem [thread:$0]  %s621_s20, 16, %s623_s29, [#allocation5 + $0x1d] }
 0x180   :  { %s3937_s15 = sld [smem:[#allocation8 + $0x1f]]  ;;  %s4931_s16 = sshra.s32 %s655_s30, 4  ;;  %s4932_s16 = int_to_ptr.hbm [resolvable:$true] %s4931_s16 }
 0x181   :  { %s4933_s11 = scalar_lea.hbm %s4932_s16, 1  ;;  %p4936_p11 = scmp.lt.s32.totalorder %s4932_s16, %s6405_s3 }
 0x182   :  { %p4934_p10 = scmp.ne.s32.totalorder %s4932_s16, %s4933_s11  ;;  %p4937_p12 = scmp.lt.s32.totalorder %s5804_s17, %s4933_s11 }
 0x184   :  { %p4938_p13 = por %p4937_p12, %p4936_p11 }
 0x186   :  { %p4939_p0 = pnand %p4938_p13, %p4934_p10 }
 0x188   :  { %4942 = shalt.err (!%p4939_p0)  }
 0x189   :  { %659 = dma.hbm_to_vmem [thread:$0]  %s655_s30, 16, %s657_s18, [#allocation5 + $0x1e] }
 0x18a   :  { %s3938_s21 = sld [smem:[#allocation8 + $0x20]]  ;;  %s5728_s22 = smov [#allocation3 + $0x29]  }
 0x18b   :  { %s673_s23 = sshll.u32 %s5728_s22, 4  ;;  %s5729_s29 = smov [#allocation3 + $0x2a]   ;;  %s674_s23 = int_to_ptr.vmem [resolvable:$true] %s673_s23 }
 0x18c   :  { %s6107_s24 = sshll.u32 %s5729_s29, 4  ;;  %s6110_s12 = sld [smem:[#allocation8 + $0x21]]  ;;  %s691_s24 = int_to_ptr.vmem [resolvable:$true] %s6107_s24 }
 0x18d   :  { %s661_s1 = scalar_lea.hbm %s6405_s3, %s3937_s15  ;;  %s5730_s6 = smov [#allocation3 + $0x2b]  }
 0x18e   :  { %s671_s5 = sshll.u32 %s661_s1, 4  ;;  %s6115_s26 = sshll.u32 %s5730_s6, 4  ;;  %s672_s5 = int_to_ptr.hbm [resolvable:$true] %s671_s5  ;;  %s708_s26 = int_to_ptr.vmem [resolvable:$true] %s6115_s26 }
 0x18f   :  { %s4955_s10 = sshra.s32 %s672_s5, 4  ;;  %s4956_s10 = int_to_ptr.hbm [resolvable:$true] %s4955_s10 }
 0x190   :  { %s678_s25 = scalar_lea.hbm %s6405_s3, %s3938_s21  ;;  %s4957_s27 = scalar_lea.hbm %s4956_s10, 1 }
 0x191   :  { %p4958_p1 = scmp.ne.s32.totalorder %s4956_s10, %s4957_s27  ;;  %p4960_p2 = scmp.lt.s32.totalorder %s4956_s10, %s6405_s3 }
 0x192   :  { %p4961_p3 = scmp.lt.s32.totalorder %s5804_s17, %s4957_s27 }
 0x194   :  { %p4962_p4 = por %p4961_p3, %p4960_p2 }
 0x196   :  { %p4963_p5 = pnand %p4962_p4, %p4958_p1 }
 0x198   :  { %4966 = shalt.err (!%p4963_p5)  }
 0x199   :  { %676 = dma.hbm_to_vmem [thread:$0]  %s672_s5, 16, %s674_s23, [#allocation5 + $0x1f] }
 0x19a   :  { %s688_s0 = sshll.u32 %s678_s25, 4  ;;  %s695_s15 = scalar_lea.hbm %s6405_s3, %s6110_s12  ;;  %s689_s0 = int_to_ptr.hbm [resolvable:$true] %s688_s0 }
 0x19b   :  { %s4979_s16 = sshra.s32 %s689_s0, 4  ;;  %s4980_s16 = int_to_ptr.hbm [resolvable:$true] %s4979_s16 }
 0x19c   :  { %s4981_s11 = scalar_lea.hbm %s4980_s16, 1  ;;  %p4984_p7 = scmp.lt.s32.totalorder %s4980_s16, %s6405_s3 }
 0x19d   :  { %p4982_p6 = scmp.ne.s32.totalorder %s4980_s16, %s4981_s11  ;;  %p4985_p8 = scmp.lt.s32.totalorder %s5804_s17, %s4981_s11 }
 0x19f   :  { %p4986_p9 = por %p4985_p8, %p4984_p7 }
 0x1a1   :  { %p4987_p10 = pnand %p4986_p9, %p4982_p6 }
 0x1a3   :  { %4990 = shalt.err (!%p4987_p10)  }
 0x1a4   :  { %693 = dma.hbm_to_vmem [thread:$0]  %s689_s0, 16, %s691_s24, [#allocation5 + $0x20] }
 0x1a5   :  { %s705_s21 = sshll.u32 %s695_s15, 4  ;;  %s3940_s22 = sld [smem:[#allocation8 + $0x22]]  ;;  %s706_s21 = int_to_ptr.hbm [resolvable:$true] %s705_s21 }
 0x1a6   :  { %s5003_s23 = sshra.s32 %s706_s21, 4  ;;  %s5004_s23 = int_to_ptr.hbm [resolvable:$true] %s5003_s23 }
 0x1a7   :  { %s5005_s29 = scalar_lea.hbm %s5004_s23, 1  ;;  %p5008_p12 = scmp.lt.s32.totalorder %s5004_s23, %s6405_s3 }
 0x1a8   :  { %p5006_p11 = scmp.ne.s32.totalorder %s5004_s23, %s5005_s29  ;;  %p5009_p13 = scmp.lt.s32.totalorder %s5804_s17, %s5005_s29 }
 0x1aa   :  { %p5010_p0 = por %p5009_p13, %p5008_p12 }
 0x1ac   :  { %p5011_p1 = pnand %p5010_p0, %p5006_p11 }
 0x1ae   :  { %5014 = shalt.err (!%p5011_p1)  }
 0x1af   :  { %710 = dma.hbm_to_vmem [thread:$0]  %s706_s21, 16, %s708_s26, [#allocation5 + $0x21] }
 0x1b0   :  { %s5731_s28 = smov [#allocation3 + $0x2c]   ;;  %s3941_s5 = sld [smem:[#allocation8 + $0x23]] }
 0x1b1   :  { %s724_s1 = sshll.u32 %s5731_s28, 4  ;;  %s5732_s24 = smov [#allocation3 + $0x2d]   ;;  %s725_s1 = int_to_ptr.vmem [resolvable:$true] %s724_s1 }
 0x1b2   :  { %s6139_s6 = sshll.u32 %s5732_s24, 4  ;;  %s3943_s18 = sld [smem:[#allocation8 + $0x24]]  ;;  %s742_s6 = int_to_ptr.vmem [resolvable:$true] %s6139_s6 }
 0x1b3   :  { %s712_s10 = scalar_lea.hbm %s6405_s3, %s3940_s22  ;;  %s5733_s30 = smov [#allocation3 + $0x30]  }
 0x1b4   :  { %s722_s27 = sshll.u32 %s712_s10, 4  ;;  %s6145_s7 = sshll.u32 %s5733_s30, 4  ;;  %s723_s27 = int_to_ptr.hbm [resolvable:$true] %s722_s27  ;;  %s776_s7 = int_to_ptr.vmem [resolvable:$true] %s6145_s7 }
 0x1b5   :  { %s5027_s26 = sshra.s32 %s723_s27, 4  ;;  %s5028_s26 = int_to_ptr.hbm [resolvable:$true] %s5027_s26 }
 0x1b6   :  { %s5029_s0 = scalar_lea.hbm %s5028_s26, 1  ;;  %p5032_p3 = scmp.lt.s32.totalorder %s5028_s26, %s6405_s3 }
 0x1b7   :  { %p5030_p2 = scmp.ne.s32.totalorder %s5028_s26, %s5029_s0  ;;  %p5033_p4 = scmp.lt.s32.totalorder %s5804_s17, %s5029_s0 }
 0x1b9   :  { %p5034_p5 = por %p5033_p4, %p5032_p3 }
 0x1bb   :  { %p5035_p6 = pnand %p5034_p5, %p5030_p2 }
 0x1bd   :  { %5038 = shalt.err (!%p5035_p6)  }
 0x1be   :  { %727 = dma.hbm_to_vmem [thread:$0]  %s723_s27, 16, %s725_s1, [#allocation5 + $0x22] }
 0x1bf   :  { %s729_s11 = scalar_lea.hbm %s6405_s3, %s3941_s5  ;;  %s763_s22 = scalar_lea.hbm %s6405_s3, %s3943_s18 }
 0x1c0   :  { %s739_s8 = sshll.u32 %s729_s11, 4  ;;  %s773_s23 = sshll.u32 %s763_s22, 4  ;;  %s740_s8 = int_to_ptr.hbm [resolvable:$true] %s739_s8  ;;  %s774_s23 = int_to_ptr.hbm [resolvable:$true] %s773_s23 }
 0x1c1   :  { %s5051_s29 = sshra.s32 %s740_s8, 4  ;;  %s5052_s29 = int_to_ptr.hbm [resolvable:$true] %s5051_s29 }
 0x1c2   :  { %s5053_s12 = scalar_lea.hbm %s5052_s29, 1  ;;  %p5056_p8 = scmp.lt.s32.totalorder %s5052_s29, %s6405_s3 }
 0x1c3   :  { %p5054_p7 = scmp.ne.s32.totalorder %s5052_s29, %s5053_s12  ;;  %p5057_p9 = scmp.lt.s32.totalorder %s5804_s17, %s5053_s12 }
 0x1c5   :  { %p5058_p10 = por %p5057_p9, %p5056_p8 }
 0x1c7   :  { %p5059_p11 = pnand %p5058_p10, %p5054_p7 }
 0x1c9   :  { %5062 = shalt.err (!%p5059_p11)  }
 0x1ca   :  { %744 = dma.hbm_to_vmem [thread:$0]  %s740_s8, 16, %s742_s6, [#allocation5 + $0x23] }
 0x1cb   :  { %s3944_s1 = sld [smem:[#allocation8 + $0x25]]  ;;  %s5075_s5 = sshra.s32 %s774_s23, 4  ;;  %s5076_s5 = int_to_ptr.hbm [resolvable:$true] %s5075_s5 }
 0x1cc   :  { %s5077_s24 = scalar_lea.hbm %s5076_s5, 1  ;;  %p5080_p13 = scmp.lt.s32.totalorder %s5076_s5, %s6405_s3 }
 0x1cd   :  { %p5078_p12 = scmp.ne.s32.totalorder %s5076_s5, %s5077_s24  ;;  %p5081_p0 = scmp.lt.s32.totalorder %s5804_s17, %s5077_s24 }
 0x1cf   :  { %p5082_p1 = por %p5081_p0, %p5080_p13 }
 0x1d1   :  { %p5083_p2 = pnand %p5082_p1, %p5078_p12 }
 0x1d3   :  { %5086 = shalt.err (!%p5083_p2)  }
 0x1d4   :  { %778 = dma.hbm_to_vmem [thread:$0]  %s774_s23, 16, %s776_s7, [#allocation5 + $0x24] }
 0x1d5   :  { %s3945_s25 = sld [smem:[#allocation8 + $0x26]]  ;;  %s5734_s10 = smov [#allocation3 + $0x31]  }
 0x1d6   :  { %s792_s27 = sshll.u32 %s5734_s10, 4  ;;  %s5735_s6 = smov [#allocation3 + $0x32]   ;;  %s793_s27 = int_to_ptr.vmem [resolvable:$true] %s792_s27 }
 0x1d7   :  { %s6168_s30 = sshll.u32 %s5735_s6, 4  ;;  %s6171_s26 = sld [smem:[#allocation8 + $0x27]]  ;;  %s810_s30 = int_to_ptr.vmem [resolvable:$true] %s6168_s30 }
 0x1d8   :  { %s780_s14 = scalar_lea.hbm %s6405_s3, %s3944_s1  ;;  %s5736_s16 = smov [#allocation3 + $0x33]  }
 0x1d9   :  { %s790_s15 = sshll.u32 %s780_s14, 4  ;;  %s6176_s11 = sshll.u32 %s5736_s16, 4  ;;  %s791_s15 = int_to_ptr.hbm [resolvable:$true] %s790_s15  ;;  %s827_s11 = int_to_ptr.vmem [resolvable:$true] %s6176_s11 }
 0x1da   :  { %s5099_s21 = sshra.s32 %s791_s15, 4  ;;  %s5100_s21 = int_to_ptr.hbm [resolvable:$true] %s5099_s21 }
 0x1db   :  { %s797_s13 = scalar_lea.hbm %s6405_s3, %s3945_s25  ;;  %s5101_s22 = scalar_lea.hbm %s5100_s21, 1 }
 0x1dc   :  { %p5102_p3 = scmp.ne.s32.totalorder %s5100_s21, %s5101_s22  ;;  %p5104_p4 = scmp.lt.s32.totalorder %s5100_s21, %s6405_s3 }
 0x1dd   :  { %p5105_p5 = scmp.lt.s32.totalorder %s5804_s17, %s5101_s22 }
 0x1df   :  { %p5106_p6 = por %p5105_p5, %p5104_p4 }
 0x1e1   :  { %p5107_p7 = pnand %p5106_p6, %p5102_p3 }
 0x1e3   :  { %5110 = shalt.err (!%p5107_p7)  }
 0x1e4   :  { %795 = dma.hbm_to_vmem [thread:$0]  %s791_s15, 16, %s793_s27, [#allocation5 + $0x25] }
 0x1e5   :  { %s807_s12 = sshll.u32 %s797_s13, 4  ;;  %s814_s1 = scalar_lea.hbm %s6405_s3, %s6171_s26  ;;  %s808_s12 = int_to_ptr.hbm [resolvable:$true] %s807_s12 }
 0x1e6   :  { %s5123_s5 = sshra.s32 %s808_s12, 4  ;;  %s5124_s5 = int_to_ptr.hbm [resolvable:$true] %s5123_s5 }
 0x1e7   :  { %s5125_s24 = scalar_lea.hbm %s5124_s5, 1  ;;  %p5128_p9 = scmp.lt.s32.totalorder %s5124_s5, %s6405_s3 }
 0x1e8   :  { %p5126_p8 = scmp.ne.s32.totalorder %s5124_s5, %s5125_s24  ;;  %p5129_p10 = scmp.lt.s32.totalorder %s5804_s17, %s5125_s24 }
 0x1ea   :  { %p5130_p11 = por %p5129_p10, %p5128_p9 }
 0x1ec   :  { %p5131_p12 = pnand %p5130_p11, %p5126_p8 }
 0x1ee   :  { %5134 = shalt.err (!%p5131_p12)  }
 0x1ef   :  { %812 = dma.hbm_to_vmem [thread:$0]  %s808_s12, 16, %s810_s30, [#allocation5 + $0x26] }
 0x1f0   :  { %s824_s25 = sshll.u32 %s814_s1, 4  ;;  %s35_s10 = sld [smem:[#allocation7]]  ;;  %s825_s25 = int_to_ptr.hbm [resolvable:$true] %s824_s25 }
 0x1f1   :  { %s5147_s27 = sshra.s32 %s825_s25, 4  ;;  %s5148_s27 = int_to_ptr.hbm [resolvable:$true] %s5147_s27 }
 0x1f2   :  { %s5149_s6 = scalar_lea.hbm %s5148_s27, 1  ;;  %p5152_p0 = scmp.lt.s32.totalorder %s5148_s27, %s6405_s3 }
 0x1f3   :  { %p5150_p13 = scmp.ne.s32.totalorder %s5148_s27, %s5149_s6  ;;  %p5153_p1 = scmp.lt.s32.totalorder %s5804_s17, %s5149_s6 }
 0x1f5   :  { %p5154_p2 = por %p5153_p1, %p5152_p0 }
 0x1f7   :  { %p5155_p3 = pnand %p5154_p2, %p5150_p13 }
 0x1f9   :  { %5158 = shalt.err (!%p5155_p3)  }
 0x1fa   :  { %829 = dma.hbm_to_vmem [thread:$0]  %s825_s25, 16, %s827_s11, [#allocation5 + $0x27] }
 0x1fb   :  { %s5737_s9 = smov [#allocation2]   ;;  %s3947_s15 = sld [smem:[#allocation8 + $0x28]] }
 0x1fc   :  { %s46_s14 = sshll.u32 %s5737_s9, 4  ;;  %s5738_s30 = smov [#allocation3 + $0x34]   ;;  %s47_s14 = int_to_ptr.vmem [resolvable:$true] %s46_s14 }
 0x1fd   :  { %s6200_s16 = sshll.u32 %s5738_s30, 4  ;;  %s3907_s7 = sld [smem:[#allocation7 + $0x1]]  ;;  %s844_s16 = int_to_ptr.vmem [resolvable:$true] %s6200_s16 }
 0x1fe   :  { %s36_s21 = scalar_lea.hbm %s6404_s2, %s35_s10  ;;  %s5739_s23 = smov [#allocation2 + $0x1]  }
 0x1ff   :  { %s44_s22 = sshll.u32 %s36_s21, 4  ;;  %s6206_s29 = sshll.u32 %s5739_s23, 4  ;;  %s45_s22 = int_to_ptr.hbm [resolvable:$true] %s44_s22  ;;  %s164_s29 = int_to_ptr.vmem [resolvable:$true] %s6206_s29 }
 0x200   :  { %s5171_s11 = sshra.s32 %s45_s22, 4  ;;  %s6211_s1 = scalar_lea.hbm %s6404_s2, 64  ;;  %s5172_s11 = int_to_ptr.hbm [resolvable:$true] %s5171_s11 }
 0x201   :  { %s5173_s12 = scalar_lea.hbm %s5172_s11, 1  ;;  %p5176_p5 = scmp.lt.s32.totalorder %s5172_s11, %s6404_s2 }
 0x202   :  { %p5174_p4 = scmp.ne.s32.totalorder %s5172_s11, %s5173_s12  ;;  %p5177_p6 = scmp.lt.s32.totalorder %s6211_s1, %s5173_s12 }
 0x204   :  { %p5178_p7 = por %p5177_p6, %p5176_p5 }
 0x206   :  { %p5179_p8 = pnand %p5178_p7, %p5174_p4 }
 0x208   :  { %5182 = shalt.err (!%p5179_p8)  }
 0x209   :  { %49 = dma.hbm_to_vmem [thread:$0]  %s45_s22, 16, %s47_s14, [#allocation4] }
 0x20a   :  { %s831_s25 = scalar_lea.hbm %s6405_s3, %s3947_s15  ;;  %s151_s26 = scalar_lea.hbm %s6404_s2, %s3907_s7 }
 0x20b   :  { %s841_s10 = sshll.u32 %s831_s25, 4  ;;  %s161_s0 = sshll.u32 %s151_s26, 4  ;;  %s842_s10 = int_to_ptr.hbm [resolvable:$true] %s841_s10  ;;  %s162_s0 = int_to_ptr.hbm [resolvable:$true] %s161_s0 }
 0x20c   :  { %s5195_s9 = sshra.s32 %s842_s10, 4  ;;  %s5196_s9 = int_to_ptr.hbm [resolvable:$true] %s5195_s9 }
 0x20d   :  { %s5197_s30 = scalar_lea.hbm %s5196_s9, 1  ;;  %p5200_p10 = scmp.lt.s32.totalorder %s5196_s9, %s6405_s3 }
 0x20e   :  { %p5198_p9 = scmp.ne.s32.totalorder %s5196_s9, %s5197_s30  ;;  %p5201_p11 = scmp.lt.s32.totalorder %s5804_s17, %s5197_s30 }
 0x210   :  { %p5202_p12 = por %p5201_p11, %p5200_p10 }
 0x212   :  { %p5203_p13 = pnand %p5202_p12, %p5198_p9 }
 0x214   :  { %5206 = shalt.err (!%p5203_p13)  }
 0x215   :  { %846 = dma.hbm_to_vmem [thread:$0]  %s842_s10, 16, %s844_s16, [#allocation5 + $0x28] }
 0x216   :  { %s3948_s15 = sld [smem:[#allocation8 + $0x29]]  ;;  %s5219_s7 = sshra.s32 %s162_s0, 4  ;;  %s5220_s7 = int_to_ptr.hbm [resolvable:$true] %s5219_s7 }
 0x217   :  { %s5221_s13 = scalar_lea.hbm %s5220_s7, 1  ;;  %p5224_p1 = scmp.lt.s32.totalorder %s5220_s7, %s6404_s2 }
 0x218   :  { %p5222_p0 = scmp.ne.s32.totalorder %s5220_s7, %s5221_s13  ;;  %p5225_p2 = scmp.lt.s32.totalorder %s6211_s1, %s5221_s13 }
 0x21a   :  { %p5226_p3 = por %p5225_p2, %p5224_p1 }
 0x21c   :  { %p5227_p4 = pnand %p5226_p3, %p5222_p0 }
 0x21e   :  { %5230 = shalt.err (!%p5227_p4)  }
 0x21f   :  { %166 = dma.hbm_to_vmem [thread:$0]  %s162_s0, 16, %s164_s29, [#allocation4 + $0x1] }
 0x220   :  { %s3914_s23 = sld [smem:[#allocation7 + $0x2]]  ;;  %s5740_s11 = smov [#allocation3 + $0x35]  }
 0x221   :  { %s860_s12 = sshll.u32 %s5740_s11, 4  ;;  %s5741_s16 = smov [#allocation2 + $0x2]   ;;  %s861_s12 = int_to_ptr.vmem [resolvable:$true] %s860_s12 }
 0x222   :  { %s6234_s19 = sshll.u32 %s5741_s16, 4  ;;  %s6237_s28 = sld [smem:[#allocation8 + $0x2a]]  ;;  %s283_s19 = int_to_ptr.vmem [resolvable:$true] %s6234_s19 }
 0x223   :  { %s848_s18 = scalar_lea.hbm %s6405_s3, %s3948_s15  ;;  %s5742_s25 = smov [#allocation3 + $0x38]  }
 0x224   :  { %s858_s20 = sshll.u32 %s848_s18, 4  ;;  %s6242_s10 = sshll.u32 %s5742_s25, 4  ;;  %s859_s20 = int_to_ptr.hbm [resolvable:$true] %s858_s20  ;;  %s895_s10 = int_to_ptr.vmem [resolvable:$true] %s6242_s10 }
 0x225   :  { %s5243_s26 = sshra.s32 %s859_s20, 4  ;;  %s5244_s26 = int_to_ptr.hbm [resolvable:$true] %s5243_s26 }
 0x226   :  { %s270_s6 = scalar_lea.hbm %s6404_s2, %s3914_s23  ;;  %s5245_s0 = scalar_lea.hbm %s5244_s26, 1 }
 0x227   :  { %p5246_p5 = scmp.ne.s32.totalorder %s5244_s26, %s5245_s0  ;;  %p5248_p6 = scmp.lt.s32.totalorder %s5244_s26, %s6405_s3 }
 0x228   :  { %p5249_p7 = scmp.lt.s32.totalorder %s5804_s17, %s5245_s0 }
 0x22a   :  { %p5250_p8 = por %p5249_p7, %p5248_p6 }
 0x22c   :  { %p5251_p9 = pnand %p5250_p8, %p5246_p5 }
 0x22e   :  { %5254 = shalt.err (!%p5251_p9)  }
 0x22f   :  { %863 = dma.hbm_to_vmem [thread:$0]  %s859_s20, 16, %s861_s12, [#allocation5 + $0x29] }
 0x230   :  { %s280_s8 = sshll.u32 %s270_s6, 4  ;;  %s882_s7 = scalar_lea.hbm %s6405_s3, %s6237_s28  ;;  %s281_s8 = int_to_ptr.hbm [resolvable:$true] %s280_s8 }
 0x231   :  { %s5267_s13 = sshra.s32 %s281_s8, 4  ;;  %s5268_s13 = int_to_ptr.hbm [resolvable:$true] %s5267_s13 }
 0x232   :  { %s5269_s21 = scalar_lea.hbm %s5268_s13, 1  ;;  %p5272_p11 = scmp.lt.s32.totalorder %s5268_s13, %s6404_s2 }
 0x233   :  { %p5270_p10 = scmp.ne.s32.totalorder %s5268_s13, %s5269_s21  ;;  %p5273_p12 = scmp.lt.s32.totalorder %s6211_s1, %s5269_s21 }
 0x235   :  { %p5274_p13 = por %p5273_p12, %p5272_p11 }
 0x237   :  { %p5275_p0 = pnand %p5274_p13, %p5270_p10 }
 0x239   :  { %5278 = shalt.err (!%p5275_p0)  }
 0x23a   :  { %285 = dma.hbm_to_vmem [thread:$0]  %s281_s8, 16, %s283_s19, [#allocation4 + $0x2] }
 0x23b   :  { %s892_s11 = sshll.u32 %s882_s7, 4  ;;  %s3921_s12 = sld [smem:[#allocation7 + $0x3]]  ;;  %s893_s11 = int_to_ptr.hbm [resolvable:$true] %s892_s11 }
 0x23c   :  { %s5291_s16 = sshra.s32 %s893_s11, 4  ;;  %s5292_s16 = int_to_ptr.hbm [resolvable:$true] %s5291_s16 }
 0x23d   :  { %s5293_s28 = scalar_lea.hbm %s5292_s16, 1  ;;  %p5296_p2 = scmp.lt.s32.totalorder %s5292_s16, %s6405_s3 }
 0x23e   :  { %p5294_p1 = scmp.ne.s32.totalorder %s5292_s16, %s5293_s28  ;;  %p5297_p3 = scmp.lt.s32.totalorder %s5804_s17, %s5293_s28 }
 0x240   :  { %p5298_p4 = por %p5297_p3, %p5296_p2 }
 0x242   :  { %p5299_p5 = pnand %p5298_p4, %p5294_p1 }
 0x244   :  { %5302 = shalt.err (!%p5299_p5)  }
 0x245   :  { %897 = dma.hbm_to_vmem [thread:$0]  %s893_s11, 16, %s895_s10, [#allocation5 + $0x2a] }
 0x246   :  { %s5743_s18 = smov [#allocation2 + $0x3]   ;;  %s3951_s25 = sld [smem:[#allocation8 + $0x2b]] }
 0x247   :  { %s401_s20 = sshll.u32 %s5743_s18, 4  ;;  %s5744_s19 = smov [#allocation3 + $0x39]   ;;  %s402_s20 = int_to_ptr.vmem [resolvable:$true] %s401_s20 }
 0x248   :  { %s6266_s29 = sshll.u32 %s5744_s19, 4  ;;  %s3928_s27 = sld [smem:[#allocation7 + $0x4]]  ;;  %s912_s29 = int_to_ptr.vmem [resolvable:$true] %s6266_s29 }
 0x249   :  { %s389_s0 = scalar_lea.hbm %s6404_s2, %s3921_s12  ;;  %s5745_s30 = smov [#allocation2 + $0x4]  }
 0x24a   :  { %s399_s9 = sshll.u32 %s389_s0, 4  ;;  %s6272_s8 = sshll.u32 %s5745_s30, 4  ;;  %s400_s9 = int_to_ptr.hbm [resolvable:$true] %s399_s9  ;;  %s521_s8 = int_to_ptr.vmem [resolvable:$true] %s6272_s8 }
 0x24b   :  { %s5315_s10 = sshra.s32 %s400_s9, 4  ;;  %s5316_s10 = int_to_ptr.hbm [resolvable:$true] %s5315_s10 }
 0x24c   :  { %s5317_s14 = scalar_lea.hbm %s5316_s10, 1  ;;  %p5320_p7 = scmp.lt.s32.totalorder %s5316_s10, %s6404_s2 }
 0x24d   :  { %p5318_p6 = scmp.ne.s32.totalorder %s5316_s10, %s5317_s14  ;;  %p5321_p8 = scmp.lt.s32.totalorder %s6211_s1, %s5317_s14 }
 0x24f   :  { %p5322_p9 = por %p5321_p8, %p5320_p7 }
 0x251   :  { %p5323_p10 = pnand %p5322_p9, %p5318_p6 }
 0x253   :  { %5326 = shalt.err (!%p5323_p10)  }
 0x254   :  { %404 = dma.hbm_to_vmem [thread:$0]  %s400_s9, 16, %s402_s20, [#allocation4 + $0x3] }
 0x255   :  { %s899_s22 = scalar_lea.hbm %s6405_s3, %s3951_s25  ;;  %s508_s16 = scalar_lea.hbm %s6404_s2, %s3928_s27 }
 0x256   :  { %s909_s23 = sshll.u32 %s899_s22, 4  ;;  %s518_s28 = sshll.u32 %s508_s16, 4  ;;  %s910_s23 = int_to_ptr.hbm [resolvable:$true] %s909_s23  ;;  %s519_s28 = int_to_ptr.hbm [resolvable:$true] %s518_s28 }
 0x257   :  { %s5339_s5 = sshra.s32 %s910_s23, 4  ;;  %s5340_s5 = int_to_ptr.hbm [resolvable:$true] %s5339_s5 }
 0x258   :  { %s5341_s24 = scalar_lea.hbm %s5340_s5, 1  ;;  %p5344_p12 = scmp.lt.s32.totalorder %s5340_s5, %s6405_s3 }
 0x259   :  { %p5342_p11 = scmp.ne.s32.totalorder %s5340_s5, %s5341_s24  ;;  %p5345_p13 = scmp.lt.s32.totalorder %s5804_s17, %s5341_s24 }
 0x25b   :  { %p5346_p0 = por %p5345_p13, %p5344_p12 }
 0x25d   :  { %p5347_p1 = pnand %p5346_p0, %p5342_p11 }
 0x25f   :  { %5350 = shalt.err (!%p5347_p1)  }
 0x260   :  { %914 = dma.hbm_to_vmem [thread:$0]  %s910_s23, 16, %s912_s29, [#allocation5 + $0x2b] }
 0x261   :  { %s3952_s25 = sld [smem:[#allocation8 + $0x2c]]  ;;  %s5363_s19 = sshra.s32 %s519_s28, 4  ;;  %s5364_s19 = int_to_ptr.hbm [resolvable:$true] %s5363_s19 }
 0x262   :  { %s5365_s27 = scalar_lea.hbm %s5364_s19, 1  ;;  %p5368_p3 = scmp.lt.s32.totalorder %s5364_s19, %s6404_s2 }
 0x263   :  { %p5366_p2 = scmp.ne.s32.totalorder %s5364_s19, %s5365_s27  ;;  %p5369_p4 = scmp.lt.s32.totalorder %s6211_s1, %s5365_s27 }
 0x265   :  { %p5370_p5 = por %p5369_p4, %p5368_p3 }
 0x267   :  { %p5371_p6 = pnand %p5370_p5, %p5366_p2 }
 0x269   :  { %5374 = shalt.err (!%p5371_p6)  }
 0x26a   :  { %523 = dma.hbm_to_vmem [thread:$0]  %s519_s28, 16, %s521_s8, [#allocation4 + $0x4] }
 0x26b   :  { %s3935_s0 = sld [smem:[#allocation7 + $0x5]]  ;;  %s5746_s9 = smov [#allocation3 + $0x3a]  }
 0x26c   :  { %s928_s30 = sshll.u32 %s5746_s9, 4  ;;  %s5747_s29 = smov [#allocation2 + $0x5]   ;;  %s929_s30 = int_to_ptr.vmem [resolvable:$true] %s928_s30 }
 0x26d   :  { %s6295_s10 = sshll.u32 %s5747_s29, 4  ;;  %s6298_s14 = sld [smem:[#allocation8 + $0x2d]]  ;;  %s640_s10 = int_to_ptr.vmem [resolvable:$true] %s6295_s10 }
 0x26e   :  { %s916_s13 = scalar_lea.hbm %s6405_s3, %s3952_s25  ;;  %s5748_s22 = smov [#allocation3 + $0x3b]  }
 0x26f   :  { %s926_s21 = sshll.u32 %s916_s13, 4  ;;  %s6303_s23 = sshll.u32 %s5748_s22, 4  ;;  %s927_s21 = int_to_ptr.hbm [resolvable:$true] %s926_s21  ;;  %s946_s23 = int_to_ptr.vmem [resolvable:$true] %s6303_s23 }
 0x270   :  { %s5387_s16 = sshra.s32 %s927_s21, 4  ;;  %s5388_s16 = int_to_ptr.hbm [resolvable:$true] %s5387_s16 }
 0x271   :  { %s627_s12 = scalar_lea.hbm %s6404_s2, %s3935_s0  ;;  %s5389_s28 = scalar_lea.hbm %s5388_s16, 1 }
 0x272   :  { %p5390_p7 = scmp.ne.s32.totalorder %s5388_s16, %s5389_s28  ;;  %p5392_p8 = scmp.lt.s32.totalorder %s5388_s16, %s6405_s3 }
 0x273   :  { %p5393_p9 = scmp.lt.s32.totalorder %s5804_s17, %s5389_s28 }
 0x275   :  { %p5394_p10 = por %p5393_p9, %p5392_p8 }
 0x277   :  { %p5395_p11 = pnand %p5394_p10, %p5390_p7 }
 0x279   :  { %5398 = shalt.err (!%p5395_p11)  }
 0x27a   :  { %931 = dma.hbm_to_vmem [thread:$0]  %s927_s21, 16, %s929_s30, [#allocation5 + $0x2c] }
 0x27b   :  { %s637_s18 = sshll.u32 %s627_s12, 4  ;;  %s933_s19 = scalar_lea.hbm %s6405_s3, %s6298_s14  ;;  %s638_s18 = int_to_ptr.hbm [resolvable:$true] %s637_s18 }
 0x27c   :  { %s5411_s27 = sshra.s32 %s638_s18, 4  ;;  %s5412_s27 = int_to_ptr.hbm [resolvable:$true] %s5411_s27 }
 0x27d   :  { %s5413_s6 = scalar_lea.hbm %s5412_s27, 1  ;;  %p5416_p13 = scmp.lt.s32.totalorder %s5412_s27, %s6404_s2 }
 0x27e   :  { %p5414_p12 = scmp.ne.s32.totalorder %s5412_s27, %s5413_s6  ;;  %p5417_p0 = scmp.lt.s32.totalorder %s6211_s1, %s5413_s6 }
 0x280   :  { %p5418_p1 = por %p5417_p0, %p5416_p13 }
 0x282   :  { %p5419_p2 = pnand %p5418_p1, %p5414_p12 }
 0x284   :  { %5422 = shalt.err (!%p5419_p2)  }
 0x285   :  { %642 = dma.hbm_to_vmem [thread:$0]  %s638_s18, 16, %s640_s10, [#allocation4 + $0x5] }
 0x286   :  { %s943_s9 = sshll.u32 %s933_s19, 4  ;;  %s3942_s30 = sld [smem:[#allocation7 + $0x6]]  ;;  %s944_s9 = int_to_ptr.hbm [resolvable:$true] %s943_s9 }
 0x287   :  { %s5435_s29 = sshra.s32 %s944_s9, 4  ;;  %s5436_s29 = int_to_ptr.hbm [resolvable:$true] %s5435_s29 }
 0x288   :  { %s5437_s14 = scalar_lea.hbm %s5436_s29, 1  ;;  %p5440_p4 = scmp.lt.s32.totalorder %s5436_s29, %s6405_s3 }
 0x289   :  { %p5438_p3 = scmp.ne.s32.totalorder %s5436_s29, %s5437_s14  ;;  %p5441_p5 = scmp.lt.s32.totalorder %s5804_s17, %s5437_s14 }
 0x28b   :  { %p5442_p6 = por %p5441_p5, %p5440_p4 }
 0x28d   :  { %p5443_p7 = pnand %p5442_p6, %p5438_p3 }
 0x28f   :  { %5446 = shalt.err (!%p5443_p7)  }
 0x290   :  { %948 = dma.hbm_to_vmem [thread:$0]  %s944_s9, 16, %s946_s23, [#allocation5 + $0x2d] }
 0x291   :  { %s5749_s13 = smov [#allocation2 + $0x6]   ;;  %s3954_s22 = sld [smem:[#allocation8 + $0x2e]] }
 0x292   :  { %s758_s21 = sshll.u32 %s5749_s13, 4  ;;  %s5750_s10 = smov [#allocation3 + $0x3c]   ;;  %s759_s21 = int_to_ptr.vmem [resolvable:$true] %s758_s21 }
 0x293   :  { %s6327_s8 = sshll.u32 %s5750_s10, 4  ;;  %s3949_s11 = sld [smem:[#allocation7 + $0x7]]  ;;  %s963_s8 = int_to_ptr.vmem [resolvable:$true] %s6327_s8 }
 0x294   :  { %s746_s28 = scalar_lea.hbm %s6404_s2, %s3942_s30  ;;  %s5751_s24 = smov [#allocation2 + $0x7]  }
 0x295   :  { %s756_s5 = sshll.u32 %s746_s28, 4  ;;  %s6333_s18 = sshll.u32 %s5751_s24, 4  ;;  %s757_s5 = int_to_ptr.hbm [resolvable:$true] %s756_s5  ;;  %s878_s18 = int_to_ptr.vmem [resolvable:$true] %s6333_s18 }
 0x296   :  { %s5459_s23 = sshra.s32 %s757_s5, 4  ;;  %s5460_s23 = int_to_ptr.hbm [resolvable:$true] %s5459_s23 }
 0x297   :  { %s5461_s20 = scalar_lea.hbm %s5460_s23, 1  ;;  %p5464_p9 = scmp.lt.s32.totalorder %s5460_s23, %s6404_s2 }
 0x298   :  { %p5462_p8 = scmp.ne.s32.totalorder %s5460_s23, %s5461_s20  ;;  %p5465_p10 = scmp.lt.s32.totalorder %s6211_s1, %s5461_s20 }
 0x29a   :  { %p5466_p11 = por %p5465_p10, %p5464_p9 }
 0x29c   :  { %p5467_p12 = pnand %p5466_p11, %p5462_p8 }
 0x29e   :  { %5470 = shalt.err (!%p5467_p12)  }
 0x29f   :  { %761 = dma.hbm_to_vmem [thread:$0]  %s757_s5, 16, %s759_s21, [#allocation4 + $0x6] }
 0x2a0   :  { %s950_s26 = scalar_lea.hbm %s6405_s3, %s3954_s22  ;;  %s865_s29 = scalar_lea.hbm %s6404_s2, %s3949_s11 }
 0x2a1   :  { %s960_s0 = sshll.u32 %s950_s26, 4  ;;  %s875_s14 = sshll.u32 %s865_s29, 4  ;;  %s961_s0 = int_to_ptr.hbm [resolvable:$true] %s960_s0  ;;  %s876_s14 = int_to_ptr.hbm [resolvable:$true] %s875_s14 }
 0x2a2   :  { %s5483_s15 = sshra.s32 %s961_s0, 4  ;;  %s5484_s15 = int_to_ptr.hbm [resolvable:$true] %s5483_s15 }
 0x2a3   :  { %s5485_s7 = scalar_lea.hbm %s5484_s15, 1  ;;  %p5488_p0 = scmp.lt.s32.totalorder %s5484_s15, %s6405_s3 }
 0x2a4   :  { %p5486_p13 = scmp.ne.s32.totalorder %s5484_s15, %s5485_s7  ;;  %p5489_p1 = scmp.lt.s32.totalorder %s5804_s17, %s5485_s7 }
 0x2a6   :  { %p5490_p2 = por %p5489_p1, %p5488_p0 }
 0x2a8   :  { %p5491_p3 = pnand %p5490_p2, %p5486_p13 }
 0x2aa   :  { %5494 = shalt.err (!%p5491_p3)  }
 0x2ab   :  { %965 = dma.hbm_to_vmem [thread:$0]  %s961_s0, 16, %s963_s8, [#allocation5 + $0x2e] }
 0x2ac   :  { %s3955_s22 = sld [smem:[#allocation8 + $0x2f]]  ;;  %s5507_s10 = sshra.s32 %s876_s14, 4  ;;  %s5508_s10 = int_to_ptr.hbm [resolvable:$true] %s5507_s10 }
 0x2ad   :  { %s5509_s11 = scalar_lea.hbm %s5508_s10, 1  ;;  %p5512_p5 = scmp.lt.s32.totalorder %s5508_s10, %s6404_s2 }
 0x2ae   :  { %p5510_p4 = scmp.ne.s32.totalorder %s5508_s10, %s5509_s11  ;;  %p5513_p6 = scmp.lt.s32.totalorder %s6211_s1, %s5509_s11 }
 0x2b0   :  { %p5514_p7 = por %p5513_p6, %p5512_p5 }
 0x2b2   :  { %p5515_p8 = pnand %p5514_p7, %p5510_p4 }
 0x2b4   :  { %5518 = shalt.err (!%p5515_p8)  }
 0x2b5   :  { %880 = dma.hbm_to_vmem [thread:$0]  %s876_s14, 16, %s878_s18, [#allocation4 + $0x7] }
 0x2b6   :  { %s5752_s28 = smov [#allocation3 + $0x3d]   ;;  %s967_s23 = scalar_lea.hbm %s6405_s3, %s3955_s22 }
 0x2b7   :  { %s979_s5 = sshll.u32 %s5752_s28, 4  ;;  %s977_s20 = sshll.u32 %s967_s23, 4  ;;  %s980_s5 = int_to_ptr.vmem [resolvable:$true] %s979_s5  ;;  %s978_s20 = int_to_ptr.hbm [resolvable:$true] %s977_s20 }
 0x2b8   :  { %s5531_s25 = sshra.s32 %s978_s20, 4  ;;  %s5532_s25 = int_to_ptr.hbm [resolvable:$true] %s5531_s25 }
 0x2b9   :  { %s5533_s19 = scalar_lea.hbm %s5532_s25, 1  ;;  %p5536_p10 = scmp.lt.s32.totalorder %s5532_s25, %s6405_s3 }
 0x2ba   :  { %p5534_p9 = scmp.ne.s32.totalorder %s5532_s25, %s5533_s19  ;;  %p5537_p11 = scmp.lt.s32.totalorder %s5804_s17, %s5533_s19 }
 0x2bc   :  { %p5538_p12 = por %p5537_p11, %p5536_p10 }
 0x2be   :  { %p5539_p13 = pnand %p5538_p12, %p5534_p9 }
 0x2c0   :  { %5542 = shalt.err (!%p5539_p13)  }
 0x2c1   :  { %982 = dma.hbm_to_vmem [thread:$0]  %s978_s20, 16, %s980_s5, [#allocation5 + $0x2f] }
 0x2c2   :  { %5581 = dma.done.wait [#allocation4], 16 }
 0x2c3   :  { %5582 = vsyncadd [#allocation4], 4294967280 }
 0x2c4   :  { %5583 = dma.done.wait [#allocation5], 16 }
 0x2c5   :  { %5584 = vsyncadd [#allocation5], 4294967280 }
 0x2c6   :  { %5585 = dma.done.wait [#allocation5 + $0x1], 16 }
 0x2c7   :  { %5586 = vsyncadd [#allocation5 + $0x1], 4294967280 }
 0x2c8   :  { %5587 = dma.done.wait [#allocation5 + $0x2], 16 }
 0x2c9   :  { %5588 = vsyncadd [#allocation5 + $0x2], 4294967280 }
 0x2ca   :  { %5589 = dma.done.wait [#allocation5 + $0x3], 16 }
 0x2cb   :  { %5590 = vsyncadd [#allocation5 + $0x3], 4294967280 }
 0x2cc   :  { %5591 = dma.done.wait [#allocation5 + $0x4], 16 }
 0x2cd   :  { %5592 = vsyncadd [#allocation5 + $0x4], 4294967280 }
 0x2ce   :  { %5593 = dma.done.wait [#allocation5 + $0x5], 16 }
 0x2cf   :  { %5594 = vsyncadd [#allocation5 + $0x5], 4294967280 }
 0x2d0   :  { %5595 = dma.done.wait [#allocation4 + $0x1], 16 }
 0x2d1   :  { %5596 = vsyncadd [#allocation4 + $0x1], 4294967280 }
 0x2d2   :  { %5597 = dma.done.wait [#allocation5 + $0x6], 16 }
 0x2d3   :  { %5598 = vsyncadd [#allocation5 + $0x6], 4294967280 }
 0x2d4   :  { %5599 = dma.done.wait [#allocation5 + $0x7], 16 }
 0x2d5   :  { %5600 = vsyncadd [#allocation5 + $0x7], 4294967280 }
 0x2d6   :  { %5601 = dma.done.wait [#allocation5 + $0x8], 16 }
 0x2d7   :  { %5602 = vsyncadd [#allocation5 + $0x8], 4294967280 }
 0x2d8   :  { %5603 = dma.done.wait [#allocation5 + $0x9], 16 }
 0x2d9   :  { %5604 = vsyncadd [#allocation5 + $0x9], 4294967280 }
 0x2da   :  { %5605 = dma.done.wait [#allocation5 + $0xa], 16 }
 0x2db   :  { %5606 = vsyncadd [#allocation5 + $0xa], 4294967280 }
 0x2dc   :  { %5607 = dma.done.wait [#allocation5 + $0xb], 16 }
 0x2dd   :  { %5608 = vsyncadd [#allocation5 + $0xb], 4294967280 }
 0x2de   :  { %5609 = dma.done.wait [#allocation4 + $0x2], 16 }
 0x2df   :  { %5610 = vsyncadd [#allocation4 + $0x2], 4294967280 }
 0x2e0   :  { %5611 = dma.done.wait [#allocation5 + $0xc], 16 }
 0x2e1   :  { %5612 = vsyncadd [#allocation5 + $0xc], 4294967280 }
 0x2e2   :  { %5613 = dma.done.wait [#allocation5 + $0xd], 16 }
 0x2e3   :  { %5614 = vsyncadd [#allocation5 + $0xd], 4294967280 }
 0x2e4   :  { %5615 = dma.done.wait [#allocation5 + $0xe], 16 }
 0x2e5   :  { %5616 = vsyncadd [#allocation5 + $0xe], 4294967280 }
 0x2e6   :  { %5617 = dma.done.wait [#allocation5 + $0xf], 16 }
 0x2e7   :  { %5618 = vsyncadd [#allocation5 + $0xf], 4294967280 }
 0x2e8   :  { %5619 = dma.done.wait [#allocation5 + $0x10], 16 }
 0x2e9   :  { %5620 = vsyncadd [#allocation5 + $0x10], 4294967280 }
 0x2ea   :  { %5621 = dma.done.wait [#allocation5 + $0x11], 16 }
 0x2eb   :  { %5622 = vsyncadd [#allocation5 + $0x11], 4294967280 }
 0x2ec   :  { %5623 = dma.done.wait [#allocation4 + $0x3], 16 }
 0x2ed   :  { %5624 = vsyncadd [#allocation4 + $0x3], 4294967280 }
 0x2ee   :  { %5625 = dma.done.wait [#allocation5 + $0x12], 16 }
 0x2ef   :  { %5626 = vsyncadd [#allocation5 + $0x12], 4294967280 }
 0x2f0   :  { %5627 = dma.done.wait [#allocation5 + $0x13], 16 }
 0x2f1   :  { %5628 = vsyncadd [#allocation5 + $0x13], 4294967280 }
 0x2f2   :  { %5629 = dma.done.wait [#allocation5 + $0x14], 16 }
 0x2f3   :  { %5630 = vsyncadd [#allocation5 + $0x14], 4294967280 }
 0x2f4   :  { %5631 = dma.done.wait [#allocation5 + $0x15], 16 }
 0x2f5   :  { %5632 = vsyncadd [#allocation5 + $0x15], 4294967280 }
 0x2f6   :  { %5633 = dma.done.wait [#allocation5 + $0x16], 16 }
 0x2f7   :  { %5634 = vsyncadd [#allocation5 + $0x16], 4294967280 }
 0x2f8   :  { %5635 = dma.done.wait [#allocation5 + $0x17], 16 }
 0x2f9   :  { %5636 = vsyncadd [#allocation5 + $0x17], 4294967280 }
 0x2fa   :  { %5637 = dma.done.wait [#allocation4 + $0x4], 16 }
 0x2fb   :  { %5638 = vsyncadd [#allocation4 + $0x4], 4294967280 }
 0x2fc   :  { %5639 = dma.done.wait [#allocation5 + $0x18], 16 }
 0x2fd   :  { %5640 = vsyncadd [#allocation5 + $0x18], 4294967280 }
 0x2fe   :  { %5641 = dma.done.wait [#allocation5 + $0x19], 16 }
 0x2ff   :  { %5642 = vsyncadd [#allocation5 + $0x19], 4294967280 }
 0x300   :  { %5643 = dma.done.wait [#allocation5 + $0x1a], 16 }
 0x301   :  { %5644 = vsyncadd [#allocation5 + $0x1a], 4294967280 }
 0x302   :  { %5645 = dma.done.wait [#allocation5 + $0x1b], 16 }
 0x303   :  { %5646 = vsyncadd [#allocation5 + $0x1b], 4294967280 }
 0x304   :  { %5647 = dma.done.wait [#allocation5 + $0x1c], 16 }
 0x305   :  { %5648 = vsyncadd [#allocation5 + $0x1c], 4294967280 }
 0x306   :  { %5649 = dma.done.wait [#allocation5 + $0x1d], 16 }
 0x307   :  { %5650 = vsyncadd [#allocation5 + $0x1d], 4294967280 }
 0x308   :  { %5651 = dma.done.wait [#allocation4 + $0x5], 16 }
 0x309   :  { %5652 = vsyncadd [#allocation4 + $0x5], 4294967280 }
 0x30a   :  { %5653 = dma.done.wait [#allocation5 + $0x1e], 16 }
 0x30b   :  { %5654 = vsyncadd [#allocation5 + $0x1e], 4294967280 }
 0x30c   :  { %5655 = dma.done.wait [#allocation5 + $0x1f], 16 }
 0x30d   :  { %5656 = vsyncadd [#allocation5 + $0x1f], 4294967280 }
 0x30e   :  { %5657 = dma.done.wait [#allocation5 + $0x20], 16 }
 0x30f   :  { %5658 = vsyncadd [#allocation5 + $0x20], 4294967280 }
 0x310   :  { %5659 = dma.done.wait [#allocation5 + $0x21], 16 }
 0x311   :  { %5660 = vsyncadd [#allocation5 + $0x21], 4294967280 }
 0x312   :  { %5661 = dma.done.wait [#allocation5 + $0x22], 16 }
 0x313   :  { %5662 = vsyncadd [#allocation5 + $0x22], 4294967280 }
 0x314   :  { %5663 = dma.done.wait [#allocation5 + $0x23], 16 }
 0x315   :  { %5664 = vsyncadd [#allocation5 + $0x23], 4294967280 }
 0x316   :  { %5665 = dma.done.wait [#allocation4 + $0x6], 16 }
 0x317   :  { %5666 = vsyncadd [#allocation4 + $0x6], 4294967280 }
 0x318   :  { %5667 = dma.done.wait [#allocation5 + $0x24], 16 }
 0x319   :  { %5668 = vsyncadd [#allocation5 + $0x24], 4294967280 }
 0x31a   :  { %5669 = dma.done.wait [#allocation5 + $0x25], 16 }
 0x31b   :  { %5670 = vsyncadd [#allocation5 + $0x25], 4294967280 }
 0x31c   :  { %5671 = dma.done.wait [#allocation5 + $0x26], 16 }
 0x31d   :  { %5672 = vsyncadd [#allocation5 + $0x26], 4294967280 }
 0x31e   :  { %5673 = dma.done.wait [#allocation5 + $0x27], 16 }
 0x31f   :  { %5674 = vsyncadd [#allocation5 + $0x27], 4294967280 }
 0x320   :  { %5675 = dma.done.wait [#allocation5 + $0x28], 16 }
 0x321   :  { %5676 = vsyncadd [#allocation5 + $0x28], 4294967280 }
 0x322   :  { %5677 = dma.done.wait [#allocation5 + $0x29], 16 }
 0x323   :  { %5678 = vsyncadd [#allocation5 + $0x29], 4294967280 }
 0x324   :  { %5679 = dma.done.wait [#allocation4 + $0x7], 16 }
 0x325   :  { %5680 = vsyncadd [#allocation4 + $0x7], 4294967280 }
 0x326   :  { %5681 = dma.done.wait [#allocation5 + $0x2a], 16 }
 0x327   :  { %5682 = vsyncadd [#allocation5 + $0x2a], 4294967280 }
 0x328   :  { %5683 = dma.done.wait [#allocation5 + $0x2b], 16 }
 0x329   :  { %5684 = vsyncadd [#allocation5 + $0x2b], 4294967280 }
 0x32a   :  { %5685 = dma.done.wait [#allocation5 + $0x2c], 16 }
 0x32b   :  { %5686 = vsyncadd [#allocation5 + $0x2c], 4294967280 }
 0x32c   :  { %5687 = dma.done.wait [#allocation5 + $0x2d], 16 }
 0x32d   :  { %5688 = vsyncadd [#allocation5 + $0x2d], 4294967280 }
 0x32e   :  { %5689 = dma.done.wait [#allocation5 + $0x2e], 16 }
 0x32f   :  { %5690 = vsyncadd [#allocation5 + $0x2e], 4294967280 }
 0x330   :  { %5691 = dma.done.wait [#allocation5 + $0x2f], 16 }
 0x331   :  { %5692 = vsyncadd [#allocation5 + $0x2f], 4294967280  ;;  %v2326_v0 = vld [vmem:[#allocation2] sm:$0xff]  ;;  %v2329_v1 = vld [vmem:[#allocation3] sm:$0x3f]  ;;  %vm2369_vm0 = vcmask 1045504   ;;  %v2394_v41 = vlaneseq }
 0x332   :  { %v2345_v2 = vperm.slane %v2326_v0, 0  ;;  %v2339_v3 = vrot.slane %v2326_v0, 2  ;;  %v2341_v4 = vrot.slane %v2326_v0, 4  ;;  %v2338_v5 = vrot.slane %v2326_v0, 1  ;;  %v2331_v6 = vld [vmem:[#allocation3 + $0x10] sm:$0x3f] }
 0x333   :  { %v2333_v7 = vld [vmem:[#allocation3 + $0x20] sm:$0x3f]  ;;  %v2340_v8 = vrot.slane %v2326_v0, 3  ;;  %v2342_v9 = vrot.slane %v2326_v0, 5  ;;  %v2330_v14 = vld [vmem:[#allocation3 + $0x8] sm:$0x3f] }
 0x334   :  { %v2361_v10 = vmul.f32 %v2345_v2, %v2329_v1  ;;  %v2347_v11 = vperm.slane %v2339_v3, 0  ;;  %v2349_v12 = vperm.slane %v2341_v4, 0  ;;  %v2346_v13 = vperm.slane %v2338_v5, 0  ;;  %v2332_v20 = vld [vmem:[#allocation3 + $0x18] sm:$0x3f]  ;;  %s5753_s3 = smov [#allocation9]  }
 0x335   :  { %v2348_v15 = vperm.slane %v2340_v8, 0  ;;  %v2350_v19 = vperm.slane %v2342_v9, 0  ;;  %v2334_v21 = vld [vmem:[#allocation3 + $0x28] sm:$0x3f]  ;;  %v2343_v25 = vrot.slane %v2326_v0, 6  ;;  %v2344_v28 = vrot.slane %v2326_v0, 7 }
 0x336   :  { %v2370_v16 = vsel %vm2369_vm0, %v2361_v10, 0.0  ;;  %v2363_v17 = vmul.f32 %v2347_v11, %v2331_v6  ;;  %v2365_v18 = vmul.f32 %v2349_v12, %v2333_v7  ;;  %v2362_v24 = vmul.f32 %v2346_v13, %v2330_v14  ;;  %v2335_v31 = vld [vmem:[#allocation3 + $0x30] sm:$0x3f]  ;;  %v2336_v35 = vld [vmem:[#allocation3 + $0x38] sm:$0x3f]  ;;  %s2495_s17 = sshll.u32 %s5753_s3, 4  ;;  %s2496_s17 = int_to_ptr.vmem [resolvable:$true] %s2495_s17 }
 0x337   :  { %2371 = vadd.xlane.f32.xlu0 %v2370_v16  ;;  %v2364_v26 = vmul.f32 %v2348_v15, %v2332_v20  ;;  %v2366_v27 = vmul.f32 %v2350_v19, %v2334_v21  ;;  %v2351_v30 = vperm.slane %v2343_v25, 0  ;;  %v2352_v34 = vperm.slane %v2344_v28, 0  ;;  %s2497_s6 = sshll.u32 %s6406_s4, 4  ;;  %s2498_s6 = int_to_ptr.hbm [resolvable:$true] %s2497_s6 }
 0x338   :  { %v2376_v22 = vsel %vm2369_vm0, %v2363_v17, 0.0  ;;  %v2382_v23 = vsel %vm2369_vm0, %v2365_v18, 0.0  ;;  %v2373_v29 = vsel %vm2369_vm0, %v2362_v24, 0.0  ;;  %v6371_v44 = vand.u32 127, %v2394_v41 }
 0x339   :  { %2377 = vadd.xlane.f32.xlu1 %v2376_v22  ;;  %2383 = vadd.xlane.f32.xlu2 %v2382_v23  ;;  %v2379_v32 = vsel %vm2369_vm0, %v2364_v26, 0.0  ;;  %v2385_v33 = vsel %vm2369_vm0, %v2366_v27, 0.0  ;;  %v2367_v36 = vmul.f32 %v2351_v30, %v2335_v31  ;;  %v2368_v37 = vmul.f32 %v2352_v34, %v2336_v35 }
 0x33a   :  { %vm2421_vm1 = vcmask 1041409   ;;  %vm2423_vm2 = vcmask 1042434   ;;  %vm2425_vm3 = vcmask 1043459   ;;  %vm2427_vm4 = vcmask 1044484  }
 0x33b   :  { %v2388_v38 = vsel %vm2369_vm0, %v2367_v36, 0.0  ;;  %v2391_v39 = vsel %vm2369_vm0, %v2368_v37, 0.0  ;;  %vm2429_vm5 = vcmask 1045509   ;;  %vm2431_vm6 = vcmask 1046534  }
 0x33c   :  { %vm2433_vm7 = vcmask 1047559   ;;  %vm2396_vm8 = vcmp.eq.s32.totalorder %v6371_v44, 0  ;;  %vm2483_vm10 = vcmask 48128  }
 0x33f   :  { %2374 = vadd.xlane.f32.xlu0 %v2373_v29 }
 0x341   :  { %2380 = vadd.xlane.f32.xlu1 %v2379_v32  ;;  %2386 = vadd.xlane.f32.xlu2 %v2385_v33 }
 0x347   :  { %2389 = vadd.xlane.f32.xlu0 %v2388_v38 }
 0x349   :  { %2392 = vadd.xlane.f32.xlu1 %v2391_v39 }
 0x3aa   :  { %v2372_v40 = vpop.xlane.xlu0 %2371 }
 0x3ab   :  { %v2397_v45 = vsub.f32 0.0, %v2372_v40  ;;  %v2413_v48 = vperm.slane %v2372_v40, %v6371_v44 }
 0x3ac   :  { %v2378_v42 = vpop.xlane.xlu1 %2377  ;;  %v2384_v43 = vpop.xlane.xlu2 %2383 }
 0x3ad   :  { %v2399_v46 = vsub.f32 0.0, %v2378_v42  ;;  %v2444_v51 = vperm.slane %v2397_v45, %v6371_v44  ;;  %v2415_v52 = vperm.slane %v2378_v42, %v6371_v44  ;;  %v2401_v53 = vsub.f32 0.0, %v2384_v43 }
 0x3ae   :  { %v2417_v2 = vperm.slane %v2384_v43, %v6371_v44 }
 0x3af   :  { %v2446_v60 = vperm.slane %v2399_v46, %v6371_v44  ;;  %v2448_v4 = vperm.slane %v2401_v53, %v6371_v44 }
 0x3b2   :  { %v2375_v47 = vpop.xlane.xlu0 %2374 }
 0x3b3   :  { %v2398_v49 = vsub.f32 0.0, %v2375_v47  ;;  %v2414_v50 = vperm.slane %v2375_v47, %v6371_v44 }
 0x3b4   :  { %v2381_v54 = vpop.xlane.xlu1 %2380  ;;  %v2387_v55 = vpop.xlane.xlu2 %2386 }
 0x3b5   :  { %v2422_v56 = vsel %vm2421_vm1, %v2414_v50, %v2413_v48  ;;  %v2445_v57 = vperm.slane %v2398_v49, %v6371_v44  ;;  %v2400_v58 = vsub.f32 0.0, %v2381_v54  ;;  %v2416_v59 = vperm.slane %v2381_v54, %v6371_v44 }
 0x3b6   :  { %v2424_v61 = vsel %vm2423_vm2, %v2415_v52, %v2422_v56  ;;  %v2402_v62 = vsub.f32 0.0, %v2387_v55  ;;  %v2418_v6 = vperm.slane %v2387_v55, %v6371_v44 }
 0x3b7   :  { %v2452_v63 = vsel %vm2421_vm1, %v2445_v57, %v2444_v51  ;;  %v2426_v0 = vsel %vm2425_vm3, %v2416_v59, %v2424_v61  ;;  %v2447_v1 = vperm.slane %v2400_v58, %v6371_v44 }
 0x3b8   :  { %v2453_v3 = vsel %vm2423_vm2, %v2446_v60, %v2452_v63  ;;  %v2428_v7 = vsel %vm2427_vm4, %v2417_v2, %v2426_v0  ;;  %v2449_v8 = vperm.slane %v2402_v62, %v6371_v44 }
 0x3b9   :  { %v2454_v5 = vsel %vm2425_vm3, %v2447_v1, %v2453_v3  ;;  %v2430_v14 = vsel %vm2429_vm5, %v2418_v6, %v2428_v7 }
 0x3ba   :  { %v2390_v9 = vpop.xlane.xlu0 %2389  ;;  %v2455_v10 = vsel %vm2427_vm4, %v2448_v4, %v2454_v5 }
 0x3bb   :  { %v2403_v11 = vsub.f32 0.0, %v2390_v9  ;;  %v2419_v12 = vperm.slane %v2390_v9, %v6371_v44  ;;  %v2456_v18 = vsel %vm2429_vm5, %v2449_v8, %v2455_v10 }
 0x3bc   :  { %v2393_v13 = vpop.xlane.xlu1 %2392 }
 0x3bd   :  { %v2450_v15 = vperm.slane %v2403_v11, %v6371_v44  ;;  %v2404_v16 = vsub.f32 0.0, %v2393_v13  ;;  %v2420_v17 = vperm.slane %v2393_v13, %v6371_v44  ;;  %v2432_v19 = vsel %vm2431_vm6, %v2419_v12, %v2430_v14 }
 0x3bf   :  { %v2457_v20 = vsel %vm2431_vm6, %v2450_v15, %v2456_v18  ;;  %v2451_v21 = vperm.slane %v2404_v16, %v6371_v44  ;;  %v2434_v22 = vsel %vm2433_vm7, %v2420_v17, %v2432_v19 }
 0x3c1   :  { %v2458_v23 = vsel %vm2433_vm7, %v2451_v21, %v2457_v20 }
 0x3c2   :  { %v2460_v24 = vsel %vm2396_vm8, %v2434_v22, %v2458_v23 }
 0x3c3   :  { %v2462_v25 = vand.u32 2147483647, %v2460_v24  ;;  %v2461_v36 = vmin.f32 %v2460_v24, 0.0 }
 0x3c5   :  { %v2463_v26 = vsub.f32 0.0, %v2462_v25 }
 0x3c7   :  { %v2464_v27 = vmul.f32 1.442695, %v2463_v26 }
 0x3c9   :  { %4183 = vpow2.f32 %v2464_v27 }
 0x3cf   :  { %v4184_v28 = vpop.eup %4183 }
 0x3d0   :  { %v2466_v29 = vadd.f32 1.0, %v4184_v28  ;;  %v2469_v30 = vmul.f32 -0.5, %v4184_v28  ;;  %v2472_v32 = vand.u32 2147483647, %v4184_v28 }
 0x3d2   :  { %4185 = vlog2.f32 %v2466_v29  ;;  %v2470_v31 = vadd.f32 1.0, %v2469_v30  ;;  %vm2473_vm9 = vcmp.lt.f32.partialorder %v2472_v32, 0.0004427343 }
 0x3d4   :  { %v2471_v35 = vmul.f32 %v4184_v28, %v2470_v31 }
 0x3d8   :  { %v4186_v33 = vpop.eup %4185 }
 0x3d9   :  { %v2468_v34 = vmul.f32 0.6931472, %v4186_v33 }
 0x3db   :  { %v2474_v37 = vsel %vm2473_vm9, %v2471_v35, %v2468_v34 }
 0x3dc   :  { %v2475_v38 = vsub.f32 %v2461_v36, %v2474_v37 }
 0x3de   :  { %v2484_v39 = vsel %vm2483_vm10, %v2475_v38, 0.0 }
 0x3df   :  { %2485 = vadd.xlane.f32.xlu2 %v2484_v39 }
 0x452   :  { %v2486_v40 = vpop.xlane.xlu2 %2485 }
 0x453   :  { %v2487_v41 = vsub.f32 0.0, %v2486_v40 }
 0x455   :  { %v2488_v42 = vsel %vm2396_vm8, %v2487_v41, 0.0 }
 0x456   :  { %2489 = vst [vmem:[#allocation9] sm:$0xff] %v2488_v42 }
 0x457   :  { %2500 = dma.vmem_to_hbm [thread:$0]  %s2496_s17, 128, %s2498_s6, [#allocation10]  }
 0x458   :  { %5693 = dma.done.wait [#allocation10], 128  }
 0x459   :  { %5694 = vsyncadd [#allocation10], 4294967168 }
 0x45a   :  { %2505 = vsyncpa [#allocation10], 1 }
 0x45b   :  { %2506 = vsyncmov [#allocation4] }
 0x45e   :  { %s2507_s26 = vpop.sfrf %2506 }
 0x45f   :  { %p4012_p0 = scmp.ne.s32.totalorder %s2507_s26, 0 }
 0x461   :  { %2511 = shalt.err (%p4012_p0)  }
 0x462   :  { %2513 = vsyncmov [#allocation4 + $0x1] }
 0x465   :  { %s2514_s0 = vpop.sfrf %2513 }
 0x466   :  { %p4013_p1 = scmp.ne.s32.totalorder %s2514_s0, 0 }
 0x468   :  { %2518 = shalt.err (%p4013_p1)  }
 0x469   :  { %2520 = vsyncmov [#allocation4 + $0x2] }
 0x46c   :  { %s2521_s4 = vpop.sfrf %2520 }
 0x46d   :  { %p4014_p2 = scmp.ne.s32.totalorder %s2521_s4, 0 }
 0x46f   :  { %2525 = shalt.err (%p4014_p2)  }
 0x470   :  { %2527 = vsyncmov [#allocation4 + $0x3] }
 0x473   :  { %s2528_s9 = vpop.sfrf %2527 }
 0x474   :  { %p4015_p3 = scmp.ne.s32.totalorder %s2528_s9, 0 }
 0x476   :  { %2532 = shalt.err (%p4015_p3)  }
 0x477   :  { %2534 = vsyncmov [#allocation4 + $0x4] }
 0x47a   :  { %s2535_s30 = vpop.sfrf %2534 }
 0x47b   :  { %p4016_p4 = scmp.ne.s32.totalorder %s2535_s30, 0 }
 0x47d   :  { %2539 = shalt.err (%p4016_p4)  }
 0x47e   :  { %2541 = vsyncmov [#allocation4 + $0x5] }
 0x481   :  { %s2542_s29 = vpop.sfrf %2541 }
 0x482   :  { %p4017_p5 = scmp.ne.s32.totalorder %s2542_s29, 0 }
 0x484   :  { %2546 = shalt.err (%p4017_p5)  }
 0x485   :  { %2548 = vsyncmov [#allocation4 + $0x6] }
 0x488   :  { %s2549_s14 = vpop.sfrf %2548 }
 0x489   :  { %p4018_p6 = scmp.ne.s32.totalorder %s2549_s14, 0 }
 0x48b   :  { %2553 = shalt.err (%p4018_p6)  }
 0x48c   :  { %2555 = vsyncmov [#allocation4 + $0x7] }
 0x48f   :  { %s2556_s15 = vpop.sfrf %2555 }
 0x490   :  { %p4019_p7 = scmp.ne.s32.totalorder %s2556_s15, 0 }
 0x492   :  { %2560 = shalt.err (%p4019_p7)  }
 0x493   :  { %2562 = vsyncmov [#allocation4 + $0x8] }
 0x496   :  { %s2563_s7 = vpop.sfrf %2562 }
 0x497   :  { %p4020_p8 = scmp.ne.s32.totalorder %s2563_s7, 0 }
 0x499   :  { %2567 = shalt.err (%p4020_p8)  }
 0x49a   :  { %2569 = vsyncmov [#allocation4 + $0x9] }
 0x49d   :  { %s2570_s13 = vpop.sfrf %2569 }
 0x49e   :  { %p4021_p9 = scmp.ne.s32.totalorder %s2570_s13, 0 }
 0x4a0   :  { %2574 = shalt.err (%p4021_p9)  }
 0x4a1   :  { %2576 = vsyncmov [#allocation4 + $0xa] }
 0x4a4   :  { %s2577_s21 = vpop.sfrf %2576 }
 0x4a5   :  { %p4022_p10 = scmp.ne.s32.totalorder %s2577_s21, 0 }
 0x4a7   :  { %2581 = shalt.err (%p4022_p10)  }
 0x4a8   :  { %2583 = vsyncmov [#allocation4 + $0xb] }
 0x4ab   :  { %s2584_s22 = vpop.sfrf %2583 }
 0x4ac   :  { %p4023_p11 = scmp.ne.s32.totalorder %s2584_s22, 0 }
 0x4ae   :  { %2588 = shalt.err (%p4023_p11)  }
 0x4af   :  { %2590 = vsyncmov [#allocation4 + $0xc] }
 0x4b2   :  { %s2591_s10 = vpop.sfrf %2590 }
 0x4b3   :  { %p4024_p12 = scmp.ne.s32.totalorder %s2591_s10, 0 }
 0x4b5   :  { %2595 = shalt.err (%p4024_p12)  }
 0x4b6   :  { %2597 = vsyncmov [#allocation4 + $0xd] }
 0x4b9   :  { %s2598_s11 = vpop.sfrf %2597 }
 0x4ba   :  { %p4025_p13 = scmp.ne.s32.totalorder %s2598_s11, 0 }
 0x4bc   :  { %2602 = shalt.err (%p4025_p13)  }
 0x4bd   :  { %2604 = vsyncmov [#allocation4 + $0xe] }
 0x4c0   :  { %s2605_s12 = vpop.sfrf %2604 }
 0x4c1   :  { %p4026_p0 = scmp.ne.s32.totalorder %s2605_s12, 0 }
 0x4c3   :  { %2609 = shalt.err (%p4026_p0)  }
 0x4c4   :  { %2611 = vsyncmov [#allocation4 + $0xf] }
 0x4c7   :  { %s2612_s16 = vpop.sfrf %2611 }
 0x4c8   :  { %p4027_p1 = scmp.ne.s32.totalorder %s2612_s16, 0 }
 0x4ca   :  { %2616 = shalt.err (%p4027_p1)  }
 0x4cb   :  { %2617 = vsyncmov [#allocation5] }
 0x4ce   :  { %s2618_s28 = vpop.sfrf %2617 }
 0x4cf   :  { %p4028_p2 = scmp.ne.s32.totalorder %s2618_s28, 0 }
 0x4d1   :  { %2622 = shalt.err (%p4028_p2)  }
 0x4d2   :  { %2624 = vsyncmov [#allocation5 + $0x1] }
 0x4d5   :  { %s2625_s5 = vpop.sfrf %2624 }
 0x4d6   :  { %p4029_p3 = scmp.ne.s32.totalorder %s2625_s5, 0 }
 0x4d8   :  { %2629 = shalt.err (%p4029_p3)  }
 0x4d9   :  { %2631 = vsyncmov [#allocation5 + $0x2] }
 0x4dc   :  { %s2632_s24 = vpop.sfrf %2631 }
 0x4dd   :  { %p4030_p4 = scmp.ne.s32.totalorder %s2632_s24, 0 }
 0x4df   :  { %2636 = shalt.err (%p4030_p4)  }
 0x4e0   :  { %2638 = vsyncmov [#allocation5 + $0x3] }
 0x4e3   :  { %s2639_s8 = vpop.sfrf %2638 }
 0x4e4   :  { %p4031_p5 = scmp.ne.s32.totalorder %s2639_s8, 0 }
 0x4e6   :  { %2643 = shalt.err (%p4031_p5)  }
 0x4e7   :  { %2645 = vsyncmov [#allocation5 + $0x4] }
 0x4ea   :  { %s2646_s23 = vpop.sfrf %2645 }
 0x4eb   :  { %p4032_p6 = scmp.ne.s32.totalorder %s2646_s23, 0 }
 0x4ed   :  { %2650 = shalt.err (%p4032_p6)  }
 0x4ee   :  { %2652 = vsyncmov [#allocation5 + $0x5] }
 0x4f1   :  { %s2653_s20 = vpop.sfrf %2652 }
 0x4f2   :  { %p4033_p7 = scmp.ne.s32.totalorder %s2653_s20, 0 }
 0x4f4   :  { %2657 = shalt.err (%p4033_p7)  }
 0x4f5   :  { %2659 = vsyncmov [#allocation5 + $0x6] }
 0x4f8   :  { %s2660_s25 = vpop.sfrf %2659 }
 0x4f9   :  { %p4034_p8 = scmp.ne.s32.totalorder %s2660_s25, 0 }
 0x4fb   :  { %2664 = shalt.err (%p4034_p8)  }
 0x4fc   :  { %2666 = vsyncmov [#allocation5 + $0x7] }
 0x4ff   :  { %s2667_s19 = vpop.sfrf %2666 }
 0x500   :  { %p4035_p9 = scmp.ne.s32.totalorder %s2667_s19, 0 }
 0x502   :  { %2671 = shalt.err (%p4035_p9)  }
 0x503   :  { %2673 = vsyncmov [#allocation5 + $0x8] }
 0x506   :  { %s2674_s2 = vpop.sfrf %2673 }
 0x507   :  { %p4036_p10 = scmp.ne.s32.totalorder %s2674_s2, 0 }
 0x509   :  { %2678 = shalt.err (%p4036_p10)  }
 0x50a   :  { %2680 = vsyncmov [#allocation5 + $0x9] }
 0x50d   :  { %s2681_s1 = vpop.sfrf %2680 }
 0x50e   :  { %p4037_p11 = scmp.ne.s32.totalorder %s2681_s1, 0 }
 0x510   :  { %2685 = shalt.err (%p4037_p11)  }
 0x511   :  { %2687 = vsyncmov [#allocation5 + $0xa] }
 0x514   :  { %s2688_s3 = vpop.sfrf %2687 }
 0x515   :  { %p4038_p12 = scmp.ne.s32.totalorder %s2688_s3, 0 }
 0x517   :  { %2692 = shalt.err (%p4038_p12)  }
 0x518   :  { %2694 = vsyncmov [#allocation5 + $0xb] }
 0x51b   :  { %s2695_s17 = vpop.sfrf %2694 }
 0x51c   :  { %p4039_p13 = scmp.ne.s32.totalorder %s2695_s17, 0 }
 0x51e   :  { %2699 = shalt.err (%p4039_p13)  }
 0x51f   :  { %2701 = vsyncmov [#allocation5 + $0xc] }
 0x522   :  { %s2702_s18 = vpop.sfrf %2701 }
 0x523   :  { %p4040_p0 = scmp.ne.s32.totalorder %s2702_s18, 0 }
 0x525   :  { %2706 = shalt.err (%p4040_p0)  }
 0x526   :  { %2708 = vsyncmov [#allocation5 + $0xd] }
 0x529   :  { %s2709_s27 = vpop.sfrf %2708 }
 0x52a   :  { %p4041_p1 = scmp.ne.s32.totalorder %s2709_s27, 0 }
 0x52c   :  { %2713 = shalt.err (%p4041_p1)  }
 0x52d   :  { %2715 = vsyncmov [#allocation5 + $0xe] }
 0x530   :  { %s2716_s6 = vpop.sfrf %2715 }
 0x531   :  { %p4042_p2 = scmp.ne.s32.totalorder %s2716_s6, 0 }
 0x533   :  { %2720 = shalt.err (%p4042_p2)  }
 0x534   :  { %2722 = vsyncmov [#allocation5 + $0xf] }
 0x537   :  { %s2723_s26 = vpop.sfrf %2722 }
 0x538   :  { %p4043_p3 = scmp.ne.s32.totalorder %s2723_s26, 0 }
 0x53a   :  { %2727 = shalt.err (%p4043_p3)  }
 0x53b   :  { %2729 = vsyncmov [#allocation5 + $0x10] }
 0x53e   :  { %s2730_s0 = vpop.sfrf %2729 }
 0x53f   :  { %p4044_p4 = scmp.ne.s32.totalorder %s2730_s0, 0 }
 0x541   :  { %2734 = shalt.err (%p4044_p4)  }
 0x542   :  { %2736 = vsyncmov [#allocation5 + $0x11] }
 0x545   :  { %s2737_s4 = vpop.sfrf %2736 }
 0x546   :  { %p4045_p5 = scmp.ne.s32.totalorder %s2737_s4, 0 }
 0x548   :  { %2741 = shalt.err (%p4045_p5)  }
 0x549   :  { %2743 = vsyncmov [#allocation5 + $0x12] }
 0x54c   :  { %s2744_s9 = vpop.sfrf %2743 }
 0x54d   :  { %p4046_p6 = scmp.ne.s32.totalorder %s2744_s9, 0 }
 0x54f   :  { %2748 = shalt.err (%p4046_p6)  }
 0x550   :  { %2750 = vsyncmov [#allocation5 + $0x13] }
 0x553   :  { %s2751_s30 = vpop.sfrf %2750 }
 0x554   :  { %p4047_p7 = scmp.ne.s32.totalorder %s2751_s30, 0 }
 0x556   :  { %2755 = shalt.err (%p4047_p7)  }
 0x557   :  { %2757 = vsyncmov [#allocation5 + $0x14] }
 0x55a   :  { %s2758_s29 = vpop.sfrf %2757 }
 0x55b   :  { %p4048_p8 = scmp.ne.s32.totalorder %s2758_s29, 0 }
 0x55d   :  { %2762 = shalt.err (%p4048_p8)  }
 0x55e   :  { %2764 = vsyncmov [#allocation5 + $0x15] }
 0x561   :  { %s2765_s14 = vpop.sfrf %2764 }
 0x562   :  { %p4049_p9 = scmp.ne.s32.totalorder %s2765_s14, 0 }
 0x564   :  { %2769 = shalt.err (%p4049_p9)  }
 0x565   :  { %2771 = vsyncmov [#allocation5 + $0x16] }
 0x568   :  { %s2772_s15 = vpop.sfrf %2771 }
 0x569   :  { %p4050_p10 = scmp.ne.s32.totalorder %s2772_s15, 0 }
 0x56b   :  { %2776 = shalt.err (%p4050_p10)  }
 0x56c   :  { %2778 = vsyncmov [#allocation5 + $0x17] }
 0x56f   :  { %s2779_s7 = vpop.sfrf %2778 }
 0x570   :  { %p4051_p11 = scmp.ne.s32.totalorder %s2779_s7, 0 }
 0x572   :  { %2783 = shalt.err (%p4051_p11)  }
 0x573   :  { %2785 = vsyncmov [#allocation5 + $0x18] }
 0x576   :  { %s2786_s13 = vpop.sfrf %2785 }
 0x577   :  { %p4052_p12 = scmp.ne.s32.totalorder %s2786_s13, 0 }
 0x579   :  { %2790 = shalt.err (%p4052_p12)  }
 0x57a   :  { %2792 = vsyncmov [#allocation5 + $0x19] }
 0x57d   :  { %s2793_s21 = vpop.sfrf %2792 }
 0x57e   :  { %p4053_p13 = scmp.ne.s32.totalorder %s2793_s21, 0 }
 0x580   :  { %2797 = shalt.err (%p4053_p13)  }
 0x581   :  { %2799 = vsyncmov [#allocation5 + $0x1a] }
 0x584   :  { %s2800_s22 = vpop.sfrf %2799 }
 0x585   :  { %p4054_p0 = scmp.ne.s32.totalorder %s2800_s22, 0 }
 0x587   :  { %2804 = shalt.err (%p4054_p0)  }
 0x588   :  { %2806 = vsyncmov [#allocation5 + $0x1b] }
 0x58b   :  { %s2807_s10 = vpop.sfrf %2806 }
 0x58c   :  { %p4055_p1 = scmp.ne.s32.totalorder %s2807_s10, 0 }
 0x58e   :  { %2811 = shalt.err (%p4055_p1)  }
 0x58f   :  { %2813 = vsyncmov [#allocation5 + $0x1c] }
 0x592   :  { %s2814_s11 = vpop.sfrf %2813 }
 0x593   :  { %p4056_p2 = scmp.ne.s32.totalorder %s2814_s11, 0 }
 0x595   :  { %2818 = shalt.err (%p4056_p2)  }
 0x596   :  { %2820 = vsyncmov [#allocation5 + $0x1d] }
 0x599   :  { %s2821_s12 = vpop.sfrf %2820 }
 0x59a   :  { %p4057_p3 = scmp.ne.s32.totalorder %s2821_s12, 0 }
 0x59c   :  { %2825 = shalt.err (%p4057_p3)  }
 0x59d   :  { %2827 = vsyncmov [#allocation5 + $0x1e] }
 0x5a0   :  { %s2828_s16 = vpop.sfrf %2827 }
 0x5a1   :  { %p4058_p4 = scmp.ne.s32.totalorder %s2828_s16, 0 }
 0x5a3   :  { %2832 = shalt.err (%p4058_p4)  }
 0x5a4   :  { %2834 = vsyncmov [#allocation5 + $0x1f] }
 0x5a7   :  { %s2835_s28 = vpop.sfrf %2834 }
 0x5a8   :  { %p4059_p5 = scmp.ne.s32.totalorder %s2835_s28, 0 }
 0x5aa   :  { %2839 = shalt.err (%p4059_p5)  }
 0x5ab   :  { %2841 = vsyncmov [#allocation5 + $0x20] }
 0x5ae   :  { %s2842_s5 = vpop.sfrf %2841 }
 0x5af   :  { %p4060_p6 = scmp.ne.s32.totalorder %s2842_s5, 0 }
 0x5b1   :  { %2846 = shalt.err (%p4060_p6)  }
 0x5b2   :  { %2848 = vsyncmov [#allocation5 + $0x21] }
 0x5b5   :  { %s2849_s24 = vpop.sfrf %2848 }
 0x5b6   :  { %p4061_p7 = scmp.ne.s32.totalorder %s2849_s24, 0 }
 0x5b8   :  { %2853 = shalt.err (%p4061_p7)  }
 0x5b9   :  { %2855 = vsyncmov [#allocation5 + $0x22] }
 0x5bc   :  { %s2856_s8 = vpop.sfrf %2855 }
 0x5bd   :  { %p4062_p8 = scmp.ne.s32.totalorder %s2856_s8, 0 }
 0x5bf   :  { %2860 = shalt.err (%p4062_p8)  }
 0x5c0   :  { %2862 = vsyncmov [#allocation5 + $0x23] }
 0x5c3   :  { %s2863_s23 = vpop.sfrf %2862 }
 0x5c4   :  { %p4063_p9 = scmp.ne.s32.totalorder %s2863_s23, 0 }
 0x5c6   :  { %2867 = shalt.err (%p4063_p9)  }
 0x5c7   :  { %2869 = vsyncmov [#allocation5 + $0x24] }
 0x5ca   :  { %s2870_s20 = vpop.sfrf %2869 }
 0x5cb   :  { %p4064_p10 = scmp.ne.s32.totalorder %s2870_s20, 0 }
 0x5cd   :  { %2874 = shalt.err (%p4064_p10)  }
 0x5ce   :  { %2876 = vsyncmov [#allocation5 + $0x25] }
 0x5d1   :  { %s2877_s25 = vpop.sfrf %2876 }
 0x5d2   :  { %p4065_p11 = scmp.ne.s32.totalorder %s2877_s25, 0 }
 0x5d4   :  { %2881 = shalt.err (%p4065_p11)  }
 0x5d5   :  { %2883 = vsyncmov [#allocation5 + $0x26] }
 0x5d8   :  { %s2884_s19 = vpop.sfrf %2883 }
 0x5d9   :  { %p4066_p12 = scmp.ne.s32.totalorder %s2884_s19, 0 }
 0x5db   :  { %2888 = shalt.err (%p4066_p12)  }
 0x5dc   :  { %2890 = vsyncmov [#allocation5 + $0x27] }
 0x5df   :  { %s2891_s2 = vpop.sfrf %2890 }
 0x5e0   :  { %p4067_p13 = scmp.ne.s32.totalorder %s2891_s2, 0 }
 0x5e2   :  { %2895 = shalt.err (%p4067_p13)  }
 0x5e3   :  { %2897 = vsyncmov [#allocation5 + $0x28] }
 0x5e6   :  { %s2898_s1 = vpop.sfrf %2897 }
 0x5e7   :  { %p4068_p0 = scmp.ne.s32.totalorder %s2898_s1, 0 }
 0x5e9   :  { %2902 = shalt.err (%p4068_p0)  }
 0x5ea   :  { %2904 = vsyncmov [#allocation5 + $0x29] }
 0x5ed   :  { %s2905_s3 = vpop.sfrf %2904 }
 0x5ee   :  { %p4069_p1 = scmp.ne.s32.totalorder %s2905_s3, 0 }
 0x5f0   :  { %2909 = shalt.err (%p4069_p1)  }
 0x5f1   :  { %2911 = vsyncmov [#allocation5 + $0x2a] }
 0x5f4   :  { %s2912_s17 = vpop.sfrf %2911 }
 0x5f5   :  { %p4070_p2 = scmp.ne.s32.totalorder %s2912_s17, 0 }
 0x5f7   :  { %2916 = shalt.err (%p4070_p2)  }
 0x5f8   :  { %2918 = vsyncmov [#allocation5 + $0x2b] }
 0x5fb   :  { %s2919_s18 = vpop.sfrf %2918 }
 0x5fc   :  { %p4071_p3 = scmp.ne.s32.totalorder %s2919_s18, 0 }
 0x5fe   :  { %2923 = shalt.err (%p4071_p3)  }
 0x5ff   :  { %2925 = vsyncmov [#allocation5 + $0x2c] }
 0x602   :  { %s2926_s27 = vpop.sfrf %2925 }
 0x603   :  { %p4072_p4 = scmp.ne.s32.totalorder %s2926_s27, 0 }
 0x605   :  { %2930 = shalt.err (%p4072_p4)  }
 0x606   :  { %2932 = vsyncmov [#allocation5 + $0x2d] }
 0x609   :  { %s2933_s6 = vpop.sfrf %2932 }
 0x60a   :  { %p4073_p5 = scmp.ne.s32.totalorder %s2933_s6, 0 }
 0x60c   :  { %2937 = shalt.err (%p4073_p5)  }
 0x60d   :  { %2939 = vsyncmov [#allocation5 + $0x2e] }
 0x610   :  { %s2940_s26 = vpop.sfrf %2939 }
 0x611   :  { %p4074_p6 = scmp.ne.s32.totalorder %s2940_s26, 0 }
 0x613   :  { %2944 = shalt.err (%p4074_p6)  }
 0x614   :  { %2946 = vsyncmov [#allocation5 + $0x2f] }
 0x617   :  { %s2947_s0 = vpop.sfrf %2946 }
 0x618   :  { %p4075_p7 = scmp.ne.s32.totalorder %s2947_s0, 0 }
 0x61a   :  { %2951 = shalt.err (%p4075_p7)  }
 0x61b   :  { %2953 = vsyncmov [#allocation5 + $0x30] }
 0x61e   :  { %s2954_s4 = vpop.sfrf %2953 }
 0x61f   :  { %p4076_p8 = scmp.ne.s32.totalorder %s2954_s4, 0 }
 0x621   :  { %2958 = shalt.err (%p4076_p8)  }
 0x622   :  { %2960 = vsyncmov [#allocation5 + $0x31] }
 0x625   :  { %s2961_s9 = vpop.sfrf %2960 }
 0x626   :  { %p4077_p9 = scmp.ne.s32.totalorder %s2961_s9, 0 }
 0x628   :  { %2965 = shalt.err (%p4077_p9)  }
 0x629   :  { %2967 = vsyncmov [#allocation5 + $0x32] }
 0x62c   :  { %s2968_s30 = vpop.sfrf %2967 }
 0x62d   :  { %p4078_p10 = scmp.ne.s32.totalorder %s2968_s30, 0 }
 0x62f   :  { %2972 = shalt.err (%p4078_p10)  }
 0x630   :  { %2974 = vsyncmov [#allocation5 + $0x33] }
 0x633   :  { %s2975_s29 = vpop.sfrf %2974 }
 0x634   :  { %p4079_p11 = scmp.ne.s32.totalorder %s2975_s29, 0 }
 0x636   :  { %2979 = shalt.err (%p4079_p11)  }
 0x637   :  { %2981 = vsyncmov [#allocation5 + $0x34] }
 0x63a   :  { %s2982_s14 = vpop.sfrf %2981 }
 0x63b   :  { %p4080_p12 = scmp.ne.s32.totalorder %s2982_s14, 0 }
 0x63d   :  { %2986 = shalt.err (%p4080_p12)  }
 0x63e   :  { %2988 = vsyncmov [#allocation5 + $0x35] }
 0x641   :  { %s2989_s15 = vpop.sfrf %2988 }
 0x642   :  { %p4081_p13 = scmp.ne.s32.totalorder %s2989_s15, 0 }
 0x644   :  { %2993 = shalt.err (%p4081_p13)  }
 0x645   :  { %2995 = vsyncmov [#allocation5 + $0x36] }
 0x648   :  { %s2996_s7 = vpop.sfrf %2995 }
 0x649   :  { %p4082_p0 = scmp.ne.s32.totalorder %s2996_s7, 0 }
 0x64b   :  { %3000 = shalt.err (%p4082_p0)  }
 0x64c   :  { %3002 = vsyncmov [#allocation5 + $0x37] }
 0x64f   :  { %s3003_s13 = vpop.sfrf %3002 }
 0x650   :  { %p4083_p1 = scmp.ne.s32.totalorder %s3003_s13, 0 }
 0x652   :  { %3007 = shalt.err (%p4083_p1)  }
 0x653   :  { %3009 = vsyncmov [#allocation5 + $0x38] }
 0x656   :  { %s3010_s21 = vpop.sfrf %3009 }
 0x657   :  { %p4084_p2 = scmp.ne.s32.totalorder %s3010_s21, 0 }
 0x659   :  { %3014 = shalt.err (%p4084_p2)  }
 0x65a   :  { %3016 = vsyncmov [#allocation5 + $0x39] }
 0x65d   :  { %s3017_s22 = vpop.sfrf %3016 }
 0x65e   :  { %p4085_p3 = scmp.ne.s32.totalorder %s3017_s22, 0 }
 0x660   :  { %3021 = shalt.err (%p4085_p3)  }
 0x661   :  { %3023 = vsyncmov [#allocation5 + $0x3a] }
 0x664   :  { %s3024_s10 = vpop.sfrf %3023 }
 0x665   :  { %p4086_p4 = scmp.ne.s32.totalorder %s3024_s10, 0 }
 0x667   :  { %3028 = shalt.err (%p4086_p4)  }
 0x668   :  { %3030 = vsyncmov [#allocation5 + $0x3b] }
 0x66b   :  { %s3031_s11 = vpop.sfrf %3030 }
 0x66c   :  { %p4087_p5 = scmp.ne.s32.totalorder %s3031_s11, 0 }
 0x66e   :  { %3035 = shalt.err (%p4087_p5)  }
 0x66f   :  { %3037 = vsyncmov [#allocation5 + $0x3c] }
 0x672   :  { %s3038_s12 = vpop.sfrf %3037 }
 0x673   :  { %p4088_p6 = scmp.ne.s32.totalorder %s3038_s12, 0 }
 0x675   :  { %3042 = shalt.err (%p4088_p6)  }
 0x676   :  { %3044 = vsyncmov [#allocation5 + $0x3d] }
 0x679   :  { %s3045_s16 = vpop.sfrf %3044 }
 0x67a   :  { %p4089_p7 = scmp.ne.s32.totalorder %s3045_s16, 0 }
 0x67c   :  { %3049 = shalt.err (%p4089_p7)  }
 0x67d   :  { %3051 = vsyncmov [#allocation5 + $0x3e] }
 0x680   :  { %s3052_s28 = vpop.sfrf %3051 }
 0x681   :  { %p4090_p8 = scmp.ne.s32.totalorder %s3052_s28, 0 }
 0x683   :  { %3056 = shalt.err (%p4090_p8)  }
 0x684   :  { %3058 = vsyncmov [#allocation5 + $0x3f] }
 0x687   :  { %s3059_s5 = vpop.sfrf %3058 }
 0x688   :  { %p4091_p9 = scmp.ne.s32.totalorder %s3059_s5, 0 }
 0x68a   :  { %3063 = shalt.err (%p4091_p9)  }
 0x68b   :  { %3065 = vsyncmov [#allocation5 + $0x40] }
 0x68e   :  { %s3066_s24 = vpop.sfrf %3065 }
 0x68f   :  { %p4092_p10 = scmp.ne.s32.totalorder %s3066_s24, 0 }
 0x691   :  { %3070 = shalt.err (%p4092_p10)  }
 0x692   :  { %3072 = vsyncmov [#allocation5 + $0x41] }
 0x695   :  { %s3073_s8 = vpop.sfrf %3072 }
 0x696   :  { %p4093_p11 = scmp.ne.s32.totalorder %s3073_s8, 0 }
 0x698   :  { %3077 = shalt.err (%p4093_p11)  }
 0x699   :  { %3079 = vsyncmov [#allocation5 + $0x42] }
 0x69c   :  { %s3080_s23 = vpop.sfrf %3079 }
 0x69d   :  { %p4094_p12 = scmp.ne.s32.totalorder %s3080_s23, 0 }
 0x69f   :  { %3084 = shalt.err (%p4094_p12)  }
 0x6a0   :  { %3086 = vsyncmov [#allocation5 + $0x43] }
 0x6a3   :  { %s3087_s20 = vpop.sfrf %3086 }
 0x6a4   :  { %p4095_p13 = scmp.ne.s32.totalorder %s3087_s20, 0 }
 0x6a6   :  { %3091 = shalt.err (%p4095_p13)  }
 0x6a7   :  { %3093 = vsyncmov [#allocation5 + $0x44] }
 0x6aa   :  { %s3094_s25 = vpop.sfrf %3093 }
 0x6ab   :  { %p4096_p0 = scmp.ne.s32.totalorder %s3094_s25, 0 }
 0x6ad   :  { %3098 = shalt.err (%p4096_p0)  }
 0x6ae   :  { %3100 = vsyncmov [#allocation5 + $0x45] }
 0x6b1   :  { %s3101_s19 = vpop.sfrf %3100 }
 0x6b2   :  { %p4097_p1 = scmp.ne.s32.totalorder %s3101_s19, 0 }
 0x6b4   :  { %3105 = shalt.err (%p4097_p1)  }
 0x6b5   :  { %3107 = vsyncmov [#allocation5 + $0x46] }
 0x6b8   :  { %s3108_s2 = vpop.sfrf %3107 }
 0x6b9   :  { %p4098_p2 = scmp.ne.s32.totalorder %s3108_s2, 0 }
 0x6bb   :  { %3112 = shalt.err (%p4098_p2)  }
 0x6bc   :  { %3114 = vsyncmov [#allocation5 + $0x47] }
 0x6bf   :  { %s3115_s1 = vpop.sfrf %3114 }
 0x6c0   :  { %p4099_p3 = scmp.ne.s32.totalorder %s3115_s1, 0 }
 0x6c2   :  { %3119 = shalt.err (%p4099_p3)  }
 0x6c3   :  { %3121 = vsyncmov [#allocation5 + $0x48] }
 0x6c6   :  { %s3122_s3 = vpop.sfrf %3121 }
 0x6c7   :  { %p4100_p4 = scmp.ne.s32.totalorder %s3122_s3, 0 }
 0x6c9   :  { %3126 = shalt.err (%p4100_p4)  }
 0x6ca   :  { %3128 = vsyncmov [#allocation5 + $0x49] }
 0x6cd   :  { %s3129_s17 = vpop.sfrf %3128 }
 0x6ce   :  { %p4101_p5 = scmp.ne.s32.totalorder %s3129_s17, 0 }
 0x6d0   :  { %3133 = shalt.err (%p4101_p5)  }
 0x6d1   :  { %3135 = vsyncmov [#allocation5 + $0x4a] }
 0x6d4   :  { %s3136_s18 = vpop.sfrf %3135 }
 0x6d5   :  { %p4102_p6 = scmp.ne.s32.totalorder %s3136_s18, 0 }
 0x6d7   :  { %3140 = shalt.err (%p4102_p6)  }
 0x6d8   :  { %3142 = vsyncmov [#allocation5 + $0x4b] }
 0x6db   :  { %s3143_s27 = vpop.sfrf %3142 }
 0x6dc   :  { %p4103_p7 = scmp.ne.s32.totalorder %s3143_s27, 0 }
 0x6de   :  { %3147 = shalt.err (%p4103_p7)  }
 0x6df   :  { %3149 = vsyncmov [#allocation5 + $0x4c] }
 0x6e2   :  { %s3150_s6 = vpop.sfrf %3149 }
 0x6e3   :  { %p4104_p8 = scmp.ne.s32.totalorder %s3150_s6, 0 }
 0x6e5   :  { %3154 = shalt.err (%p4104_p8)  }
 0x6e6   :  { %3156 = vsyncmov [#allocation5 + $0x4d] }
 0x6e9   :  { %s3157_s26 = vpop.sfrf %3156 }
 0x6ea   :  { %p4105_p9 = scmp.ne.s32.totalorder %s3157_s26, 0 }
 0x6ec   :  { %3161 = shalt.err (%p4105_p9)  }
 0x6ed   :  { %3163 = vsyncmov [#allocation5 + $0x4e] }
 0x6f0   :  { %s3164_s0 = vpop.sfrf %3163 }
 0x6f1   :  { %p4106_p10 = scmp.ne.s32.totalorder %s3164_s0, 0 }
 0x6f3   :  { %3168 = shalt.err (%p4106_p10)  }
 0x6f4   :  { %3170 = vsyncmov [#allocation5 + $0x4f] }
 0x6f7   :  { %s3171_s4 = vpop.sfrf %3170 }
 0x6f8   :  { %p4107_p11 = scmp.ne.s32.totalorder %s3171_s4, 0 }
 0x6fa   :  { %3175 = shalt.err (%p4107_p11)  }
 0x6fb   :  { %3177 = vsyncmov [#allocation5 + $0x50] }
 0x6fe   :  { %s3178_s9 = vpop.sfrf %3177 }
 0x6ff   :  { %p4108_p12 = scmp.ne.s32.totalorder %s3178_s9, 0 }
 0x701   :  { %3182 = shalt.err (%p4108_p12)  }
 0x702   :  { %3184 = vsyncmov [#allocation5 + $0x51] }
 0x705   :  { %s3185_s30 = vpop.sfrf %3184 }
 0x706   :  { %p4109_p13 = scmp.ne.s32.totalorder %s3185_s30, 0 }
 0x708   :  { %3189 = shalt.err (%p4109_p13)  }
 0x709   :  { %3191 = vsyncmov [#allocation5 + $0x52] }
 0x70c   :  { %s3192_s29 = vpop.sfrf %3191 }
 0x70d   :  { %p4110_p0 = scmp.ne.s32.totalorder %s3192_s29, 0 }
 0x70f   :  { %3196 = shalt.err (%p4110_p0)  }
 0x710   :  { %3198 = vsyncmov [#allocation5 + $0x53] }
 0x713   :  { %s3199_s14 = vpop.sfrf %3198 }
 0x714   :  { %p4111_p1 = scmp.ne.s32.totalorder %s3199_s14, 0 }
 0x716   :  { %3203 = shalt.err (%p4111_p1)  }
 0x717   :  { %3205 = vsyncmov [#allocation5 + $0x54] }
 0x71a   :  { %s3206_s15 = vpop.sfrf %3205 }
 0x71b   :  { %p4112_p2 = scmp.ne.s32.totalorder %s3206_s15, 0 }
 0x71d   :  { %3210 = shalt.err (%p4112_p2)  }
 0x71e   :  { %3212 = vsyncmov [#allocation5 + $0x55] }
 0x721   :  { %s3213_s7 = vpop.sfrf %3212 }
 0x722   :  { %p4113_p3 = scmp.ne.s32.totalorder %s3213_s7, 0 }
 0x724   :  { %3217 = shalt.err (%p4113_p3)  }
 0x725   :  { %3219 = vsyncmov [#allocation5 + $0x56] }
 0x728   :  { %s3220_s13 = vpop.sfrf %3219 }
 0x729   :  { %p4114_p4 = scmp.ne.s32.totalorder %s3220_s13, 0 }
 0x72b   :  { %3224 = shalt.err (%p4114_p4)  }
 0x72c   :  { %3226 = vsyncmov [#allocation5 + $0x57] }
 0x72f   :  { %s3227_s21 = vpop.sfrf %3226 }
 0x730   :  { %p4115_p5 = scmp.ne.s32.totalorder %s3227_s21, 0 }
 0x732   :  { %3231 = shalt.err (%p4115_p5)  }
 0x733   :  { %3233 = vsyncmov [#allocation5 + $0x58] }
 0x736   :  { %s3234_s22 = vpop.sfrf %3233 }
 0x737   :  { %p4116_p6 = scmp.ne.s32.totalorder %s3234_s22, 0 }
 0x739   :  { %3238 = shalt.err (%p4116_p6)  }
 0x73a   :  { %3240 = vsyncmov [#allocation5 + $0x59] }
 0x73d   :  { %s3241_s10 = vpop.sfrf %3240 }
 0x73e   :  { %p4117_p7 = scmp.ne.s32.totalorder %s3241_s10, 0 }
 0x740   :  { %3245 = shalt.err (%p4117_p7)  }
 0x741   :  { %3247 = vsyncmov [#allocation5 + $0x5a] }
 0x744   :  { %s3248_s11 = vpop.sfrf %3247 }
 0x745   :  { %p4118_p8 = scmp.ne.s32.totalorder %s3248_s11, 0 }
 0x747   :  { %3252 = shalt.err (%p4118_p8)  }
 0x748   :  { %3254 = vsyncmov [#allocation5 + $0x5b] }
 0x74b   :  { %s3255_s12 = vpop.sfrf %3254 }
 0x74c   :  { %p4119_p9 = scmp.ne.s32.totalorder %s3255_s12, 0 }
 0x74e   :  { %3259 = shalt.err (%p4119_p9)  }
 0x74f   :  { %3261 = vsyncmov [#allocation5 + $0x5c] }
 0x752   :  { %s3262_s16 = vpop.sfrf %3261 }
 0x753   :  { %p4120_p10 = scmp.ne.s32.totalorder %s3262_s16, 0 }
 0x755   :  { %3266 = shalt.err (%p4120_p10)  }
 0x756   :  { %3268 = vsyncmov [#allocation5 + $0x5d] }
 0x759   :  { %s3269_s28 = vpop.sfrf %3268 }
 0x75a   :  { %p4121_p11 = scmp.ne.s32.totalorder %s3269_s28, 0 }
 0x75c   :  { %3273 = shalt.err (%p4121_p11)  }
 0x75d   :  { %3275 = vsyncmov [#allocation5 + $0x5e] }
 0x760   :  { %s3276_s5 = vpop.sfrf %3275 }
 0x761   :  { %p4122_p12 = scmp.ne.s32.totalorder %s3276_s5, 0 }
 0x763   :  { %3280 = shalt.err (%p4122_p12)  }
 0x764   :  { %3282 = vsyncmov [#allocation5 + $0x5f] }
 0x767   :  { %s3283_s24 = vpop.sfrf %3282 }
 0x768   :  { %p4123_p13 = scmp.ne.s32.totalorder %s3283_s24, 0 }
 0x76a   :  { %3287 = shalt.err (%p4123_p13)  }

</bundles_post_ra>
